<compile_context>
chip_gen: v6e
topology: v6e:2x2x1
jax: 0.10.0
libtpu: 0.0.40
codegen_flags: <defaults>
</compile_context>

<pallas_src>
import functools

import jax
import jax.numpy as jnp
from jax import lax
from jax.experimental import pallas as pl
from jax.experimental.pallas import tpu as pltpu

# ----------------------------- model dims -----------------------------------
IMG_DIM = 3200        # cnn feature dim (fixed in the module)
PHRASE_DIM = 300      # phrase embedding dim (fixed in the module)
RNN_FC_DIM = 64       # opt['rnn_fc_dim']
RNN_SIZE = 256        # opt['rnn_size']
NUM_CLASSES = 2
LANE = 128            # lane-dense padded width for the classifier output

VMEM_LIMIT = 32 * 1024 * 1024   # explicit scoped-VMEM limit (safe on v5e/v6e/v7x)
VMEM_BUDGET = 24 * 1024 * 1024  # tile-selection budget (headroom under the limit)


def _round_up(x, m):
    return ((x + m - 1) // m) * m


def _cdiv(a, b):
    return -(-a // b)


def _num_tensorcores():
    """Best-effort detection of multi-TensorCore chips (v7x)."""
    try:
        kind = (jax.devices()[0].device_kind or "").lower()
    except Exception:
        return 1
    return 2 if ("v7" in kind or "7x" in kind) else 1


def _vmem_bytes(nb, t_blk, img_itemsize):
    """Rough VMEM footprint estimate for one (nb, t_blk) block configuration."""
    blk = nb * t_blk
    img = 2 * blk * IMG_DIM * img_itemsize                       # dbl-buffered img
    outs = 2 * blk * (RNN_SIZE + LANE) * 4                       # dbl-buffered outputs
    scr = blk * (4 * RNN_SIZE + RNN_SIZE + RNN_FC_DIM) * 4       # xg + hout + fuse
    scr += nb * (RNN_FC_DIM + 2 * RNN_SIZE) * 4                  # emb, h, c
    weights = 2 * (
        (IMG_DIM * RNN_FC_DIM + PHRASE_DIM * RNN_FC_DIM
         + RNN_FC_DIM * 4 * RNN_SIZE + RNN_SIZE * 4 * RNN_SIZE
         + RNN_SIZE * RNN_FC_DIM + RNN_FC_DIM * LANE) * 2        # bf16 weights
        + (4 * RNN_SIZE + 3 * RNN_FC_DIM + LANE + RNN_FC_DIM) * 4)  # f32 biases
    return img + outs + scr + weights


def _choose_tiles(n, L, img_itemsize):
    """Pick (nb, t_blk): fewest time blocks, large M, bounded VMEM.

    NOTE: the last time/batch block may be partial (cdiv grid); the garbage tail
    timesteps are computed but their outputs are dropped by Pallas, avoiding any
    wrapper-side jnp.pad HBM copy of the (n, L, 3200) stream.
    """
    # time tile: minimize #blocks, then minimize padded steps (max 32)
    t_cands = list(range(8, 33, 8))
    t_blk = min(t_cands, key=lambda t: (_cdiv(L, t), _cdiv(L, t) * t))

    # batch tile: whole batch on 1-TC chips; split 2 ways only on 2-TC chips.
    shards = 2 if (_num_tensorcores() >= 2 and n >= 16) else 1
    nb = min(_round_up(_cdiv(n, shards), 8), _round_up(n, 8))

    # shrink to the VMEM budget (t_blk first down to 16, then nb, then t_blk)
    while _vmem_bytes(nb, t_blk, img_itemsize) > VMEM_BUDGET and t_blk > 16:
        t_blk -= 8
    while _vmem_bytes(nb, t_blk, img_itemsize) > VMEM_BUDGET and nb > 8:
        nb -= 8
    while _vmem_bytes(nb, t_blk, img_itemsize) > VMEM_BUDGET and t_blk > 8:
        t_blk -= 8
    return nb, t_blk


# ------------------------------ kernel ---------------------------------------
def _localizer_kernel(
    # inputs
    img_ref,            # (nb, T_BLK, IMG_DIM)  batch-major time block (f32 or bf16)
    phrase_ref,         # (nb, PHRASE_DIM)
    wc_ref, bc_ref,     # cnn_fc_layer: (IMG_DIM, F) bf16, (1, F) f32
    wp_ref, bp_ref,     # phrase_embed: (PHRASE_DIM, F) bf16, (1, F) f32
    wih_ref, whh_ref,   # LSTMCell: (F, 4H) bf16, (H, 4H) bf16
    blstm_ref,          # pre-summed LSTM bias (bih + bhh): (1, 4H) f32
    w1_ref, b1_ref,     # classifier fc1: (H, F) bf16, (1, F) f32
    w2_ref, b2_ref,     # classifier fc2 (lane-padded): (F, 128) bf16, (1, 128) f32
    # outputs
    out_ref,            # (nb, T_BLK, H)
    lp_ref,             # (nb, T_BLK, 128)   cols [0:2] hold the logprobs
    # scratch (persists across grid steps)
    emb_sc,             # (nb, F)            cached phrase embedding
    h_sc,               # (nb, H)            carried hidden state (f32)
    c_sc,               # (nb, H)            carried cell state (f32)
    fuse_sc,            # (T_BLK, nb, F)     time-major fused features
    xg_sc,              # (T_BLK, nb, 4H)    time-major input-side gates
    hout_sc,            # (T_BLK, nb, H)     time-major per-step hidden states
    *, nb, t_blk,
):
    g = pl.program_id(1)          # time-block index ("arbitrary" / innermost)
    H = RNN_SIZE
    F = RNN_FC_DIM
    M = nb * t_blk                # rows in this block (nb, t_blk multiples of 8)

    @pl.when(g == 0)
    def _init():
        # phrase_embed: Linear(300 -> F) + ReLU, computed once per batch block.
        emb = jnp.dot(phrase_ref[...].astype(jnp.bfloat16), wp_ref[...],
                      preferred_element_type=jnp.float32) + bp_ref[...]
        emb_sc[...] = jnp.maximum(emb, 0.0)
        # init_hidden: zeros (correct only because time is the innermost axis).
        h_sc[...] = jnp.zeros_like(h_sc)
        c_sc[...] = jnp.zeros_like(c_sc)

    # -------- batched, time-independent work for the whole block --------------
    # cnn_fc_layer: ReLU((M, 3200) @ (3200, 64)); bf16 inputs, f32 accumulation.
    # (astype is a no-op when img already arrives in bf16 from upstream.)
    img = img_ref[...].reshape(M, IMG_DIM).astype(jnp.bfloat16)
    fc = jnp.dot(img, wc_ref[...], preferred_element_type=jnp.float32) + bc_ref[...]
    fc = jnp.maximum(fc, 0.0)                                        # (M, F), (b,t) rows

    # fuse_t = img_fc_t * emb  (emb broadcast over the time axis of the block)
    fuse = fc.reshape(nb, t_blk, F) * emb_sc[...][:, None, :]        # (nb, t_blk, F)

    # Scatter the narrow (64-lane) fused features into a time-major scratch.
    # This is the only strided access of the block and it is OFF the recurrence
    # critical chain; everything inside the per-timestep loop is contiguous.
    for b in range(nb):
        fuse_sc[:, b, :] = fuse[b]

    # input-side LSTM gates for all timesteps, time-major rows, biases pre-folded.
    xg = jnp.dot(fuse_sc[...].reshape(M, F).astype(jnp.bfloat16), wih_ref[...],
                 preferred_element_type=jnp.float32) + blstm_ref[...]  # (M, 4H)
    xg_sc[...] = xg.reshape(t_blk, nb, 4 * H)                          # contiguous store

    # -------- sequential LSTM recurrence (fori_loop, fully unrolled) ----------
    whh = whh_ref[...]   # bf16 (H, 4H)
    # TODO(synk): inspect the bundle dump to confirm whh stays resident in the
    # MXU across timesteps; if a full RHS re-push shows up per step, drive it
    # explicitly with pltpu.matmul_push_rhs / matmul_acc_lhs.

    def _step(tt, carry):
        h, c = carry                                     # f32 carries
        gates = xg_sc[tt] + jnp.dot(h.astype(jnp.bfloat16), whh,
                                    preferred_element_type=jnp.float32)
        i_g = jax.nn.sigmoid(gates[:, 0 * H:1 * H])
        f_g = jax.nn.sigmoid(gates[:, 1 * H:2 * H])
        g_g = jnp.tanh(gates[:, 2 * H:3 * H])
        o_g = jax.nn.sigmoid(gates[:, 3 * H:4 * H])
        c_new = f_g * c + i_g * g_g
        h_new = o_g * jnp.tanh(c_new)
        hout_sc[tt] = h_new                               # contiguous (nb, H) store
        return (h_new, c_new)

    h_fin, c_fin = lax.fori_loop(0, t_blk, _step, (h_sc[...], c_sc[...]),
                                 unroll=True)
    h_sc[...] = h_fin
    c_sc[...] = c_fin

    # -------- reorder hidden states to batch-major output (off-chain) ---------
    for b in range(nb):
        out_ref[b] = hout_sc[:, b, :]

    # -------- classifier, batched over the block, lane-dense (128) output -----
    hblk = out_ref[...].reshape(M, H).astype(jnp.bfloat16)
    hid = jnp.maximum(
        jnp.dot(hblk, w1_ref[...], preferred_element_type=jnp.float32) + b1_ref[...],
        0.0)
    logits = jnp.dot(hid.astype(jnp.bfloat16), w2_ref[...],
                     preferred_element_type=jnp.float32) + b2_ref[...]    # (M, 128)
    lane = lax.broadcasted_iota(jnp.int32, logits.shape, 1)
    valid = lane < NUM_CLASSES
    masked = jnp.where(valid, logits, -1e30)
    mx = jnp.max(masked, axis=-1, keepdims=True)
    se = jnp.sum(jnp.where(valid, jnp.exp(masked - mx), 0.0), axis=-1, keepdims=True)
    lp_ref[...] = (logits - (mx + jnp.log(se))).reshape(nb, t_blk, LANE)


# ------------------------------ wrapper ---------------------------------------
@jax.jit
def localizer_forward(img_feats, phrase_emb, masks, select_ixs, params):
    """
    img_feats  : (n, L, 3200) f32 or bf16 (bf16 preferred if produced upstream)
    phrase_emb : (n, 300)     f32
    masks      : (n, L)       f32  (unused, kept for signature parity)
    select_ixs : (n,)         i32
    returns (logprobs (n,L,2), output_feats (n,L,RNN_SIZE), selected_feats (n,RNN_SIZE))
    """
    del masks
    n, L, _ = img_feats.shape
    img_itemsize = jnp.dtype(img_feats.dtype).itemsize

    # ---- static tiling decisions (shapes/dtypes are static under jit) ----
    nb, t_blk = _choose_tiles(n, L, img_itemsize)
    grid = (_cdiv(n, nb), _cdiv(L, t_blk))   # ragged edges -> partial blocks, no jnp.pad

    # ---- cheap one-time parameter prep (tiny tensors) ----
    bf16 = jnp.bfloat16
    wc_bf = params["wc"].astype(bf16)
    wp_bf = params["wp"].astype(bf16)
    wih_bf = params["wih"].astype(bf16)
    whh_bf = params["whh"].astype(bf16)
    w1_bf = params["w1"].astype(bf16)
    b_lstm = (params["bih"] + params["bhh"]).astype(jnp.float32)
    w2p = jnp.zeros((RNN_FC_DIM, LANE), bf16).at[:, :NUM_CLASSES].set(
        params["w2"].astype(bf16))
    b2p = jnp.zeros((1, LANE), jnp.float32).at[:, :NUM_CLASSES].set(params["b2"])

    weight_args = (
        wc_bf, params["bc"], wp_bf, params["bp"],
        wih_bf, whh_bf, b_lstm,
        w1_bf, params["b1"], w2p, b2p,
    )

    const2d = lambda b, g: (0, 0)
    # NOTE: weights are constant across the grid; default double-buffering wastes
    # ~1 MiB of VMEM (bf16 weights) which is inside the budget above.
    in_specs = [
        pl.BlockSpec((nb, t_blk, IMG_DIM), lambda b, g: (b, g, 0)),   # img block
        pl.BlockSpec((nb, PHRASE_DIM), lambda b, g: (b, 0)),          # phrase
    ] + [pl.BlockSpec(w.shape, const2d) for w in weight_args]

    out_specs = [
        pl.BlockSpec((nb, t_blk, RNN_SIZE), lambda b, g: (b, g, 0)),  # hidden states
        pl.BlockSpec((nb, t_blk, LANE), lambda b, g: (b, g, 0)),      # padded logprobs
    ]

    grid_spec = pltpu.PrefetchScalarGridSpec(
        num_scalar_prefetch=0,
        grid=grid,
        in_specs=in_specs,
        out_specs=out_specs,
        scratch_shapes=[
            pltpu.VMEM((nb, RNN_FC_DIM), jnp.float32),               # cached phrase emb
            pltpu.VMEM((nb, RNN_SIZE), jnp.float32),                 # h carry
            pltpu.VMEM((nb, RNN_SIZE), jnp.float32),                 # c carry
            pltpu.VMEM((t_blk, nb, RNN_FC_DIM), jnp.float32),        # time-major fuse
            pltpu.VMEM((t_blk, nb, 4 * RNN_SIZE), jnp.float32),      # time-major x-gates
            pltpu.VMEM((t_blk, nb, RNN_SIZE), jnp.float32),          # time-major h outputs
        ],
    )

    out_feats, lp_full = pl.pallas_call(
        functools.partial(_localizer_kernel, nb=nb, t_blk=t_blk),
        grid_spec=grid_spec,
        out_shape=[
            jax.ShapeDtypeStruct((n, L, RNN_SIZE), jnp.float32),
            jax.ShapeDtypeStruct((n, L, LANE), jnp.float32),
        ],
        compiler_params=pltpu.CompilerParams(
            dimension_semantics=("parallel", "arbitrary"),   # batch ||, time sequential
            vmem_limit_bytes=VMEM_LIMIT,
        ),
    )(img_feats, phrase_emb, *weight_args)

    logprobs = lp_full[:, :, :NUM_CLASSES]                   # (n, L, 2)

    # select(): one feature row per batch element.
    # TODO(synk): select() gather stays as a glue-level jnp.take_along_axis.
    selected_feats = jnp.take_along_axis(
        out_feats, select_ixs[:, None, None].astype(jnp.int32), axis=1)[:, 0, :]
    return logprobs, out_feats, selected_feats


# ----------------------- pure-JAX reference (for checking) -------------------
def localizer_reference(img_feats, phrase_emb, select_ixs, params):
    """Reference emulating the kernel's bf16-input / f32-accum mixed precision."""
    bf = lambda x: x.astype(jnp.bfloat16).astype(jnp.float32)
    H = RNN_SIZE
    wc, wih, whh = bf(params["wc"]), bf(params["wih"]), bf(params["whh"])
    w1, w2, wp = bf(params["w1"]), bf(params["w2"]), bf(params["wp"])
    emb = jnp.maximum(bf(phrase_emb) @ wp + params["bp"], 0.0)
    img = bf(img_feats)

    def step(carry, img_t):
        h, c = carry
        fc = jnp.maximum(img_t @ wc + params["bc"], 0.0)
        fuse = bf(fc * emb)
        gates = fuse @ wih + params["bih"] + params["bhh"] + bf(h) @ whh
        i_g = jax.nn.sigmoid(gates[:, 0 * H:1 * H])
        f_g = jax.nn.sigmoid(gates[:, 1 * H:2 * H])
        g_g = jnp.tanh(gates[:, 2 * H:3 * H])
        o_g = jax.nn.sigmoid(gates[:, 3 * H:4 * H])
        c_new = f_g * c + i_g * g_g
        h_new = o_g * jnp.tanh(c_new)
        hid = jnp.maximum(bf(h_new) @ w1 + params["b1"], 0.0)
        logits = bf(hid) @ w2 + params["b2"]
        lp = jax.nn.log_softmax(logits, axis=-1)
        return (h_new, c_new), (lp, h_new)

    n = img.shape[0]
    init = (jnp.zeros((n, H), jnp.float32), jnp.zeros((n, H), jnp.float32))
    _, (lp_tm, h_tm) = lax.scan(step, init, jnp.transpose(img, (1, 0, 2)))
    logprobs = jnp.transpose(lp_tm, (1, 0, 2))
    output_feats = jnp.transpose(h_tm, (1, 0, 2))
    selected = jnp.take_along_axis(
        output_feats, select_ixs[:, None, None].astype(jnp.int32), axis=1)[:, 0, :]
    return logprobs, output_feats, selected


# ------------------------------- main -----------------------------------------
def _make_params(key):
    ks = jax.random.split(key, 12)

    def init(k, shape, fan_in):
        return (jax.random.normal(k, shape, jnp.float32) / jnp.sqrt(fan_in)).astype(jnp.float32)

    F, H = RNN_FC_DIM, RNN_SIZE
    return {
        "wc":  init(ks[0], (IMG_DIM, F), IMG_DIM),
        "bc":  init(ks[1], (1, F), IMG_DIM),
        "wp":  init(ks[2], (PHRASE_DIM, F), PHRASE_DIM),
        "bp":  init(ks[3], (1, F), PHRASE_DIM),
        "wih": init(ks[4], (F, 4 * H), F),
        "whh": init(ks[5], (H, 4 * H), H),
        "bih": init(ks[6], (1, 4 * H), H),
        "bhh": init(ks[7], (1, 4 * H), H),
        "w1":  init(ks[8], (H, F), H),
        "b1":  init(ks[9], (1, F), H),
        "w2":  init(ks[10], (F, NUM_CLASSES), F),
        "b2":  init(ks[11], (1, NUM_CLASSES), F),
    }


def _run_case(n, L, img_dtype, case_key, params):
    ki, ke, ks = jax.random.split(case_key, 3)
    img_feats = jax.random.normal(ki, (n, L, IMG_DIM), jnp.float32).astype(img_dtype)
    phrase_emb = jax.random.normal(ke, (n, PHRASE_DIM), jnp.float32)
    masks = jnp.ones((n, L), jnp.float32)
    select_ixs = jax.random.randint(ks, (n,), 0, L, dtype=jnp.int32)

    logprobs, output_feats, selected_feats = jax.block_until_ready(
        localizer_forward(img_feats, phrase_emb, masks, select_ixs, params))

    assert logprobs.shape == (n, L, NUM_CLASSES)
    assert output_feats.shape == (n, L, RNN_SIZE)
    assert selected_feats.shape == (n, RNN_SIZE)
    assert bool(jnp.all(jnp.isfinite(logprobs)))
    assert bool(jnp.all(jnp.isfinite(output_feats)))

    # numerical check vs a precision-matched pure-JAX reference (both sides use
    # bf16 matmul inputs with f32 accumulation and f32 h/c carries).
    lp_ref, of_ref, sel_ref = localizer_reference(
        img_feats.astype(jnp.float32), phrase_emb, select_ixs, params)
    tol = dict(atol=3e-2, rtol=3e-2)
    assert bool(jnp.allclose(logprobs, lp_ref, **tol))
    assert bool(jnp.allclose(output_feats, of_ref, **tol))
    assert bool(jnp.allclose(selected_feats, sel_ref, **tol))


if __name__ == "__main__":
    key = jax.random.PRNGKey(0)
    kp, k1, k2 = jax.random.split(key, 3)
    params = _make_params(kp)

    # case 1: small f32 img path, single batch/time block.
    _run_case(n=8, L=8, img_dtype=jnp.float32, case_key=k1, params=params)
    # case 2: bf16 img path, partial batch block (n=12 -> nb=16), two time
    # blocks with a ragged tail (L=40) exercising the h/c carry across blocks.
    _run_case(n=12, L=40, img_dtype=jnp.bfloat16, case_key=k2, params=params)

    print("KERNEL_OK")
</pallas_src>

<mosaic_0001>
module attributes {stable_mosaic.version = 11 : i64} {
  func.func @_localizer_kernel(%arg0: i32, %arg1: i32, %arg2: memref<8x8x3200xf32, #tpu.memory_space<vmem>>, %arg3: memref<8x300xf32, #tpu.memory_space<vmem>>, %arg4: memref<3200x64xbf16, #tpu.memory_space<vmem>>, %arg5: memref<1x64xf32, #tpu.memory_space<vmem>>, %arg6: memref<300x64xbf16, #tpu.memory_space<vmem>>, %arg7: memref<1x64xf32, #tpu.memory_space<vmem>>, %arg8: memref<64x1024xbf16, #tpu.memory_space<vmem>>, %arg9: memref<256x1024xbf16, #tpu.memory_space<vmem>>, %arg10: memref<1x1024xf32, #tpu.memory_space<vmem>>, %arg11: memref<256x64xbf16, #tpu.memory_space<vmem>>, %arg12: memref<1x64xf32, #tpu.memory_space<vmem>>, %arg13: memref<64x128xbf16, #tpu.memory_space<vmem>>, %arg14: memref<1x128xf32, #tpu.memory_space<vmem>>, %arg15: memref<8x8x256xf32, #tpu.memory_space<vmem>>, %arg16: memref<8x8x128xf32, #tpu.memory_space<vmem>>, %arg17: memref<8x64xf32, #tpu.memory_space<vmem>>, %arg18: memref<8x256xf32, #tpu.memory_space<vmem>>, %arg19: memref<8x256xf32, #tpu.memory_space<vmem>>, %arg20: memref<8x8x64xf32, #tpu.memory_space<vmem>>, %arg21: memref<8x8x1024xf32, #tpu.memory_space<vmem>>, %arg22: memref<8x8x256xf32, #tpu.memory_space<vmem>>) attributes {dimension_semantics = [#tpu.dimension_semantics<parallel>, #tpu.dimension_semantics<arbitrary>], iteration_bounds = array<i64: 1, 1>, scalar_prefetch = 0 : i64, scratch_operands = 6 : i64, tpu.core_type = #tpu.core_type<tc>, window_params = [{transform_indices = @transform_0, window_bounds = array<i64: 8, 8, 3200>}, {transform_indices = @transform_1, window_bounds = array<i64: 8, 300>}, {pipeline_mode = #tpu.pipeline_mode<synchronous>, transform_indices = @transform_2, window_bounds = array<i64: 3200, 64>}, {pipeline_mode = #tpu.pipeline_mode<synchronous>, transform_indices = @transform_3, window_bounds = array<i64: 1, 64>}, {pipeline_mode = #tpu.pipeline_mode<synchronous>, transform_indices = @transform_4, window_bounds = array<i64: 300, 64>}, {pipeline_mode = #tpu.pipeline_mode<synchronous>, transform_indices = @transform_5, window_bounds = array<i64: 1, 64>}, {pipeline_mode = #tpu.pipeline_mode<synchronous>, transform_indices = @transform_6, window_bounds = array<i64: 64, 1024>}, {pipeline_mode = #tpu.pipeline_mode<synchronous>, transform_indices = @transform_7, window_bounds = array<i64: 256, 1024>}, {pipeline_mode = #tpu.pipeline_mode<synchronous>, transform_indices = @transform_8, window_bounds = array<i64: 1, 1024>}, {pipeline_mode = #tpu.pipeline_mode<synchronous>, transform_indices = @transform_9, window_bounds = array<i64: 256, 64>}, {pipeline_mode = #tpu.pipeline_mode<synchronous>, transform_indices = @transform_10, window_bounds = array<i64: 1, 64>}, {pipeline_mode = #tpu.pipeline_mode<synchronous>, transform_indices = @transform_11, window_bounds = array<i64: 64, 128>}, {pipeline_mode = #tpu.pipeline_mode<synchronous>, transform_indices = @transform_12, window_bounds = array<i64: 1, 128>}, {transform_indices = @transform_13, window_bounds = array<i64: 8, 8, 256>}, {transform_indices = @transform_14, window_bounds = array<i64: 8, 8, 128>}]} {
    %c0_i32 = arith.constant 0 : i32
    %0 = arith.cmpi eq, %arg1, %c0_i32 : i32
    %1 = arith.extui %0 : i1 to i32
    %c0_i32_0 = arith.constant 0 : i32
    %2 = arith.cmpi ne, %1, %c0_i32_0 : i32
    scf.if %2 {
      %c0_183 = arith.constant 0 : index
      %c0_184 = arith.constant 0 : index
      %429 = vector.load %arg3[%c0_183, %c0_184] : memref<8x300xf32, #tpu.memory_space<vmem>>, vector<8x300xf32>
      %430 = arith.truncf %429 : vector<8x300xf32> to vector<8x300xbf16>
      %c0_185 = arith.constant 0 : index
      %c0_186 = arith.constant 0 : index
      %431 = vector.load %arg6[%c0_185, %c0_186] : memref<300x64xbf16, #tpu.memory_space<vmem>>, vector<300x64xbf16>
      %cst_187 = arith.constant dense<0.000000e+00> : vector<8x64xf32>
      %432 = tpu.matmul %430, %431, %cst_187 {dimension_numbers = #tpu.dot_dimension_numbers<[1], [0], [0], [1], [0, 0, 1, 1], [], []>} : vector<8x300xbf16>, vector<300x64xbf16>, vector<8x64xf32> -> vector<8x64xf32>
      %c0_188 = arith.constant 0 : index
      %c0_189 = arith.constant 0 : index
      %433 = vector.load %arg7[%c0_188, %c0_189] : memref<1x64xf32, #tpu.memory_space<vmem>>, vector<1x64xf32>
      %434 = vector.broadcast %433 : vector<1x64xf32> to vector<8x64xf32>
      %435 = arith.addf %432, %434 : vector<8x64xf32>
      %cst_190 = arith.constant 0.000000e+00 : f32
      %436 = vector.broadcast %cst_190 : f32 to vector<8x64xf32>
      %437 = arith.maximumf %435, %436 : vector<8x64xf32>
      %c0_191 = arith.constant 0 : index
      %c0_192 = arith.constant 0 : index
      %438 = vector.load %arg17[%c0_191, %c0_192] : memref<8x64xf32, #tpu.memory_space<vmem>>, vector<8x64xf32>
      tpu.vector_store %arg17[%c0_191, %c0_192], %437 {strides = array<i32>} : memref<8x64xf32, #tpu.memory_space<vmem>>, vector<8x64xf32>,
      %cst_193 = arith.constant 0.000000e+00 : f32
      %439 = vector.broadcast %cst_193 : f32 to vector<8x256xf32>
      %c0_194 = arith.constant 0 : index
      %c0_195 = arith.constant 0 : index
      %440 = vector.load %arg18[%c0_194, %c0_195] : memref<8x256xf32, #tpu.memory_space<vmem>>, vector<8x256xf32>
      tpu.vector_store %arg18[%c0_194, %c0_195], %439 {strides = array<i32>} : memref<8x256xf32, #tpu.memory_space<vmem>>, vector<8x256xf32>,
      %cst_196 = arith.constant 0.000000e+00 : f32
      %441 = vector.broadcast %cst_196 : f32 to vector<8x256xf32>
      %c0_197 = arith.constant 0 : index
      %c0_198 = arith.constant 0 : index
      %442 = vector.load %arg19[%c0_197, %c0_198] : memref<8x256xf32, #tpu.memory_space<vmem>>, vector<8x256xf32>
      tpu.vector_store %arg19[%c0_197, %c0_198], %441 {strides = array<i32>} : memref<8x256xf32, #tpu.memory_space<vmem>>, vector<8x256xf32>,
    } else {
    }
    %c0 = arith.constant 0 : index
    %c0_1 = arith.constant 0 : index
    %c0_2 = arith.constant 0 : index
    %3 = vector.load %arg2[%c0, %c0_1, %c0_2] : memref<8x8x3200xf32, #tpu.memory_space<vmem>>, vector<8x8x3200xf32>
    %4 = vector.shape_cast %3 : vector<8x8x3200xf32> to vector<64x3200xf32>
    %5 = arith.truncf %4 : vector<64x3200xf32> to vector<64x3200xbf16>
    %c0_3 = arith.constant 0 : index
    %c0_4 = arith.constant 0 : index
    %6 = vector.load %arg4[%c0_3, %c0_4] : memref<3200x64xbf16, #tpu.memory_space<vmem>>, vector<3200x64xbf16>
    %cst = arith.constant dense<0.000000e+00> : vector<64x64xf32>
    %7 = tpu.matmul %5, %6, %cst {dimension_numbers = #tpu.dot_dimension_numbers<[1], [0], [0], [1], [0, 0, 1, 1], [], []>} : vector<64x3200xbf16>, vector<3200x64xbf16>, vector<64x64xf32> -> vector<64x64xf32>
    %c0_5 = arith.constant 0 : index
    %c0_6 = arith.constant 0 : index
    %8 = vector.load %arg5[%c0_5, %c0_6] : memref<1x64xf32, #tpu.memory_space<vmem>>, vector<1x64xf32>
    %9 = vector.broadcast %8 : vector<1x64xf32> to vector<64x64xf32>
    %10 = arith.addf %7, %9 : vector<64x64xf32>
    %cst_7 = arith.constant 0.000000e+00 : f32
    %11 = vector.broadcast %cst_7 : f32 to vector<64x64xf32>
    %12 = arith.maximumf %10, %11 : vector<64x64xf32>
    %13 = vector.shape_cast %12 : vector<64x64xf32> to vector<8x8x64xf32>
    %c0_8 = arith.constant 0 : index
    %c0_9 = arith.constant 0 : index
    %14 = vector.load %arg17[%c0_8, %c0_9] : memref<8x64xf32, #tpu.memory_space<vmem>>, vector<8x64xf32>
    %15 = vector.shape_cast %14 : vector<8x64xf32> to vector<8x1x64xf32>
    %16 = vector.broadcast %15 : vector<8x1x64xf32> to vector<8x8x64xf32>
    %17 = arith.mulf %13, %16 : vector<8x8x64xf32>
    %18 = vector.extract_strided_slice %17 {offsets = [0, 0, 0], sizes = [1, 8, 64], strides = [1, 1, 1]} : vector<8x8x64xf32> to vector<1x8x64xf32>
    %19 = vector.shape_cast %18 : vector<1x8x64xf32> to vector<8x64xf32>
    %c0_10 = arith.constant 0 : index
    %c0_11 = arith.constant 0 : index
    %c0_12 = arith.constant 0 : index
    %20 = vector.load %arg20[%c0_10, %c0_11, %c0_12] : memref<8x8x64xf32, #tpu.memory_space<vmem>>, vector<8x1x64xf32>
    %21 = vector.shape_cast %20 : vector<8x1x64xf32> to vector<8x64xf32>
    %22 = vector.shape_cast %19 : vector<8x64xf32> to vector<8x1x64xf32>
    tpu.vector_store %arg20[%c0_10, %c0_11, %c0_12], %22 {strides = array<i32>} : memref<8x8x64xf32, #tpu.memory_space<vmem>>, vector<8x1x64xf32>,
    %23 = vector.extract_strided_slice %17 {offsets = [1, 0, 0], sizes = [1, 8, 64], strides = [1, 1, 1]} : vector<8x8x64xf32> to vector<1x8x64xf32>
    %24 = vector.shape_cast %23 : vector<1x8x64xf32> to vector<8x64xf32>
    %c0_13 = arith.constant 0 : index
    %c1 = arith.constant 1 : index
    %c0_14 = arith.constant 0 : index
    %25 = vector.load %arg20[%c0_13, %c1, %c0_14] : memref<8x8x64xf32, #tpu.memory_space<vmem>>, vector<8x1x64xf32>
    %26 = vector.shape_cast %25 : vector<8x1x64xf32> to vector<8x64xf32>
    %27 = vector.shape_cast %24 : vector<8x64xf32> to vector<8x1x64xf32>
    tpu.vector_store %arg20[%c0_13, %c1, %c0_14], %27 {strides = array<i32>} : memref<8x8x64xf32, #tpu.memory_space<vmem>>, vector<8x1x64xf32>,
    %28 = vector.extract_strided_slice %17 {offsets = [2, 0, 0], sizes = [1, 8, 64], strides = [1, 1, 1]} : vector<8x8x64xf32> to vector<1x8x64xf32>
    %29 = vector.shape_cast %28 : vector<1x8x64xf32> to vector<8x64xf32>
    %c0_15 = arith.constant 0 : index
    %c2 = arith.constant 2 : index
    %c0_16 = arith.constant 0 : index
    %30 = vector.load %arg20[%c0_15, %c2, %c0_16] : memref<8x8x64xf32, #tpu.memory_space<vmem>>, vector<8x1x64xf32>
    %31 = vector.shape_cast %30 : vector<8x1x64xf32> to vector<8x64xf32>
    %32 = vector.shape_cast %29 : vector<8x64xf32> to vector<8x1x64xf32>
    tpu.vector_store %arg20[%c0_15, %c2, %c0_16], %32 {strides = array<i32>} : memref<8x8x64xf32, #tpu.memory_space<vmem>>, vector<8x1x64xf32>,
    %33 = vector.extract_strided_slice %17 {offsets = [3, 0, 0], sizes = [1, 8, 64], strides = [1, 1, 1]} : vector<8x8x64xf32> to vector<1x8x64xf32>
    %34 = vector.shape_cast %33 : vector<1x8x64xf32> to vector<8x64xf32>
    %c0_17 = arith.constant 0 : index
    %c3 = arith.constant 3 : index
    %c0_18 = arith.constant 0 : index
    %35 = vector.load %arg20[%c0_17, %c3, %c0_18] : memref<8x8x64xf32, #tpu.memory_space<vmem>>, vector<8x1x64xf32>
    %36 = vector.shape_cast %35 : vector<8x1x64xf32> to vector<8x64xf32>
    %37 = vector.shape_cast %34 : vector<8x64xf32> to vector<8x1x64xf32>
    tpu.vector_store %arg20[%c0_17, %c3, %c0_18], %37 {strides = array<i32>} : memref<8x8x64xf32, #tpu.memory_space<vmem>>, vector<8x1x64xf32>,
    %38 = vector.extract_strided_slice %17 {offsets = [4, 0, 0], sizes = [1, 8, 64], strides = [1, 1, 1]} : vector<8x8x64xf32> to vector<1x8x64xf32>
    %39 = vector.shape_cast %38 : vector<1x8x64xf32> to vector<8x64xf32>
    %c0_19 = arith.constant 0 : index
    %c4 = arith.constant 4 : index
    %c0_20 = arith.constant 0 : index
    %40 = vector.load %arg20[%c0_19, %c4, %c0_20] : memref<8x8x64xf32, #tpu.memory_space<vmem>>, vector<8x1x64xf32>
    %41 = vector.shape_cast %40 : vector<8x1x64xf32> to vector<8x64xf32>
    %42 = vector.shape_cast %39 : vector<8x64xf32> to vector<8x1x64xf32>
    tpu.vector_store %arg20[%c0_19, %c4, %c0_20], %42 {strides = array<i32>} : memref<8x8x64xf32, #tpu.memory_space<vmem>>, vector<8x1x64xf32>,
    %43 = vector.extract_strided_slice %17 {offsets = [5, 0, 0], sizes = [1, 8, 64], strides = [1, 1, 1]} : vector<8x8x64xf32> to vector<1x8x64xf32>
    %44 = vector.shape_cast %43 : vector<1x8x64xf32> to vector<8x64xf32>
    %c0_21 = arith.constant 0 : index
    %c5 = arith.constant 5 : index
    %c0_22 = arith.constant 0 : index
    %45 = vector.load %arg20[%c0_21, %c5, %c0_22] : memref<8x8x64xf32, #tpu.memory_space<vmem>>, vector<8x1x64xf32>
    %46 = vector.shape_cast %45 : vector<8x1x64xf32> to vector<8x64xf32>
    %47 = vector.shape_cast %44 : vector<8x64xf32> to vector<8x1x64xf32>
    tpu.vector_store %arg20[%c0_21, %c5, %c0_22], %47 {strides = array<i32>} : memref<8x8x64xf32, #tpu.memory_space<vmem>>, vector<8x1x64xf32>,
    %48 = vector.extract_strided_slice %17 {offsets = [6, 0, 0], sizes = [1, 8, 64], strides = [1, 1, 1]} : vector<8x8x64xf32> to vector<1x8x64xf32>
    %49 = vector.shape_cast %48 : vector<1x8x64xf32> to vector<8x64xf32>
    %c0_23 = arith.constant 0 : index
    %c6 = arith.constant 6 : index
    %c0_24 = arith.constant 0 : index
    %50 = vector.load %arg20[%c0_23, %c6, %c0_24] : memref<8x8x64xf32, #tpu.memory_space<vmem>>, vector<8x1x64xf32>
    %51 = vector.shape_cast %50 : vector<8x1x64xf32> to vector<8x64xf32>
    %52 = vector.shape_cast %49 : vector<8x64xf32> to vector<8x1x64xf32>
    tpu.vector_store %arg20[%c0_23, %c6, %c0_24], %52 {strides = array<i32>} : memref<8x8x64xf32, #tpu.memory_space<vmem>>, vector<8x1x64xf32>,
    %53 = vector.extract_strided_slice %17 {offsets = [7, 0, 0], sizes = [1, 8, 64], strides = [1, 1, 1]} : vector<8x8x64xf32> to vector<1x8x64xf32>
    %54 = vector.shape_cast %53 : vector<1x8x64xf32> to vector<8x64xf32>
    %c0_25 = arith.constant 0 : index
    %c7 = arith.constant 7 : index
    %c0_26 = arith.constant 0 : index
    %55 = vector.load %arg20[%c0_25, %c7, %c0_26] : memref<8x8x64xf32, #tpu.memory_space<vmem>>, vector<8x1x64xf32>
    %56 = vector.shape_cast %55 : vector<8x1x64xf32> to vector<8x64xf32>
    %57 = vector.shape_cast %54 : vector<8x64xf32> to vector<8x1x64xf32>
    tpu.vector_store %arg20[%c0_25, %c7, %c0_26], %57 {strides = array<i32>} : memref<8x8x64xf32, #tpu.memory_space<vmem>>, vector<8x1x64xf32>,
    %c0_27 = arith.constant 0 : index
    %c0_28 = arith.constant 0 : index
    %c0_29 = arith.constant 0 : index
    %58 = vector.load %arg20[%c0_27, %c0_28, %c0_29] : memref<8x8x64xf32, #tpu.memory_space<vmem>>, vector<8x8x64xf32>
    %59 = vector.shape_cast %58 : vector<8x8x64xf32> to vector<64x64xf32>
    %60 = arith.truncf %59 : vector<64x64xf32> to vector<64x64xbf16>
    %c0_30 = arith.constant 0 : index
    %c0_31 = arith.constant 0 : index
    %61 = vector.load %arg8[%c0_30, %c0_31] : memref<64x1024xbf16, #tpu.memory_space<vmem>>, vector<64x1024xbf16>
    %cst_32 = arith.constant dense<0.000000e+00> : vector<64x1024xf32>
    %62 = tpu.matmul %60, %61, %cst_32 {dimension_numbers = #tpu.dot_dimension_numbers<[1], [0], [0], [1], [0, 0, 1, 1], [], []>} : vector<64x64xbf16>, vector<64x1024xbf16>, vector<64x1024xf32> -> vector<64x1024xf32>
    %c0_33 = arith.constant 0 : index
    %c0_34 = arith.constant 0 : index
    %63 = vector.load %arg10[%c0_33, %c0_34] : memref<1x1024xf32, #tpu.memory_space<vmem>>, vector<1x1024xf32>
    %64 = vector.broadcast %63 : vector<1x1024xf32> to vector<64x1024xf32>
    %65 = arith.addf %62, %64 : vector<64x1024xf32>
    %66 = vector.shape_cast %65 : vector<64x1024xf32> to vector<8x8x1024xf32>
    %c0_35 = arith.constant 0 : index
    %c0_36 = arith.constant 0 : index
    %c0_37 = arith.constant 0 : index
    %67 = vector.load %arg21[%c0_35, %c0_36, %c0_37] : memref<8x8x1024xf32, #tpu.memory_space<vmem>>, vector<8x8x1024xf32>
    tpu.vector_store %arg21[%c0_35, %c0_36, %c0_37], %66 {strides = array<i32>} : memref<8x8x1024xf32, #tpu.memory_space<vmem>>, vector<8x8x1024xf32>,
    %c0_38 = arith.constant 0 : index
    %c0_39 = arith.constant 0 : index
    %68 = vector.load %arg9[%c0_38, %c0_39] : memref<256x1024xbf16, #tpu.memory_space<vmem>>, vector<256x1024xbf16>
    %c0_40 = arith.constant 0 : index
    %c0_41 = arith.constant 0 : index
    %69 = vector.load %arg18[%c0_40, %c0_41] : memref<8x256xf32, #tpu.memory_space<vmem>>, vector<8x256xf32>
    %c0_42 = arith.constant 0 : index
    %c0_43 = arith.constant 0 : index
    %70 = vector.load %arg19[%c0_42, %c0_43] : memref<8x256xf32, #tpu.memory_space<vmem>>, vector<8x256xf32>
    %c0_i32_44 = arith.constant 0 : i32
    %71 = arith.index_cast %c0_i32_44 : i32 to index
    %c0_45 = arith.constant 0 : index
    %c0_46 = arith.constant 0 : index
    %72 = vector.load %arg21[%71, %c0_45, %c0_46] : memref<8x8x1024xf32, #tpu.memory_space<vmem>>, vector<1x8x1024xf32>
    %73 = vector.shape_cast %72 : vector<1x8x1024xf32> to vector<8x1024xf32>
    %74 = arith.truncf %69 : vector<8x256xf32> to vector<8x256xbf16>
    %cst_47 = arith.constant dense<0.000000e+00> : vector<8x1024xf32>
    %75 = tpu.matmul %74, %68, %cst_47 {dimension_numbers = #tpu.dot_dimension_numbers<[1], [0], [0], [1], [0, 0, 1, 1], [], []>} : vector<8x256xbf16>, vector<256x1024xbf16>, vector<8x1024xf32> -> vector<8x1024xf32>
    %76 = arith.addf %73, %75 : vector<8x1024xf32>
    %77 = vector.extract_strided_slice %76 {offsets = [0, 0], sizes = [8, 256], strides = [1, 1]} : vector<8x1024xf32> to vector<8x256xf32>
    %78 = arith.negf %77 : vector<8x256xf32>
    %79 = math.exp %78 : vector<8x256xf32>
    %cst_48 = arith.constant 1.000000e+00 : f32
    %80 = vector.broadcast %cst_48 : f32 to vector<8x256xf32>
    %81 = arith.addf %80, %79 : vector<8x256xf32>
    %82 = arith.divf %80, %81 : vector<8x256xf32>
    %83 = vector.extract_strided_slice %76 {offsets = [0, 256], sizes = [8, 256], strides = [1, 1]} : vector<8x1024xf32> to vector<8x256xf32>
    %84 = arith.negf %83 : vector<8x256xf32>
    %85 = math.exp %84 : vector<8x256xf32>
    %cst_49 = arith.constant 1.000000e+00 : f32
    %86 = vector.broadcast %cst_49 : f32 to vector<8x256xf32>
    %87 = arith.addf %86, %85 : vector<8x256xf32>
    %88 = arith.divf %86, %87 : vector<8x256xf32>
    %89 = vector.extract_strided_slice %76 {offsets = [0, 512], sizes = [8, 256], strides = [1, 1]} : vector<8x1024xf32> to vector<8x256xf32>
    %90 = math.tanh %89 : vector<8x256xf32>
    %91 = vector.extract_strided_slice %76 {offsets = [0, 768], sizes = [8, 256], strides = [1, 1]} : vector<8x1024xf32> to vector<8x256xf32>
    %92 = arith.negf %91 : vector<8x256xf32>
    %93 = math.exp %92 : vector<8x256xf32>
    %cst_50 = arith.constant 1.000000e+00 : f32
    %94 = vector.broadcast %cst_50 : f32 to vector<8x256xf32>
    %95 = arith.addf %94, %93 : vector<8x256xf32>
    %96 = arith.divf %94, %95 : vector<8x256xf32>
    %97 = arith.mulf %88, %70 : vector<8x256xf32>
    %98 = arith.mulf %82, %90 : vector<8x256xf32>
    %99 = arith.addf %97, %98 : vector<8x256xf32>
    %100 = math.tanh %99 : vector<8x256xf32>
    %101 = arith.mulf %96, %100 : vector<8x256xf32>
    %102 = arith.index_cast %c0_i32_44 : i32 to index
    %c0_51 = arith.constant 0 : index
    %c0_52 = arith.constant 0 : index
    %103 = vector.load %arg22[%102, %c0_51, %c0_52] : memref<8x8x256xf32, #tpu.memory_space<vmem>>, vector<1x8x256xf32>
    %104 = vector.shape_cast %103 : vector<1x8x256xf32> to vector<8x256xf32>
    %105 = vector.shape_cast %101 : vector<8x256xf32> to vector<1x8x256xf32>
    tpu.vector_store %arg22[%102, %c0_51, %c0_52], %105 {strides = array<i32>} : memref<8x8x256xf32, #tpu.memory_space<vmem>>, vector<1x8x256xf32>,
    %c1_i32 = arith.constant 1 : i32
    %106 = arith.index_cast %c1_i32 : i32 to index
    %c0_53 = arith.constant 0 : index
    %c0_54 = arith.constant 0 : index
    %107 = vector.load %arg21[%106, %c0_53, %c0_54] : memref<8x8x1024xf32, #tpu.memory_space<vmem>>, vector<1x8x1024xf32>
    %108 = vector.shape_cast %107 : vector<1x8x1024xf32> to vector<8x1024xf32>
    %109 = arith.truncf %101 : vector<8x256xf32> to vector<8x256xbf16>
    %cst_55 = arith.constant dense<0.000000e+00> : vector<8x1024xf32>
    %110 = tpu.matmul %109, %68, %cst_55 {dimension_numbers = #tpu.dot_dimension_numbers<[1], [0], [0], [1], [0, 0, 1, 1], [], []>} : vector<8x256xbf16>, vector<256x1024xbf16>, vector<8x1024xf32> -> vector<8x1024xf32>
    %111 = arith.addf %108, %110 : vector<8x1024xf32>
    %112 = vector.extract_strided_slice %111 {offsets = [0, 0], sizes = [8, 256], strides = [1, 1]} : vector<8x1024xf32> to vector<8x256xf32>
    %113 = arith.negf %112 : vector<8x256xf32>
    %114 = math.exp %113 : vector<8x256xf32>
    %cst_56 = arith.constant 1.000000e+00 : f32
    %115 = vector.broadcast %cst_56 : f32 to vector<8x256xf32>
    %116 = arith.addf %115, %114 : vector<8x256xf32>
    %117 = arith.divf %115, %116 : vector<8x256xf32>
    %118 = vector.extract_strided_slice %111 {offsets = [0, 256], sizes = [8, 256], strides = [1, 1]} : vector<8x1024xf32> to vector<8x256xf32>
    %119 = arith.negf %118 : vector<8x256xf32>
    %120 = math.exp %119 : vector<8x256xf32>
    %cst_57 = arith.constant 1.000000e+00 : f32
    %121 = vector.broadcast %cst_57 : f32 to vector<8x256xf32>
    %122 = arith.addf %121, %120 : vector<8x256xf32>
    %123 = arith.divf %121, %122 : vector<8x256xf32>
    %124 = vector.extract_strided_slice %111 {offsets = [0, 512], sizes = [8, 256], strides = [1, 1]} : vector<8x1024xf32> to vector<8x256xf32>
    %125 = math.tanh %124 : vector<8x256xf32>
    %126 = vector.extract_strided_slice %111 {offsets = [0, 768], sizes = [8, 256], strides = [1, 1]} : vector<8x1024xf32> to vector<8x256xf32>
    %127 = arith.negf %126 : vector<8x256xf32>
    %128 = math.exp %127 : vector<8x256xf32>
    %cst_58 = arith.constant 1.000000e+00 : f32
    %129 = vector.broadcast %cst_58 : f32 to vector<8x256xf32>
    %130 = arith.addf %129, %128 : vector<8x256xf32>
    %131 = arith.divf %129, %130 : vector<8x256xf32>
    %132 = arith.mulf %123, %99 : vector<8x256xf32>
    %133 = arith.mulf %117, %125 : vector<8x256xf32>
    %134 = arith.addf %132, %133 : vector<8x256xf32>
    %135 = math.tanh %134 : vector<8x256xf32>
    %136 = arith.mulf %131, %135 : vector<8x256xf32>
    %137 = arith.index_cast %c1_i32 : i32 to index
    %c0_59 = arith.constant 0 : index
    %c0_60 = arith.constant 0 : index
    %138 = vector.load %arg22[%137, %c0_59, %c0_60] : memref<8x8x256xf32, #tpu.memory_space<vmem>>, vector<1x8x256xf32>
    %139 = vector.shape_cast %138 : vector<1x8x256xf32> to vector<8x256xf32>
    %140 = vector.shape_cast %136 : vector<8x256xf32> to vector<1x8x256xf32>
    tpu.vector_store %arg22[%137, %c0_59, %c0_60], %140 {strides = array<i32>} : memref<8x8x256xf32, #tpu.memory_space<vmem>>, vector<1x8x256xf32>,
    %c2_i32 = arith.constant 2 : i32
    %141 = arith.index_cast %c2_i32 : i32 to index
    %c0_61 = arith.constant 0 : index
    %c0_62 = arith.constant 0 : index
    %142 = vector.load %arg21[%141, %c0_61, %c0_62] : memref<8x8x1024xf32, #tpu.memory_space<vmem>>, vector<1x8x1024xf32>
    %143 = vector.shape_cast %142 : vector<1x8x1024xf32> to vector<8x1024xf32>
    %144 = arith.truncf %136 : vector<8x256xf32> to vector<8x256xbf16>
    %cst_63 = arith.constant dense<0.000000e+00> : vector<8x1024xf32>
    %145 = tpu.matmul %144, %68, %cst_63 {dimension_numbers = #tpu.dot_dimension_numbers<[1], [0], [0], [1], [0, 0, 1, 1], [], []>} : vector<8x256xbf16>, vector<256x1024xbf16>, vector<8x1024xf32> -> vector<8x1024xf32>
    %146 = arith.addf %143, %145 : vector<8x1024xf32>
    %147 = vector.extract_strided_slice %146 {offsets = [0, 0], sizes = [8, 256], strides = [1, 1]} : vector<8x1024xf32> to vector<8x256xf32>
    %148 = arith.negf %147 : vector<8x256xf32>
    %149 = math.exp %148 : vector<8x256xf32>
    %cst_64 = arith.constant 1.000000e+00 : f32
    %150 = vector.broadcast %cst_64 : f32 to vector<8x256xf32>
    %151 = arith.addf %150, %149 : vector<8x256xf32>
    %152 = arith.divf %150, %151 : vector<8x256xf32>
    %153 = vector.extract_strided_slice %146 {offsets = [0, 256], sizes = [8, 256], strides = [1, 1]} : vector<8x1024xf32> to vector<8x256xf32>
    %154 = arith.negf %153 : vector<8x256xf32>
    %155 = math.exp %154 : vector<8x256xf32>
    %cst_65 = arith.constant 1.000000e+00 : f32
    %156 = vector.broadcast %cst_65 : f32 to vector<8x256xf32>
    %157 = arith.addf %156, %155 : vector<8x256xf32>
    %158 = arith.divf %156, %157 : vector<8x256xf32>
    %159 = vector.extract_strided_slice %146 {offsets = [0, 512], sizes = [8, 256], strides = [1, 1]} : vector<8x1024xf32> to vector<8x256xf32>
    %160 = math.tanh %159 : vector<8x256xf32>
    %161 = vector.extract_strided_slice %146 {offsets = [0, 768], sizes = [8, 256], strides = [1, 1]} : vector<8x1024xf32> to vector<8x256xf32>
    %162 = arith.negf %161 : vector<8x256xf32>
    %163 = math.exp %162 : vector<8x256xf32>
    %cst_66 = arith.constant 1.000000e+00 : f32
    %164 = vector.broadcast %cst_66 : f32 to vector<8x256xf32>
    %165 = arith.addf %164, %163 : vector<8x256xf32>
    %166 = arith.divf %164, %165 : vector<8x256xf32>
    %167 = arith.mulf %158, %134 : vector<8x256xf32>
    %168 = arith.mulf %152, %160 : vector<8x256xf32>
    %169 = arith.addf %167, %168 : vector<8x256xf32>
    %170 = math.tanh %169 : vector<8x256xf32>
    %171 = arith.mulf %166, %170 : vector<8x256xf32>
    %172 = arith.index_cast %c2_i32 : i32 to index
    %c0_67 = arith.constant 0 : index
    %c0_68 = arith.constant 0 : index
    %173 = vector.load %arg22[%172, %c0_67, %c0_68] : memref<8x8x256xf32, #tpu.memory_space<vmem>>, vector<1x8x256xf32>
    %174 = vector.shape_cast %173 : vector<1x8x256xf32> to vector<8x256xf32>
    %175 = vector.shape_cast %171 : vector<8x256xf32> to vector<1x8x256xf32>
    tpu.vector_store %arg22[%172, %c0_67, %c0_68], %175 {strides = array<i32>} : memref<8x8x256xf32, #tpu.memory_space<vmem>>, vector<1x8x256xf32>,
    %c3_i32 = arith.constant 3 : i32
    %176 = arith.index_cast %c3_i32 : i32 to index
    %c0_69 = arith.constant 0 : index
    %c0_70 = arith.constant 0 : index
    %177 = vector.load %arg21[%176, %c0_69, %c0_70] : memref<8x8x1024xf32, #tpu.memory_space<vmem>>, vector<1x8x1024xf32>
    %178 = vector.shape_cast %177 : vector<1x8x1024xf32> to vector<8x1024xf32>
    %179 = arith.truncf %171 : vector<8x256xf32> to vector<8x256xbf16>
    %cst_71 = arith.constant dense<0.000000e+00> : vector<8x1024xf32>
    %180 = tpu.matmul %179, %68, %cst_71 {dimension_numbers = #tpu.dot_dimension_numbers<[1], [0], [0], [1], [0, 0, 1, 1], [], []>} : vector<8x256xbf16>, vector<256x1024xbf16>, vector<8x1024xf32> -> vector<8x1024xf32>
    %181 = arith.addf %178, %180 : vector<8x1024xf32>
    %182 = vector.extract_strided_slice %181 {offsets = [0, 0], sizes = [8, 256], strides = [1, 1]} : vector<8x1024xf32> to vector<8x256xf32>
    %183 = arith.negf %182 : vector<8x256xf32>
    %184 = math.exp %183 : vector<8x256xf32>
    %cst_72 = arith.constant 1.000000e+00 : f32
    %185 = vector.broadcast %cst_72 : f32 to vector<8x256xf32>
    %186 = arith.addf %185, %184 : vector<8x256xf32>
    %187 = arith.divf %185, %186 : vector<8x256xf32>
    %188 = vector.extract_strided_slice %181 {offsets = [0, 256], sizes = [8, 256], strides = [1, 1]} : vector<8x1024xf32> to vector<8x256xf32>
    %189 = arith.negf %188 : vector<8x256xf32>
    %190 = math.exp %189 : vector<8x256xf32>
    %cst_73 = arith.constant 1.000000e+00 : f32
    %191 = vector.broadcast %cst_73 : f32 to vector<8x256xf32>
    %192 = arith.addf %191, %190 : vector<8x256xf32>
    %193 = arith.divf %191, %192 : vector<8x256xf32>
    %194 = vector.extract_strided_slice %181 {offsets = [0, 512], sizes = [8, 256], strides = [1, 1]} : vector<8x1024xf32> to vector<8x256xf32>
    %195 = math.tanh %194 : vector<8x256xf32>
    %196 = vector.extract_strided_slice %181 {offsets = [0, 768], sizes = [8, 256], strides = [1, 1]} : vector<8x1024xf32> to vector<8x256xf32>
    %197 = arith.negf %196 : vector<8x256xf32>
    %198 = math.exp %197 : vector<8x256xf32>
    %cst_74 = arith.constant 1.000000e+00 : f32
    %199 = vector.broadcast %cst_74 : f32 to vector<8x256xf32>
    %200 = arith.addf %199, %198 : vector<8x256xf32>
    %201 = arith.divf %199, %200 : vector<8x256xf32>
    %202 = arith.mulf %193, %169 : vector<8x256xf32>
    %203 = arith.mulf %187, %195 : vector<8x256xf32>
    %204 = arith.addf %202, %203 : vector<8x256xf32>
    %205 = math.tanh %204 : vector<8x256xf32>
    %206 = arith.mulf %201, %205 : vector<8x256xf32>
    %207 = arith.index_cast %c3_i32 : i32 to index
    %c0_75 = arith.constant 0 : index
    %c0_76 = arith.constant 0 : index
    %208 = vector.load %arg22[%207, %c0_75, %c0_76] : memref<8x8x256xf32, #tpu.memory_space<vmem>>, vector<1x8x256xf32>
    %209 = vector.shape_cast %208 : vector<1x8x256xf32> to vector<8x256xf32>
    %210 = vector.shape_cast %206 : vector<8x256xf32> to vector<1x8x256xf32>
    tpu.vector_store %arg22[%207, %c0_75, %c0_76], %210 {strides = array<i32>} : memref<8x8x256xf32, #tpu.memory_space<vmem>>, vector<1x8x256xf32>,
    %c4_i32 = arith.constant 4 : i32
    %211 = arith.index_cast %c4_i32 : i32 to index
    %c0_77 = arith.constant 0 : index
    %c0_78 = arith.constant 0 : index
    %212 = vector.load %arg21[%211, %c0_77, %c0_78] : memref<8x8x1024xf32, #tpu.memory_space<vmem>>, vector<1x8x1024xf32>
    %213 = vector.shape_cast %212 : vector<1x8x1024xf32> to vector<8x1024xf32>
    %214 = arith.truncf %206 : vector<8x256xf32> to vector<8x256xbf16>
    %cst_79 = arith.constant dense<0.000000e+00> : vector<8x1024xf32>
    %215 = tpu.matmul %214, %68, %cst_79 {dimension_numbers = #tpu.dot_dimension_numbers<[1], [0], [0], [1], [0, 0, 1, 1], [], []>} : vector<8x256xbf16>, vector<256x1024xbf16>, vector<8x1024xf32> -> vector<8x1024xf32>
    %216 = arith.addf %213, %215 : vector<8x1024xf32>
    %217 = vector.extract_strided_slice %216 {offsets = [0, 0], sizes = [8, 256], strides = [1, 1]} : vector<8x1024xf32> to vector<8x256xf32>
    %218 = arith.negf %217 : vector<8x256xf32>
    %219 = math.exp %218 : vector<8x256xf32>
    %cst_80 = arith.constant 1.000000e+00 : f32
    %220 = vector.broadcast %cst_80 : f32 to vector<8x256xf32>
    %221 = arith.addf %220, %219 : vector<8x256xf32>
    %222 = arith.divf %220, %221 : vector<8x256xf32>
    %223 = vector.extract_strided_slice %216 {offsets = [0, 256], sizes = [8, 256], strides = [1, 1]} : vector<8x1024xf32> to vector<8x256xf32>
    %224 = arith.negf %223 : vector<8x256xf32>
    %225 = math.exp %224 : vector<8x256xf32>
    %cst_81 = arith.constant 1.000000e+00 : f32
    %226 = vector.broadcast %cst_81 : f32 to vector<8x256xf32>
    %227 = arith.addf %226, %225 : vector<8x256xf32>
    %228 = arith.divf %226, %227 : vector<8x256xf32>
    %229 = vector.extract_strided_slice %216 {offsets = [0, 512], sizes = [8, 256], strides = [1, 1]} : vector<8x1024xf32> to vector<8x256xf32>
    %230 = math.tanh %229 : vector<8x256xf32>
    %231 = vector.extract_strided_slice %216 {offsets = [0, 768], sizes = [8, 256], strides = [1, 1]} : vector<8x1024xf32> to vector<8x256xf32>
    %232 = arith.negf %231 : vector<8x256xf32>
    %233 = math.exp %232 : vector<8x256xf32>
    %cst_82 = arith.constant 1.000000e+00 : f32
    %234 = vector.broadcast %cst_82 : f32 to vector<8x256xf32>
    %235 = arith.addf %234, %233 : vector<8x256xf32>
    %236 = arith.divf %234, %235 : vector<8x256xf32>
    %237 = arith.mulf %228, %204 : vector<8x256xf32>
    %238 = arith.mulf %222, %230 : vector<8x256xf32>
    %239 = arith.addf %237, %238 : vector<8x256xf32>
    %240 = math.tanh %239 : vector<8x256xf32>
    %241 = arith.mulf %236, %240 : vector<8x256xf32>
    %242 = arith.index_cast %c4_i32 : i32 to index
    %c0_83 = arith.constant 0 : index
    %c0_84 = arith.constant 0 : index
    %243 = vector.load %arg22[%242, %c0_83, %c0_84] : memref<8x8x256xf32, #tpu.memory_space<vmem>>, vector<1x8x256xf32>
    %244 = vector.shape_cast %243 : vector<1x8x256xf32> to vector<8x256xf32>
    %245 = vector.shape_cast %241 : vector<8x256xf32> to vector<1x8x256xf32>
    tpu.vector_store %arg22[%242, %c0_83, %c0_84], %245 {strides = array<i32>} : memref<8x8x256xf32, #tpu.memory_space<vmem>>, vector<1x8x256xf32>,
    %c5_i32 = arith.constant 5 : i32
    %246 = arith.index_cast %c5_i32 : i32 to index
    %c0_85 = arith.constant 0 : index
    %c0_86 = arith.constant 0 : index
    %247 = vector.load %arg21[%246, %c0_85, %c0_86] : memref<8x8x1024xf32, #tpu.memory_space<vmem>>, vector<1x8x1024xf32>
    %248 = vector.shape_cast %247 : vector<1x8x1024xf32> to vector<8x1024xf32>
    %249 = arith.truncf %241 : vector<8x256xf32> to vector<8x256xbf16>
    %cst_87 = arith.constant dense<0.000000e+00> : vector<8x1024xf32>
    %250 = tpu.matmul %249, %68, %cst_87 {dimension_numbers = #tpu.dot_dimension_numbers<[1], [0], [0], [1], [0, 0, 1, 1], [], []>} : vector<8x256xbf16>, vector<256x1024xbf16>, vector<8x1024xf32> -> vector<8x1024xf32>
    %251 = arith.addf %248, %250 : vector<8x1024xf32>
    %252 = vector.extract_strided_slice %251 {offsets = [0, 0], sizes = [8, 256], strides = [1, 1]} : vector<8x1024xf32> to vector<8x256xf32>
    %253 = arith.negf %252 : vector<8x256xf32>
    %254 = math.exp %253 : vector<8x256xf32>
    %cst_88 = arith.constant 1.000000e+00 : f32
    %255 = vector.broadcast %cst_88 : f32 to vector<8x256xf32>
    %256 = arith.addf %255, %254 : vector<8x256xf32>
    %257 = arith.divf %255, %256 : vector<8x256xf32>
    %258 = vector.extract_strided_slice %251 {offsets = [0, 256], sizes = [8, 256], strides = [1, 1]} : vector<8x1024xf32> to vector<8x256xf32>
    %259 = arith.negf %258 : vector<8x256xf32>
    %260 = math.exp %259 : vector<8x256xf32>
    %cst_89 = arith.constant 1.000000e+00 : f32
    %261 = vector.broadcast %cst_89 : f32 to vector<8x256xf32>
    %262 = arith.addf %261, %260 : vector<8x256xf32>
    %263 = arith.divf %261, %262 : vector<8x256xf32>
    %264 = vector.extract_strided_slice %251 {offsets = [0, 512], sizes = [8, 256], strides = [1, 1]} : vector<8x1024xf32> to vector<8x256xf32>
    %265 = math.tanh %264 : vector<8x256xf32>
    %266 = vector.extract_strided_slice %251 {offsets = [0, 768], sizes = [8, 256], strides = [1, 1]} : vector<8x1024xf32> to vector<8x256xf32>
    %267 = arith.negf %266 : vector<8x256xf32>
    %268 = math.exp %267 : vector<8x256xf32>
    %cst_90 = arith.constant 1.000000e+00 : f32
    %269 = vector.broadcast %cst_90 : f32 to vector<8x256xf32>
    %270 = arith.addf %269, %268 : vector<8x256xf32>
    %271 = arith.divf %269, %270 : vector<8x256xf32>
    %272 = arith.mulf %263, %239 : vector<8x256xf32>
    %273 = arith.mulf %257, %265 : vector<8x256xf32>
    %274 = arith.addf %272, %273 : vector<8x256xf32>
    %275 = math.tanh %274 : vector<8x256xf32>
    %276 = arith.mulf %271, %275 : vector<8x256xf32>
    %277 = arith.index_cast %c5_i32 : i32 to index
    %c0_91 = arith.constant 0 : index
    %c0_92 = arith.constant 0 : index
    %278 = vector.load %arg22[%277, %c0_91, %c0_92] : memref<8x8x256xf32, #tpu.memory_space<vmem>>, vector<1x8x256xf32>
    %279 = vector.shape_cast %278 : vector<1x8x256xf32> to vector<8x256xf32>
    %280 = vector.shape_cast %276 : vector<8x256xf32> to vector<1x8x256xf32>
    tpu.vector_store %arg22[%277, %c0_91, %c0_92], %280 {strides = array<i32>} : memref<8x8x256xf32, #tpu.memory_space<vmem>>, vector<1x8x256xf32>,
    %c6_i32 = arith.constant 6 : i32
    %281 = arith.index_cast %c6_i32 : i32 to index
    %c0_93 = arith.constant 0 : index
    %c0_94 = arith.constant 0 : index
    %282 = vector.load %arg21[%281, %c0_93, %c0_94] : memref<8x8x1024xf32, #tpu.memory_space<vmem>>, vector<1x8x1024xf32>
    %283 = vector.shape_cast %282 : vector<1x8x1024xf32> to vector<8x1024xf32>
    %284 = arith.truncf %276 : vector<8x256xf32> to vector<8x256xbf16>
    %cst_95 = arith.constant dense<0.000000e+00> : vector<8x1024xf32>
    %285 = tpu.matmul %284, %68, %cst_95 {dimension_numbers = #tpu.dot_dimension_numbers<[1], [0], [0], [1], [0, 0, 1, 1], [], []>} : vector<8x256xbf16>, vector<256x1024xbf16>, vector<8x1024xf32> -> vector<8x1024xf32>
    %286 = arith.addf %283, %285 : vector<8x1024xf32>
    %287 = vector.extract_strided_slice %286 {offsets = [0, 0], sizes = [8, 256], strides = [1, 1]} : vector<8x1024xf32> to vector<8x256xf32>
    %288 = arith.negf %287 : vector<8x256xf32>
    %289 = math.exp %288 : vector<8x256xf32>
    %cst_96 = arith.constant 1.000000e+00 : f32
    %290 = vector.broadcast %cst_96 : f32 to vector<8x256xf32>
    %291 = arith.addf %290, %289 : vector<8x256xf32>
    %292 = arith.divf %290, %291 : vector<8x256xf32>
    %293 = vector.extract_strided_slice %286 {offsets = [0, 256], sizes = [8, 256], strides = [1, 1]} : vector<8x1024xf32> to vector<8x256xf32>
    %294 = arith.negf %293 : vector<8x256xf32>
    %295 = math.exp %294 : vector<8x256xf32>
    %cst_97 = arith.constant 1.000000e+00 : f32
    %296 = vector.broadcast %cst_97 : f32 to vector<8x256xf32>
    %297 = arith.addf %296, %295 : vector<8x256xf32>
    %298 = arith.divf %296, %297 : vector<8x256xf32>
    %299 = vector.extract_strided_slice %286 {offsets = [0, 512], sizes = [8, 256], strides = [1, 1]} : vector<8x1024xf32> to vector<8x256xf32>
    %300 = math.tanh %299 : vector<8x256xf32>
    %301 = vector.extract_strided_slice %286 {offsets = [0, 768], sizes = [8, 256], strides = [1, 1]} : vector<8x1024xf32> to vector<8x256xf32>
    %302 = arith.negf %301 : vector<8x256xf32>
    %303 = math.exp %302 : vector<8x256xf32>
    %cst_98 = arith.constant 1.000000e+00 : f32
    %304 = vector.broadcast %cst_98 : f32 to vector<8x256xf32>
    %305 = arith.addf %304, %303 : vector<8x256xf32>
    %306 = arith.divf %304, %305 : vector<8x256xf32>
    %307 = arith.mulf %298, %274 : vector<8x256xf32>
    %308 = arith.mulf %292, %300 : vector<8x256xf32>
    %309 = arith.addf %307, %308 : vector<8x256xf32>
    %310 = math.tanh %309 : vector<8x256xf32>
    %311 = arith.mulf %306, %310 : vector<8x256xf32>
    %312 = arith.index_cast %c6_i32 : i32 to index
    %c0_99 = arith.constant 0 : index
    %c0_100 = arith.constant 0 : index
    %313 = vector.load %arg22[%312, %c0_99, %c0_100] : memref<8x8x256xf32, #tpu.memory_space<vmem>>, vector<1x8x256xf32>
    %314 = vector.shape_cast %313 : vector<1x8x256xf32> to vector<8x256xf32>
    %315 = vector.shape_cast %311 : vector<8x256xf32> to vector<1x8x256xf32>
    tpu.vector_store %arg22[%312, %c0_99, %c0_100], %315 {strides = array<i32>} : memref<8x8x256xf32, #tpu.memory_space<vmem>>, vector<1x8x256xf32>,
    %c7_i32 = arith.constant 7 : i32
    %316 = arith.index_cast %c7_i32 : i32 to index
    %c0_101 = arith.constant 0 : index
    %c0_102 = arith.constant 0 : index
    %317 = vector.load %arg21[%316, %c0_101, %c0_102] : memref<8x8x1024xf32, #tpu.memory_space<vmem>>, vector<1x8x1024xf32>
    %318 = vector.shape_cast %317 : vector<1x8x1024xf32> to vector<8x1024xf32>
    %319 = arith.truncf %311 : vector<8x256xf32> to vector<8x256xbf16>
    %cst_103 = arith.constant dense<0.000000e+00> : vector<8x1024xf32>
    %320 = tpu.matmul %319, %68, %cst_103 {dimension_numbers = #tpu.dot_dimension_numbers<[1], [0], [0], [1], [0, 0, 1, 1], [], []>} : vector<8x256xbf16>, vector<256x1024xbf16>, vector<8x1024xf32> -> vector<8x1024xf32>
    %321 = arith.addf %318, %320 : vector<8x1024xf32>
    %322 = vector.extract_strided_slice %321 {offsets = [0, 0], sizes = [8, 256], strides = [1, 1]} : vector<8x1024xf32> to vector<8x256xf32>
    %323 = arith.negf %322 : vector<8x256xf32>
    %324 = math.exp %323 : vector<8x256xf32>
    %cst_104 = arith.constant 1.000000e+00 : f32
    %325 = vector.broadcast %cst_104 : f32 to vector<8x256xf32>
    %326 = arith.addf %325, %324 : vector<8x256xf32>
    %327 = arith.divf %325, %326 : vector<8x256xf32>
    %328 = vector.extract_strided_slice %321 {offsets = [0, 256], sizes = [8, 256], strides = [1, 1]} : vector<8x1024xf32> to vector<8x256xf32>
    %329 = arith.negf %328 : vector<8x256xf32>
    %330 = math.exp %329 : vector<8x256xf32>
    %cst_105 = arith.constant 1.000000e+00 : f32
    %331 = vector.broadcast %cst_105 : f32 to vector<8x256xf32>
    %332 = arith.addf %331, %330 : vector<8x256xf32>
    %333 = arith.divf %331, %332 : vector<8x256xf32>
    %334 = vector.extract_strided_slice %321 {offsets = [0, 512], sizes = [8, 256], strides = [1, 1]} : vector<8x1024xf32> to vector<8x256xf32>
    %335 = math.tanh %334 : vector<8x256xf32>
    %336 = vector.extract_strided_slice %321 {offsets = [0, 768], sizes = [8, 256], strides = [1, 1]} : vector<8x1024xf32> to vector<8x256xf32>
    %337 = arith.negf %336 : vector<8x256xf32>
    %338 = math.exp %337 : vector<8x256xf32>
    %cst_106 = arith.constant 1.000000e+00 : f32
    %339 = vector.broadcast %cst_106 : f32 to vector<8x256xf32>
    %340 = arith.addf %339, %338 : vector<8x256xf32>
    %341 = arith.divf %339, %340 : vector<8x256xf32>
    %342 = arith.mulf %333, %309 : vector<8x256xf32>
    %343 = arith.mulf %327, %335 : vector<8x256xf32>
    %344 = arith.addf %342, %343 : vector<8x256xf32>
    %345 = math.tanh %344 : vector<8x256xf32>
    %346 = arith.mulf %341, %345 : vector<8x256xf32>
    %347 = arith.index_cast %c7_i32 : i32 to index
    %c0_107 = arith.constant 0 : index
    %c0_108 = arith.constant 0 : index
    %348 = vector.load %arg22[%347, %c0_107, %c0_108] : memref<8x8x256xf32, #tpu.memory_space<vmem>>, vector<1x8x256xf32>
    %349 = vector.shape_cast %348 : vector<1x8x256xf32> to vector<8x256xf32>
    %350 = vector.shape_cast %346 : vector<8x256xf32> to vector<1x8x256xf32>
    tpu.vector_store %arg22[%347, %c0_107, %c0_108], %350 {strides = array<i32>} : memref<8x8x256xf32, #tpu.memory_space<vmem>>, vector<1x8x256xf32>,
    %c8_i32 = arith.constant 8 : i32
    %c0_109 = arith.constant 0 : index
    %c0_110 = arith.constant 0 : index
    %351 = vector.load %arg18[%c0_109, %c0_110] : memref<8x256xf32, #tpu.memory_space<vmem>>, vector<8x256xf32>
    tpu.vector_store %arg18[%c0_109, %c0_110], %346 {strides = array<i32>} : memref<8x256xf32, #tpu.memory_space<vmem>>, vector<8x256xf32>,
    %c0_111 = arith.constant 0 : index
    %c0_112 = arith.constant 0 : index
    %352 = vector.load %arg19[%c0_111, %c0_112] : memref<8x256xf32, #tpu.memory_space<vmem>>, vector<8x256xf32>
    tpu.vector_store %arg19[%c0_111, %c0_112], %344 {strides = array<i32>} : memref<8x256xf32, #tpu.memory_space<vmem>>, vector<8x256xf32>,
    %c0_113 = arith.constant 0 : index
    %c0_114 = arith.constant 0 : index
    %c0_115 = arith.constant 0 : index
    %353 = vector.load %arg22[%c0_113, %c0_114, %c0_115] : memref<8x8x256xf32, #tpu.memory_space<vmem>>, vector<8x1x256xf32>
    %354 = vector.shape_cast %353 : vector<8x1x256xf32> to vector<8x256xf32>
    %c0_116 = arith.constant 0 : index
    %c0_117 = arith.constant 0 : index
    %c0_118 = arith.constant 0 : index
    %355 = vector.load %arg15[%c0_116, %c0_117, %c0_118] : memref<8x8x256xf32, #tpu.memory_space<vmem>>, vector<1x8x256xf32>
    %356 = vector.shape_cast %355 : vector<1x8x256xf32> to vector<8x256xf32>
    %357 = vector.shape_cast %354 : vector<8x256xf32> to vector<1x8x256xf32>
    tpu.vector_store %arg15[%c0_116, %c0_117, %c0_118], %357 {strides = array<i32>} : memref<8x8x256xf32, #tpu.memory_space<vmem>>, vector<1x8x256xf32>,
    %c0_119 = arith.constant 0 : index
    %c1_120 = arith.constant 1 : index
    %c0_121 = arith.constant 0 : index
    %358 = vector.load %arg22[%c0_119, %c1_120, %c0_121] : memref<8x8x256xf32, #tpu.memory_space<vmem>>, vector<8x1x256xf32>
    %359 = vector.shape_cast %358 : vector<8x1x256xf32> to vector<8x256xf32>
    %c1_122 = arith.constant 1 : index
    %c0_123 = arith.constant 0 : index
    %c0_124 = arith.constant 0 : index
    %360 = vector.load %arg15[%c1_122, %c0_123, %c0_124] : memref<8x8x256xf32, #tpu.memory_space<vmem>>, vector<1x8x256xf32>
    %361 = vector.shape_cast %360 : vector<1x8x256xf32> to vector<8x256xf32>
    %362 = vector.shape_cast %359 : vector<8x256xf32> to vector<1x8x256xf32>
    tpu.vector_store %arg15[%c1_122, %c0_123, %c0_124], %362 {strides = array<i32>} : memref<8x8x256xf32, #tpu.memory_space<vmem>>, vector<1x8x256xf32>,
    %c0_125 = arith.constant 0 : index
    %c2_126 = arith.constant 2 : index
    %c0_127 = arith.constant 0 : index
    %363 = vector.load %arg22[%c0_125, %c2_126, %c0_127] : memref<8x8x256xf32, #tpu.memory_space<vmem>>, vector<8x1x256xf32>
    %364 = vector.shape_cast %363 : vector<8x1x256xf32> to vector<8x256xf32>
    %c2_128 = arith.constant 2 : index
    %c0_129 = arith.constant 0 : index
    %c0_130 = arith.constant 0 : index
    %365 = vector.load %arg15[%c2_128, %c0_129, %c0_130] : memref<8x8x256xf32, #tpu.memory_space<vmem>>, vector<1x8x256xf32>
    %366 = vector.shape_cast %365 : vector<1x8x256xf32> to vector<8x256xf32>
    %367 = vector.shape_cast %364 : vector<8x256xf32> to vector<1x8x256xf32>
    tpu.vector_store %arg15[%c2_128, %c0_129, %c0_130], %367 {strides = array<i32>} : memref<8x8x256xf32, #tpu.memory_space<vmem>>, vector<1x8x256xf32>,
    %c0_131 = arith.constant 0 : index
    %c3_132 = arith.constant 3 : index
    %c0_133 = arith.constant 0 : index
    %368 = vector.load %arg22[%c0_131, %c3_132, %c0_133] : memref<8x8x256xf32, #tpu.memory_space<vmem>>, vector<8x1x256xf32>
    %369 = vector.shape_cast %368 : vector<8x1x256xf32> to vector<8x256xf32>
    %c3_134 = arith.constant 3 : index
    %c0_135 = arith.constant 0 : index
    %c0_136 = arith.constant 0 : index
    %370 = vector.load %arg15[%c3_134, %c0_135, %c0_136] : memref<8x8x256xf32, #tpu.memory_space<vmem>>, vector<1x8x256xf32>
    %371 = vector.shape_cast %370 : vector<1x8x256xf32> to vector<8x256xf32>
    %372 = vector.shape_cast %369 : vector<8x256xf32> to vector<1x8x256xf32>
    tpu.vector_store %arg15[%c3_134, %c0_135, %c0_136], %372 {strides = array<i32>} : memref<8x8x256xf32, #tpu.memory_space<vmem>>, vector<1x8x256xf32>,
    %c0_137 = arith.constant 0 : index
    %c4_138 = arith.constant 4 : index
    %c0_139 = arith.constant 0 : index
    %373 = vector.load %arg22[%c0_137, %c4_138, %c0_139] : memref<8x8x256xf32, #tpu.memory_space<vmem>>, vector<8x1x256xf32>
    %374 = vector.shape_cast %373 : vector<8x1x256xf32> to vector<8x256xf32>
    %c4_140 = arith.constant 4 : index
    %c0_141 = arith.constant 0 : index
    %c0_142 = arith.constant 0 : index
    %375 = vector.load %arg15[%c4_140, %c0_141, %c0_142] : memref<8x8x256xf32, #tpu.memory_space<vmem>>, vector<1x8x256xf32>
    %376 = vector.shape_cast %375 : vector<1x8x256xf32> to vector<8x256xf32>
    %377 = vector.shape_cast %374 : vector<8x256xf32> to vector<1x8x256xf32>
    tpu.vector_store %arg15[%c4_140, %c0_141, %c0_142], %377 {strides = array<i32>} : memref<8x8x256xf32, #tpu.memory_space<vmem>>, vector<1x8x256xf32>,
    %c0_143 = arith.constant 0 : index
    %c5_144 = arith.constant 5 : index
    %c0_145 = arith.constant 0 : index
    %378 = vector.load %arg22[%c0_143, %c5_144, %c0_145] : memref<8x8x256xf32, #tpu.memory_space<vmem>>, vector<8x1x256xf32>
    %379 = vector.shape_cast %378 : vector<8x1x256xf32> to vector<8x256xf32>
    %c5_146 = arith.constant 5 : index
    %c0_147 = arith.constant 0 : index
    %c0_148 = arith.constant 0 : index
    %380 = vector.load %arg15[%c5_146, %c0_147, %c0_148] : memref<8x8x256xf32, #tpu.memory_space<vmem>>, vector<1x8x256xf32>
    %381 = vector.shape_cast %380 : vector<1x8x256xf32> to vector<8x256xf32>
    %382 = vector.shape_cast %379 : vector<8x256xf32> to vector<1x8x256xf32>
    tpu.vector_store %arg15[%c5_146, %c0_147, %c0_148], %382 {strides = array<i32>} : memref<8x8x256xf32, #tpu.memory_space<vmem>>, vector<1x8x256xf32>,
    %c0_149 = arith.constant 0 : index
    %c6_150 = arith.constant 6 : index
    %c0_151 = arith.constant 0 : index
    %383 = vector.load %arg22[%c0_149, %c6_150, %c0_151] : memref<8x8x256xf32, #tpu.memory_space<vmem>>, vector<8x1x256xf32>
    %384 = vector.shape_cast %383 : vector<8x1x256xf32> to vector<8x256xf32>
    %c6_152 = arith.constant 6 : index
    %c0_153 = arith.constant 0 : index
    %c0_154 = arith.constant 0 : index
    %385 = vector.load %arg15[%c6_152, %c0_153, %c0_154] : memref<8x8x256xf32, #tpu.memory_space<vmem>>, vector<1x8x256xf32>
    %386 = vector.shape_cast %385 : vector<1x8x256xf32> to vector<8x256xf32>
    %387 = vector.shape_cast %384 : vector<8x256xf32> to vector<1x8x256xf32>
    tpu.vector_store %arg15[%c6_152, %c0_153, %c0_154], %387 {strides = array<i32>} : memref<8x8x256xf32, #tpu.memory_space<vmem>>, vector<1x8x256xf32>,
    %c0_155 = arith.constant 0 : index
    %c7_156 = arith.constant 7 : index
    %c0_157 = arith.constant 0 : index
    %388 = vector.load %arg22[%c0_155, %c7_156, %c0_157] : memref<8x8x256xf32, #tpu.memory_space<vmem>>, vector<8x1x256xf32>
    %389 = vector.shape_cast %388 : vector<8x1x256xf32> to vector<8x256xf32>
    %c7_158 = arith.constant 7 : index
    %c0_159 = arith.constant 0 : index
    %c0_160 = arith.constant 0 : index
    %390 = vector.load %arg15[%c7_158, %c0_159, %c0_160] : memref<8x8x256xf32, #tpu.memory_space<vmem>>, vector<1x8x256xf32>
    %391 = vector.shape_cast %390 : vector<1x8x256xf32> to vector<8x256xf32>
    %392 = vector.shape_cast %389 : vector<8x256xf32> to vector<1x8x256xf32>
    tpu.vector_store %arg15[%c7_158, %c0_159, %c0_160], %392 {strides = array<i32>} : memref<8x8x256xf32, #tpu.memory_space<vmem>>, vector<1x8x256xf32>,
    %c0_161 = arith.constant 0 : index
    %c0_162 = arith.constant 0 : index
    %c0_163 = arith.constant 0 : index
    %393 = vector.load %arg15[%c0_161, %c0_162, %c0_163] : memref<8x8x256xf32, #tpu.memory_space<vmem>>, vector<8x8x256xf32>
    %394 = vector.shape_cast %393 : vector<8x8x256xf32> to vector<64x256xf32>
    %395 = arith.truncf %394 : vector<64x256xf32> to vector<64x256xbf16>
    %c0_164 = arith.constant 0 : index
    %c0_165 = arith.constant 0 : index
    %396 = vector.load %arg11[%c0_164, %c0_165] : memref<256x64xbf16, #tpu.memory_space<vmem>>, vector<256x64xbf16>
    %cst_166 = arith.constant dense<0.000000e+00> : vector<64x64xf32>
    %397 = tpu.matmul %395, %396, %cst_166 {dimension_numbers = #tpu.dot_dimension_numbers<[1], [0], [0], [1], [0, 0, 1, 1], [], []>} : vector<64x256xbf16>, vector<256x64xbf16>, vector<64x64xf32> -> vector<64x64xf32>
    %c0_167 = arith.constant 0 : index
    %c0_168 = arith.constant 0 : index
    %398 = vector.load %arg12[%c0_167, %c0_168] : memref<1x64xf32, #tpu.memory_space<vmem>>, vector<1x64xf32>
    %399 = vector.broadcast %398 : vector<1x64xf32> to vector<64x64xf32>
    %400 = arith.addf %397, %399 : vector<64x64xf32>
    %cst_169 = arith.constant 0.000000e+00 : f32
    %401 = vector.broadcast %cst_169 : f32 to vector<64x64xf32>
    %402 = arith.maximumf %400, %401 : vector<64x64xf32>
    %403 = arith.truncf %402 : vector<64x64xf32> to vector<64x64xbf16>
    %c0_170 = arith.constant 0 : index
    %c0_171 = arith.constant 0 : index
    %404 = vector.load %arg13[%c0_170, %c0_171] : memref<64x128xbf16, #tpu.memory_space<vmem>>, vector<64x128xbf16>
    %cst_172 = arith.constant dense<0.000000e+00> : vector<64x128xf32>
    %405 = tpu.matmul %403, %404, %cst_172 {dimension_numbers = #tpu.dot_dimension_numbers<[1], [0], [0], [1], [0, 0, 1, 1], [], []>} : vector<64x64xbf16>, vector<64x128xbf16>, vector<64x128xf32> -> vector<64x128xf32>
    %c0_173 = arith.constant 0 : index
    %c0_174 = arith.constant 0 : index
    %406 = vector.load %arg14[%c0_173, %c0_174] : memref<1x128xf32, #tpu.memory_space<vmem>>, vector<1x128xf32>
    %407 = vector.broadcast %406 : vector<1x128xf32> to vector<64x128xf32>
    %408 = arith.addf %405, %407 : vector<64x128xf32>
    %409 = tpu.iota {dimensions = array<i32: 1>} : vector<64x128xi32>
    %c2_i32_175 = arith.constant 2 : i32
    %410 = vector.broadcast %c2_i32_175 : i32 to vector<64x128xi32>
    %411 = arith.cmpi slt, %409, %410 : vector<64x128xi32>
    %cst_176 = arith.constant -1.000000e+30 : f32
    %412 = vector.broadcast %cst_176 : f32 to vector<64x128xf32>
    %413 = arith.select %411, %408, %412 : vector<64x128xi1>, vector<64x128xf32>
    %cst_177 = arith.constant dense<0xFF800000> : vector<64xf32>
    %414 = vector.multi_reduction <maximumf>, %413, %cst_177 [1] : vector<64x128xf32> to vector<64xf32>
    %415 = vector.shape_cast %414 : vector<64xf32> to vector<64x1xf32>
    %416 = vector.broadcast %415 : vector<64x1xf32> to vector<64x128xf32>
    %417 = arith.subf %413, %416 : vector<64x128xf32>
    %418 = math.exp %417 : vector<64x128xf32>
    %cst_178 = arith.constant 0.000000e+00 : f32
    %419 = vector.broadcast %cst_178 : f32 to vector<64x128xf32>
    %420 = arith.select %411, %418, %419 : vector<64x128xi1>, vector<64x128xf32>
    %cst_179 = arith.constant dense<0.000000e+00> : vector<64xf32>
    %421 = vector.multi_reduction <add>, %420, %cst_179 [1] : vector<64x128xf32> to vector<64xf32>
    %422 = vector.shape_cast %421 : vector<64xf32> to vector<64x1xf32>
    %423 = math.log %422 : vector<64x1xf32>
    %424 = arith.addf %415, %423 : vector<64x1xf32>
    %425 = vector.broadcast %424 : vector<64x1xf32> to vector<64x128xf32>
    %426 = arith.subf %408, %425 : vector<64x128xf32>
    %427 = vector.shape_cast %426 : vector<64x128xf32> to vector<8x8x128xf32>
    %c0_180 = arith.constant 0 : index
    %c0_181 = arith.constant 0 : index
    %c0_182 = arith.constant 0 : index
    %428 = vector.load %arg16[%c0_180, %c0_181, %c0_182] : memref<8x8x128xf32, #tpu.memory_space<vmem>>, vector<8x8x128xf32>
    tpu.vector_store %arg16[%c0_180, %c0_181, %c0_182], %427 {strides = array<i32>} : memref<8x8x128xf32, #tpu.memory_space<vmem>>, vector<8x8x128xf32>,
    return
  }
  func.func @transform_0(%arg0: i32, %arg1: i32) -> (i32, i32, i32) {
    %c0_i32 = arith.constant 0 : i32
    %c0_i32_0 = arith.constant 0 : i32
    return %arg0, %arg1, %c0_i32 : i32, i32, i32
  }
  func.func @transform_1(%arg0: i32, %arg1: i32) -> (i32, i32) {
    %c0_i32 = arith.constant 0 : i32
    %c0_i32_0 = arith.constant 0 : i32
    return %arg0, %c0_i32 : i32, i32
  }
  func.func @transform_2(%arg0: i32, %arg1: i32) -> (i32, i32) {
    %c0_i32 = arith.constant 0 : i32
    %c0_i32_0 = arith.constant 0 : i32
    %c0_i32_1 = arith.constant 0 : i32
    return %c0_i32, %c0_i32_0 : i32, i32
  }
  func.func @transform_3(%arg0: i32, %arg1: i32) -> (i32, i32) {
    %c0_i32 = arith.constant 0 : i32
    %c0_i32_0 = arith.constant 0 : i32
    %c0_i32_1 = arith.constant 0 : i32
    return %c0_i32, %c0_i32_0 : i32, i32
  }
  func.func @transform_4(%arg0: i32, %arg1: i32) -> (i32, i32) {
    %c0_i32 = arith.constant 0 : i32
    %c0_i32_0 = arith.constant 0 : i32
    %c0_i32_1 = arith.constant 0 : i32
    return %c0_i32, %c0_i32_0 : i32, i32
  }
  func.func @transform_5(%arg0: i32, %arg1: i32) -> (i32, i32) {
    %c0_i32 = arith.constant 0 : i32
    %c0_i32_0 = arith.constant 0 : i32
    %c0_i32_1 = arith.constant 0 : i32
    return %c0_i32, %c0_i32_0 : i32, i32
  }
  func.func @transform_6(%arg0: i32, %arg1: i32) -> (i32, i32) {
    %c0_i32 = arith.constant 0 : i32
    %c0_i32_0 = arith.constant 0 : i32
    %c0_i32_1 = arith.constant 0 : i32
    return %c0_i32, %c0_i32_0 : i32, i32
  }
  func.func @transform_7(%arg0: i32, %arg1: i32) -> (i32, i32) {
    %c0_i32 = arith.constant 0 : i32
    %c0_i32_0 = arith.constant 0 : i32
    %c0_i32_1 = arith.constant 0 : i32
    return %c0_i32, %c0_i32_0 : i32, i32
  }
  func.func @transform_8(%arg0: i32, %arg1: i32) -> (i32, i32) {
    %c0_i32 = arith.constant 0 : i32
    %c0_i32_0 = arith.constant 0 : i32
    %c0_i32_1 = arith.constant 0 : i32
    return %c0_i32, %c0_i32_0 : i32, i32
  }
  func.func @transform_9(%arg0: i32, %arg1: i32) -> (i32, i32) {
    %c0_i32 = arith.constant 0 : i32
    %c0_i32_0 = arith.constant 0 : i32
    %c0_i32_1 = arith.constant 0 : i32
    return %c0_i32, %c0_i32_0 : i32, i32
  }
  func.func @transform_10(%arg0: i32, %arg1: i32) -> (i32, i32) {
    %c0_i32 = arith.constant 0 : i32
    %c0_i32_0 = arith.constant 0 : i32
    %c0_i32_1 = arith.constant 0 : i32
    return %c0_i32, %c0_i32_0 : i32, i32
  }
  func.func @transform_11(%arg0: i32, %arg1: i32) -> (i32, i32) {
    %c0_i32 = arith.constant 0 : i32
    %c0_i32_0 = arith.constant 0 : i32
    %c0_i32_1 = arith.constant 0 : i32
    return %c0_i32, %c0_i32_0 : i32, i32
  }
  func.func @transform_12(%arg0: i32, %arg1: i32) -> (i32, i32) {
    %c0_i32 = arith.constant 0 : i32
    %c0_i32_0 = arith.constant 0 : i32
    %c0_i32_1 = arith.constant 0 : i32
    return %c0_i32, %c0_i32_0 : i32, i32
  }
  func.func @transform_13(%arg0: i32, %arg1: i32) -> (i32, i32, i32) {
    %c0_i32 = arith.constant 0 : i32
    %c0_i32_0 = arith.constant 0 : i32
    return %arg0, %arg1, %c0_i32 : i32, i32, i32
  }
  func.func @transform_14(%arg0: i32, %arg1: i32) -> (i32, i32, i32) {
    %c0_i32 = arith.constant 0 : i32
    %c0_i32_0 = arith.constant 0 : i32
    return %arg0, %arg1, %c0_i32 : i32, i32, i32
  }
}

</mosaic_0001>

<bundles_post_ra>
// kernel: localizer_forward.1
= control target key start
LH: loop header
LB: loop body
LE: loop exit
PB: predicated region body
PF: predicated region fallthrough
CT: control target
= control target key end

     0   :  { %vm219_vm0 = vcmask 1045504   ;;  %v9826_v34 = vmov 0.0   ;;  %vm9827_vm1 = vmmov 0   ;;  %vm215_vm2 = vcmask 359424   ;;  %s14271_s4 = inlined_call_operand.vmem [shape: bf16[300,64], index: 4, kind: input, shape index: {}]   ;;  %s14272_s2 = inlined_call_operand.vmem [shape: bf16[3200,64], index: 2, kind: input, shape index: {}]   ;;  %s14273_s1 = inlined_call_operand.vmem [shape: f32[8,300], index: 1, kind: input, shape index: {}]   ;;  %s14274_s0 = inlined_call_operand.vmem [shape: f32[8,8,3200], index: 0, kind: input, shape index: {}]   ;;  %s14275_s5 = inlined_call_operand.vmem [shape: f32[1,64], index: 5, kind: input, shape index: {}]   ;;  %s14276_s3 = inlined_call_operand.vmem [shape: f32[1,64], index: 3, kind: input, shape index: {}]   ;;  %s14277_s6 = inlined_call_operand.vmem [shape: bf16[64,1024], index: 6, kind: input, shape index: {}]   ;;  %s14278_s7 = inlined_call_operand.vmem [shape: bf16[256,1024], index: 7, kind: input, shape index: {}]   ;;  %s14279_s8 = inlined_call_operand.vmem [shape: f32[1,1024], index: 8, kind: input, shape index: {}]   ;;  %s14280_s9 = inlined_call_operand.vmem [shape: bf16[256,64], index: 9, kind: input, shape index: {}]   ;;  %s14281_s13 = inlined_call_operand.vmem [shape: f32[8,8,256], index: 13, kind: output, shape index: {0}]   ;;  %s14282_s11 = inlined_call_operand.vmem [shape: bf16[64,128], index: 11, kind: input, shape index: {}]   ;;  %s14283_s10 = inlined_call_operand.vmem [shape: f32[1,64], index: 10, kind: input, shape index: {}]   ;;  %s14284_s12 = inlined_call_operand.vmem [shape: f32[1,128], index: 12, kind: input, shape index: {}]   ;;  %s14285_s14 = inlined_call_operand.vmem [shape: f32[8,8,128], index: 14, kind: output, shape index: {1}]  }
   0x1   :  { %v9299_v0 = vld [vmem:[%s14271_s4 + $0x78] sm:$0xff]   ;;  %v9301_v2 = vld [vmem:[%s14271_s4 + $0x70] sm:$0xff]   ;;  %v9303_v4 = vld [vmem:[%s14271_s4 + $0x68] sm:$0xff]   ;;  %vm304_vm3 = vcmask 523264   ;;  %vm3227_vm4 = vcmask 516096  }
   0x2   :  { %v9300_v1 = vld [vmem:[%s14271_s4 + $0x38] sm:$0xff]   ;;  %8678 = vmatprep.subr.bf16.mxu0 %v9299_v0  ;;  %v9302_v3 = vld [vmem:[%s14271_s4 + $0x30] sm:$0xff]   ;;  %v9304_v5 = vld [vmem:[%s14271_s4 + $0x28] sm:$0xff]  }
   0x3   :  { %8679 = vmatpush3.bf16.msra.mxu0 %v9300_v1  ;;  %v9305_v6 = vld [vmem:[%s14271_s4 + $0x60] sm:$0xff]   ;;  %v9307_v7 = vld [vmem:[%s14272_s2 + $0x78] sm:$0xff]   ;;  %v9311_v11 = vld [vmem:[%s14272_s2 + $0x70] sm:$0xff]  }
   0x4   :  { %8680 = vmatprep.subr.bf16.mxu0 %v9301_v2  ;;  %v9308_v8 = vld [vmem:[%s14272_s2 + $0x38] sm:$0xff]   ;;  %v9306_v9 = vld [vmem:[%s14271_s4 + $0x20] sm:$0xff]   ;;  %8704 = vmatprep.subr.bf16.mxu1 %v9307_v7  ;;  %v9312_v12 = vld [vmem:[%s14272_s2 + $0x30] sm:$0xff]  }
   0x5   :  { %8705 = vmatpush3.bf16.msra.mxu1 %v9308_v8  ;;  %v9309_v10 = vld [vmem:[%s14271_s4 + $0x58] sm:$0xff]   ;;  %v9313_v14 = vld [vmem:[%s14271_s4 + $0x50] sm:$0xff]   ;;  %v9315_v15 = vld [vmem:[%s14272_s2 + $0x68] sm:$0xff]  }
   0x6   :  { %v9310_v13 = vld [vmem:[%s14271_s4 + $0x18] sm:$0xff]   ;;  %8706 = vmatprep.subr.bf16.mxu1 %v9311_v11  ;;  %v9316_v16 = vld [vmem:[%s14272_s2 + $0x28] sm:$0xff]   ;;  %v9314_v17 = vld [vmem:[%s14271_s4 + $0x10] sm:$0xff]  }
   0x7   :  { %8681 = vmatpush3.bf16.msra.mxu0 %v9302_v3  ;;  %v9317_v18 = vld [vmem:[%s14271_s4 + $0x48] sm:$0xff]   ;;  %v9319_v19 = vld [vmem:[%s14272_s2 + $0x60] sm:$0xff]   ;;  %v9323_v23 = vld [vmem:[%s14272_s2 + $0x58] sm:$0xff]  }
   0x8   :  { %8682 = vmatprep.subr.bf16.mxu0 %v9303_v4  ;;  %v9320_v20 = vld [vmem:[%s14272_s2 + $0x20] sm:$0xff]   ;;  %v9318_v21 = vld [vmem:[%s14271_s4 + $0x8] sm:$0xff]   ;;  %v9324_v27 = vld [vmem:[%s14272_s2 + $0x18] sm:$0xff]  }
   0x9   :  { %8707 = vmatpush3.bf16.msra.mxu1 %v9312_v12  ;;  %v9321_v22 = vld [vmem:[%s14271_s4 + $0x40] sm:$0xff]   ;;  %v52_v25 = vld [vmem:[%s14273_s1 + $0x8] sm:$0xff]  ;;  %v9325_v29 = vld [vmem:[%s14271_s4 + $0x90] sm:$0x3f]  }
   0xa   :  { %8708 = vmatprep.subr.bf16.mxu1 %v9315_v15  ;;  %v9322_v24 = vld [vmem:[%s14271_s4] sm:$0xff]   ;;  %v55_v26 = vpack.c.bf16 %v52_v25, %v52_v25  ;;  %v9326_v30 = vld [vmem:[%s14272_s2 + $0x50] sm:$0xff]   ;;  %v9329_v33 = vld [vmem:[%s14272_s2 + $0x48] sm:$0xff]   ;;  %v221_v35 = vsel %vm219_vm0, %v9325_v29, 0 }
   0xb   :  { %8683 = vmatpush3.bf16.msra.mxu0 %v9304_v5  ;;  %v51_v28 = vld [vmem:[%s14273_s1] sm:$0xff]  ;;  %v9327_v31 = vld [vmem:[%s14272_s2 + $0x10] sm:$0xff]   ;;  %v9330_v36 = vld [vmem:[%s14272_s2 + $0x8] sm:$0xff]  }
   0xc   :  { %8684 = vmatprep.subr.bf16.mxu0 %v9305_v6  ;;  %255 = vmatprep.mubr.bf16.mxu0 %v55_v26  ;;  %v54_v32 = vpack.c.bf16 %v51_v28, %v51_v28  ;;  %v9332_v37 = vld [vmem:[%s14272_s2 + $0x40] sm:$0xff]   ;;  %v9328_v38 = vld [vmem:[%s14271_s4 + $0x88] sm:$0xff]   ;;  %v53_v40 = vld [vmem:[%s14273_s1 + $0x10] sm:$0xff] }
   0xd   :  { %8709 = vmatpush3.bf16.msra.mxu1 %v9316_v16  ;;  %v9333_v39 = vld [vmem:[%s14272_s2] sm:$0xff]   ;;  %v311_v42 = vld [vmem:[%s14274_s0 + $0x8] sm:$0xff]  ;;  %v336_v43 = vld [vmem:[%s14274_s0 + $0xd0] sm:$0xff]  ;;  %v56_v51 = vpack.c.bf16 %v53_v40, %v53_v40 }
   0xe   :  { %8710 = vmatprep.subr.bf16.mxu1 %v9319_v19  ;;  %v9331_v41 = vld [vmem:[%s14271_s4 + $0x80] sm:$0xff]   ;;  %v9334_v44 = vld [vmem:[%s14272_s2 + $0xf8] sm:$0xff]   ;;  %v511_v45 = vpack.c.bf16 %v336_v43, %v311_v42  ;;  %v335_v47 = vld [vmem:[%s14274_s0 + $0xc8] sm:$0xff] }
   0xf   :  { %8685 = vmatpush3.bf16.msra.mxu0 %v9306_v9  ;;  %v310_v46 = vld [vmem:[%s14274_s0] sm:$0xff]  ;;  %v9336_v49 = vld [vmem:[%s14272_s2 + $0x178] sm:$0xff]   ;;  %v9338_v53 = vld [vmem:[%s14272_s2 + $0xf0] sm:$0xff]  }
  0x10   :  { %8686 = vmatprep.subr.bf16.mxu0 %v9309_v10  ;;  %2249 = vmatprep.mubr.bf16.mxu1 %v511_v45  ;;  %v510_v48 = vpack.c.bf16 %v335_v47, %v310_v46  ;;  %v9337_v50 = vld [vmem:[%s14272_s2 + $0x138] sm:$0xff]   ;;  %v9340_v54 = vld [vmem:[%s14272_s2 + $0x170] sm:$0xff]   ;;  %v386_v58 = vld [vmem:[%s14274_s0 + $0x260] sm:$0xff] }
  0x11   :  { %8711 = vmatpush3.bf16.msra.mxu1 %v9320_v20  ;;  %v9335_v52 = vld [vmem:[%s14272_s2 + $0xb8] sm:$0xff]   ;;  %v9341_v55 = vld [vmem:[%s14272_s2 + $0x130] sm:$0xff]   ;;  %v9342_v59 = vld [vmem:[%s14272_s2 + $0xe8] sm:$0xff]  }
  0x12   :  { %8712 = vmatprep.subr.bf16.mxu1 %v9323_v23  ;;  %v9339_v56 = vld [vmem:[%s14272_s2 + $0xb0] sm:$0xff]   ;;  %v361_v57 = vld [vmem:[%s14274_s0 + $0x198] sm:$0xff]  ;;  %v9344_v0 = vld [vmem:[%s14272_s2 + $0x168] sm:$0xff]  }
  0x13   :  { %8687 = vmatpush3.bf16.msra.mxu0 %v9310_v13  ;;  %v536_v60 = vpack.c.bf16 %v386_v58, %v361_v57  ;;  %v360_v61 = vld [vmem:[%s14274_s0 + $0x190] sm:$0xff]  ;;  %v385_v62 = vld [vmem:[%s14274_s0 + $0x258] sm:$0xff]  ;;  %v9345_v1 = vld [vmem:[%s14272_s2 + $0x128] sm:$0xff]  }
  0x14   :  { %8688 = vmatprep.subr.bf16.mxu0 %v9313_v14  ;;  %v535_v63 = vpack.c.bf16 %v385_v62, %v360_v61  ;;  %v9343_v2 = vld [vmem:[%s14272_s2 + $0xa8] sm:$0xff]   ;;  %v9346_v3 = vld [vmem:[%s14272_s2 + $0xe0] sm:$0xff]   ;;  %v9350_v7 = vld [vmem:[%s14272_s2 + $0xd8] sm:$0xff]  }
  0x15   :  { %8713 = vmatpush3.bf16.msra.mxu1 %v9324_v27  ;;  %v9347_v4 = vld [vmem:[%s14272_s2 + $0xa0] sm:$0xff]   ;;  %v411_v8 = vld [vmem:[%s14274_s0 + $0x328] sm:$0xff]  ;;  %v436_v9 = vld [vmem:[%s14274_s0 + $0x3f0] sm:$0xff] }
  0x16   :  { %8714 = vmatprep.subr.bf16.mxu1 %v9326_v30  ;;  %v9348_v5 = vld [vmem:[%s14272_s2 + $0x160] sm:$0xff]   ;;  %v561_v10 = vpack.c.bf16 %v436_v9, %v411_v8  ;;  %v9351_v11 = vld [vmem:[%s14272_s2 + $0x98] sm:$0xff]   ;;  %v435_v13 = vld [vmem:[%s14274_s0 + $0x3e8] sm:$0xff] }
  0x17   :  { %8689 = vmatpush3.bf16.msra.mxu0 %v9314_v17  ;;  %v9349_v6 = vld [vmem:[%s14272_s2 + $0x120] sm:$0xff]   ;;  %v9352_v15 = vld [vmem:[%s14272_s2 + $0x158] sm:$0xff]   ;;  %v9354_v17 = vld [vmem:[%s14272_s2 + $0xd0] sm:$0xff]  }
  0x18   :  { %8690 = vmatprep.subr.bf16.mxu0 %v9317_v18  ;;  %v410_v12 = vld [vmem:[%s14274_s0 + $0x320] sm:$0xff]  ;;  %v9353_v16 = vld [vmem:[%s14272_s2 + $0x118] sm:$0xff]   ;;  %v9355_v18 = vld [vmem:[%s14272_s2 + $0x90] sm:$0xff]  }
  0x19   :  { %8715 = vmatpush3.bf16.msra.mxu1 %v9327_v31  ;;  %v560_v14 = vpack.c.bf16 %v435_v13, %v410_v12  ;;  %v9356_v19 = vld [vmem:[%s14272_s2 + $0x150] sm:$0xff]   ;;  %v486_v23 = vld [vmem:[%s14274_s0 + $0x580] sm:$0xff]  ;;  %v9359_v25 = vld [vmem:[%s14272_s2 + $0x88] sm:$0xff]  }
  0x1a   :  { %8716 = vmatprep.subr.bf16.mxu1 %v9329_v33  ;;  %v9357_v20 = vld [vmem:[%s14272_s2 + $0x110] sm:$0xff]   ;;  %v485_v27 = vld [vmem:[%s14274_s0 + $0x578] sm:$0xff]  ;;  %v9360_v29 = vld [vmem:[%s14272_s2 + $0x148] sm:$0xff]  }
  0x1b   :  { %8691 = vmatpush3.bf16.msra.mxu0 %v9318_v21  ;;  %v9358_v21 = vld [vmem:[%s14272_s2 + $0xc8] sm:$0xff]   ;;  %v460_v26 = vld [vmem:[%s14274_s0 + $0x4b0] sm:$0xff]  ;;  %v9362_v31 = vld [vmem:[%s14272_s2 + $0xc0] sm:$0xff]  }
  0x1c   :  { %8692 = vmatprep.subr.bf16.mxu0 %v9321_v22  ;;  %v461_v22 = vld [vmem:[%s14274_s0 + $0x4b8] sm:$0xff]  ;;  %v585_v28 = vpack.c.bf16 %v485_v27, %v460_v26  ;;  %v9361_v30 = vld [vmem:[%s14272_s2 + $0x108] sm:$0xff]   ;;  %v9364_v33 = vld [vmem:[%s14272_s2 + $0x140] sm:$0xff]  }
  0x1d   :  { %8717 = vmatpush3.bf16.msra.mxu1 %v9330_v36  ;;  %v315_v42 = vld [vmem:[%s14274_s0 + $0x28] sm:$0xff]  ;;  %v340_v43 = vld [vmem:[%s14274_s0 + $0xf0] sm:$0xff]  ;;  %v9367_v45 = vld [vmem:[%s14272_s2 + $0x1b8] sm:$0xff]  }
  0x1e   :  { %8718 = vmatprep.subr.bf16.mxu1 %v9332_v37  ;;  %v9365_v37 = vld [vmem:[%s14272_s2 + $0x100] sm:$0xff]   ;;  %v339_v47 = vld [vmem:[%s14274_s0 + $0xe8] sm:$0xff]  ;;  %v9373_v57 = vld [vmem:[%s14272_s2 + $0x230] sm:$0xff]  }
  0x1f   :  { %8693 = vmatpush3.bf16.msra.mxu0 %v9322_v24  ;;  %v586_v24 = vpack.c.bf16 %v486_v23, %v461_v22  ;;  %v314_v46 = vld [vmem:[%s14274_s0 + $0x20] sm:$0xff]  ;;  %v9374_v61 = vld [vmem:[%s14272_s2 + $0x1e8] sm:$0xff]   ;;  %v365_v62 = vld [vmem:[%s14274_s0 + $0x1b8] sm:$0xff] }
  0x20   :  { %9244 = vmatprep.subr.bf16.mxu0 %v9826_v34  ;;  %v362_v58 = vld [vmem:[%s14274_s0 + $0x1a0] sm:$0xff]  ;;  %v439_v23 = vld [vmem:[%s14274_s0 + $0x408] sm:$0xff]  ;;  %v9385_v26 = vld [vmem:[%s14272_s2 + $0x218] sm:$0xff]  }
  0x21   :  { %8719 = vmatpush3.bf16.msra.mxu1 %v9333_v39  ;;  %v337_v39 = vld [vmem:[%s14274_s0 + $0xd8] sm:$0xff]  ;;  %v9379_v8 = vld [vmem:[%s14272_s2 + $0x1a0] sm:$0xff]   ;;  %v9386_v27 = vld [vmem:[%s14272_s2 + $0x1d0] sm:$0xff]  }
  0x22   :  { %256 = vmatmul.mubr.bf16.vlgmr.msra.gmra.mxu0 %v54_v32  ;;  %8784 = vmatprep.subr.bf16.mxu1 %v9336_v49  ;;  %v9363_v32 = vld [vmem:[%s14272_s2 + $0x80] sm:$0xff]   ;;  %v9368_v49 = vld [vmem:[%s14272_s2 + $0x278] sm:$0xff]  }
  0x23   :  { %9245 = vmatpush3.bf16.msra.mxu0 %v221_v35  ;;  %9250 = vmatprep.mubr.msk.bf16.mxu0 %vm9827_vm1, %v9826_v34  ;;  %v338_v35 = vld [vmem:[%s14274_s0 + $0xe0] sm:$0xff] }
  0x24   :  { %9246 = vmatprep.subr.bf16.mxu0 %v9826_v34  ;;  %2250 = vmatmul.mubr.bf16.vlgmr.msra.gmra.mxu1 %v510_v48  ;;  %v514_v48 = vpack.c.bf16 %v339_v47, %v314_v46  ;;  %v9380_v9 = vld [vmem:[%s14272_s2 + $0x260] sm:$0xff]   ;;  %v9393_v46 = vld [vmem:[%s14272_s2 + $0x208] sm:$0xff]  }
  0x25   :  { %8785 = vmatpush3.bf16.msra.mxu1 %v9337_v50  ;;  %2257 = vmatprep.mubr.bf16.mxu1 %v536_v60  ;;  %v9369_v50 = vld [vmem:[%s14272_s2 + $0x238] sm:$0xff]   ;;  %v9381_v13 = vld [vmem:[%s14272_s2 + $0x220] sm:$0xff]  }
  0x26   :  { %8786 = vmatprep.subr.bf16.mxu1 %v9340_v54  ;;  %v363_v54 = vld [vmem:[%s14274_s0 + $0x1a8] sm:$0xff]  ;;  %v414_v22 = vld [vmem:[%s14274_s0 + $0x340] sm:$0xff] }
  0x27   :  { %9247 = vmatpush3.bf16.msra.mxu0 %v9328_v38  ;;  %v312_v38 = vld [vmem:[%s14274_s0 + $0x10] sm:$0xff]  ;;  %v9394_v47 = vld [vmem:[%s14272_s2 + $0x1c0] sm:$0xff]  }
  0x28   :  { %9248 = vmatprep.subr.bf16.mxu0 %v9826_v34  ;;  %v313_v34 = vld [vmem:[%s14274_s0 + $0x18] sm:$0xff]  ;;  %v512_v40 = vpack.c.bf16 %v337_v39, %v312_v38  ;;  %v490_v39 = vld [vmem:[%s14274_s0 + $0x5a0] sm:$0xff] }
  0x29   :  { %8787 = vmatpush3.bf16.msra.mxu1 %v9341_v55  ;;  %v513_v36 = vpack.c.bf16 %v338_v35, %v313_v34  ;;  %v388_v55 = vld [vmem:[%s14274_s0 + $0x270] sm:$0xff]  ;;  %v462_v34 = vld [vmem:[%s14274_s0 + $0x4c0] sm:$0xff]  ;;  %v487_v35 = vld [vmem:[%s14274_s0 + $0x588] sm:$0xff] }
  0x2a   :  { %8788 = vmatprep.subr.bf16.mxu1 %v9344_v0  ;;  %v465_v38 = vld [vmem:[%s14274_s0 + $0x4d8] sm:$0xff] }
  0x2b   :  { %9249 = vmatpush3.bf16.msra.mxu0 %v9331_v41  ;;  %v9366_v41 = vld [vmem:[%s14272_s2 + $0x1f8] sm:$0xff]  }
  0x2c   :  { %8744 = vmatprep.subr.bf16.mxu0 %v9334_v44  ;;  %2258 = vmatmul.mubr.bf16.gmra.mxu1 %v535_v63  ;;  %v515_v44 = vpack.c.bf16 %v340_v43, %v315_v42  ;;  %v390_v63 = vld [vmem:[%s14274_s0 + $0x280] sm:$0xff]  ;;  %v464_v42 = vld [vmem:[%s14274_s0 + $0x4d0] sm:$0xff]  ;;  %v489_v43 = vld [vmem:[%s14274_s0 + $0x598] sm:$0xff] }
  0x2d   :  { %8789 = vmatpush3.bf16.msra.mxu1 %v9345_v1  ;;  %2265 = vmatprep.mubr.bf16.mxu1 %v561_v10  ;;  %v540_v0 = vpack.c.bf16 %v390_v63, %v365_v62  ;;  %v9375_v1 = vld [vmem:[%s14272_s2 + $0x1a8] sm:$0xff]   ;;  %v413_v10 = vld [vmem:[%s14274_s0 + $0x338] sm:$0xff]  ;;  %v318_v62 = vld [vmem:[%s14274_s0 + $0x40] sm:$0xff] }
  0x2e   :  { %9251 = vmatmul.mubr.msk.bf16.vlgmr.msra.gmra.mxu0 %vm215_vm2, %v56_v51  ;;  %8790 = vmatprep.subr.bf16.mxu1 %v9348_v5  ;;  %v9370_v51 = vld [vmem:[%s14272_s2 + $0x1f0] sm:$0xff]   ;;  %v9376_v5 = vld [vmem:[%s14272_s2 + $0x268] sm:$0xff]  }
  0x2f   :  { %8745 = vmatpush3.bf16.msra.mxu0 %v9335_v52  ;;  %2314 = vmatprep.mubr.bf16.mxu0 %v513_v36  ;;  %v9371_v52 = vld [vmem:[%s14272_s2 + $0x1b0] sm:$0xff]   ;;  %v587_v36 = vpack.c.bf16 %v487_v35, %v462_v34  ;;  %v343_v63 = vld [vmem:[%s14274_s0 + $0x108] sm:$0xff] }
  0x30   :  { %8746 = vmatprep.subr.bf16.mxu0 %v9338_v53  ;;  %v9372_v53 = vld [vmem:[%s14272_s2 + $0x270] sm:$0xff]   ;;  %v419_v34 = vld [vmem:[%s14274_s0 + $0x368] sm:$0xff] }
  0x31   :  { %8791 = vmatpush3.bf16.msra.mxu1 %v9349_v6  ;;  %v9377_v6 = vld [vmem:[%s14272_s2 + $0x228] sm:$0xff]   ;;  %v444_v35 = vld [vmem:[%s14274_s0 + $0x430] sm:$0xff] }
  0x32   :  { %8792 = vmatprep.subr.bf16.mxu1 %v9352_v15  ;;  %v437_v15 = vld [vmem:[%s14274_s0 + $0x3f8] sm:$0xff] }
  0x33   :  { %8747 = vmatpush3.bf16.msra.mxu0 %v9339_v56  ;;  %v538_v56 = vpack.c.bf16 %v388_v55, %v363_v54  ;;  %v316_v54 = vld [vmem:[%s14274_s0 + $0x30] sm:$0xff]  ;;  %v341_v55 = vld [vmem:[%s14274_s0 + $0xf8] sm:$0xff] }
  0x34   :  { %8748 = vmatprep.subr.bf16.mxu0 %v9342_v59  ;;  %2266 = vmatmul.mubr.bf16.gmra.mxu1 %v560_v14  ;;  %v387_v59 = vld [vmem:[%s14274_s0 + $0x268] sm:$0xff]  ;;  %v412_v14 = vld [vmem:[%s14274_s0 + $0x330] sm:$0xff] }
  0x35   :  { %8793 = vmatpush3.bf16.msra.mxu1 %v9353_v16  ;;  %2273 = vmatprep.mubr.bf16.mxu1 %v586_v24  ;;  %v537_v60 = vpack.c.bf16 %v387_v59, %v362_v58  ;;  %v562_v16 = vpack.c.bf16 %v437_v15, %v412_v14  ;;  %v564_v24 = vpack.c.bf16 %v439_v23, %v414_v22  ;;  %v319_v58 = vld [vmem:[%s14274_s0 + $0x48] sm:$0xff]  ;;  %v344_v59 = vld [vmem:[%s14274_s0 + $0x110] sm:$0xff]  ;;  %v369_v14 = vld [vmem:[%s14274_s0 + $0x1d8] sm:$0xff] }
  0x36   :  { %8794 = vmatprep.subr.bf16.mxu1 %v9356_v19  ;;  %v440_v19 = vld [vmem:[%s14274_s0 + $0x410] sm:$0xff]  ;;  %v394_v15 = vld [vmem:[%s14274_s0 + $0x2a0] sm:$0xff]  ;;  %v9409_v22 = vld [vmem:[%s14272_s2 + $0x328] sm:$0xff]  }
  0x37   :  { %8749 = vmatpush3.bf16.msra.mxu0 %v9343_v2  ;;  %v364_v2 = vld [vmem:[%s14274_s0 + $0x1b0] sm:$0xff]  ;;  %v9410_v23 = vld [vmem:[%s14272_s2 + $0x2e0] sm:$0xff]  }
  0x38   :  { %8750 = vmatprep.subr.bf16.mxu0 %v9346_v3  ;;  %v389_v3 = vld [vmem:[%s14274_s0 + $0x278] sm:$0xff] }
  0x39   :  { %8795 = vmatpush3.bf16.msra.mxu1 %v9357_v20 }
  0x3a   :  { %8796 = vmatprep.subr.bf16.mxu1 %v9360_v29  ;;  %v9388_v29 = vld [vmem:[%s14272_s2 + $0x250] sm:$0xff]  }
  0x3b   :  { %8751 = vmatpush3.bf16.msra.mxu0 %v9347_v4  ;;  %v539_v4 = vpack.c.bf16 %v389_v3, %v364_v2  ;;  %v9401_v2 = vld [vmem:[%s14272_s2 + $0x338] sm:$0xff]   ;;  %v9402_v3 = vld [vmem:[%s14272_s2 + $0x2f0] sm:$0xff]  }
  0x3c   :  { %8752 = vmatprep.subr.bf16.mxu0 %v9350_v7  ;;  %2274 = vmatmul.mubr.bf16.gmra.mxu1 %v585_v28  ;;  %v9378_v7 = vld [vmem:[%s14272_s2 + $0x1e0] sm:$0xff]   ;;  %v9387_v28 = vld [vmem:[%s14272_s2 + $0x190] sm:$0xff]  }
  0x3d   :  { %8797 = vmatpush3.bf16.msra.mxu1 %v9361_v30  ;;  %2379 = vmatprep.mubr.bf16.mxu1 %v515_v44  ;;  %v463_v30 = vld [vmem:[%s14274_s0 + $0x4c8] sm:$0xff]  ;;  %v589_v44 = vpack.c.bf16 %v489_v43, %v464_v42  ;;  %v9417_v42 = vld [vmem:[%s14272_s2 + $0x318] sm:$0xff]   ;;  %v9418_v43 = vld [vmem:[%s14272_s2 + $0x2d0] sm:$0xff]  }
  0x3e   :  { %8798 = vmatprep.subr.bf16.mxu1 %v9364_v33  ;;  %v9389_v33 = vld [vmem:[%s14272_s2 + $0x210] sm:$0xff]  }
  0x3f   :  { %8753 = vmatpush3.bf16.msra.mxu0 %v9351_v11  ;;  %v438_v11 = vld [vmem:[%s14274_s0 + $0x400] sm:$0xff] }
  0x40   :  { %8754 = vmatprep.subr.bf16.mxu0 %v9354_v17  ;;  %v563_v12 = vpack.c.bf16 %v438_v11, %v413_v10  ;;  %v9382_v17 = vld [vmem:[%s14272_s2 + $0x1d8] sm:$0xff]   ;;  %v366_v10 = vld [vmem:[%s14274_s0 + $0x1c0] sm:$0xff]  ;;  %v391_v11 = vld [vmem:[%s14274_s0 + $0x288] sm:$0xff] }
  0x41   :  { %8799 = vmatpush3.bf16.msra.mxu1 %v9365_v37  ;;  %v9390_v37 = vld [vmem:[%s14272_s2 + $0x1c8] sm:$0xff]  }
  0x42   :  { %8864 = vmatprep.subr.bf16.mxu1 %v9368_v49  ;;  %v9396_v49 = vld [vmem:[%s14272_s2 + $0x240] sm:$0xff]  }
  0x43   :  { %8755 = vmatpush3.bf16.msra.mxu0 %v9355_v18  ;;  %v415_v18 = vld [vmem:[%s14274_s0 + $0x348] sm:$0xff] }
  0x44   :  { %8756 = vmatprep.subr.bf16.mxu0 %v9358_v21  ;;  %2380 = vmatmul.mubr.bf16.vlgmr.msra.gmra.mxu1 %v514_v48  ;;  %v565_v20 = vpack.c.bf16 %v440_v19, %v415_v18  ;;  %v9383_v21 = vld [vmem:[%s14272_s2 + $0x198] sm:$0xff]   ;;  %v9395_v48 = vld [vmem:[%s14272_s2 + $0x180] sm:$0xff]   ;;  %v368_v18 = vld [vmem:[%s14274_s0 + $0x1d0] sm:$0xff] }
  0x45   :  { %8865 = vmatpush3.bf16.msra.mxu1 %v9369_v50  ;;  %2387 = vmatprep.mubr.bf16.mxu1 %v540_v0  ;;  %v317_v50 = vld [vmem:[%s14274_s0 + $0x38] sm:$0xff]  ;;  %v518_v0 = vpack.c.bf16 %v343_v63, %v318_v62  ;;  %v9425_v62 = vld [vmem:[%s14272_s2 + $0x308] sm:$0xff]   ;;  %v9426_v63 = vld [vmem:[%s14272_s2 + $0x2c0] sm:$0xff]  }
  0x46   :  { %8866 = vmatprep.subr.bf16.mxu1 %v9372_v53  ;;  %v9397_v53 = vld [vmem:[%s14272_s2 + $0x200] sm:$0xff]   ;;  %v393_v19 = vld [vmem:[%s14274_s0 + $0x298] sm:$0xff] }
  0x47   :  { %8757 = vmatpush3.bf16.msra.mxu0 %v9359_v25  ;;  %v9384_v25 = vld [vmem:[%s14272_s2 + $0x258] sm:$0xff]  }
  0x48   :  { %8758 = vmatprep.subr.bf16.mxu0 %v9362_v31  ;;  %v488_v31 = vld [vmem:[%s14274_s0 + $0x590] sm:$0xff] }
  0x49   :  { %8867 = vmatpush3.bf16.msra.mxu1 %v9373_v57  ;;  %v9398_v57 = vld [vmem:[%s14272_s2 + $0x2f8] sm:$0xff]  }
  0x4a   :  { %8868 = vmatprep.subr.bf16.mxu1 %v9376_v5  ;;  %v9404_v5 = vld [vmem:[%s14272_s2 + $0x370] sm:$0xff]  }
  0x4b   :  { %8759 = vmatpush3.bf16.msra.mxu0 %v9363_v32  ;;  %v588_v32 = vpack.c.bf16 %v488_v31, %v463_v30  ;;  %v416_v30 = vld [vmem:[%s14274_s0 + $0x350] sm:$0xff]  ;;  %v441_v31 = vld [vmem:[%s14274_s0 + $0x418] sm:$0xff] }
  0x4c   :  { %8824 = vmatprep.subr.bf16.mxu0 %v9366_v41  ;;  %2388 = vmatmul.mubr.bf16.gmra.mxu1 %v539_v4  ;;  %v9391_v41 = vld [vmem:[%s14272_s2 + $0x188] sm:$0xff]   ;;  %v9403_v4 = vld [vmem:[%s14272_s2 + $0x2b0] sm:$0xff]  }
  0x4d   :  { %8869 = vmatpush3.bf16.msra.mxu1 %v9377_v6  ;;  %2395 = vmatprep.mubr.bf16.mxu1 %v565_v20  ;;  %v367_v6 = vld [vmem:[%s14274_s0 + $0x1c8] sm:$0xff]  ;;  %v543_v20 = vpack.c.bf16 %v393_v19, %v368_v18  ;;  %v9433_v18 = vld [vmem:[%s14272_s2 + $0x438] sm:$0xff]   ;;  %v9434_v19 = vld [vmem:[%s14272_s2 + $0x3f0] sm:$0xff]  }
  0x4e   :  { %2315 = vmatmul.mubr.bf16.vlgmr.msra.gmra.mxu0 %v512_v40  ;;  %8870 = vmatprep.subr.bf16.mxu1 %v9380_v9  ;;  %v590_v40 = vpack.c.bf16 %v490_v39, %v465_v38  ;;  %v9405_v9 = vld [vmem:[%s14272_s2 + $0x330] sm:$0xff]   ;;  %v418_v38 = vld [vmem:[%s14274_s0 + $0x360] sm:$0xff]  ;;  %v443_v39 = vld [vmem:[%s14274_s0 + $0x428] sm:$0xff] }
  0x4f   :  { %8825 = vmatpush3.bf16.msra.mxu0 %v9367_v45  ;;  %2322 = vmatprep.mubr.bf16.mxu0 %v538_v56  ;;  %v9392_v45 = vld [vmem:[%s14272_s2 + $0x248] sm:$0xff]   ;;  %v516_v56 = vpack.c.bf16 %v341_v55, %v316_v54  ;;  %v469_v54 = vld [vmem:[%s14274_s0 + $0x4f8] sm:$0xff]  ;;  %v494_v55 = vld [vmem:[%s14274_s0 + $0x5c0] sm:$0xff] }
  0x50   :  { %8826 = vmatprep.subr.bf16.mxu0 %v9370_v51  ;;  %v342_v51 = vld [vmem:[%s14274_s0 + $0x100] sm:$0xff] }
  0x51   :  { %8871 = vmatpush3.bf16.msra.mxu1 %v9381_v13  ;;  %v9406_v13 = vld [vmem:[%s14272_s2 + $0x2e8] sm:$0xff]  }
  0x52   :  { %8872 = vmatprep.subr.bf16.mxu1 %v9384_v25  ;;  %v9412_v25 = vld [vmem:[%s14272_s2 + $0x360] sm:$0xff]  }
  0x53   :  { %8827 = vmatpush3.bf16.msra.mxu0 %v9371_v52  ;;  %v517_v52 = vpack.c.bf16 %v342_v51, %v317_v50  ;;  %v466_v50 = vld [vmem:[%s14274_s0 + $0x4e0] sm:$0xff]  ;;  %v491_v51 = vld [vmem:[%s14274_s0 + $0x5a8] sm:$0xff] }
  0x54   :  { %8828 = vmatprep.subr.bf16.mxu0 %v9374_v61  ;;  %2396 = vmatmul.mubr.bf16.gmra.mxu1 %v564_v24  ;;  %v9399_v61 = vld [vmem:[%s14272_s2 + $0x2b8] sm:$0xff]   ;;  %v9411_v24 = vld [vmem:[%s14272_s2 + $0x2a0] sm:$0xff]  }
  0x55   :  { %8873 = vmatpush3.bf16.msra.mxu1 %v9385_v26  ;;  %2403 = vmatprep.mubr.bf16.mxu1 %v590_v40  ;;  %v417_v26 = vld [vmem:[%s14274_s0 + $0x358] sm:$0xff]  ;;  %v568_v40 = vpack.c.bf16 %v443_v39, %v418_v38  ;;  %v9441_v38 = vld [vmem:[%s14272_s2 + $0x428] sm:$0xff]   ;;  %v9442_v39 = vld [vmem:[%s14272_s2 + $0x3e0] sm:$0xff]  }
  0x56   :  { %2323 = vmatmul.mubr.bf16.gmra.mxu0 %v537_v60  ;;  %8874 = vmatprep.subr.bf16.mxu1 %v9388_v29  ;;  %v519_v60 = vpack.c.bf16 %v344_v59, %v319_v58  ;;  %v9413_v29 = vld [vmem:[%s14272_s2 + $0x320] sm:$0xff]   ;;  %v468_v58 = vld [vmem:[%s14274_s0 + $0x4f0] sm:$0xff]  ;;  %v493_v59 = vld [vmem:[%s14274_s0 + $0x5b8] sm:$0xff] }
  0x57   :  { %8829 = vmatpush3.bf16.msra.mxu0 %v9375_v1  ;;  %2330 = vmatprep.mubr.bf16.mxu0 %v563_v12  ;;  %v9400_v1 = vld [vmem:[%s14272_s2 + $0x378] sm:$0xff]   ;;  %v541_v12 = vpack.c.bf16 %v391_v11, %v366_v10  ;;  %v323_v10 = vld [vmem:[%s14274_s0 + $0x68] sm:$0xff]  ;;  %v348_v11 = vld [vmem:[%s14274_s0 + $0x130] sm:$0xff] }
  0x58   :  { %8830 = vmatprep.subr.bf16.mxu0 %v9378_v7  ;;  %v392_v7 = vld [vmem:[%s14274_s0 + $0x290] sm:$0xff] }
  0x59   :  { %8875 = vmatpush3.bf16.msra.mxu1 %v9389_v33  ;;  %v9414_v33 = vld [vmem:[%s14272_s2 + $0x2d8] sm:$0xff]  }
  0x5a   :  { %8876 = vmatprep.subr.bf16.mxu1 %v9392_v45  ;;  %v9420_v45 = vld [vmem:[%s14272_s2 + $0x350] sm:$0xff]  }
  0x5b   :  { %8831 = vmatpush3.bf16.msra.mxu0 %v9379_v8  ;;  %v542_v8 = vpack.c.bf16 %v392_v7, %v367_v6  ;;  %v320_v6 = vld [vmem:[%s14274_s0 + $0x50] sm:$0xff]  ;;  %v345_v7 = vld [vmem:[%s14274_s0 + $0x118] sm:$0xff] }
  0x5c   :  { %8832 = vmatprep.subr.bf16.mxu0 %v9382_v17  ;;  %2404 = vmatmul.mubr.bf16.gmra.mxu1 %v589_v44  ;;  %v9407_v17 = vld [vmem:[%s14272_s2 + $0x2a8] sm:$0xff]   ;;  %v9419_v44 = vld [vmem:[%s14272_s2 + $0x290] sm:$0xff]  }
  0x5d   :  { %8877 = vmatpush3.bf16.msra.mxu1 %v9393_v46  ;;  %2509 = vmatprep.mubr.bf16.mxu1 %v519_v60  ;;  %v467_v46 = vld [vmem:[%s14274_s0 + $0x4e8] sm:$0xff]  ;;  %v593_v60 = vpack.c.bf16 %v493_v59, %v468_v58  ;;  %v9449_v58 = vld [vmem:[%s14272_s2 + $0x418] sm:$0xff]   ;;  %v9450_v59 = vld [vmem:[%s14272_s2 + $0x3d0] sm:$0xff]  }
  0x5e   :  { %2331 = vmatmul.mubr.bf16.gmra.mxu0 %v562_v16  ;;  %8878 = vmatprep.subr.bf16.mxu1 %v9396_v49  ;;  %v544_v16 = vpack.c.bf16 %v394_v15, %v369_v14  ;;  %v9421_v49 = vld [vmem:[%s14272_s2 + $0x310] sm:$0xff]   ;;  %v322_v14 = vld [vmem:[%s14274_s0 + $0x60] sm:$0xff]  ;;  %v347_v15 = vld [vmem:[%s14274_s0 + $0x128] sm:$0xff] }
  0x5f   :  { %8833 = vmatpush3.bf16.msra.mxu0 %v9383_v21  ;;  %2338 = vmatprep.mubr.bf16.mxu0 %v588_v32  ;;  %v9408_v21 = vld [vmem:[%s14272_s2 + $0x368] sm:$0xff]   ;;  %v566_v32 = vpack.c.bf16 %v441_v31, %v416_v30  ;;  %v373_v30 = vld [vmem:[%s14274_s0 + $0x1f8] sm:$0xff]  ;;  %v398_v31 = vld [vmem:[%s14274_s0 + $0x2c0] sm:$0xff] }
  0x60   :  { %8834 = vmatprep.subr.bf16.mxu0 %v9386_v27  ;;  %v442_v27 = vld [vmem:[%s14274_s0 + $0x420] sm:$0xff] }
  0x61   :  { %8879 = vmatpush3.bf16.msra.mxu1 %v9397_v53  ;;  %v9422_v53 = vld [vmem:[%s14272_s2 + $0x2c8] sm:$0xff]  }
  0x62   :  { %8944 = vmatprep.subr.bf16.mxu1 %v9400_v1  ;;  %v9428_v1 = vld [vmem:[%s14272_s2 + $0x340] sm:$0xff]  }
  0x63   :  { %8835 = vmatpush3.bf16.msra.mxu0 %v9387_v28  ;;  %v567_v28 = vpack.c.bf16 %v442_v27, %v417_v26  ;;  %v370_v26 = vld [vmem:[%s14274_s0 + $0x1e0] sm:$0xff]  ;;  %v395_v27 = vld [vmem:[%s14274_s0 + $0x2a8] sm:$0xff] }
  0x64   :  { %8836 = vmatprep.subr.bf16.mxu0 %v9390_v37  ;;  %2510 = vmatmul.mubr.bf16.vlgmr.msra.gmra.mxu1 %v518_v0  ;;  %v9415_v37 = vld [vmem:[%s14272_s2 + $0x298] sm:$0xff]   ;;  %v9427_v0 = vld [vmem:[%s14272_s2 + $0x280] sm:$0xff]  }
  0x65   :  { %8945 = vmatpush3.bf16.msra.mxu1 %v9401_v2  ;;  %2517 = vmatprep.mubr.bf16.mxu1 %v544_v16  ;;  %v321_v2 = vld [vmem:[%s14274_s0 + $0x58] sm:$0xff]  ;;  %v522_v16 = vpack.c.bf16 %v347_v15, %v322_v14  ;;  %v9457_v14 = vld [vmem:[%s14272_s2 + $0x408] sm:$0xff]   ;;  %v9458_v15 = vld [vmem:[%s14272_s2 + $0x3c0] sm:$0xff]  }
  0x66   :  { %2339 = vmatmul.mubr.bf16.gmra.mxu0 %v587_v36  ;;  %8946 = vmatprep.subr.bf16.mxu1 %v9404_v5  ;;  %v569_v36 = vpack.c.bf16 %v444_v35, %v419_v34  ;;  %v9429_v5 = vld [vmem:[%s14272_s2 + $0x300] sm:$0xff]   ;;  %v372_v34 = vld [vmem:[%s14274_s0 + $0x1f0] sm:$0xff]  ;;  %v397_v35 = vld [vmem:[%s14274_s0 + $0x2b8] sm:$0xff] }
  0x67   :  { %8837 = vmatpush3.bf16.msra.mxu0 %v9391_v41  ;;  %2444 = vmatprep.mubr.bf16.mxu0 %v517_v52  ;;  %v9416_v41 = vld [vmem:[%s14272_s2 + $0x358] sm:$0xff]   ;;  %v591_v52 = vpack.c.bf16 %v491_v51, %v466_v50  ;;  %v423_v50 = vld [vmem:[%s14274_s0 + $0x388] sm:$0xff]  ;;  %v448_v51 = vld [vmem:[%s14274_s0 + $0x450] sm:$0xff] }
  0x68   :  { %8838 = vmatprep.subr.bf16.mxu0 %v9394_v47  ;;  %v492_v47 = vld [vmem:[%s14274_s0 + $0x5b0] sm:$0xff] }
  0x69   :  { %8947 = vmatpush3.bf16.msra.mxu1 %v9405_v9  ;;  %v9430_v9 = vld [vmem:[%s14272_s2 + $0x3f8] sm:$0xff]  }
  0x6a   :  { %8948 = vmatprep.subr.bf16.mxu1 %v9408_v21  ;;  %v9436_v21 = vld [vmem:[%s14272_s2 + $0x470] sm:$0xff]  }
  0x6b   :  { %8839 = vmatpush3.bf16.msra.mxu0 %v9395_v48  ;;  %v592_v48 = vpack.c.bf16 %v492_v47, %v467_v46  ;;  %v420_v46 = vld [vmem:[%s14274_s0 + $0x370] sm:$0xff]  ;;  %v445_v47 = vld [vmem:[%s14274_s0 + $0x438] sm:$0xff] }
  0x6c   :  { %8904 = vmatprep.subr.bf16.mxu0 %v9398_v57  ;;  %2518 = vmatmul.mubr.bf16.gmra.mxu1 %v543_v20  ;;  %v9423_v57 = vld [vmem:[%s14272_s2 + $0x288] sm:$0xff]   ;;  %v9435_v20 = vld [vmem:[%s14272_s2 + $0x3b0] sm:$0xff]  }
  0x6d   :  { %8949 = vmatpush3.bf16.msra.mxu1 %v9409_v22  ;;  %2525 = vmatprep.mubr.bf16.mxu1 %v569_v36  ;;  %v371_v22 = vld [vmem:[%s14274_s0 + $0x1e8] sm:$0xff]  ;;  %v547_v36 = vpack.c.bf16 %v397_v35, %v372_v34  ;;  %v9465_v34 = vld [vmem:[%s14272_s2 + $0x538] sm:$0xff]   ;;  %v9466_v35 = vld [vmem:[%s14272_s2 + $0x4f0] sm:$0xff]  }
  0x6e   :  { %2445 = vmatmul.mubr.bf16.vlgmr.msra.gmra.mxu0 %v516_v56  ;;  %8950 = vmatprep.subr.bf16.mxu1 %v9412_v25  ;;  %v594_v56 = vpack.c.bf16 %v494_v55, %v469_v54  ;;  %v9437_v25 = vld [vmem:[%s14272_s2 + $0x430] sm:$0xff]   ;;  %v422_v54 = vld [vmem:[%s14274_s0 + $0x380] sm:$0xff]  ;;  %v447_v55 = vld [vmem:[%s14274_s0 + $0x448] sm:$0xff] }
  0x6f   :  { %8905 = vmatpush3.bf16.msra.mxu0 %v9399_v61  ;;  %2452 = vmatprep.mubr.bf16.mxu0 %v542_v8  ;;  %v9424_v61 = vld [vmem:[%s14272_s2 + $0x348] sm:$0xff]   ;;  %v520_v8 = vpack.c.bf16 %v345_v7, %v320_v6  ;;  %v473_v6 = vld [vmem:[%s14274_s0 + $0x518] sm:$0xff]  ;;  %v498_v7 = vld [vmem:[%s14274_s0 + $0x5e0] sm:$0xff] }
  0x70   :  { %8906 = vmatprep.subr.bf16.mxu0 %v9402_v3  ;;  %v346_v3 = vld [vmem:[%s14274_s0 + $0x120] sm:$0xff] }
  0x71   :  { %8951 = vmatpush3.bf16.msra.mxu1 %v9413_v29  ;;  %v9438_v29 = vld [vmem:[%s14272_s2 + $0x3e8] sm:$0xff]  }
  0x72   :  { %8952 = vmatprep.subr.bf16.mxu1 %v9416_v41  ;;  %v9444_v41 = vld [vmem:[%s14272_s2 + $0x460] sm:$0xff]  }
  0x73   :  { %8907 = vmatpush3.bf16.msra.mxu0 %v9403_v4  ;;  %v521_v4 = vpack.c.bf16 %v346_v3, %v321_v2  ;;  %v470_v2 = vld [vmem:[%s14274_s0 + $0x500] sm:$0xff]  ;;  %v495_v3 = vld [vmem:[%s14274_s0 + $0x5c8] sm:$0xff] }
  0x74   :  { %8908 = vmatprep.subr.bf16.mxu0 %v9406_v13  ;;  %2526 = vmatmul.mubr.bf16.gmra.mxu1 %v568_v40  ;;  %v9431_v13 = vld [vmem:[%s14272_s2 + $0x3b8] sm:$0xff]   ;;  %v9443_v40 = vld [vmem:[%s14272_s2 + $0x3a0] sm:$0xff]  }
  0x75   :  { %8953 = vmatpush3.bf16.msra.mxu1 %v9417_v42  ;;  %2533 = vmatprep.mubr.bf16.mxu1 %v594_v56  ;;  %v421_v42 = vld [vmem:[%s14274_s0 + $0x378] sm:$0xff]  ;;  %v572_v56 = vpack.c.bf16 %v447_v55, %v422_v54  ;;  %v9473_v54 = vld [vmem:[%s14272_s2 + $0x528] sm:$0xff]   ;;  %v9474_v55 = vld [vmem:[%s14272_s2 + $0x4e0] sm:$0xff]  }
  0x76   :  { %2453 = vmatmul.mubr.bf16.gmra.mxu0 %v541_v12  ;;  %8954 = vmatprep.subr.bf16.mxu1 %v9420_v45  ;;  %v523_v12 = vpack.c.bf16 %v348_v11, %v323_v10  ;;  %v9445_v45 = vld [vmem:[%s14272_s2 + $0x420] sm:$0xff]   ;;  %v472_v10 = vld [vmem:[%s14274_s0 + $0x510] sm:$0xff]  ;;  %v497_v11 = vld [vmem:[%s14274_s0 + $0x5d8] sm:$0xff] }
  0x77   :  { %8909 = vmatpush3.bf16.msra.mxu0 %v9407_v17  ;;  %2460 = vmatprep.mubr.bf16.mxu0 %v567_v28  ;;  %v9432_v17 = vld [vmem:[%s14272_s2 + $0x478] sm:$0xff]   ;;  %v545_v28 = vpack.c.bf16 %v395_v27, %v370_v26  ;;  %v327_v26 = vld [vmem:[%s14274_s0 + $0x88] sm:$0xff]  ;;  %v352_v27 = vld [vmem:[%s14274_s0 + $0x150] sm:$0xff] }
  0x78   :  { %8910 = vmatprep.subr.bf16.mxu0 %v9410_v23  ;;  %v396_v23 = vld [vmem:[%s14274_s0 + $0x2b0] sm:$0xff] }
  0x79   :  { %8955 = vmatpush3.bf16.msra.mxu1 %v9421_v49  ;;  %v9446_v49 = vld [vmem:[%s14272_s2 + $0x3d8] sm:$0xff]  }
  0x7a   :  { %8956 = vmatprep.subr.bf16.mxu1 %v9424_v61  ;;  %v9452_v61 = vld [vmem:[%s14272_s2 + $0x450] sm:$0xff]  }
  0x7b   :  { %8911 = vmatpush3.bf16.msra.mxu0 %v9411_v24  ;;  %v546_v24 = vpack.c.bf16 %v396_v23, %v371_v22  ;;  %v324_v22 = vld [vmem:[%s14274_s0 + $0x70] sm:$0xff]  ;;  %v349_v23 = vld [vmem:[%s14274_s0 + $0x138] sm:$0xff] }
  0x7c   :  { %8912 = vmatprep.subr.bf16.mxu0 %v9414_v33  ;;  %2534 = vmatmul.mubr.bf16.gmra.mxu1 %v593_v60  ;;  %v9439_v33 = vld [vmem:[%s14272_s2 + $0x3a8] sm:$0xff]   ;;  %v9451_v60 = vld [vmem:[%s14272_s2 + $0x390] sm:$0xff]  }
  0x7d   :  { %8957 = vmatpush3.bf16.msra.mxu1 %v9425_v62  ;;  %2639 = vmatprep.mubr.bf16.mxu1 %v523_v12  ;;  %v471_v62 = vld [vmem:[%s14274_s0 + $0x508] sm:$0xff]  ;;  %v597_v12 = vpack.c.bf16 %v497_v11, %v472_v10  ;;  %v9480_v10 = vld [vmem:[%s14272_s2 + $0x558] sm:$0xff]  }
  0x7e   :  { %2461 = vmatmul.mubr.bf16.gmra.mxu0 %v566_v32  ;;  %8958 = vmatprep.subr.bf16.mxu1 %v9428_v1  ;;  %v548_v32 = vpack.c.bf16 %v398_v31, %v373_v30  ;;  %v9453_v1 = vld [vmem:[%s14272_s2 + $0x410] sm:$0xff]   ;;  %v326_v30 = vld [vmem:[%s14274_s0 + $0x80] sm:$0xff]  ;;  %v351_v31 = vld [vmem:[%s14274_s0 + $0x148] sm:$0xff] }
  0x7f   :  { %8913 = vmatpush3.bf16.msra.mxu0 %v9415_v37  ;;  %2468 = vmatprep.mubr.bf16.mxu0 %v592_v48  ;;  %v9440_v37 = vld [vmem:[%s14272_s2 + $0x468] sm:$0xff]   ;;  %v570_v48 = vpack.c.bf16 %v445_v47, %v420_v46  ;;  %v377_v46 = vld [vmem:[%s14274_s0 + $0x218] sm:$0xff]  ;;  %v402_v47 = vld [vmem:[%s14274_s0 + $0x2e0] sm:$0xff] }
  0x80   :  { %8914 = vmatprep.subr.bf16.mxu0 %v9418_v43  ;;  %v446_v43 = vld [vmem:[%s14274_s0 + $0x440] sm:$0xff] }
  0x81   :  { %8959 = vmatpush3.bf16.msra.mxu1 %v9429_v5  ;;  %v9454_v5 = vld [vmem:[%s14272_s2 + $0x3c8] sm:$0xff]  }
  0x82   :  { %9024 = vmatprep.subr.bf16.mxu1 %v9432_v17  ;;  %v9460_v17 = vld [vmem:[%s14272_s2 + $0x440] sm:$0xff]  }
  0x83   :  { %8915 = vmatpush3.bf16.msra.mxu0 %v9419_v44  ;;  %v571_v44 = vpack.c.bf16 %v446_v43, %v421_v42  ;;  %v374_v42 = vld [vmem:[%s14274_s0 + $0x200] sm:$0xff]  ;;  %v399_v43 = vld [vmem:[%s14274_s0 + $0x2c8] sm:$0xff] }
  0x84   :  { %8916 = vmatprep.subr.bf16.mxu0 %v9422_v53  ;;  %2640 = vmatmul.mubr.bf16.vlgmr.msra.gmra.mxu1 %v522_v16  ;;  %v9447_v53 = vld [vmem:[%s14272_s2 + $0x398] sm:$0xff]   ;;  %v9459_v16 = vld [vmem:[%s14272_s2 + $0x380] sm:$0xff]  }
  0x85   :  { %9025 = vmatpush3.bf16.msra.mxu1 %v9433_v18  ;;  %2647 = vmatprep.mubr.bf16.mxu1 %v548_v32  ;;  %v325_v18 = vld [vmem:[%s14274_s0 + $0x78] sm:$0xff]  ;;  %v526_v32 = vpack.c.bf16 %v351_v31, %v326_v30  ;;  %v9487_v30 = vld [vmem:[%s14272_s2 + $0x488] sm:$0xff]   ;;  %v476_v31 = vld [vmem:[%s14274_s0 + $0x530] sm:$0xff] }
  0x86   :  { %2469 = vmatmul.mubr.bf16.gmra.mxu0 %v591_v52  ;;  %9026 = vmatprep.subr.bf16.mxu1 %v9436_v21  ;;  %v573_v52 = vpack.c.bf16 %v448_v51, %v423_v50  ;;  %v9461_v21 = vld [vmem:[%s14272_s2 + $0x400] sm:$0xff]   ;;  %v376_v50 = vld [vmem:[%s14274_s0 + $0x210] sm:$0xff]  ;;  %v401_v51 = vld [vmem:[%s14274_s0 + $0x2d8] sm:$0xff] }
  0x87   :  { %8917 = vmatpush3.bf16.msra.mxu0 %v9423_v57  ;;  %2574 = vmatprep.mubr.bf16.mxu0 %v521_v4  ;;  %v9448_v57 = vld [vmem:[%s14272_s2 + $0x458] sm:$0xff]   ;;  %v595_v4 = vpack.c.bf16 %v495_v3, %v470_v2  ;;  %v427_v2 = vld [vmem:[%s14274_s0 + $0x3a8] sm:$0xff]  ;;  %v452_v3 = vld [vmem:[%s14274_s0 + $0x470] sm:$0xff] }
  0x88   :  { %8918 = vmatprep.subr.bf16.mxu0 %v9426_v63  ;;  %v496_v63 = vld [vmem:[%s14274_s0 + $0x5d0] sm:$0xff] }
  0x89   :  { %9027 = vmatpush3.bf16.msra.mxu1 %v9437_v25  ;;  %v9462_v25 = vld [vmem:[%s14272_s2 + $0x4f8] sm:$0xff]  }
  0x8a   :  { %9028 = vmatprep.subr.bf16.mxu1 %v9440_v37  ;;  %v9468_v37 = vld [vmem:[%s14272_s2 + $0x570] sm:$0xff]  }
  0x8b   :  { %8919 = vmatpush3.bf16.msra.mxu0 %v9427_v0  ;;  %v596_v0 = vpack.c.bf16 %v496_v63, %v471_v62  ;;  %v424_v62 = vld [vmem:[%s14274_s0 + $0x390] sm:$0xff]  ;;  %v449_v63 = vld [vmem:[%s14274_s0 + $0x458] sm:$0xff] }
  0x8c   :  { %8984 = vmatprep.subr.bf16.mxu0 %v9430_v9  ;;  %2648 = vmatmul.mubr.bf16.gmra.mxu1 %v547_v36  ;;  %v9455_v9 = vld [vmem:[%s14272_s2 + $0x388] sm:$0xff]   ;;  %v9467_v36 = vld [vmem:[%s14272_s2 + $0x4b0] sm:$0xff]  }
  0x8d   :  { %9029 = vmatpush3.bf16.msra.mxu1 %v9441_v38  ;;  %2655 = vmatprep.mubr.bf16.mxu1 %v573_v52  ;;  %v375_v38 = vld [vmem:[%s14274_s0 + $0x208] sm:$0xff]  ;;  %v551_v52 = vpack.c.bf16 %v401_v51, %v376_v50  ;;  %v328_v50 = vld [vmem:[%s14274_s0 + $0x90] sm:$0xff] }
  0x8e   :  { %2575 = vmatmul.mubr.bf16.vlgmr.msra.gmra.mxu0 %v520_v8  ;;  %9030 = vmatprep.subr.bf16.mxu1 %v9444_v41  ;;  %v598_v8 = vpack.c.bf16 %v498_v7, %v473_v6  ;;  %v9469_v41 = vld [vmem:[%s14272_s2 + $0x530] sm:$0xff]   ;;  %v426_v6 = vld [vmem:[%s14274_s0 + $0x3a0] sm:$0xff] }
  0x8f   :  { %8985 = vmatpush3.bf16.msra.mxu0 %v9431_v13  ;;  %2582 = vmatprep.mubr.bf16.mxu0 %v546_v24  ;;  %v9456_v13 = vld [vmem:[%s14272_s2 + $0x448] sm:$0xff]   ;;  %v524_v24 = vpack.c.bf16 %v349_v23, %v324_v22  ;;  %v474_v22 = vld [vmem:[%s14274_s0 + $0x520] sm:$0xff] }
  0x90   :  { %8986 = vmatprep.subr.bf16.mxu0 %v9434_v19  ;;  %v350_v19 = vld [vmem:[%s14274_s0 + $0x140] sm:$0xff]  ;;  %v499_v23 = vld [vmem:[%s14274_s0 + $0x5e8] sm:$0xff] }
  0x91   :  { %9031 = vmatpush3.bf16.msra.mxu1 %v9445_v45  ;;  %v9470_v45 = vld [vmem:[%s14272_s2 + $0x4e8] sm:$0xff]  }
  0x92   :  { %9032 = vmatprep.subr.bf16.mxu1 %v9448_v57  ;;  %v9476_v57 = vld [vmem:[%s14272_s2 + $0x560] sm:$0xff]  }
  0x93   :  { %8987 = vmatpush3.bf16.msra.mxu0 %v9435_v20  ;;  %v525_v20 = vpack.c.bf16 %v350_v19, %v325_v18  ;;  %v500_v18 = vld [vmem:[%s14274_s0 + $0x5f0] sm:$0xff] }
  0x94   :  { %8988 = vmatprep.subr.bf16.mxu0 %v9438_v29  ;;  %2656 = vmatmul.mubr.bf16.gmra.mxu1 %v572_v56  ;;  %v9463_v29 = vld [vmem:[%s14272_s2 + $0x4b8] sm:$0xff]   ;;  %v9475_v56 = vld [vmem:[%s14272_s2 + $0x4a0] sm:$0xff]  }
  0x95   :  { %9033 = vmatpush3.bf16.msra.mxu1 %v9449_v58  ;;  %2663 = vmatprep.mubr.bf16.mxu1 %v598_v8  ;;  %v425_v58 = vld [vmem:[%s14274_s0 + $0x398] sm:$0xff]  ;;  %v451_v8 = vld [vmem:[%s14274_s0 + $0x468] sm:$0xff] }
  0x96   :  { %2583 = vmatmul.mubr.bf16.gmra.mxu0 %v545_v28  ;;  %9034 = vmatprep.subr.bf16.mxu1 %v9452_v61  ;;  %v527_v28 = vpack.c.bf16 %v352_v27, %v327_v26  ;;  %v9477_v61 = vld [vmem:[%s14272_s2 + $0x520] sm:$0xff]   ;;  %v477_v26 = vld [vmem:[%s14274_s0 + $0x538] sm:$0xff] }
  0x97   :  { %8989 = vmatpush3.bf16.msra.mxu0 %v9439_v33  ;;  %2590 = vmatprep.mubr.bf16.mxu0 %v571_v44  ;;  %v9464_v33 = vld [vmem:[%s14272_s2 + $0x578] sm:$0xff]   ;;  %v549_v44 = vpack.c.bf16 %v399_v43, %v374_v42  ;;  %v502_v27 = vld [vmem:[%s14274_s0 + $0x600] sm:$0xff] }
  0x98   :  { %8990 = vmatprep.subr.bf16.mxu0 %v9442_v39  ;;  %v400_v39 = vld [vmem:[%s14274_s0 + $0x2d0] sm:$0xff]  ;;  %v9491_v42 = vld [vmem:[%s14272_s2 + $0x480] sm:$0xff]  }
  0x99   :  { %9035 = vmatpush3.bf16.msra.mxu1 %v9453_v1  ;;  %v9478_v1 = vld [vmem:[%s14272_s2 + $0x4d8] sm:$0xff]   ;;  %v9492_v43 = vld [vmem:[%s14272_s2 + $0x540] sm:$0xff]  }
  0x9a   :  { %9036 = vmatprep.subr.bf16.mxu1 %v9456_v13  ;;  %v9482_v13 = vld [vmem:[%s14272_s2 + $0x4d0] sm:$0xff]  }
  0x9b   :  { %8991 = vmatpush3.bf16.msra.mxu0 %v9443_v40  ;;  %v550_v40 = vpack.c.bf16 %v400_v39, %v375_v38  ;;  %v9490_v39 = vld [vmem:[%s14272_s2 + $0x4c0] sm:$0xff]  }
  0x9c   :  { %8992 = vmatprep.subr.bf16.mxu0 %v9446_v49  ;;  %2664 = vmatmul.mubr.bf16.gmra.mxu1 %v597_v12  ;;  %v9471_v49 = vld [vmem:[%s14272_s2 + $0x4a8] sm:$0xff]   ;;  %v9481_v12 = vld [vmem:[%s14272_s2 + $0x518] sm:$0xff]  }
  0x9d   :  { %9037 = vmatpush3.bf16.msra.mxu1 %v9457_v14  ;;  %2769 = vmatprep.mubr.bf16.mxu1 %v527_v28 }
  0x9e   :  { %2591 = vmatmul.mubr.bf16.gmra.mxu0 %v570_v48  ;;  %9038 = vmatprep.subr.bf16.mxu1 %v9460_v17  ;;  %v552_v48 = vpack.c.bf16 %v402_v47, %v377_v46  ;;  %v475_v17 = vld [vmem:[%s14274_s0 + $0x528] sm:$0xff]  ;;  %v329_v46 = vld [vmem:[%s14274_s0 + $0x98] sm:$0xff]  ;;  %v354_v47 = vld [vmem:[%s14274_s0 + $0x160] sm:$0xff] }
  0x9f   :  { %8993 = vmatpush3.bf16.msra.mxu0 %v9447_v53  ;;  %2598 = vmatprep.mubr.bf16.mxu0 %v596_v0  ;;  %v9472_v53 = vld [vmem:[%s14272_s2 + $0x568] sm:$0xff]   ;;  %v574_v0 = vpack.c.bf16 %v449_v63, %v424_v62  ;;  %v330_v62 = vld [vmem:[%s14274_s0 + $0xa0] sm:$0xff] }
  0xa0   :  { %8994 = vmatprep.subr.bf16.mxu0 %v9450_v59  ;;  %v450_v59 = vld [vmem:[%s14274_s0 + $0x460] sm:$0xff]  ;;  %v355_v63 = vld [vmem:[%s14274_s0 + $0x168] sm:$0xff] }
  0xa1   :  { %9039 = vmatpush3.bf16.msra.mxu1 %v9461_v21  ;;  %v9485_v21 = vld [vmem:[%s14272_s2 + $0x510] sm:$0xff]  }
  0xa2   :  { %9104 = vmatprep.subr.bf16.mxu1 %v9464_v33 }
  0xa3   :  { %8995 = vmatpush3.bf16.msra.mxu0 %v9451_v60  ;;  %v575_v60 = vpack.c.bf16 %v450_v59, %v425_v58 }
  0xa4   :  { %8996 = vmatprep.subr.bf16.mxu0 %v9454_v5  ;;  %2770 = vmatmul.mubr.bf16.vlgmr.msra.gmra.mxu1 %v526_v32  ;;  %v9479_v5 = vld [vmem:[%s14272_s2 + $0x498] sm:$0xff]  }
  0xa5   :  { %9105 = vmatpush3.bf16.msra.mxu1 %v9465_v34  ;;  %2777 = vmatprep.mubr.bf16.mxu1 %v552_v48  ;;  %v501_v32 = vld [vmem:[%s14274_s0 + $0x5f8] sm:$0xff]  ;;  %v9488_v34 = vld [vmem:[%s14272_s2 + $0x548] sm:$0xff]   ;;  %v529_v48 = vpack.c.bf16 %v354_v47, %v329_v46 }
  0xa6   :  { %2599 = vmatmul.mubr.bf16.gmra.mxu0 %v595_v4  ;;  %9106 = vmatprep.subr.bf16.mxu1 %v9468_v37  ;;  %v577_v4 = vpack.c.bf16 %v452_v3, %v427_v2  ;;  %v601_v33 = vpack.c.bf16 %v501_v32, %v476_v31  ;;  %v9489_v37 = vld [vmem:[%s14272_s2 + $0x508] sm:$0xff]   ;;  %v9496_v2 = vld [vmem:[%s14272_s2 + $0x5f0] sm:$0xff]   ;;  %v9497_v3 = vld [vmem:[%s14272_s2 + $0x638] sm:$0xff]  }
  0xa7   :  { %8997 = vmatpush3.bf16.msra.mxu0 %v9455_v9  ;;  %2704 = vmatprep.mubr.bf16.mxu0 %v525_v20  ;;  %v576_v9 = vpack.c.bf16 %v451_v8, %v426_v6  ;;  %v600_v20 = vpack.c.bf16 %v500_v18, %v475_v17  ;;  %v379_v6 = vld [vmem:[%s14274_s0 + $0x228] sm:$0xff]  ;;  %v404_v8 = vld [vmem:[%s14274_s0 + $0x2f0] sm:$0xff]  ;;  %v381_v18 = vld [vmem:[%s14274_s0 + $0x238] sm:$0xff] }
  0xa8   :  { %8998 = vmatprep.subr.bf16.mxu0 %v9458_v15  ;;  %v9483_v15 = vld [vmem:[%s14272_s2 + $0x490] sm:$0xff]   ;;  %v429_v31 = vld [vmem:[%s14274_s0 + $0x3b8] sm:$0xff]  ;;  %v454_v32 = vld [vmem:[%s14274_s0 + $0x480] sm:$0xff] }
  0xa9   :  { %9107 = vmatpush3.bf16.msra.mxu1 %v9469_v41 }
  0xaa   :  { %9108 = vmatprep.subr.bf16.mxu1 %v9472_v53  ;;  %v353_v53 = vld [vmem:[%s14274_s0 + $0x158] sm:$0xff] }
  0xab   :  { %8999 = vmatpush3.bf16.msra.mxu0 %v9459_v16  ;;  %v9484_v16 = vld [vmem:[%s14272_s2 + $0x550] sm:$0xff]  }
  0xac   :  { %9064 = vmatprep.subr.bf16.mxu0 %v9462_v25  ;;  %2778 = vmatmul.mubr.bf16.gmra.mxu1 %v551_v52  ;;  %v9486_v25 = vld [vmem:[%s14272_s2 + $0x4c8] sm:$0xff]  }
  0xad   :  { %9109 = vmatpush3.bf16.msra.mxu1 %v9473_v54  ;;  %2785 = vmatprep.mubr.bf16.mxu1 %v577_v4  ;;  %v528_v54 = vpack.c.bf16 %v353_v53, %v328_v50  ;;  %v455_v50 = vld [vmem:[%s14274_s0 + $0x488] sm:$0xff]  ;;  %v9508_v53 = vld [vmem:[%s14272_s2 + $0x5d0] sm:$0xff]  }
  0xae   :  { %2705 = vmatmul.mubr.bf16.vlgmr.msra.gmra.mxu0 %v524_v24  ;;  %9110 = vmatprep.subr.bf16.mxu1 %v9476_v57  ;;  %v599_v24 = vpack.c.bf16 %v499_v23, %v474_v22  ;;  %v356_v57 = vld [vmem:[%s14274_s0 + $0x170] sm:$0xff]  ;;  %v9501_v22 = vld [vmem:[%s14272_s2 + $0x5a8] sm:$0xff]  }
  0xaf   :  { %9065 = vmatpush3.bf16.msra.mxu0 %v9463_v29  ;;  %2712 = vmatprep.mubr.bf16.mxu0 %v550_v40  ;;  %v602_v29 = vpack.c.bf16 %v502_v27, %v477_v26  ;;  %v380_v23 = vld [vmem:[%s14274_s0 + $0x230] sm:$0xff]  ;;  %v9502_v27 = vld [vmem:[%s14272_s2 + $0x5e0] sm:$0xff]  }
  0xb0   :  { %9066 = vmatprep.subr.bf16.mxu0 %v9466_v35 }
  0xb1   :  { %9111 = vmatpush3.bf16.msra.mxu1 %v9477_v61 }
  0xb2   :  { %9112 = vmatprep.subr.bf16.mxu1 %v9480_v10  ;;  %v403_v10 = vld [vmem:[%s14274_s0 + $0x2e8] sm:$0xff] }
  0xb3   :  { %9067 = vmatpush3.bf16.msra.mxu0 %v9467_v36 }
  0xb4   :  { %9068 = vmatprep.subr.bf16.mxu0 %v9470_v45  ;;  %2786 = vmatmul.mubr.bf16.gmra.mxu1 %v576_v9  ;;  %v378_v9 = vld [vmem:[%s14274_s0 + $0x220] sm:$0xff] }
  0xb5   :  { %9113 = vmatpush3.bf16.msra.mxu1 %v9481_v12  ;;  %2793 = vmatprep.mubr.bf16.mxu1 %v602_v29  ;;  %v9503_v29 = vld [vmem:[%s14272_s2 + $0x628] sm:$0xff]  }
  0xb6   :  { %2713 = vmatmul.mubr.bf16.gmra.mxu0 %v549_v44  ;;  %9114 = vmatprep.subr.bf16.mxu1 %v9484_v16  ;;  %v9500_v16 = vld [vmem:[%s14272_s2 + $0x630] sm:$0xff]  }
  0xb7   :  { %9069 = vmatpush3.bf16.msra.mxu0 %v9471_v49  ;;  %2720 = vmatprep.mubr.bf16.mxu0 %v575_v60  ;;  %v9493_v49 = vld [vmem:[%s14272_s2 + $0x500] sm:$0xff]   ;;  %v9495_v60 = vld [vmem:[%s14272_s2 + $0x5b8] sm:$0xff]  }
  0xb8   :  { %9070 = vmatprep.subr.bf16.mxu0 %v9474_v55  ;;  %v9494_v55 = vld [vmem:[%s14272_s2 + $0x5f8] sm:$0xff]  }
  0xb9   :  { %9115 = vmatpush3.bf16.msra.mxu1 %v9485_v21 }
  0xba   :  { %9116 = vmatprep.subr.bf16.mxu1 %v9488_v34  ;;  %v428_v34 = vld [vmem:[%s14274_s0 + $0x3b0] sm:$0xff] }
  0xbb   :  { %9071 = vmatpush3.bf16.msra.mxu0 %v9475_v56  ;;  %v331_v56 = vld [vmem:[%s14274_s0 + $0xa8] sm:$0xff] }
  0xbc   :  { %9072 = vmatprep.subr.bf16.mxu0 %v9478_v1  ;;  %2794 = vmatmul.mubr.bf16.gmra.mxu1 %v601_v33  ;;  %v531_v59 = vpack.c.bf16 %v356_v57, %v331_v56  ;;  %v530_v1 = vpack.c.bf16 %v355_v63, %v330_v62  ;;  %v579_v33 = vpack.c.bf16 %v454_v32, %v429_v31  ;;  %v9510_v56 = vld [vmem:[%s14272_s2 + $0x590] sm:$0xff]   ;;  %v503_v63 = vld [vmem:[%s14274_s0 + $0x608] sm:$0xff] }
  0xbd   :  { %9117 = vmatpush3.bf16.msra.mxu1 %v9489_v37  ;;  %v332_v31 = vld [vmem:[%s14274_s0 + $0xb0] sm:$0xff] }
  0xbe   :  { %2721 = vmatmul.mubr.bf16.gmra.mxu0 %v574_v0  ;;  %9118 = vmatprep.subr.bf16.mxu1 %v9492_v43  ;;  %v431_v43 = vld [vmem:[%s14274_s0 + $0x3c8] sm:$0xff] }
  0xbf   :  { %9073 = vmatpush3.bf16.msra.mxu0 %v9479_v5  ;;  %2728 = vmatprep.mubr.bf16.mxu0 %v600_v20  ;;  %v9498_v5 = vld [vmem:[%s14272_s2 + $0x5b0] sm:$0xff]  }
  0xc0   :  { %9074 = vmatprep.subr.bf16.mxu0 %v9482_v13  ;;  %2899 = vmatprep.mubr.bf16.mxu1 %v531_v59  ;;  %v554_v13 = vpack.c.bf16 %v404_v8, %v379_v6  ;;  %v504_v59 = vld [vmem:[%s14274_s0 + $0x610] sm:$0xff]  ;;  %v481_v6 = vld [vmem:[%s14274_s0 + $0x558] sm:$0xff]  ;;  %v506_v8 = vld [vmem:[%s14274_s0 + $0x620] sm:$0xff] }
  0xc1   :  { %9119 = vmatpush3.bf16.msra.mxu1 %v9493_v49  ;;  %v430_v49 = vld [vmem:[%s14274_s0 + $0x3c0] sm:$0xff] }
  0xc2   :  { %9254 = vmatprep.subr.bf16.mxu1 %v9497_v3 }
  0xc3   :  { %9075 = vmatpush3.bf16.msra.mxu0 %v9483_v15  ;;  %v9499_v15 = vld [vmem:[%s14272_s2 + $0x5e8] sm:$0xff]  }
  0xc4   :  { %9076 = vmatprep.subr.bf16.mxu0 %v9486_v25  ;;  %2900 = vmatmul.mubr.bf16.vlgmr.msra.gmra.mxu1 %v530_v1  ;;  %v405_v25 = vld [vmem:[%s14274_s0 + $0x2f8] sm:$0xff] }
  0xc5   :  { %9255 = vmatpush3.bf16.msra.mxu1 %v9497_v3  ;;  %v555_v26 = vpack.c.bf16 %v405_v25, %v380_v23  ;;  %v9511_v3 = vld [vmem:[%s14272_s2 + $0x5c8] sm:$0xff]  }
  0xc6   :  { %2729 = vmatmul.mubr.bf16.gmra.mxu0 %v599_v24  ;;  %9256 = vmatprep.subr.bf16.mxu1 %v9500_v16  ;;  %v9515_v25 = vld [vmem:[%s14272_s2 + $0x608] sm:$0xff]  }
  0xc7   :  { %9077 = vmatpush3.bf16.msra.mxu0 %v9487_v30  ;;  %2834 = vmatprep.mubr.bf16.mxu0 %v529_v48  ;;  %v9504_v30 = vld [vmem:[%s14272_s2 + $0x5a0] sm:$0xff]   ;;  %v9507_v48 = vld [vmem:[%s14272_s2 + $0x598] sm:$0xff]  }
  0xc8   :  { %9078 = vmatprep.subr.bf16.mxu0 %v9490_v39  ;;  %v9505_v39 = vld [vmem:[%s14272_s2 + $0x5d8] sm:$0xff]  }
  0xc9   :  { %9257 = vmatpush3.bf16.msra.mxu1 %v9500_v16  ;;  %v505_v16 = vld [vmem:[%s14274_s0 + $0x618] sm:$0xff] }
  0xca   :  { %9258 = vmatprep.subr.bf16.mxu1 %v9503_v29 }
  0xcb   :  { %9079 = vmatpush3.bf16.msra.mxu0 %v9491_v42  ;;  %v9506_v42 = vld [vmem:[%s14272_s2 + $0x620] sm:$0xff]  }
  0xcc   :  { %9144 = vmatprep.subr.bf16.mxu0 %v9494_v55  ;;  %v9509_v55 = vld [vmem:[%s14272_s2 + $0x618] sm:$0xff]  }
  0xcd   :  { %9259 = vmatpush3.bf16.msra.mxu1 %v9503_v29  ;;  %v358_v29 = vld [vmem:[%s14274_s0 + $0x180] sm:$0xff] }
  0xce   :  { %2835 = vmatmul.mubr.bf16.vlgmr.msra.gmra.mxu0 %v528_v54  ;;  %9260 = vmatprep.subr.bf16.mxu1 %v9506_v42 }
  0xcf   :  { %9145 = vmatpush3.bf16.msra.mxu0 %v9495_v60  ;;  %2842 = vmatprep.mubr.bf16.mxu0 %v554_v13  ;;  %v478_v60 = vld [vmem:[%s14274_s0 + $0x540] sm:$0xff]  ;;  %v9513_v13 = vld [vmem:[%s14272_s2 + $0x588] sm:$0xff]  }
  0xd0   :  { %9146 = vmatprep.subr.bf16.mxu0 %v9496_v2  ;;  %v603_v2 = vpack.c.bf16 %v503_v63, %v478_v60  ;;  %v433_v63 = vld [vmem:[%s14274_s0 + $0x3d8] sm:$0xff] }
  0xd1   :  { %9261 = vmatpush3.bf16.msra.mxu1 %v9506_v42  ;;  %v359_v42 = vld [vmem:[%s14274_s0 + $0x188] sm:$0xff] }
  0xd2   :  { %9262 = vmatprep.subr.bf16.mxu1 %v9509_v55 }
  0xd3   :  { %9147 = vmatpush3.bf16.msra.mxu0 %v9498_v5  ;;  %v9512_v5 = vld [vmem:[%s14272_s2 + $0x610] sm:$0xff]  }
  0xd4   :  { %9148 = vmatprep.subr.bf16.mxu0 %v9499_v15  ;;  %v480_v15 = vld [vmem:[%s14274_s0 + $0x550] sm:$0xff] }
  0xd5   :  { %9263 = vmatpush3.bf16.msra.mxu1 %v9509_v55 }
  0xd6   :  { %9264 = vmatprep.subr.bf16.mxu1 %v9512_v5 }
  0xd7   :  { %9149 = vmatpush3.bf16.msra.mxu0 %v9501_v22  ;;  %v9514_v22 = vld [vmem:[%s14272_s2 + $0x5c0] sm:$0xff]  }
  0xd8   :  { %9150 = vmatprep.subr.bf16.mxu0 %v9502_v27 }
  0xd9   :  { %9265 = vmatpush3.bf16.msra.mxu1 %v9512_v5 }
  0xda   :  { %9266 = vmatprep.subr.bf16.mxu1 %v9515_v25 }
  0xdb   :  { %9151 = vmatpush3.bf16.msra.mxu0 %v9504_v30  ;;  %v8192_v30 = vld [vmem:[%s14275_s5] ss:$0 sm:$0xff] }
  0xdc   :  { %9152 = vmatprep.subr.bf16.mxu0 %v9505_v39  ;;  %v9517_v39 = vld [vmem:[%s14272_s2 + $0x600] sm:$0xff]  }
  0xdd   :  { %9267 = vmatpush3.bf16.msra.mxu1 %v9515_v25  ;;  %v484_v25 = vld [vmem:[%s14274_s0 + $0x570] sm:$0xff] }
  0xde   :  { %9268 = vmatprep.subr.bf16.mxu1 %v9517_v39 }
  0xdf   :  { %9153 = vmatpush3.bf16.msra.mxu0 %v9507_v48  ;;  %v11163_v48 = vld [vmem:[%s14276_s3] ss:$0 sm:$0xff] }
  0xe0   :  { %9154 = vmatprep.subr.bf16.mxu0 %v9508_v53 }
  0xe1   :  { %9269 = vmatpush3.bf16.msra.mxu1 %v9517_v39 }
  0xe2   :  { %v10863_v7 = vpop.f32.mrf.mxu0 }
  0xe3   :  { %9155 = vmatpush3.bf16.msra.mxu0 %v9510_v56 }
  0xe4   :  { %v10871_v11 = vpop.f32.mrf.mxu0  ;;  %v8720_v28 = vpop.f32.mrf.mxu1  ;;  %9156 = vmatprep.subr.bf16.mxu0 %v9511_v3 }
  0xe6   :  { %v8697_v14 = vpop.f32.mrf.mxu0  ;;  %v8721_v36 = vpop.f32.mrf.mxu1 }
  0xe7   :  { %v10926_v38 = vadd.f32 %v8721_v36, %v8720_v28  ;;  %v553_v14 = vpack.c.bf16 %v403_v10, %v378_v9  ;;  %v453_v36 = vld [vmem:[%s14274_s0 + $0x478] sm:$0xff]  ;;  %9157 = vmatpush3.bf16.msra.mxu0 %v9513_v13 }
  0xe8   :  { %v8698_v19 = vpop.f32.mrf.mxu0  ;;  %v10931_v41 = vpop.f32.mrf.mxu1  ;;  %v578_v37 = vpack.c.bf16 %v453_v36, %v428_v34  ;;  %9158 = vmatprep.subr.bf16.mxu0 %v9514_v22  ;;  %v357_v34 = vld [vmem:[%s14274_s0 + $0x178] sm:$0xff] }
  0xe9   :  { %v406_v19 = vld [vmem:[%s14274_s0 + $0x300] sm:$0xff]  ;;  %2843 = vmatmul.mubr.bf16.gmra.mxu0 %v553_v14  ;;  %v2252_v56 = vadd.f32 %v10926_v38, %v11163_v48 }
  0xea   :  { %v10939_v45 = vpop.f32.mrf.mxu1  ;;  %v556_v21 = vpack.c.bf16 %v406_v19, %v381_v18  ;;  %2850 = vmatprep.mubr.bf16.mxu0 %v579_v33  ;;  %v8696_v19 = vadd.f32 %v10871_v11, %v10863_v7  ;;  %v9516_v7 = vld [vmem:[%s14272_s2 + $0x580] sm:$0xff]   ;;  %v333_v11 = vld [vmem:[%s14274_s0 + $0xb8] sm:$0xff] }
  0xeb   :  { %9159 = vmatpush3.bf16.msra.mxu0 %v9516_v7  ;;  %v533_v32 = vpack.c.bf16 %v358_v29, %v333_v11  ;;  %v458_v38 = vld [vmem:[%s14274_s0 + $0x4a0] sm:$0xff] }
  0xec   :  { %v8726_v52 = vpop.f32.mrf.mxu1  ;;  %2907 = vmatprep.mubr.bf16.mxu1 %v556_v21  ;;  %v605_v21 = vpack.c.bf16 %v505_v16, %v480_v15  ;;  %v258_v33 = vadd.f32 %v8696_v19, %v8192_v30 }
  0xed   :  { %2908 = vmatmul.mubr.bf16.gmra.mxu1 %v555_v26 }
  0xee   :  { %v10921_v35 = vpop.f32.mrf.mxu0  ;;  %v8727_v58 = vpop.f32.mrf.mxu1 }
  0xef   :  { %v10968_v61 = vadd.f32 %v8727_v58, %v8726_v52  ;;  %v580_v52 = vpack.c.bf16 %v455_v50, %v430_v49  ;;  %v479_v58 = vld [vmem:[%s14274_s0 + $0x548] sm:$0xff]  ;;  %v384_v49 = vld [vmem:[%s14274_s0 + $0x250] sm:$0xff]  ;;  %v409_v50 = vld [vmem:[%s14274_s0 + $0x318] sm:$0xff] }
  0xf0   :  { %v9252_v40 = vpop.f32.mrf.mxu0  ;;  %v10976_v0 = vpop.f32.mrf.mxu1  ;;  %v604_v62 = vpack.c.bf16 %v504_v59, %v479_v58  ;;  %v559_v58 = vpack.c.bf16 %v409_v50, %v384_v49  ;;  %v407_v59 = vld [vmem:[%s14274_s0 + $0x308] sm:$0xff] }
  0xf1   :  { %2851 = vmatmul.mubr.bf16.gmra.mxu0 %v578_v37  ;;  %v532_v37 = vpack.c.bf16 %v357_v34, %v332_v31  ;;  %v2260_v5 = vadd.f32 %v10968_v61, %v11163_v48  ;;  %v432_v31 = vld [vmem:[%s14274_s0 + $0x3d0] sm:$0xff]  ;;  %v483_v34 = vld [vmem:[%s14274_s0 + $0x568] sm:$0xff] }
  0xf2   :  { %v300_v44 = vpop.f32.mrf.mxu0  ;;  %v10984_v4 = vpop.f32.mrf.mxu1  ;;  %2858 = vmatprep.mubr.bf16.mxu0 %v604_v62 }
  0xf3   :  { %v456_v44 = vld [vmem:[%s14274_s0 + $0x490] sm:$0xff] }
  0xf4   :  { %v9253_v51 = vpop.f32.mrf.mxu0  ;;  %v8732_v12 = vpop.f32.mrf.mxu1  ;;  %v581_v47 = vpack.c.bf16 %v456_v44, %v431_v43  ;;  %v8725_v43 = vadd.f32 %v10939_v45, %v10931_v41  ;;  %v8731_v41 = vadd.f32 %v10984_v4, %v10976_v0  ;;  %v408_v45 = vld [vmem:[%s14274_s0 + $0x310] sm:$0xff]  ;;  %v382_v4 = vld [vmem:[%s14274_s0 + $0x240] sm:$0xff] }
  0xf6   :  { %v8733_v17 = vpop.f32.mrf.mxu1  ;;  %2915 = vmatprep.mubr.bf16.mxu1 %v581_v47  ;;  %v2255_v62 = vadd.f32 %v8725_v43, %v11163_v48 }
  0xf7   :  { %v11013_v20 = vadd.f32 %v8733_v17, %v8732_v12  ;;  %2916 = vmatmul.mubr.bf16.gmra.mxu1 %v580_v52  ;;  %v606_v12 = vpack.c.bf16 %v506_v8, %v481_v6  ;;  %v2263_v6 = vadd.f32 %v8731_v41, %v11163_v48  ;;  %v459_v8 = vld [vmem:[%s14274_s0 + $0x4a8] sm:$0xff] }
  0xf8   :  { %v11021_v24 = vpop.f32.mrf.mxu1 }
  0xf9   :  { %2859 = vmatmul.mubr.bf16.gmra.mxu0 %v603_v2  ;;  %2923 = vmatprep.mubr.bf16.mxu1 %v606_v12  ;;  %v557_v12 = vpack.c.bf16 %v407_v59, %v382_v4 }
  0xfa   :  { %v11029_v28 = vpop.f32.mrf.mxu1  ;;  %2964 = vmatprep.mubr.bf16.mxu0 %v533_v32  ;;  %v457_v32 = vld [vmem:[%s14274_s0 + $0x498] sm:$0xff] }
  0xfc   :  { %v8738_v40 = vpop.f32.mrf.mxu1 }
  0xfe   :  { %v8739_v46 = vpop.f32.mrf.mxu1 }
  0xff   :  { %v11070_v51 = vadd.f32 %v8739_v46, %v8738_v40  ;;  %2924 = vmatmul.mubr.bf16.gmra.mxu1 %v605_v21  ;;  %v334_v40 = vld [vmem:[%s14274_s0 + $0xc0] sm:$0xff]  ;;  %v298_v46 = vadd.f32 %v10921_v35, %v258_v33  ;;  %v383_v35 = vld [vmem:[%s14274_s0 + $0x248] sm:$0xff] }
 0x100   :  { %v11075_v54 = vpop.f32.mrf.mxu1  ;;  %v534_v47 = vpack.c.bf16 %v359_v42, %v334_v40  ;;  %v558_v0 = vpack.c.bf16 %v408_v45, %v383_v35  ;;  %v2268_v40 = vadd.f32 %v11013_v20, %v11163_v48  ;;  %v8737_v42 = vadd.f32 %v11029_v28, %v11021_v24  ;;  %v482_v20 = vld [vmem:[%s14274_s0 + $0x560] sm:$0xff]  ;;  %v507_v24 = vld [vmem:[%s14274_s0 + $0x628] sm:$0xff] }
 0x101   :  { %2965 = vmatmul.mubr.bf16.vlgmr.msra.gmra.mxu0 %v532_v37  ;;  %v303_v55 = vmax.f32 %v298_v46, 0.0  ;;  %v607_v59 = vpack.c.bf16 %v507_v24, %v482_v20 }
 0x102   :  { %v11083_v57 = vpop.f32.mrf.mxu1  ;;  %9270 = vmatprep.mubr.bf16.mxu1 %v534_v47  ;;  %2972 = vmatprep.mubr.bf16.mxu0 %v558_v0  ;;  %v2271_v45 = vadd.f32 %v8737_v42, %v11163_v48 }
 0x103   :  { %305 = vst.msk [vmem:[#allocation2] sm:$0xff] %vm304_vm3, %v303_v55 }
 0x104   :  { %v8800_v10 = vpop.f32.mrf.mxu1 }
 0x106   :  { %v8801_v18 = vpop.f32.mrf.mxu1 }
 0x107   :  { %v11125_v23 = vadd.f32 %v8801_v18, %v8800_v10  ;;  %9271 = vmatmul.mubr.bf16.vlgmr.msra.gmra.mxu1 %v559_v58  ;;  %v583_v18 = vpack.c.bf16 %v458_v38, %v433_v63  ;;  %v2276_v63 = vadd.f32 %v11070_v51, %v11163_v48  ;;  %v8743_v38 = vadd.f32 %v11083_v57, %v11075_v54 }
 0x108   :  { %v8803_v27 = vpop.f32.mrf.mxu1 }
 0x109   :  { %2973 = vmatmul.mubr.bf16.gmra.mxu0 %v557_v12 }
 0x10a   :  { %v8804_v36 = vpop.f32.mrf.mxu1  ;;  %2980 = vmatprep.mubr.bf16.mxu0 %v583_v18 }
 0x10b   :  { %v8805_v2 = vadd.f32 %v8804_v36, %v8803_v27  ;;  %v508_v36 = vld [vmem:[%s14274_s0 + $0x630] sm:$0xff] }
 0x10c   :  { %v8806_v60 = vpop.f32.mrf.mxu1  ;;  %v608_v49 = vpack.c.bf16 %v508_v36, %v483_v34 }
 0x10e   :  { %v8760_v1 = vpop.f32.mrf.mxu0  ;;  %v8807_v10 = vpop.f32.mrf.mxu1 }
 0x10f   :  { %v8808_v61 = vadd.f32 %v8807_v10, %v8806_v60  ;;  %v2279_v10 = vadd.f32 %v8743_v38, %v11163_v48 }
 0x110   :  { %v8761_v9 = vpop.f32.mrf.mxu0  ;;  %v8809_v22 = vpop.f32.mrf.mxu1 }
 0x111   :  { %v11112_v14 = vadd.f32 %v8761_v9, %v8760_v1  ;;  %v434_v1 = vld [vmem:[%s14274_s0 + $0x3e0] sm:$0xff] }
 0x112   :  { %v8763_v17 = vpop.f32.mrf.mxu0  ;;  %v584_v13 = vpack.c.bf16 %v459_v8, %v434_v1  ;;  %v8810_v11 = vpop.f32.mrf.mxu1 }
 0x113   :  { %v2317_v9 = vadd.f32 %v11112_v14, %v2252_v56  ;;  %v509_v14 = vld [vmem:[%s14274_s0 + $0x638] sm:$0xff]  ;;  %v8811_v30 = vadd.f32 %v8810_v11, %v8809_v22 }
 0x114   :  { %v8764_v26 = vpop.f32.mrf.mxu0  ;;  %9274 = vmatprep.mubr.bf16.mxu1 %v584_v13  ;;  %v609_v33 = vpack.c.bf16 %v509_v14, %v484_v25  ;;  %v8812_v46 = vpop.f32.mrf.mxu1 }
 0x115   :  { %v8765_v52 = vadd.f32 %v8764_v26, %v8763_v17  ;;  %v11206_v19 = vadd.f32 %v11125_v23, %v2317_v9 }
 0x116   :  { %v8766_v44 = vpop.f32.mrf.mxu0  ;;  %9275 = vmatmul.mubr.bf16.gmra.mxu1 %v609_v33  ;;  %v8813_v41 = vpop.f32.mrf.mxu1 }
 0x117   :  { %v2320_v15 = vadd.f32 %v8765_v52, %v2255_v62  ;;  %v8814_v52 = vadd.f32 %v8813_v41, %v8812_v46 }
 0x118   :  { %v8767_v53 = vpop.f32.mrf.mxu0  ;;  %v8815_v55 = vpop.f32.mrf.mxu1 }
 0x119   :  { %v8768_v16 = vadd.f32 %v8767_v53, %v8766_v44  ;;  %v11214_v26 = vadd.f32 %v8805_v2, %v2320_v15  ;;  %v582_v44 = vpack.c.bf16 %v457_v32, %v432_v31 }
 0x11a   :  { %v8769_v3 = vpop.f32.mrf.mxu0  ;;  %v8816_v58 = vpop.f32.mrf.mxu1 }
 0x11b   :  { %v2325_v27 = vadd.f32 %v8768_v16, %v2260_v5  ;;  %2981 = vmatmul.mubr.bf16.gmra.mxu0 %v582_v44  ;;  %v8817_v4 = vadd.f32 %v8816_v58, %v8815_v55 }
 0x11c   :  { %v8770_v17 = vpop.f32.mrf.mxu0  ;;  %2988 = vmatprep.mubr.bf16.mxu0 %v608_v49  ;;  %v8818_v2 = vpop.f32.mrf.mxu1 }
 0x11d   :  { %v8771_v21 = vadd.f32 %v8770_v17, %v8769_v3  ;;  %v11216_v23 = vadd.f32 %v8808_v61, %v2325_v27 }
 0x11e   :  { %v8772_v29 = vpop.f32.mrf.mxu0 }
 0x11f   :  { %v2328_v7 = vadd.f32 %v8771_v21, %v2263_v6  ;;  %v8819_v6 = vpop.f32.mrf.mxu1 }
 0x120   :  { %v8773_v39 = vpop.f32.mrf.mxu0  ;;  %v8820_v8 = vadd.f32 %v8819_v6, %v8818_v2 }
 0x121   :  { %v11230_v37 = vadd.f32 %v8811_v30, %v2328_v7  ;;  %v8774_v43 = vadd.f32 %v8773_v39, %v8772_v29  ;;  %v8821_v13 = vpop.f32.mrf.mxu1 }
 0x122   :  { %v8775_v47 = vpop.f32.mrf.mxu0 }
 0x123   :  { %v2333_v50 = vadd.f32 %v8774_v43, %v2268_v40  ;;  %2989 = vmatmul.mubr.bf16.gmra.mxu0 %v607_v59  ;;  %v8822_v17 = vpop.f32.mrf.mxu1 }
 0x124   :  { %v8776_v35 = vpop.f32.mrf.mxu0  ;;  %v8823_v18 = vadd.f32 %v8822_v17, %v8821_v13 }
 0x125   :  { %v8777_v53 = vadd.f32 %v8776_v35, %v8775_v47  ;;  %v11243_v28 = vadd.f32 %v8814_v52, %v2333_v50  ;;  %v8880_v57 = vpop.f32.mrf.mxu1 }
 0x126   :  { %v8778_v0 = vpop.f32.mrf.mxu0 }
 0x127   :  { %v2336_v56 = vadd.f32 %v8777_v53, %v2271_v45  ;;  %v8881_v14 = vpop.f32.mrf.mxu1 }
 0x128   :  { %v8779_v62 = vpop.f32.mrf.mxu0  ;;  %v8882_v27 = vadd.f32 %v8881_v14, %v8880_v57 }
 0x129   :  { %v11245_v60 = vadd.f32 %v8817_v4, %v2336_v56  ;;  %v8780_v1 = vadd.f32 %v8779_v62, %v8778_v0  ;;  %v8883_v29 = vpop.f32.mrf.mxu1 }
 0x12a   :  { %v8781_v3 = vpop.f32.mrf.mxu0 }
 0x12b   :  { %v2341_v5 = vadd.f32 %v8780_v1, %v2276_v63  ;;  %v8884_v31 = vpop.f32.mrf.mxu1 }
 0x12c   :  { %v8782_v9 = vpop.f32.mrf.mxu0  ;;  %v8885_v33 = vadd.f32 %v8884_v31, %v8883_v29 }
 0x12d   :  { %v8783_v12 = vadd.f32 %v8782_v9, %v8781_v3  ;;  %v2406_v15 = vadd.f32 %v8820_v8, %v2341_v5  ;;  %v8886_v40 = vpop.f32.mrf.mxu1 }
 0x12e   :  { %v8840_v51 = vpop.f32.mrf.mxu0 }
 0x12f   :  { %v2344_v16 = vadd.f32 %v8783_v12, %v2279_v10  ;;  %v8887_v44 = vpop.f32.mrf.mxu1 }
 0x130   :  { %v8841_v21 = vpop.f32.mrf.mxu0  ;;  %v8888_v46 = vadd.f32 %v8887_v44, %v8886_v40 }
 0x131   :  { %v2409_v61 = vadd.f32 %v8823_v18, %v2344_v16  ;;  %v8842_v54 = vadd.f32 %v8841_v21, %v8840_v51  ;;  %v8889_v49 = vpop.f32.mrf.mxu1 }
 0x132   :  { %v8843_v22 = vpop.f32.mrf.mxu0 }
 0x133   :  { %v2447_v25 = vadd.f32 %v8842_v54, %v11206_v19  ;;  %v8890_v35 = vpop.f32.mrf.mxu1 }
 0x134   :  { %v8844_v7 = vpop.f32.mrf.mxu0  ;;  %v8891_v45 = vadd.f32 %v8890_v35, %v8889_v49 }
 0x135   :  { %v8845_v11 = vadd.f32 %v8844_v7, %v8843_v22  ;;  %v2512_v48 = vadd.f32 %v8882_v27, %v2447_v25  ;;  %v8892_v20 = vpop.f32.mrf.mxu1 }
 0x136   :  { %v8846_v32 = vpop.f32.mrf.mxu0 }
 0x137   :  { %v2450_v30 = vadd.f32 %v8845_v11, %v11214_v26  ;;  %v8893_v58 = vpop.f32.mrf.mxu1 }
 0x138   :  { %v8847_v36 = vpop.f32.mrf.mxu0 }
 0x139   :  { %v2515_v34 = vadd.f32 %v8885_v33, %v2450_v30  ;;  %v8848_v39 = vadd.f32 %v8847_v36, %v8846_v32  ;;  %v8895_v59 = vpop.f32.mrf.mxu1 }
 0x13a   :  { %v8849_v42 = vpop.f32.mrf.mxu0 }
 0x13b   :  { %v2455_v43 = vadd.f32 %v8848_v39, %v11216_v23  ;;  %v8894_v23 = vadd.f32 %v8893_v58, %v8892_v20  ;;  %v8896_v38 = vpop.f32.mrf.mxu1 }
 0x13c   :  { %v8850_v19 = vpop.f32.mrf.mxu0 }
 0x13d   :  { %v8851_v47 = vadd.f32 %v8850_v19, %v8849_v42  ;;  %v2520_v50 = vadd.f32 %v8888_v46, %v2455_v43  ;;  %v8898_v6 = vpop.f32.mrf.mxu1 }
 0x13e   :  { %v8852_v26 = vpop.f32.mrf.mxu0 }
 0x13f   :  { %v2458_v41 = vadd.f32 %v8851_v47, %v11230_v37  ;;  %v8897_v37 = vadd.f32 %v8896_v38, %v8895_v59  ;;  %v8899_v10 = vpop.f32.mrf.mxu1 }
 0x140   :  { %v8853_v53 = vpop.f32.mrf.mxu0  ;;  %v8900_v12 = vadd.f32 %v8899_v10, %v8898_v6 }
 0x141   :  { %v2523_v52 = vadd.f32 %v8891_v45, %v2458_v41  ;;  %v8854_v55 = vadd.f32 %v8853_v53, %v8852_v26  ;;  %v8901_v16 = vpop.f32.mrf.mxu1 }
 0x142   :  { %v8855_v24 = vpop.f32.mrf.mxu0 }
 0x143   :  { %v2463_v56 = vadd.f32 %v8854_v55, %v11243_v28  ;;  %v8902_v51 = vpop.f32.mrf.mxu1 }
 0x144   :  { %v8856_v0 = vpop.f32.mrf.mxu0  ;;  %v8903_v21 = vadd.f32 %v8902_v51, %v8901_v16  ;;  %v3734_v16 = vld [vmem:[%s14277_s6 + $0xc0] sm:$0xff] }
 0x145   :  { %v8857_v4 = vadd.f32 %v8856_v0, %v8855_v24  ;;  %v2528_v62 = vadd.f32 %v8894_v23, %v2463_v56  ;;  %v8960_v25 = vpop.f32.mrf.mxu1 }
 0x146   :  { %v8858_v1 = vpop.f32.mrf.mxu0 }
 0x147   :  { %v2466_v63 = vadd.f32 %v8857_v4, %v11245_v60  ;;  %v8961_v7 = vpop.f32.mrf.mxu1 }
 0x148   :  { %v8859_v3 = vpop.f32.mrf.mxu0  ;;  %v8962_v11 = vadd.f32 %v8961_v7, %v8960_v25  ;;  %v3727_v7 = vld [vmem:[%s14277_s6 + $0x88] sm:$0xff] }
 0x149   :  { %v2531_v2 = vadd.f32 %v8897_v37, %v2466_v63  ;;  %v8860_v5 = vadd.f32 %v8859_v3, %v8858_v1  ;;  %v8963_v30 = vpop.f32.mrf.mxu1 }
 0x14a   :  { %v8861_v8 = vpop.f32.mrf.mxu0 }
 0x14b   :  { %v2471_v9 = vadd.f32 %v8860_v5, %v2406_v15  ;;  %v8964_v33 = vpop.f32.mrf.mxu1 }
 0x14c   :  { %v8862_v28 = vpop.f32.mrf.mxu0  ;;  %v8965_v36 = vadd.f32 %v8964_v33, %v8963_v30 }
 0x14d   :  { %v8863_v13 = vadd.f32 %v8862_v28, %v8861_v8  ;;  %v11258_v17 = vadd.f32 %v8900_v12, %v2471_v9  ;;  %v8966_v43 = vpop.f32.mrf.mxu1  ;;  %v3735_v9 = vld [vmem:[%s14277_s6 + $0xc8] sm:$0xff] }
 0x14e   :  { %v8920_v60 = vpop.f32.mrf.mxu0 }
 0x14f   :  { %v2474_v18 = vadd.f32 %v8863_v13, %v2409_v61  ;;  %v8967_v46 = vpop.f32.mrf.mxu1 }
 0x150   :  { %v8921_v57 = vpop.f32.mrf.mxu0 }
 0x151   :  { %v11260_v54 = vadd.f32 %v8903_v21, %v2474_v18  ;;  %v8922_v22 = vadd.f32 %v8921_v57, %v8920_v60  ;;  %v8969_v41 = vpop.f32.mrf.mxu1  ;;  %v3738_v18 = vld [vmem:[%s14277_s6 + $0xe0] sm:$0xff] }
 0x152   :  { %v8923_v14 = vpop.f32.mrf.mxu0  ;;  %v8439_v60 = vcombine.high %v3734_v16, %v3738_v18  ;;  %v8438_v25 = vcombine.low %v3734_v16, %v3738_v18 }
 0x153   :  { %v2577_v27 = vadd.f32 %v8922_v22, %v2512_v48  ;;  %v8968_v48 = vadd.f32 %v8967_v46, %v8966_v43  ;;  %v8970_v45 = vpop.f32.mrf.mxu1  ;;  %v3718_v46 = vld [vmem:[%s14277_s6 + $0x40] sm:$0xff] }
 0x154   :  { %v8924_v15 = vpop.f32.mrf.mxu0  ;;  %3965 = vmatprep.subr.bf16.mxu1 %v8439_v60 }
 0x155   :  { %v8925_v29 = vadd.f32 %v8924_v15, %v8923_v14  ;;  %v11262_v31 = vadd.f32 %v8962_v11, %v2577_v27  ;;  %v8972_v56 = vpop.f32.mrf.mxu1  ;;  %v3731_v15 = vld [vmem:[%s14277_s6 + $0xa8] sm:$0xff]  ;;  %3966 = vmatpush1.bf16.msra.mxu1 %v8438_v25  ;;  %v3726_v11 = vld [vmem:[%s14277_s6 + $0x80] sm:$0xff] }
 0x156   :  { %v8926_v61 = vpop.f32.mrf.mxu0  ;;  %v8433_v30 = vcombine.high %v3727_v7, %v3731_v15 }
 0x157   :  { %v2580_v32 = vadd.f32 %v8925_v29, %v2515_v34  ;;  %v8971_v34 = vadd.f32 %v8970_v45, %v8969_v41  ;;  %v8973_v0 = vpop.f32.mrf.mxu1  ;;  %v3722_v41 = vld [vmem:[%s14277_s6 + $0x60] sm:$0xff]  ;;  %v3715_v45 = vld [vmem:[%s14277_s6 + $0x28] sm:$0xff] }
 0x158   :  { %v8927_v40 = vpop.f32.mrf.mxu0 }
 0x159   :  { %v11264_v39 = vadd.f32 %v8965_v36, %v2580_v32  ;;  %v8928_v42 = vadd.f32 %v8927_v40, %v8926_v61  ;;  %v8975_v63 = vpop.f32.mrf.mxu1  ;;  %v3730_v32 = vld [vmem:[%s14277_s6 + $0xa0] sm:$0xff]  ;;  %v8432_v61 = vcombine.low %v3727_v7, %v3731_v15 }
 0x15a   :  { %v8929_v44 = vpop.f32.mrf.mxu0  ;;  %v8430_v36 = vcombine.low %v3726_v11, %v3730_v32  ;;  %v8431_v40 = vcombine.high %v3726_v11, %v3730_v32 }
 0x15b   :  { %v2585_v19 = vadd.f32 %v8928_v42, %v2520_v50  ;;  %v8974_v50 = vadd.f32 %v8973_v0, %v8972_v56  ;;  %v8976_v1 = vpop.f32.mrf.mxu1  ;;  %v3710_v56 = vld [vmem:[%s14277_s6] sm:$0xff] }
 0x15c   :  { %v8930_v47 = vpop.f32.mrf.mxu0  ;;  %v8977_v3 = vadd.f32 %v8976_v1, %v8975_v63  ;;  %3967 = vmatprep.subr.bf16.mxu1 %v8431_v40 }
 0x15d   :  { %v8931_v49 = vadd.f32 %v8930_v47, %v8929_v44  ;;  %v11266_v35 = vadd.f32 %v8968_v48, %v2585_v19  ;;  %v8978_v10 = vpop.f32.mrf.mxu1  ;;  %v3719_v44 = vld [vmem:[%s14277_s6 + $0x48] sm:$0xff]  ;;  %3968 = vmatpush1.bf16.msra.mxu1 %v8430_v36 }
 0x15e   :  { %v8932_v53 = vpop.f32.mrf.mxu0  ;;  %v3723_v19 = vld [vmem:[%s14277_s6 + $0x68] sm:$0xff] }
 0x15f   :  { %v2588_v26 = vadd.f32 %v8931_v49, %v2523_v52  ;;  %v8979_v51 = vpop.f32.mrf.mxu1  ;;  %v8424_v47 = vcombine.low %v3719_v44, %v3723_v19  ;;  %v8425_v49 = vcombine.high %v3719_v44, %v3723_v19 }
 0x160   :  { %v8933_v20 = vpop.f32.mrf.mxu0  ;;  %v8980_v57 = vadd.f32 %v8979_v51, %v8978_v10  ;;  %v11370_v10 = vld [vmem:[%s14277_s6 + $0xf8] sm:$0xff] }
 0x161   :  { %v11268_v55 = vadd.f32 %v8971_v34, %v2588_v26  ;;  %v8934_v24 = vadd.f32 %v8933_v20, %v8932_v53  ;;  %v8981_v14 = vpop.f32.mrf.mxu1  ;;  %v3711_v26 = vld [vmem:[%s14277_s6 + $0x8] sm:$0xff]  ;;  %v8422_v53 = vcombine.low %v3718_v46, %v3722_v41  ;;  %v8423_v20 = vcombine.high %v3718_v46, %v3722_v41  ;;  %14570 = vst [vmem:[#allocation11_spill] sm:$0xff] %v11370_v10 }
 0x162   :  { %v8935_v58 = vpop.f32.mrf.mxu0 }
 0x163   :  { %v2593_v23 = vadd.f32 %v8934_v24, %v2528_v62  ;;  %v3739_v62 = vld [vmem:[%s14277_s6 + $0xe8] sm:$0xff]  ;;  %v8982_v29 = vpop.f32.mrf.mxu1  ;;  %v8417_v24 = vcombine.high %v3711_v26, %v3715_v45  ;;  %3969 = vmatprep.subr.bf16.mxu1 %v8423_v20 }
 0x164   :  { %v8936_v4 = vpop.f32.mrf.mxu0  ;;  %v8440_v28 = vcombine.low %v3735_v9, %v3739_v62  ;;  %v8441_v13 = vcombine.high %v3735_v9, %v3739_v62  ;;  %3970 = vmatpush1.bf16.msra.mxu1 %v8422_v53  ;;  %v9829_v53 = vmov 1966171168  }
 0x165   :  { %v8937_v59 = vadd.f32 %v8936_v4, %v8935_v58  ;;  %v11270_v38 = vadd.f32 %v8974_v50, %v2593_v23  ;;  %v11317_v48 = vpop.f32.mrf.mxu1  ;;  %v3714_v58 = vld [vmem:[%s14277_s6 + $0x20] sm:$0xff]  ;;  %v14286_v23 = vmov 0   ;;  %v8416_v4 = vcombine.low %v3711_v26, %v3715_v45 }
 0x166   :  { %v8938_v52 = vpop.f32.mrf.mxu0  ;;  %4038 = vmatprep.subr.bf16.mxu0 %v8441_v13  ;;  %3989 = vmatprep.mubr.bf16.mxu1 %v14286_v23  ;;  %v8415_v50 = vcombine.high %v3710_v56, %v3714_v58  ;;  %v3074_v20 = vunpack.c.l.s4 %v9829_v53 }
 0x167   :  { %v2596_v37 = vadd.f32 %v8937_v59, %v2531_v2  ;;  %4039 = vmatpush1.bf16.msra.mxu0 %v8440_v28  ;;  %v11337_v0 = vpop.f32.mrf.mxu1  ;;  %4062 = vmatprep.mubr.bf16.mxu0 %v14286_v23  ;;  %v3070_v23 = vld [vmem:[#allocation2] sm:$0xff] }
 0x168   :  { %v8939_v6 = vpop.f32.mrf.mxu0  ;;  %4040 = vmatprep.subr.bf16.mxu0 %v8433_v30  ;;  %3971 = vmatprep.subr.bf16.mxu1 %v8415_v50 }
 0x169   :  { %v11272_v5 = vadd.f32 %v8977_v3, %v2596_v37  ;;  %v8940_v8 = vadd.f32 %v8939_v6, %v8938_v52  ;;  %v11342_v63 = vpop.f32.mrf.mxu1  ;;  %v8414_v37 = vcombine.low %v3710_v56, %v3714_v58  ;;  %v11349_v52 = vld [vmem:[%s14277_s6 + $0xd0] sm:$0xff]  ;;  %v11359_v6 = vld [vmem:[%s14277_s6 + $0xd8] sm:$0xff] }
 0x16a   :  { %v8941_v12 = vpop.f32.mrf.mxu0  ;;  %14567 = vst [vmem:[#allocation8_spill] sm:$0xff] %v11349_v52  ;;  %v11354_v3 = vld [vmem:[%s14277_s6 + $0xf0] sm:$0xff]  ;;  %14569 = vst [vmem:[#allocation10_spill] sm:$0xff] %v11359_v6  ;;  %v8445_v28 = vcombine.high %v11359_v6, %v11370_v10 }
 0x16b   :  { %v2601_v2 = vadd.f32 %v8940_v8, %v11258_v17  ;;  %4041 = vmatpush1.bf16.msra.mxu0 %v8432_v61  ;;  %v11344_v1 = vpop.f32.mrf.mxu1  ;;  %14568 = vst [vmem:[#allocation9_spill] sm:$0xff] %v11354_v3  ;;  %3972 = vmatpush1.bf16.msra.mxu1 %v8414_v37  ;;  %v8443_v62 = vcombine.high %v11349_v52, %v11354_v3  ;;  %v3075_v37 = vunpack.c.0.s8 %v3074_v20 }
 0x16c   :  { %v8942_v21 = vpop.f32.mrf.mxu0  ;;  %4042 = vmatprep.subr.bf16.mxu0 %v8425_v49  ;;  %v3072_v52 = vcombine.high %v3070_v23, %v3070_v23 }
 0x16d   :  { %v8943_v22 = vadd.f32 %v8942_v21, %v8941_v12  ;;  %v11287_v27 = vadd.f32 %v8980_v57, %v2601_v2  ;;  %4111 = vmatprep.subr.bf16.mxu1 %v8443_v62  ;;  %v11378_v2 = vpop.f32.mrf.mxu1 }
 0x16e   :  { %v11302_v33 = vpop.f32.mrf.mxu0 }
 0x16f   :  { %v2604_v17 = vadd.f32 %v8943_v22, %v11260_v54  ;;  %v8983_v54 = vadd.f32 %v8982_v29, %v8981_v14  ;;  %4043 = vmatpush1.bf16.msra.mxu0 %v8424_v47  ;;  %v11382_v18 = vpop.f32.mrf.mxu1 }
 0x170   :  { %v11306_v43 = vpop.f32.mrf.mxu0  ;;  %4044 = vmatprep.subr.bf16.mxu0 %v8417_v24  ;;  %v14288_v24 = vlaneseq }
 0x171   :  { %v11304_v42 = vadd.f32 %v8983_v54, %v2604_v17  ;;  %v11386_v21 = vpop.f32.mrf.mxu1 }
 0x172   :  { %v11328_v34 = vpop.f32.mrf.mxu0  ;;  %v11434_v62 = vshrl.u32 %v14288_v24, 7 }
 0x173   :  { %4045 = vmatpush1.bf16.msra.mxu0 %v8416_v4  ;;  %v11390_v57 = vpop.f32.mrf.mxu1 }
 0x174   :  { %v11340_v59 = vpop.f32.mrf.mxu0  ;;  %4184 = vmatprep.subr.bf16.mxu0 %v8445_v28  ;;  %14572 = vst [vmem:[#allocation13_spill] sm:$0xff] %v11434_v62  ;;  %v11445_v53 = vsub.s32 %v3075_v37, %v11434_v62  ;;  %v9002_v37 = vadd.f32 %v11306_v43, %v11302_v33  ;;  %v11480_v43 = vsub.s32 0, %v11434_v62 }
 0x175   :  { %v11394_v25 = vpop.f32.mrf.mxu1 }
 0x176   :  { %v11361_v8 = vpop.f32.mrf.mxu0  ;;  %14574 = vst [vmem:[#allocation15_spill] sm:$0xff] %v11445_v53  ;;  %v3079_v10 = vrot.slane %v3070_v23, %v11445_v53  ;;  %v9042_v23 = vadd.f32 %v11337_v0, %v11317_v48 }
 0x177   :  { %v11396_v17 = vpop.f32.mrf.mxu1 }
 0x178   :  { %v11376_v13 = vpop.f32.mrf.mxu0 }
 0x179   :  { %v11398_v11 = vpop.f32.mrf.mxu1 }
 0x17a   :  { %v11380_v16 = vpop.f32.mrf.mxu0 }
 0x17b   :  { %v11403_v30 = vpop.f32.mrf.mxu1 }
 0x17c   :  { %v11384_v51 = vpop.f32.mrf.mxu0 }
 0x17d   :  { %v11409_v61 = vpop.f32.mrf.mxu1 }
 0x17e   :  { %v11388_v60 = vpop.f32.mrf.mxu0 }
 0x17f   :  { %v11413_v40 = vpop.f32.mrf.mxu1 }
 0x180   :  { %v11392_v22 = vpop.f32.mrf.mxu0 }
 0x181   :  { %v11417_v19 = vpop.f32.mrf.mxu1 }
 0x182   :  { %v9015_v14 = vpop.f32.mrf.mxu0 }
 0x183   :  { %v11419_v46 = vpop.f32.mrf.mxu1 }
 0x184   :  { %v9016_v7 = vpop.f32.mrf.mxu0 }
 0x185   :  { %v9017_v15 = vadd.f32 %v9016_v7, %v9015_v14  ;;  %v11421_v49 = vpop.f32.mrf.mxu1 }
 0x186   :  { %v11405_v32 = vpop.f32.mrf.mxu0 }
 0x187   :  { %v11401_v29 = vadd.f32 %v9017_v15, %v11272_v5  ;;  %v9121_v26 = vpop.f32.mrf.mxu1 }
 0x188   :  { %v11407_v54 = vpop.f32.mrf.mxu0 }
 0x189   :  { %14571 = vst [vmem:[#allocation12_spill] sm:$0xff] %v11401_v29  ;;  %v11425_v56 = vpop.f32.mrf.mxu1 }
 0x18a   :  { %v11411_v36 = vpop.f32.mrf.mxu0 }
 0x18b   :  { %v11429_v50 = vpop.f32.mrf.mxu1 }
 0x18c   :  { %v11415_v44 = vpop.f32.mrf.mxu0 }
 0x18e   :  { %v9080_v5 = vpop.f32.mrf.mxu0 }
 0x190   :  { %v9081_v47 = vpop.f32.mrf.mxu0 }
 0x191   :  { %v9082_v48 = vadd.f32 %v9081_v47, %v9080_v5  ;;  %v9045_v5 = vadd.f32 %v11344_v1, %v11342_v63 }
 0x192   :  { %v11423_v41 = vpop.f32.mrf.mxu0 }
 0x194   :  { %v9084_v45 = vpop.f32.mrf.mxu0 }
 0x195   :  { %v9085_v1 = vadd.f32 %v9084_v45, %v11423_v41 }
 0x1a9   :  { %v11427_v58 = vpop.f32.mrf.mxu0 }
 0x1ab   :  { %v11431_v4 = vpop.f32.mrf.mxu0 }
 0x1ad   :  { %v11436_v28 = vpop.f32.mrf.mxu1  ;;  %v11438_v14 = vpop.f32.mrf.mxu0 }
 0x1af   :  { %v11440_v7 = vpop.f32.mrf.mxu1  ;;  %v11442_v15 = vpop.f32.mrf.mxu0 }
 0x1b0   :  { %14573 = vst [vmem:[#allocation14_spill] sm:$0xff] %v11442_v15 }
 0x1b1   :  { %v11447_v12 = vpop.f32.mrf.mxu1  ;;  %v11449_v9 = vpop.f32.mrf.mxu0 }
 0x1b2   :  { %14575 = vst [vmem:[#allocation16_spill] sm:$0xff] %v11447_v12  ;;  %14576 = vst [vmem:[#allocation17_spill] sm:$0xff] %v11449_v9  ;;  %v3087_v12 = vcombine.high %v3079_v10, %v3079_v10 }
 0x1b3   :  { %v11451_v20 = vpop.f32.mrf.mxu1  ;;  %v11453_v24 = vpop.f32.mrf.mxu0 }
 0x1b4   :  { %14577 = vst [vmem:[#allocation18_spill] sm:$0xff] %v11451_v20  ;;  %14578 = vst [vmem:[#allocation19_spill] sm:$0xff] %v11453_v24  ;;  %v11469_v20 = vrot.slane %v3079_v10, %v11445_v53  ;;  %v9005_v10 = vadd.f32 %v11340_v59, %v11328_v34  ;;  %v9014_v34 = vadd.f32 %v11392_v22, %v11388_v60 }
 0x1b5   :  { %v11458_v3 = vpop.f32.mrf.mxu0 }
 0x1b6   :  { %14580 = vst [vmem:[#allocation21_spill] sm:$0xff] %v11458_v3  ;;  %v2707_v3 = vadd.f32 %v9002_v37, %v11262_v31  ;;  %v3117_v31 = vcombine.high %v11469_v20, %v11469_v20 }
 0x1b7   :  { %v11456_v6 = vpop.f32.mrf.mxu1  ;;  %v11464_v15 = vpop.f32.mrf.mxu0 }
 0x1b8   :  { %14579 = vst [vmem:[#allocation20_spill] sm:$0xff] %v11456_v6  ;;  %v3086_v6 = vrot.slane %v3072_v52, %v11445_v53 }
 0x1b9   :  { %v11462_v29 = vpop.f32.mrf.mxu1  ;;  %v11471_v24 = vpop.f32.mrf.mxu0 }
 0x1ba   :  { %14581 = vst [vmem:[#allocation22_spill] sm:$0xff] %v11462_v29  ;;  %v11483_v29 = vrot.slane %v3087_v12, %v11445_v53  ;;  %v11498_v62 = vrot.slane %v3086_v6, %v11445_v53  ;;  %v2772_v12 = vadd.f32 %v9042_v23, %v2707_v3  ;;  %v9011_v23 = vadd.f32 %v11384_v51, %v11380_v16 }
 0x1bb   :  { %v11466_v9 = vpop.f32.mrf.mxu1  ;;  %v11489_v52 = vpop.f32.mrf.mxu0  ;;  %v9020_v16 = vadd.f32 %v11407_v54, %v11405_v32  ;;  %v9051_v54 = vadd.f32 %v11390_v57, %v11386_v21  ;;  %v9060_v21 = vadd.f32 %v11413_v40, %v11409_v61 }
 0x1bc   :  { %14582 = vst [vmem:[#allocation23_spill] sm:$0xff] %v11466_v9  ;;  %v9008_v9 = vadd.f32 %v11376_v13, %v11361_v8  ;;  %v3119_v59 = vcombine.high %v11483_v29, %v11483_v29  ;;  %v3088_v8 = vcombine.high %v3086_v6, %v3086_v6  ;;  %v2710_v13 = vadd.f32 %v9005_v10, %v11264_v39 }
 0x1bd   :  { %v11477_v33 = vpop.f32.mrf.mxu1  ;;  %v11495_v37 = vpop.f32.mrf.mxu0  ;;  %v11517_v6 = vrot.slane %v3117_v31, %v11480_v43  ;;  %v3128_v39 = vrot.slane %v11483_v29, %v11480_v43  ;;  %v2837_v63 = vadd.f32 %v9082_v48, %v2772_v12  ;;  %v3140_v60 = vrot.slane %v11498_v62, %v11480_v43 }
 0x1be   :  { %14583 = vst [vmem:[#allocation24_spill] sm:$0xff] %v11477_v33  ;;  %v2715_v47 = vadd.f32 %v9008_v9, %v11266_v35  ;;  %v9122_v35 = vadd.f32 %v9121_v26, %v11421_v49  ;;  %v11534_v22 = vrot.slane %v3088_v8, %v11445_v53  ;;  %v2775_v49 = vadd.f32 %v9045_v5, %v2710_v13  ;;  %v14587_v8 = vld [vmem:[#allocation19_spill] sm:$0xff] }
 0x1bf   :  { %v11493_v0 = vpop.f32.mrf.mxu1  ;;  %v9102_v3 = vpop.f32.mrf.mxu0  ;;  %v9088_v26 = vadd.f32 %v11431_v4, %v11427_v58  ;;  %v11539_v45 = vrot.slane %v3119_v59, %v11480_v43  ;;  %v2718_v32 = vadd.f32 %v9011_v23, %v11268_v55  ;;  %v9057_v12 = vadd.f32 %v11403_v30, %v11398_v11  ;;  %v14585_v11 = vld [vmem:[#allocation14_spill] sm:$0xff] }
 0x1c0   :  { %14584 = vst [vmem:[#allocation25_spill] sm:$0xff] %v11493_v0  ;;  %v9048_v0 = vadd.f32 %v11382_v18, %v11378_v2  ;;  %v3118_v2 = vcombine.high %v11498_v62, %v11498_v62  ;;  %v9023_v18 = vadd.f32 %v11415_v44, %v11411_v36  ;;  %v2723_v36 = vadd.f32 %v9014_v34, %v11270_v38 }
 0x1c1   :  { %v11510_v33 = vpop.f32.mrf.mxu1  ;;  %v9160_v51 = vpop.f32.mrf.mxu0  ;;  %v9054_v44 = vadd.f32 %v11396_v17, %v11394_v25  ;;  %v2902_v31 = vadd.f32 %v9122_v35, %v2837_v63  ;;  %v2840_v48 = vadd.f32 %v9085_v1, %v2775_v49  ;;  %v2731_v55 = vadd.f32 %v9020_v16, %v11287_v27  ;;  %v14586_v27 = vld [vmem:[#allocation17_spill] sm:$0xff] }
 0x1c2   :  { %v2780_v41 = vadd.f32 %v9048_v0, %v2715_v47  ;;  %v9125_v0 = vadd.f32 %v11429_v50, %v11425_v56  ;;  %v2734_v38 = vadd.f32 %v9023_v18, %v11304_v42  ;;  %v9063_v25 = vadd.f32 %v11419_v46, %v11417_v19  ;;  %v14588_v19 = vld [vmem:[#allocation21_spill] sm:$0xff] }
 0x1c3   :  { %v11523_v9 = vpop.f32.mrf.mxu1  ;;  %v9161_v10 = vpop.f32.mrf.mxu0  ;;  %v9128_v56 = vadd.f32 %v11440_v7, %v11436_v28  ;;  %v2783_v59 = vadd.f32 %v9051_v54, %v2718_v32  ;;  %v9091_v30 = vadd.f32 %v14585_v11, %v11438_v14  ;;  %v9094_v13 = vadd.f32 %v14587_v8, %v14586_v27  ;;  %v14589_v7 = vld [vmem:[#allocation12_spill] sm:$0xff]  ;;  %v14591_v54 = vld [vmem:[#allocation18_spill] sm:$0xff] }
 0x1c4   :  { %v9162_v4 = vadd.f32 %v9161_v10, %v9160_v51  ;;  %v2845_v17 = vadd.f32 %v9088_v26, %v2780_v41  ;;  %v3120_v42 = vcombine.high %v11534_v22, %v11534_v22  ;;  %v2788_v40 = vadd.f32 %v9054_v44, %v2723_v36  ;;  %v14590_v32 = vld [vmem:[#allocation16_spill] sm:$0xff] }
 0x1c5   :  { %v9142_v58 = vpop.f32.mrf.mxu1  ;;  %v9163_v57 = vpop.f32.mrf.mxu0  ;;  %v2905_v5 = vadd.f32 %v9125_v0, %v2840_v48  ;;  %v9097_v46 = vadd.f32 %v11464_v15, %v14588_v19  ;;  %v2791_v23 = vadd.f32 %v9057_v12, %v14589_v7  ;;  %v2796_v63 = vadd.f32 %v9060_v21, %v2731_v55  ;;  %v14593_v48 = vld [vmem:[#allocation22_spill] sm:$0xff] }
 0x1c6   :  { %v2967_v34 = vadd.f32 %v9162_v4, %v2902_v31  ;;  %v9100_v14 = vadd.f32 %v11489_v52, %v11471_v24  ;;  %v2799_v16 = vadd.f32 %v9063_v25, %v2734_v38  ;;  %v2910_v18 = vadd.f32 %v9128_v56, %v2845_v17  ;;  %v14592_v31 = vld [vmem:[#allocation20_spill] sm:$0xff]  ;;  %v14594_v24 = vld [vmem:[#allocation23_spill] sm:$0xff] }
 0x1c7   :  { %v9272_v50 = vpop.f32.mrf.mxu1  ;;  %v9164_v61 = vpop.f32.mrf.mxu0  ;;  %v9103_v51 = vadd.f32 %v9102_v3, %v11495_v37  ;;  %v2848_v26 = vadd.f32 %v9091_v30, %v2783_v59  ;;  %v9131_v15 = vadd.f32 %v14591_v54, %v14590_v32  ;;  %v2853_v36 = vadd.f32 %v9094_v13, %v2788_v40  ;;  %v14595_v52 = vld [vmem:[#allocation24_spill] sm:$0xff]  ;;  %v14597_v17 = vld [vmem:[#allocation25_spill] sm:$0xff] }
 0x1c8   :  { %v9165_v47 = vadd.f32 %v9164_v61, %v9163_v57  ;;  %v9134_v0 = vadd.f32 %v14593_v48, %v14592_v31  ;;  %v2856_v4 = vadd.f32 %v9097_v46, %v2791_v23  ;;  %v9137_v12 = vadd.f32 %v14595_v52, %v14594_v24 }
 0x1c9   :  { %v3031_v28 = vpop.f32.mrf.mxu1  ;;  %v9166_v1 = vpop.f32.mrf.mxu0  ;;  %v2861_v38 = vadd.f32 %v9100_v14, %v2796_v63  ;;  %v14596_v37 = vrot.slane %v11469_v20, %v11480_v43  ;;  %v9140_v56 = vadd.f32 %v11510_v33, %v14597_v17  ;;  %v9143_v59 = vadd.f32 %v9142_v58, %v11523_v9 }
 0x1ca   :  { %v3032_v35 = vadd.f32 %v3031_v28, %v2967_v34  ;;  %v2970_v41 = vadd.f32 %v9165_v47, %v2905_v5  ;;  %v2864_v34 = vadd.f32 %v9103_v51, %v2799_v16  ;;  %v2913_v30 = vadd.f32 %v9131_v15, %v2848_v26 }
 0x1cb   :  { %v9273_v49 = vpop.f32.mrf.mxu1  ;;  %v9167_v10 = vpop.f32.mrf.mxu0  ;;  %v2918_v40 = vadd.f32 %v9134_v0, %v2853_v36  ;;  %v11584_v5 = vadd.f32 %v9137_v12, %v2856_v4  ;;  %v11591_v28 = vadd.f32 %v9140_v56, %v2861_v38 }
 0x1cc   :  { %v3062_v44 = vmax.f32 %v3032_v35, 0.0  ;;  %v9168_v55 = vadd.f32 %v9167_v10, %v9166_v1  ;;  %v11593_v7 = vadd.f32 %v9143_v59, %v2864_v34 }
 0x1cd   :  { %v3034_v21 = vpop.f32.mrf.mxu1  ;;  %v9169_v25 = vpop.f32.mrf.mxu0 }
 0x1ce   :  { %v3161_v3 = vmul.f32 %v14596_v37, %v3062_v44  ;;  %v3035_v57 = vadd.f32 %v3034_v21, %v2970_v41  ;;  %v2975_v11 = vadd.f32 %v9168_v55, %v2910_v18 }
 0x1cf   :  { %v9170_v61 = vpop.f32.mrf.mxu0 }
 0x1d0   :  { %v3170_v27 = vcombine.high %v3161_v3, %v3161_v3  ;;  %v3177_v8 = vrot.slane %v3161_v3, %v11445_v53  ;;  %v3063_v13 = vmax.f32 %v3035_v57, 0.0  ;;  %v3040_v20 = vadd.f32 %v9272_v50, %v2975_v11 }
 0x1d1   :  { %v9171_v19 = vadd.f32 %v9170_v61, %v9169_v25 }
 0x1d2   :  { %v3184_v46 = vrot.slane %v3170_v27, %v11445_v53  ;;  %v3185_v47 = vcombine.high %v3177_v8, %v3177_v8  ;;  %v3193_v33 = vrot.slane %v3177_v8, %v11445_v53  ;;  %v3162_v9 = vmul.f32 %v3128_v39, %v3063_v13 }
 0x1d3   :  { %v3064_v23 = vmax.f32 %v3040_v20, 0.0  ;;  %v2978_v63 = vadd.f32 %v9171_v19, %v2913_v30 }
 0x1d4   :  { %v3186_v50 = vcombine.high %v3184_v46, %v3184_v46  ;;  %v3200_v35 = vrot.slane %v3184_v46, %v11445_v53  ;;  %v3207_v1 = vrot.slane %v3185_v47, %v11445_v53  ;;  %v3215_v16 = vcombine.high %v3193_v33, %v3193_v33  ;;  %3228 = vst.msk [vmem:[#allocation5] sm:$0x1] %vm3227_vm4, %v3193_v33 }
 0x1d5   :  { %v3163_v29 = vmul.f32 %v11517_v6, %v3064_v23  ;;  %v3237_v39 = vcombine.high %v3162_v9, %v3162_v9  ;;  %v3244_v51 = vrot.slane %v3162_v9, %v11445_v53  ;;  %v3043_v41 = vadd.f32 %v9273_v49, %v2978_v63 }
 0x1d6   :  { %v11595_v14 = vpop.f32.mrf.mxu1  ;;  %v3214_v26 = vrot.slane %v3186_v50, %v11445_v53  ;;  %v3216_v32 = vcombine.high %v3200_v35, %v3200_v35  ;;  %v3217_v54 = vcombine.high %v3207_v1, %v3207_v1  ;;  %3229 = vst.msk [vmem:[#allocation5 + $0x8] sm:$0x1] %vm3227_vm4, %v3207_v1  ;;  %3230 = vst.msk [vmem:[#allocation5 + $0x10] sm:$0x1] %vm3227_vm4, %v3215_v16 }
 0x1d7   :  { %3232 = vst.msk [vmem:[#allocation5 + $0x20] sm:$0x1] %vm3227_vm4, %v3200_v35  ;;  %v3303_v44 = vcombine.high %v3163_v29, %v3163_v29  ;;  %v3310_v10 = vrot.slane %v3163_v29, %v11445_v53  ;;  %v3251_v6 = vrot.slane %v3237_v39, %v11445_v53  ;;  %v3252_v31 = vcombine.high %v3244_v51, %v3244_v51 }
 0x1d8   :  { %v3047_v48 = vpop.f32.mrf.mxu1  ;;  %v3218_v49 = vcombine.high %v3214_v26, %v3214_v26  ;;  %3231 = vst.msk [vmem:[#allocation5 + $0x18] sm:$0x1] %vm3227_vm4, %v3217_v54  ;;  %3233 = vst.msk [vmem:[#allocation5 + $0x28] sm:$0x1] %vm3227_vm4, %v3214_v26  ;;  %v3260_v0 = vrot.slane %v3244_v51, %v11445_v53  ;;  %v3065_v4 = vmax.f32 %v3043_v41, 0.0 }
 0x1d9   :  { %3234 = vst.msk [vmem:[#allocation5 + $0x30] sm:$0x1] %vm3227_vm4, %v3216_v32  ;;  %v3317_v12 = vrot.slane %v3303_v44, %v11445_v53  ;;  %v3318_v55 = vcombine.high %v3310_v10, %v3310_v10  ;;  %v3326_v21 = vrot.slane %v3310_v10, %v11445_v53  ;;  %v3253_v38 = vcombine.high %v3251_v6, %v3251_v6 }
 0x1da   :  { %3235 = vst.msk [vmem:[#allocation5 + $0x38] sm:$0x1] %vm3227_vm4, %v3218_v49  ;;  %v3267_v37 = vrot.slane %v3251_v6, %v11445_v53  ;;  %v3274_v3 = vrot.slane %v3252_v31, %v11445_v53  ;;  %v3282_v57 = vcombine.high %v3260_v0, %v3260_v0  ;;  %3294 = vst.msk [vmem:[#allocation5 + $0x1] sm:$0x1] %vm3227_vm4, %v3260_v0  ;;  %v11622_v30 = vpop.f32.mrf.mxu1 }
 0x1db   :  { %v9172_v58 = vpop.f32.mrf.mxu0  ;;  %v3164_v25 = vmul.f32 %v11539_v45, %v3065_v4  ;;  %v3319_v56 = vcombine.high %v3317_v12, %v3317_v12  ;;  %v3333_v34 = vrot.slane %v3317_v12, %v11445_v53  ;;  %v3340_v59 = vrot.slane %v3318_v55, %v11445_v53  ;;  %3360 = vst.msk [vmem:[#allocation5 + $0x2] sm:$0x1] %vm3227_vm4, %v3326_v21 }
 0x1dc   :  { %v3348_v11 = vcombine.high %v3326_v21, %v3326_v21  ;;  %v3281_v27 = vrot.slane %v3253_v38, %v11445_v53  ;;  %v3283_v8 = vcombine.high %v3267_v37, %v3267_v37  ;;  %v3284_v13 = vcombine.high %v3274_v3, %v3274_v3  ;;  %3295 = vst.msk [vmem:[#allocation5 + $0x9] sm:$0x1] %vm3227_vm4, %v3274_v3  ;;  %v3050_v16 = vpop.f32.mrf.mxu1 }
 0x1dd   :  { %v9173_v18 = vpop.f32.mrf.mxu0  ;;  %3296 = vst.msk [vmem:[#allocation5 + $0x11] sm:$0x1] %vm3227_vm4, %v3282_v57  ;;  %3298 = vst.msk [vmem:[#allocation5 + $0x21] sm:$0x1] %vm3227_vm4, %v3267_v37  ;;  %v3369_v45 = vcombine.high %v3164_v25, %v3164_v25  ;;  %v3349_v20 = vcombine.high %v3333_v34, %v3333_v34  ;;  %v3350_v19 = vcombine.high %v3340_v59, %v3340_v59 }
 0x1de   :  { %v9174_v15 = vadd.f32 %v9173_v18, %v9172_v58  ;;  %3361 = vst.msk [vmem:[#allocation5 + $0xa] sm:$0x1] %vm3227_vm4, %v3340_v59  ;;  %3362 = vst.msk [vmem:[#allocation5 + $0x12] sm:$0x1] %vm3227_vm4, %v3348_v11  ;;  %v3376_v46 = vrot.slane %v3164_v25, %v11445_v53  ;;  %v3285_v47 = vcombine.high %v3281_v27, %v3281_v27 }
 0x1df   :  { %v9175_v36 = vpop.f32.mrf.mxu0  ;;  %3364 = vst.msk [vmem:[#allocation5 + $0x22] sm:$0x1] %vm3227_vm4, %v3333_v34  ;;  %3297 = vst.msk [vmem:[#allocation5 + $0x19] sm:$0x1] %vm3227_vm4, %v3284_v13  ;;  %v3383_v33 = vrot.slane %v3369_v45, %v11445_v53  ;;  %v3152_v3 = vrot.slane %v3120_v42, %v11480_v43 }
 0x1e0   :  { %v2983_v52 = vadd.f32 %v9174_v15, %v2918_v40  ;;  %v3347_v40 = vrot.slane %v3319_v56, %v11445_v53  ;;  %3299 = vst.msk [vmem:[#allocation5 + $0x29] sm:$0x1] %vm3227_vm4, %v3281_v27  ;;  %3300 = vst.msk [vmem:[#allocation5 + $0x31] sm:$0x1] %vm3227_vm4, %v3283_v8  ;;  %v3384_v50 = vcombine.high %v3376_v46, %v3376_v46 }
 0x1e1   :  { %v9176_v24 = vpop.f32.mrf.mxu0  ;;  %3363 = vst.msk [vmem:[#allocation5 + $0x1a] sm:$0x1] %vm3227_vm4, %v3350_v19  ;;  %3366 = vst.msk [vmem:[#allocation5 + $0x32] sm:$0x1] %vm3227_vm4, %v3349_v20  ;;  %v3392_v35 = vrot.slane %v3376_v46, %v11445_v53  ;;  %v3385_v18 = vcombine.high %v3383_v33, %v3383_v33  ;;  %v3399_v29 = vrot.slane %v3383_v33, %v11445_v53 }
 0x1e2   :  { %v9177_v9 = vadd.f32 %v9176_v24, %v9175_v36  ;;  %v3048_v58 = vadd.f32 %v3047_v48, %v2983_v52  ;;  %v3351_v63 = vcombine.high %v3347_v40, %v3347_v40  ;;  %3365 = vst.msk [vmem:[#allocation5 + $0x2a] sm:$0x1] %vm3227_vm4, %v3347_v40  ;;  %3301 = vst.msk [vmem:[#allocation5 + $0x39] sm:$0x1] %vm3227_vm4, %v3285_v47 }
 0x1e3   :  { %v9178_v17 = vpop.f32.mrf.mxu0  ;;  %v3406_v26 = vrot.slane %v3384_v50, %v11445_v53  ;;  %v3414_v32 = vcombine.high %v3392_v35, %v3392_v35  ;;  %3426 = vst.msk [vmem:[#allocation5 + $0x3] sm:$0x1] %vm3227_vm4, %v3392_v35  ;;  %v3413_v36 = vrot.slane %v3385_v18, %v11445_v53  ;;  %v3415_v44 = vcombine.high %v3399_v29, %v3399_v29 }
 0x1e4   :  { %v2986_v39 = vadd.f32 %v9177_v9, %v11584_v5  ;;  %v3066_v51 = vmax.f32 %v3048_v58, 0.0  ;;  %3367 = vst.msk [vmem:[#allocation5 + $0x3a] sm:$0x1] %vm3227_vm4, %v3351_v63  ;;  %3430 = vst.msk [vmem:[#allocation5 + $0x23] sm:$0x1] %vm3227_vm4, %v3399_v29 }
 0x1e5   :  { %v9179_v61 = vpop.f32.mrf.mxu0  ;;  %v3416_v6 = vcombine.high %v3406_v26, %v3406_v26  ;;  %3427 = vst.msk [vmem:[#allocation5 + $0xb] sm:$0x1] %vm3227_vm4, %v3406_v26  ;;  %3428 = vst.msk [vmem:[#allocation5 + $0x13] sm:$0x1] %vm3227_vm4, %v3414_v32  ;;  %v3417_v49 = vcombine.high %v3413_v36, %v3413_v36 }
 0x1e6   :  { %v9180_v1 = vadd.f32 %v9179_v61, %v9178_v17  ;;  %v3165_v5 = vmul.f32 %v3140_v60, %v3066_v51  ;;  %v3051_v10 = vadd.f32 %v3050_v16, %v2986_v39  ;;  %3431 = vst.msk [vmem:[#allocation5 + $0x2b] sm:$0x1] %vm3227_vm4, %v3413_v36  ;;  %3432 = vst.msk [vmem:[#allocation5 + $0x33] sm:$0x1] %vm3227_vm4, %v3415_v44 }
 0x1e7   :  { %v9181_v23 = vpop.f32.mrf.mxu0  ;;  %3429 = vst.msk [vmem:[#allocation5 + $0x1b] sm:$0x1] %vm3227_vm4, %v3416_v6  ;;  %3433 = vst.msk [vmem:[#allocation5 + $0x3b] sm:$0x1] %vm3227_vm4, %v3417_v49  ;;  %v3728_v49 = vld [vmem:[%s14277_s6 + $0x90] sm:$0xff] }
 0x1e8   :  { %v2991_v54 = vadd.f32 %v9180_v1, %v11591_v28  ;;  %v3144_v28 = vrot.slane %v11534_v22, %v11480_v43  ;;  %v3435_v0 = vcombine.high %v3165_v5, %v3165_v5  ;;  %v3442_v60 = vrot.slane %v3165_v5, %v11445_v53 }
 0x1e9   :  { %v9182_v41 = vpop.f32.mrf.mxu0  ;;  %v3067_v4 = vmax.f32 %v3051_v10, 0.0 }
 0x1ea   :  { %v9183_v15 = vadd.f32 %v9182_v41, %v9181_v23  ;;  %v3056_v31 = vadd.f32 %v11595_v14, %v2991_v54  ;;  %v3148_v14 = vrot.slane %v3118_v2, %v11480_v43  ;;  %v3450_v12 = vcombine.high %v3442_v60, %v3442_v60 }
 0x1eb   :  { %v3458_v55 = vrot.slane %v3442_v60, %v11445_v53  ;;  %v3166_v21 = vmul.f32 %v3144_v28, %v3067_v4  ;;  %v3729_v60 = vld [vmem:[%s14277_s6 + $0x98] sm:$0xff] }
 0x1ec   :  { %v2994_v48 = vadd.f32 %v9183_v15, %v11593_v7  ;;  %v3068_v24 = vmax.f32 %v3056_v31, 0.0  ;;  %v3449_v7 = vrot.slane %v3435_v0, %v11445_v53  ;;  %v3472_v2 = vrot.slane %v3450_v12, %v11445_v53  ;;  %v3732_v0 = vld [vmem:[%s14277_s6 + $0xb0] sm:$0xff]  ;;  %v3733_v4 = vld [vmem:[%s14277_s6 + $0xb8] sm:$0xff] }
 0x1ed   :  { %v3480_v25 = vcombine.high %v3458_v55, %v3458_v55  ;;  %3492 = vst.msk [vmem:[#allocation5 + $0x4] sm:$0x1] %vm3227_vm4, %v3458_v55  ;;  %v3501_v34 = vcombine.high %v3166_v21, %v3166_v21  ;;  %v3508_v59 = vrot.slane %v3166_v21, %v11445_v53  ;;  %v8435_v12 = vcombine.high %v3728_v49, %v3732_v0  ;;  %v3724_v21 = vld [vmem:[%s14277_s6 + $0x70] sm:$0xff] }
 0x1ee   :  { %v3059_v52 = vadd.f32 %v11622_v30, %v2994_v48  ;;  %v3167_v38 = vmul.f32 %v3148_v14, %v3068_v24  ;;  %v3451_v57 = vcombine.high %v3449_v7, %v3449_v7  ;;  %v3465_v62 = vrot.slane %v3449_v7, %v11445_v53  ;;  %3493 = vst.msk [vmem:[#allocation5 + $0xc] sm:$0x1] %vm3227_vm4, %v3472_v2  ;;  %v3720_v7 = vld [vmem:[%s14277_s6 + $0x50] sm:$0xff] }
 0x1ef   :  { %v3482_v27 = vcombine.high %v3472_v2, %v3472_v2  ;;  %3494 = vst.msk [vmem:[#allocation5 + $0x14] sm:$0x1] %vm3227_vm4, %v3480_v25  ;;  %v3515_v45 = vrot.slane %v3501_v34, %v11445_v53  ;;  %v3516_v40 = vcombine.high %v3508_v59, %v3508_v59  ;;  %v3524_v20 = vrot.slane %v3508_v59, %v11445_v53  ;;  %v14601_v2 = vld [vmem:[#allocation10_spill] sm:$0xff]  ;;  %v14602_v25 = vld [vmem:[#allocation11_spill] sm:$0xff] }
 0x1f0   :  { %v3069_v37 = vmax.f32 %v3059_v52, 0.0  ;;  %v3567_v17 = vcombine.high %v3167_v38, %v3167_v38  ;;  %v3574_v56 = vrot.slane %v3167_v38, %v11445_v53  ;;  %v3479_v11 = vrot.slane %v3451_v57, %v11445_v53  ;;  %3496 = vst.msk [vmem:[#allocation5 + $0x24] sm:$0x1] %vm3227_vm4, %v3465_v62  ;;  %v3721_v38 = vld [vmem:[%s14277_s6 + $0x58] sm:$0xff]  ;;  %v14599_v57 = vld [vmem:[#allocation9_spill] sm:$0xff] }
 0x1f1   :  { %v3481_v30 = vcombine.high %v3465_v62, %v3465_v62  ;;  %3495 = vst.msk [vmem:[#allocation5 + $0x1c] sm:$0x1] %vm3227_vm4, %v3482_v27  ;;  %v3517_v58 = vcombine.high %v3515_v45, %v3515_v45  ;;  %v3531_v23 = vrot.slane %v3515_v45, %v11445_v53  ;;  %v3538_v63 = vrot.slane %v3516_v40, %v11445_v53 }
 0x1f2   :  { %v3168_v22 = vmul.f32 %v3152_v3, %v3069_v37  ;;  %v3581_v42 = vrot.slane %v3567_v17, %v11445_v53  ;;  %v3582_v8 = vcombine.high %v3574_v56, %v3574_v56  ;;  %v3590_v13 = vrot.slane %v3574_v56, %v11445_v53  ;;  %3497 = vst.msk [vmem:[#allocation5 + $0x2c] sm:$0x1] %vm3227_vm4, %v3479_v11  ;;  %v3725_v37 = vld [vmem:[%s14277_s6 + $0x78] sm:$0xff]  ;;  %v14598_v3 = vld [vmem:[#allocation8_spill] sm:$0xff] }
 0x1f3   :  { %v3483_v61 = vcombine.high %v3479_v11, %v3479_v11  ;;  %3498 = vst.msk [vmem:[#allocation5 + $0x34] sm:$0x1] %vm3227_vm4, %v3481_v30  ;;  %v3546_v50 = vcombine.high %v3524_v20, %v3524_v20  ;;  %3558 = vst.msk [vmem:[#allocation5 + $0x5] sm:$0x1] %vm3227_vm4, %v3524_v20  ;;  %v3545_v29 = vrot.slane %v3517_v58, %v11445_v53  ;;  %v14604_v59 = vmov 0   ;;  %v4374_v58 = vld [vmem:[%s14278_s7 + $0x1e8] sm:$0xff] }
 0x1f4   :  { %v3633_v19 = vcombine.high %v3168_v22, %v3168_v22  ;;  %v3583_v46 = vcombine.high %v3581_v42, %v3581_v42  ;;  %v3597_v47 = vrot.slane %v3581_v42, %v11445_v53  ;;  %v3604_v33 = vrot.slane %v3582_v8, %v11445_v53  ;;  %3624 = vst.msk [vmem:[#allocation5 + $0x6] sm:$0x1] %vm3227_vm4, %v3590_v13  ;;  %v3716_v42 = vld [vmem:[%s14277_s6 + $0x30] sm:$0xff]  ;;  %v3713_v8 = vld [vmem:[%s14277_s6 + $0x18] sm:$0xff] }
 0x1f5   :  { %v3612_v9 = vcombine.high %v3590_v13, %v3590_v13  ;;  %3499 = vst.msk [vmem:[#allocation5 + $0x3c] sm:$0x1] %vm3227_vm4, %v3483_v61  ;;  %v3640_v18 = vrot.slane %v3168_v22, %v11445_v53  ;;  %v3547_v39 = vcombine.high %v3531_v23, %v3531_v23  ;;  %v3548_v51 = vcombine.high %v3538_v63, %v3538_v63  ;;  %v3712_v22 = vld [vmem:[%s14277_s6 + $0x10] sm:$0xff]  ;;  %v3717_v13 = vld [vmem:[%s14277_s6 + $0x38] sm:$0xff] }
 0x1f6   :  { %v3611_v35 = vrot.slane %v3583_v46, %v11445_v53  ;;  %v3613_v1 = vcombine.high %v3597_v47, %v3597_v47  ;;  %v3614_v16 = vcombine.high %v3604_v33, %v3604_v33  ;;  %3625 = vst.msk [vmem:[#allocation5 + $0xe] sm:$0x1] %vm3227_vm4, %v3604_v33  ;;  %3628 = vst.msk [vmem:[#allocation5 + $0x26] sm:$0x1] %vm3227_vm4, %v3597_v47  ;;  %v4369_v47 = vld [vmem:[%s14278_s7 + $0x1c0] sm:$0xff] }
 0x1f7   :  { %3626 = vst.msk [vmem:[#allocation5 + $0x16] sm:$0x1] %vm3227_vm4, %v3612_v9  ;;  %3559 = vst.msk [vmem:[#allocation5 + $0xd] sm:$0x1] %vm3227_vm4, %v3538_v63  ;;  %v3647_v41 = vrot.slane %v3633_v19, %v11445_v53  ;;  %v3648_v32 = vcombine.high %v3640_v18, %v3640_v18  ;;  %v3656_v54 = vrot.slane %v3640_v18, %v11445_v53  ;;  %v4373_v33 = vld [vmem:[%s14278_s7 + $0x1e0] sm:$0xff]  ;;  %v4370_v9 = vld [vmem:[%s14278_s7 + $0x1c8] sm:$0xff] }
 0x1f8   :  { %3560 = vst.msk [vmem:[#allocation5 + $0x15] sm:$0x1] %vm3227_vm4, %v3546_v50  ;;  %3562 = vst.msk [vmem:[#allocation5 + $0x25] sm:$0x1] %vm3227_vm4, %v3531_v23  ;;  %v3615_v26 = vcombine.high %v3611_v35, %v3611_v35  ;;  %v3549_v15 = vcombine.high %v3545_v29, %v3545_v29  ;;  %v8437_v55 = vcombine.high %v3729_v60, %v3733_v4 }
 0x1f9   :  { %3627 = vst.msk [vmem:[#allocation5 + $0x1e] sm:$0x1] %vm3227_vm4, %v3614_v16  ;;  %3629 = vst.msk [vmem:[#allocation5 + $0x2e] sm:$0x1] %vm3227_vm4, %v3611_v35  ;;  %v3649_v36 = vcombine.high %v3647_v41, %v3647_v41  ;;  %v3663_v44 = vrot.slane %v3647_v41, %v11445_v53  ;;  %v3670_v5 = vrot.slane %v3648_v32, %v11445_v53  ;;  %v4361_v41 = vld [vmem:[%s14278_s7 + $0x180] sm:$0xff]  ;;  %v4362_v32 = vld [vmem:[%s14278_s7 + $0x188] sm:$0xff] }
 0x1fa   :  { %3630 = vst.msk [vmem:[#allocation5 + $0x36] sm:$0x1] %vm3227_vm4, %v3613_v1  ;;  %3561 = vst.msk [vmem:[#allocation5 + $0x1d] sm:$0x1] %vm3227_vm4, %v3548_v51  ;;  %v3678_v10 = vcombine.high %v3656_v54, %v3656_v54  ;;  %v14600_v62 = vcombine.low %v14598_v3, %v14599_v57  ;;  %v14603_v17 = vcombine.low %v14601_v2, %v14602_v25  ;;  %v4338_v3 = vld [vmem:[%s14278_s7 + $0xc8] sm:$0xff] }
 0x1fb   :  { %3563 = vst.msk [vmem:[#allocation5 + $0x2d] sm:$0x1] %vm3227_vm4, %v3545_v29  ;;  %3564 = vst.msk [vmem:[#allocation5 + $0x35] sm:$0x1] %vm3227_vm4, %v3547_v39  ;;  %v3677_v6 = vrot.slane %v3649_v36, %v11445_v53  ;;  %v3679_v31 = vcombine.high %v3663_v44, %v3663_v44  ;;  %v3680_v28 = vcombine.high %v3670_v5, %v3670_v5  ;;  %v4342_v57 = vld [vmem:[%s14278_s7 + $0xe8] sm:$0xff]  ;;  %v4385_v53 = vld [vmem:[%s14278_s7 + $0x240] sm:$0xff] }
 0x1fc   :  { %3631 = vst.msk [vmem:[#allocation5 + $0x3e] sm:$0x1] %vm3227_vm4, %v3615_v26  ;;  %3690 = vst.msk [vmem:[#allocation5 + $0x7] sm:$0x1] %vm3227_vm4, %v3656_v54  ;;  %v8434_v56 = vcombine.low %v3728_v49, %v3732_v0  ;;  %v8436_v34 = vcombine.low %v3729_v60, %v3733_v4  ;;  %v8427_v11 = vcombine.high %v3720_v7, %v3724_v21  ;;  %v4365_v26 = vld [vmem:[%s14278_s7 + $0x1a0] sm:$0xff]  ;;  %v4366_v54 = vld [vmem:[%s14278_s7 + $0x1a8] sm:$0xff] }
 0x1fd   :  { %3565 = vst.msk [vmem:[#allocation5 + $0x3d] sm:$0x1] %vm3227_vm4, %v3549_v15  ;;  %3694 = vst.msk [vmem:[#allocation5 + $0x27] sm:$0x1] %vm3227_vm4, %v3663_v44  ;;  %v3681_v48 = vcombine.high %v3677_v6, %v3677_v6  ;;  %v8429_v30 = vcombine.high %v3721_v38, %v3725_v37  ;;  %v8426_v40 = vcombine.low %v3720_v7, %v3724_v21  ;;  %v4345_v4 = vld [vmem:[%s14278_s7 + $0x100] sm:$0xff] }
 0x1fe   :  { %3691 = vst.msk [vmem:[#allocation5 + $0xf] sm:$0x1] %vm3227_vm4, %v3670_v5  ;;  %3692 = vst.msk [vmem:[#allocation5 + $0x17] sm:$0x1] %vm3227_vm4, %v3678_v10  ;;  %v8428_v20 = vcombine.low %v3721_v38, %v3725_v37  ;;  %v8419_v19 = vcombine.high %v3712_v22, %v3716_v42  ;;  %v8421_v46 = vcombine.high %v3713_v8, %v3717_v13  ;;  %v4353_v10 = vld [vmem:[%s14278_s7 + $0x140] sm:$0xff] }
 0x1ff   :  { %3695 = vst.msk [vmem:[#allocation5 + $0x2f] sm:$0x1] %vm3227_vm4, %v3677_v6  ;;  %3696 = vst.msk [vmem:[#allocation5 + $0x37] sm:$0x1] %vm3227_vm4, %v3679_v31  ;;  %v8418_v23 = vcombine.low %v3712_v22, %v3716_v42  ;;  %v8420_v63 = vcombine.low %v3713_v8, %v3717_v13  ;;  %v11798_v35 = vcombine.high %v4369_v47, %v4373_v33  ;;  %v4357_v6 = vld [vmem:[%s14278_s7 + $0x160] sm:$0xff]  ;;  %v4354_v31 = vld [vmem:[%s14278_s7 + $0x148] sm:$0xff] }
 0x200   :  { %3693 = vst.msk [vmem:[#allocation5 + $0x1f] sm:$0x1] %vm3227_vm4, %v3680_v28  ;;  %3697 = vst.msk [vmem:[#allocation5 + $0x3f] sm:$0x1] %vm3227_vm4, %v3681_v48  ;;  %v11800_v1 = vcombine.high %v4370_v9, %v4374_v58  ;;  %v11832_v15 = vcombine.low %v4369_v47, %v4373_v33  ;;  %v11834_v36 = vcombine.low %v4370_v9, %v4374_v58  ;;  %v4358_v28 = vld [vmem:[%s14278_s7 + $0x168] sm:$0xff]  ;;  %v4337_v38 = vld [vmem:[%s14278_s7 + $0xc0] sm:$0xff] }
 0x201   :  { %14605 = vst [vmem:[#allocation14_spill] sm:$0xff] %v11798_v35  ;;  %v11836_v44 = vcombine.high %v4361_v41, %v4365_v26  ;;  %v11838_v5 = vcombine.high %v4362_v32, %v4366_v54  ;;  %v11858_v48 = vcombine.low %v4361_v41, %v4365_v26  ;;  %v11860_v49 = vcombine.low %v4362_v32, %v4366_v54  ;;  %v4341_v37 = vld [vmem:[%s14278_s7 + $0xe0] sm:$0xff]  ;;  %v4314_v58 = vld [vmem:[%s14278_s7 + $0x8] sm:$0xff] }
 0x202   :  { %14606 = vst [vmem:[#allocation17_spill] sm:$0xff] %v11800_v1  ;;  %14607 = vst [vmem:[#allocation19_spill] sm:$0xff] %v11832_v15  ;;  %v11864_v0 = vcombine.high %v4353_v10, %v4357_v6  ;;  %v11866_v60 = vcombine.high %v4354_v31, %v4358_v28  ;;  %v11884_v7 = vcombine.low %v4353_v10, %v4357_v6  ;;  %v4321_v13 = vld [vmem:[%s14278_s7 + $0x40] sm:$0xff]  ;;  %v4438_v41 = vld [vmem:[%s14278_s7 + $0x3e8] sm:$0xff] }
 0x203   :  { %v3698_v24 = vld [vmem:[#allocation5] sm:$0xff]  ;;  %14608 = vst [vmem:[#allocation21_spill] sm:$0xff] %v11834_v36  ;;  %14609 = vst [vmem:[#allocation12_spill] sm:$0xff] %v11836_v44  ;;  %v11918_v25 = vcombine.high %v4337_v38, %v4341_v37  ;;  %v11940_v22 = vcombine.low %v4338_v3, %v4342_v57  ;;  %v4313_v33 = vld [vmem:[%s14278_s7] sm:$0xff] }
 0x204   :  { %v3702_v16 = vld [vmem:[#allocation5 + $0x20] sm:$0xff]  ;;  %14610 = vst [vmem:[#allocation16_spill] sm:$0xff] %v11838_v5  ;;  %14611 = vst [vmem:[#allocation18_spill] sm:$0xff] %v11858_v48  ;;  %v4317_v9 = vld [vmem:[%s14278_s7 + $0x20] sm:$0xff] }
 0x205   :  { %v3699_v14 = vld [vmem:[#allocation5 + $0x8] sm:$0xff]  ;;  %v3700_v45 = vld [vmem:[#allocation5 + $0x10] sm:$0xff]  ;;  %14612 = vst [vmem:[#allocation20_spill] sm:$0xff] %v11860_v49  ;;  %14613 = vst [vmem:[#allocation22_spill] sm:$0xff] %v11864_v0  ;;  %v12020_v26 = vcombine.low %v4313_v33, %v4317_v9 }
 0x206   :  { %v11740_v52 = vpack.c.bf16 %v3699_v14, %v3698_v24  ;;  %v3703_v50 = vld [vmem:[#allocation5 + $0x28] sm:$0xff]  ;;  %v3704_v39 = vld [vmem:[#allocation5 + $0x30] sm:$0xff]  ;;  %14614 = vst [vmem:[#allocation23_spill] sm:$0xff] %v11866_v60  ;;  %v4349_v24 = vld [vmem:[%s14278_s7 + $0x120] sm:$0xff] }
 0x207   :  { %v3701_v27 = vld [vmem:[#allocation5 + $0x18] sm:$0xff]  ;;  %v11802_v18 = vpack.c.bf16 %v3703_v50, %v3702_v16  ;;  %v4346_v14 = vld [vmem:[%s14278_s7 + $0x108] sm:$0xff]  ;;  %14615 = vst [vmem:[#allocation24_spill] sm:$0xff] %v11884_v7  ;;  %14621 = vst [vmem:[#allocation26_spill] sm:$0xff] %v11918_v25 }
 0x208   :  { %8446 = vmatmul.mubr.msk.bf16.vlgmr.msra.gmra.mxu1 %vm304_vm3, %v11740_v52  ;;  %8450 = vmatmul.mubr.msk.bf16.vlgmr.msra.gmra.mxu0 %vm304_vm3, %v11740_v52  ;;  %v11778_v61 = vpack.c.bf16 %v3701_v27, %v3700_v45  ;;  %v3705_v29 = vld [vmem:[#allocation5 + $0x38] sm:$0xff]  ;;  %v11938_v27 = vcombine.low %v4337_v38, %v4341_v37  ;;  %14624 = vst [vmem:[#allocation29_spill] sm:$0xff] %v11940_v22  ;;  %14635 = vst [vmem:[#allocation40_spill] sm:$0xff] %v12020_v26 }
 0x209   :  { %4112 = vmatpush1.bf16.msra.mxu1 %v14600_v62  ;;  %4185 = vmatpush1.bf16.msra.mxu0 %v14603_v17  ;;  %v11812_v51 = vpack.c.bf16 %v3705_v29, %v3704_v39  ;;  %v11912_v62 = vcombine.low %v4345_v4, %v4349_v24  ;;  %v11920_v17 = vcombine.high %v4338_v3, %v4342_v57  ;;  %v4325_v45 = vld [vmem:[%s14278_s7 + $0x60] sm:$0xff]  ;;  %v4434_v39 = vld [vmem:[%s14278_s7 + $0x3c8] sm:$0xff] }
 0x20a   :  { %3999 = vmatprep.mubr.bf16.mxu1 %v14604_v59  ;;  %4072 = vmatprep.mubr.bf16.mxu0 %v14604_v59  ;;  %14623 = vst [vmem:[#allocation28_spill] sm:$0xff] %v11938_v27  ;;  %v4437_v29 = vld [vmem:[%s14278_s7 + $0x3e0] sm:$0xff]  ;;  %v12028_v10 = vcombine.high %v4434_v39, %v4438_v41  ;;  %v4418_v57 = vld [vmem:[%s14278_s7 + $0x348] sm:$0xff] }
 0x20b   :  { %4113 = vmatprep.subr.bf16.mxu1 %v8435_v12  ;;  %4186 = vmatprep.subr.bf16.mxu0 %v8437_v55  ;;  %v11886_v12 = vcombine.low %v4354_v31, %v4358_v28  ;;  %v11890_v55 = vcombine.high %v4345_v4, %v4349_v24  ;;  %14619 = vst [vmem:[#allocation10_spill] sm:$0xff] %v11912_v62  ;;  %14622 = vst [vmem:[#allocation27_spill] sm:$0xff] %v11920_v17  ;;  %v4429_v6 = vld [vmem:[%s14278_s7 + $0x3a0] sm:$0xff]  ;;  %v4426_v31 = vld [vmem:[%s14278_s7 + $0x388] sm:$0xff]  ;;  %v14295_v4 = vmov 0.0|0.0  }
 0x20c   :  { %14638 = vst [vmem:[#allocation43_spill] sm:$0xff] %v12028_v10  ;;  %v4430_v28 = vld [vmem:[%s14278_s7 + $0x3a8] sm:$0xff]  ;;  %v4417_v37 = vld [vmem:[%s14278_s7 + $0x340] sm:$0xff] }
 0x20d   :  { %4114 = vmatpush1.bf16.msra.mxu1 %v8434_v56  ;;  %4187 = vmatpush1.bf16.msra.mxu0 %v8436_v34  ;;  %14616 = vst [vmem:[#allocation25_spill] sm:$0xff] %v11886_v12  ;;  %14617 = vst [vmem:[#allocation8_spill] sm:$0xff] %v11890_v55  ;;  %v4329_v56 = vld [vmem:[%s14278_s7 + $0x80] sm:$0xff]  ;;  %v12054_v38 = vcombine.high %v4426_v31, %v4430_v28 }
 0x20e   :  { %4115 = vmatprep.subr.bf16.mxu1 %v8427_v11  ;;  %4188 = vmatprep.subr.bf16.mxu0 %v8429_v30  ;;  %v4333_v34 = vld [vmem:[%s14278_s7 + $0xa0] sm:$0xff]  ;;  %v4330_v11 = vld [vmem:[%s14278_s7 + $0x88] sm:$0xff] }
 0x20f   :  { %v4334_v30 = vld [vmem:[%s14278_s7 + $0xa8] sm:$0xff]  ;;  %v11944_v42 = vcombine.high %v4329_v56, %v4333_v34  ;;  %14642 = vst [vmem:[#allocation47_spill] sm:$0xff] %v12054_v38  ;;  %v4421_v3 = vld [vmem:[%s14278_s7 + $0x360] sm:$0xff] }
 0x210   :  { %8447 = vmatmul.mubr.msk.bf16.gmra.mxu1 %vm304_vm3, %v11778_v61  ;;  %8451 = vmatmul.mubr.msk.bf16.gmra.mxu0 %vm304_vm3, %v11778_v61  ;;  %v11946_v8 = vcombine.high %v4330_v11, %v4334_v30 }
 0x211   :  { %4009 = vmatprep.mubr.bf16.mxu1 %v14604_v59  ;;  %4082 = vmatprep.mubr.bf16.mxu0 %v14604_v59  ;;  %14625 = vst [vmem:[#allocation30_spill] sm:$0xff] %v11944_v42 }
 0x212   :  { %4116 = vmatpush1.bf16.msra.mxu1 %v8426_v40  ;;  %4189 = vmatpush1.bf16.msra.mxu0 %v8428_v20  ;;  %14626 = vst [vmem:[#allocation31_spill] sm:$0xff] %v11946_v8  ;;  %v4326_v40 = vld [vmem:[%s14278_s7 + $0x68] sm:$0xff]  ;;  %v11966_v20 = vcombine.low %v4329_v56, %v4333_v34 }
 0x213   :  { %4117 = vmatprep.subr.bf16.mxu1 %v8419_v19  ;;  %4190 = vmatprep.subr.bf16.mxu0 %v8421_v46  ;;  %v11968_v19 = vcombine.low %v4330_v11, %v4334_v30  ;;  %v11972_v46 = vcombine.high %v4321_v13, %v4325_v45  ;;  %v4422_v56 = vld [vmem:[%s14278_s7 + $0x368] sm:$0xff]  ;;  %v12072_v11 = vcombine.low %v4426_v31, %v4430_v28 }
 0x214   :  { %14627 = vst [vmem:[#allocation32_spill] sm:$0xff] %v11966_v20  ;;  %v12076_v30 = vcombine.high %v4417_v37, %v4421_v3 }
 0x215   :  { %14628 = vst [vmem:[#allocation33_spill] sm:$0xff] %v11968_v19  ;;  %14629 = vst [vmem:[#allocation34_spill] sm:$0xff] %v11972_v46 }
 0x216   :  { %4118 = vmatpush1.bf16.msra.mxu1 %v8418_v23  ;;  %4191 = vmatpush1.bf16.msra.mxu0 %v8420_v63  ;;  %v4318_v23 = vld [vmem:[%s14278_s7 + $0x28] sm:$0xff]  ;;  %v11992_v63 = vcombine.low %v4321_v13, %v4325_v45  ;;  %14644 = vst [vmem:[#allocation49_spill] sm:$0xff] %v12072_v11  ;;  %14645 = vst [vmem:[#allocation50_spill] sm:$0xff] %v12076_v30  ;;  %v12078_v13 = vcombine.high %v4418_v57, %v4422_v56  ;;  %v4409_v45 = vld [vmem:[%s14278_s7 + $0x300] sm:$0xff] }
 0x217   :  { %5095 = vmatprep.subr.bf16.mxu1 %v11798_v35  ;;  %5136 = vmatprep.subr.bf16.mxu0 %v11800_v1  ;;  %v12000_v16 = vcombine.high %v4314_v58, %v4318_v23  ;;  %v12022_v32 = vcombine.low %v4314_v58, %v4318_v23  ;;  %v12096_v58 = vcombine.low %v4418_v57, %v4422_v56  ;;  %v4397_v57 = vld [vmem:[%s14278_s7 + $0x2a0] sm:$0xff]  ;;  %v4394_v56 = vld [vmem:[%s14278_s7 + $0x288] sm:$0xff] }
 0x218   :  { %8448 = vmatmul.mubr.msk.bf16.gmra.mxu1 %vm304_vm3, %v11802_v18  ;;  %8452 = vmatmul.mubr.msk.bf16.gmra.mxu0 %vm304_vm3, %v11802_v18  ;;  %14631 = vst [vmem:[#allocation36_spill] sm:$0xff] %v11992_v63  ;;  %14646 = vst [vmem:[#allocation51_spill] sm:$0xff] %v12078_v13 }
 0x219   :  { %4019 = vmatprep.mubr.bf16.mxu1 %v14604_v59  ;;  %4092 = vmatprep.mubr.bf16.mxu0 %v14604_v59  ;;  %14634 = vst [vmem:[#allocation39_spill] sm:$0xff] %v12000_v16  ;;  %14636 = vst [vmem:[#allocation41_spill] sm:$0xff] %v12022_v32 }
 0x21a   :  { %14648 = vst [vmem:[#allocation53_spill] sm:$0xff] %v12096_v58 }
 0x220   :  { %8449 = vmatmul.mubr.msk.bf16.gmra.mxu1 %vm304_vm3, %v11812_v51  ;;  %8453 = vmatmul.mubr.msk.bf16.gmra.mxu0 %vm304_vm3, %v11812_v51 }
 0x221   :  { %4135 = vmatprep.mubr.bf16.mxu1 %v14604_v59  ;;  %4208 = vmatprep.mubr.bf16.mxu0 %v14604_v59 }
 0x228   :  { %8454 = vmatmul.mubr.msk.bf16.vlgmr.msra.gmra.mxu1 %vm304_vm3, %v11740_v52  ;;  %8458 = vmatmul.mubr.msk.bf16.vlgmr.msra.gmra.mxu0 %vm304_vm3, %v11740_v52  ;;  %v4350_v52 = vld [vmem:[%s14278_s7 + $0x128] sm:$0xff] }
 0x229   :  { %5096 = vmatpush1.bf16.msra.mxu1 %v11832_v15  ;;  %5137 = vmatpush1.bf16.msra.mxu0 %v11834_v36  ;;  %v11892_v21 = vcombine.high %v4346_v14, %v4350_v52  ;;  %v11914_v2 = vcombine.low %v4346_v14, %v4350_v52  ;;  %v12048_v14 = vcombine.low %v4434_v39, %v4438_v41  ;;  %v4405_v39 = vld [vmem:[%s14278_s7 + $0x2e0] sm:$0xff]  ;;  %v4402_v41 = vld [vmem:[%s14278_s7 + $0x2c8] sm:$0xff] }
 0x22a   :  { %5097 = vmatprep.subr.bf16.mxu1 %v11836_v44  ;;  %5138 = vmatprep.subr.bf16.mxu0 %v11838_v5 }
 0x22b   :  { %4145 = vmatprep.mubr.bf16.mxu1 %v14604_v59  ;;  %4218 = vmatprep.mubr.bf16.mxu0 %v14604_v59  ;;  %14618 = vst [vmem:[#allocation9_spill] sm:$0xff] %v11892_v21  ;;  %14620 = vst [vmem:[#allocation11_spill] sm:$0xff] %v11914_v2 }
 0x22c   :  { %14640 = vst [vmem:[#allocation45_spill] sm:$0xff] %v12048_v14 }
 0x22d   :  { %5098 = vmatpush1.bf16.msra.mxu1 %v11858_v48  ;;  %5139 = vmatpush1.bf16.msra.mxu0 %v11860_v49 }
 0x22e   :  { %5099 = vmatprep.subr.bf16.mxu1 %v11864_v0  ;;  %5140 = vmatprep.subr.bf16.mxu0 %v11866_v60 }
 0x230   :  { %8455 = vmatmul.mubr.msk.bf16.gmra.mxu1 %vm304_vm3, %v11778_v61  ;;  %8459 = vmatmul.mubr.msk.bf16.gmra.mxu0 %vm304_vm3, %v11778_v61  ;;  %v4322_v61 = vld [vmem:[%s14278_s7 + $0x48] sm:$0xff] }
 0x231   :  { %5100 = vmatpush1.bf16.msra.mxu1 %v11884_v7  ;;  %5141 = vmatpush1.bf16.msra.mxu0 %v11886_v12  ;;  %v11974_v47 = vcombine.high %v4322_v61, %v4326_v40  ;;  %v11994_v50 = vcombine.low %v4322_v61, %v4326_v40  ;;  %v4413_v61 = vld [vmem:[%s14278_s7 + $0x320] sm:$0xff]  ;;  %v4410_v40 = vld [vmem:[%s14278_s7 + $0x308] sm:$0xff] }
 0x232   :  { %5101 = vmatprep.subr.bf16.mxu1 %v11890_v55  ;;  %5142 = vmatprep.subr.bf16.mxu0 %v11892_v21  ;;  %v12100_v23 = vcombine.high %v4409_v45, %v4413_v61 }
 0x233   :  { %4155 = vmatprep.mubr.bf16.mxu1 %v14604_v59  ;;  %4228 = vmatprep.mubr.bf16.mxu0 %v14604_v59  ;;  %14630 = vst [vmem:[#allocation35_spill] sm:$0xff] %v11974_v47  ;;  %14632 = vst [vmem:[#allocation37_spill] sm:$0xff] %v11994_v50 }
 0x234   :  { %14649 = vst [vmem:[#allocation54_spill] sm:$0xff] %v12100_v23 }
 0x235   :  { %5102 = vmatpush1.bf16.msra.mxu1 %v11912_v62  ;;  %5143 = vmatpush1.bf16.msra.mxu0 %v11914_v2 }
 0x236   :  { %5103 = vmatprep.subr.bf16.mxu1 %v11918_v25  ;;  %5144 = vmatprep.subr.bf16.mxu0 %v11920_v17 }
 0x238   :  { %8456 = vmatmul.mubr.msk.bf16.gmra.mxu1 %vm304_vm3, %v11802_v18  ;;  %8460 = vmatmul.mubr.msk.bf16.gmra.mxu0 %vm304_vm3, %v11802_v18  ;;  %v4433_v18 = vld [vmem:[%s14278_s7 + $0x3c0] sm:$0xff] }
 0x239   :  { %5104 = vmatpush1.bf16.msra.mxu1 %v11938_v27  ;;  %5145 = vmatpush1.bf16.msra.mxu0 %v11940_v22  ;;  %v12026_v54 = vcombine.high %v4433_v18, %v4437_v29  ;;  %v12046_v24 = vcombine.low %v4433_v18, %v4437_v29  ;;  %v4401_v29 = vld [vmem:[%s14278_s7 + $0x2c0] sm:$0xff] }
 0x23a   :  { %5105 = vmatprep.subr.bf16.mxu1 %v11944_v42  ;;  %5146 = vmatprep.subr.bf16.mxu0 %v11946_v8  ;;  %v12124_v28 = vcombine.high %v4401_v29, %v4405_v39 }
 0x23b   :  { %4165 = vmatprep.mubr.bf16.mxu1 %v14604_v59  ;;  %4238 = vmatprep.mubr.bf16.mxu0 %v14604_v59  ;;  %v11998_v59 = vcombine.high %v4313_v33, %v4317_v9  ;;  %14637 = vst [vmem:[#allocation42_spill] sm:$0xff] %v12026_v54  ;;  %14639 = vst [vmem:[#allocation44_spill] sm:$0xff] %v12046_v24  ;;  %v4414_v33 = vld [vmem:[%s14278_s7 + $0x328] sm:$0xff]  ;;  %v12094_v9 = vcombine.low %v4417_v37, %v4421_v3  ;;  %v4393_v3 = vld [vmem:[%s14278_s7 + $0x280] sm:$0xff] }
 0x23c   :  { %v12102_v18 = vcombine.high %v4410_v40, %v4414_v33  ;;  %v12120_v31 = vcombine.low %v4410_v40, %v4414_v33  ;;  %14653 = vst [vmem:[#allocation58_spill] sm:$0xff] %v12124_v28  ;;  %v12148_v33 = vcombine.high %v4393_v3, %v4397_v57 }
 0x23d   :  { %5106 = vmatpush1.bf16.msra.mxu1 %v11966_v20  ;;  %5147 = vmatpush1.bf16.msra.mxu0 %v11968_v19  ;;  %14633 = vst [vmem:[#allocation38_spill] sm:$0xff] %v11998_v59  ;;  %14647 = vst [vmem:[#allocation52_spill] sm:$0xff] %v12094_v9 }
 0x23e   :  { %5107 = vmatprep.subr.bf16.mxu1 %v11972_v46  ;;  %5148 = vmatprep.subr.bf16.mxu0 %v11974_v47  ;;  %14650 = vst [vmem:[#allocation55_spill] sm:$0xff] %v12102_v18  ;;  %14652 = vst [vmem:[#allocation57_spill] sm:$0xff] %v12120_v31 }
 0x23f   :  { %14657 = vst [vmem:[#allocation62_spill] sm:$0xff] %v12148_v33 }
 0x240   :  { %8457 = vmatmul.mubr.msk.bf16.gmra.mxu1 %vm304_vm3, %v11812_v51  ;;  %8461 = vmatmul.mubr.msk.bf16.gmra.mxu0 %vm304_vm3, %v11812_v51  ;;  %v4425_v51 = vld [vmem:[%s14278_s7 + $0x380] sm:$0xff] }
 0x241   :  { %5108 = vmatpush1.bf16.msra.mxu1 %v11992_v63  ;;  %5149 = vmatpush1.bf16.msra.mxu0 %v11994_v50  ;;  %v12052_v52 = vcombine.high %v4425_v51, %v4429_v6  ;;  %v12070_v34 = vcombine.low %v4425_v51, %v4429_v6  ;;  %v4406_v51 = vld [vmem:[%s14278_s7 + $0x2e8] sm:$0xff]  ;;  %v12118_v6 = vcombine.low %v4409_v45, %v4413_v61 }
 0x242   :  { %5109 = vmatprep.subr.bf16.mxu1 %v11998_v59  ;;  %5150 = vmatprep.subr.bf16.mxu0 %v12000_v16  ;;  %v12126_v37 = vcombine.high %v4402_v41, %v4406_v51  ;;  %v4398_v45 = vld [vmem:[%s14278_s7 + $0x2a8] sm:$0xff]  ;;  %v12142_v61 = vcombine.low %v4401_v29, %v4405_v39  ;;  %v12144_v40 = vcombine.low %v4402_v41, %v4406_v51 }
 0x243   :  { %5127 = vmatprep.mubr.bf16.mxu1 %v14295_v4  ;;  %5168 = vmatprep.mubr.bf16.mxu0 %v14295_v4  ;;  %14641 = vst [vmem:[#allocation46_spill] sm:$0xff] %v12052_v52  ;;  %14643 = vst [vmem:[#allocation48_spill] sm:$0xff] %v12070_v34  ;;  %v12150_v4 = vcombine.high %v4394_v56, %v4398_v45  ;;  %v4386_v29 = vld [vmem:[%s14278_s7 + $0x248] sm:$0xff]  ;;  %v12166_v41 = vcombine.low %v4393_v3, %v4397_v57 }
 0x244   :  { %14651 = vst [vmem:[#allocation56_spill] sm:$0xff] %v12118_v6  ;;  %14654 = vst [vmem:[#allocation59_spill] sm:$0xff] %v12126_v37  ;;  %v4390_v39 = vld [vmem:[%s14278_s7 + $0x268] sm:$0xff]  ;;  %v12168_v51 = vcombine.low %v4394_v56, %v4398_v45 }
 0x245   :  { %5110 = vmatpush1.bf16.msra.mxu1 %v12020_v26  ;;  %5151 = vmatpush1.bf16.msra.mxu0 %v12022_v32  ;;  %14655 = vst [vmem:[#allocation60_spill] sm:$0xff] %v12142_v61  ;;  %14656 = vst [vmem:[#allocation61_spill] sm:$0xff] %v12144_v40  ;;  %v4378_v3 = vld [vmem:[%s14278_s7 + $0x208] sm:$0xff]  ;;  %v12192_v45 = vcombine.low %v4386_v29, %v4390_v39 }
 0x246   :  { %5111 = vmatprep.subr.bf16.mxu1 %v12026_v54  ;;  %5152 = vmatprep.subr.bf16.mxu0 %v12028_v10  ;;  %14658 = vst [vmem:[#allocation63_spill] sm:$0xff] %v12150_v4  ;;  %14659 = vst [vmem:[#allocation64_spill] sm:$0xff] %v12166_v41  ;;  %v4382_v57 = vld [vmem:[%s14278_s7 + $0x228] sm:$0xff] }
 0x247   :  { %14660 = vst [vmem:[#allocation65_spill] sm:$0xff] %v12168_v51  ;;  %14664 = vst [vmem:[#allocation69_spill] sm:$0xff] %v12192_v45 }
 0x249   :  { %5112 = vmatpush2.bf16.msra.mxu1 %v12046_v24  ;;  %5153 = vmatpush2.bf16.msra.mxu0 %v12048_v14 }
 0x24a   :  { %5113 = vmatprep.subr.bf16.mxu1 %v12052_v52  ;;  %5154 = vmatprep.subr.bf16.mxu0 %v12054_v38 }
 0x24d   :  { %5114 = vmatpush2.bf16.msra.mxu1 %v12070_v34  ;;  %5155 = vmatpush2.bf16.msra.mxu0 %v12072_v11 }
 0x24e   :  { %5115 = vmatprep.subr.bf16.mxu1 %v12076_v30  ;;  %5156 = vmatprep.subr.bf16.mxu0 %v12078_v13 }
 0x251   :  { %5116 = vmatpush2.bf16.msra.mxu1 %v12094_v9  ;;  %5157 = vmatpush2.bf16.msra.mxu0 %v12096_v58 }
 0x252   :  { %5117 = vmatprep.subr.bf16.mxu1 %v12100_v23  ;;  %5158 = vmatprep.subr.bf16.mxu0 %v12102_v18  ;;  %v4347_v18 = vld [vmem:[%s14278_s7 + $0x110] sm:$0xff] }
 0x255   :  { %5118 = vmatpush2.bf16.msra.mxu1 %v12118_v6  ;;  %5159 = vmatpush2.bf16.msra.mxu0 %v12120_v31  ;;  %v4389_v31 = vld [vmem:[%s14278_s7 + $0x260] sm:$0xff] }
 0x256   :  { %5119 = vmatprep.subr.bf16.mxu1 %v12124_v28  ;;  %5160 = vmatprep.subr.bf16.mxu0 %v12126_v37  ;;  %v12172_v37 = vcombine.high %v4385_v53, %v4389_v31  ;;  %v12174_v28 = vcombine.high %v4386_v29, %v4390_v39  ;;  %v4377_v6 = vld [vmem:[%s14278_s7 + $0x200] sm:$0xff]  ;;  %v12190_v56 = vcombine.low %v4385_v53, %v4389_v31  ;;  %v4372_v53 = vld [vmem:[%s14278_s7 + $0x1d8] sm:$0xff] }
 0x257   :  { %v4376_v31 = vld [vmem:[%s14278_s7 + $0x1f8] sm:$0xff]  ;;  %v12216_v39 = vcombine.low %v4378_v3, %v4382_v57 }
 0x258   :  { %14661 = vst [vmem:[#allocation66_spill] sm:$0xff] %v12172_v37  ;;  %14662 = vst [vmem:[#allocation67_spill] sm:$0xff] %v12174_v28 }
 0x259   :  { %5120 = vmatpush2.bf16.msra.mxu1 %v12142_v61  ;;  %5161 = vmatpush2.bf16.msra.mxu0 %v12144_v40  ;;  %v4381_v40 = vld [vmem:[%s14278_s7 + $0x220] sm:$0xff]  ;;  %14663 = vst [vmem:[#allocation68_spill] sm:$0xff] %v12190_v56  ;;  %v4371_v61 = vld [vmem:[%s14278_s7 + $0x1d0] sm:$0xff]  ;;  %14668 = vst [vmem:[#allocation73_spill] sm:$0xff] %v12216_v39 }
 0x25a   :  { %5121 = vmatprep.subr.bf16.mxu1 %v12148_v33  ;;  %5162 = vmatprep.subr.bf16.mxu0 %v12150_v4  ;;  %v12196_v4 = vcombine.high %v4377_v6, %v4381_v40  ;;  %v12198_v33 = vcombine.high %v4378_v3, %v4382_v57  ;;  %v12214_v29 = vcombine.low %v4377_v6, %v4381_v40  ;;  %v4364_v6 = vld [vmem:[%s14278_s7 + $0x198] sm:$0xff] }
 0x25b   :  { %v4368_v40 = vld [vmem:[%s14278_s7 + $0x1b8] sm:$0xff]  ;;  %v12240_v57 = vcombine.low %v4372_v53, %v4376_v31 }
 0x25c   :  { %14665 = vst [vmem:[#allocation70_spill] sm:$0xff] %v12196_v4  ;;  %14666 = vst [vmem:[#allocation71_spill] sm:$0xff] %v12198_v33 }
 0x25d   :  { %5122 = vmatpush2.bf16.msra.mxu1 %v12166_v41  ;;  %5163 = vmatpush2.bf16.msra.mxu0 %v12168_v51  ;;  %v4375_v51 = vld [vmem:[%s14278_s7 + $0x1f0] sm:$0xff]  ;;  %14667 = vst [vmem:[#allocation72_spill] sm:$0xff] %v12214_v29  ;;  %14672 = vst [vmem:[#allocation77_spill] sm:$0xff] %v12240_v57 }
 0x25e   :  { %5123 = vmatprep.subr.bf16.mxu1 %v12172_v37  ;;  %5164 = vmatprep.subr.bf16.mxu0 %v12174_v28  ;;  %v12220_v28 = vcombine.high %v4371_v61, %v4375_v51  ;;  %v12222_v37 = vcombine.high %v4372_v53, %v4376_v31  ;;  %v4363_v41 = vld [vmem:[%s14278_s7 + $0x190] sm:$0xff]  ;;  %v12238_v3 = vcombine.low %v4371_v61, %v4375_v51  ;;  %v4356_v61 = vld [vmem:[%s14278_s7 + $0x158] sm:$0xff]  ;;  %v14675_v53 = vmov 0.0|0.0  }
 0x25f   :  { %v4360_v51 = vld [vmem:[%s14278_s7 + $0x178] sm:$0xff] }
 0x260   :  { %14669 = vst [vmem:[#allocation74_spill] sm:$0xff] %v12220_v28  ;;  %14670 = vst [vmem:[#allocation75_spill] sm:$0xff] %v12222_v37 }
 0x261   :  { %5124 = vmatpush2.bf16.msra.mxu1 %v12190_v56  ;;  %5165 = vmatpush2.bf16.msra.mxu0 %v12192_v45  ;;  %v4367_v45 = vld [vmem:[%s14278_s7 + $0x1b0] sm:$0xff]  ;;  %14671 = vst [vmem:[#allocation76_spill] sm:$0xff] %v12238_v3 }
 0x262   :  { %5125 = vmatprep.subr.bf16.mxu1 %v12196_v4  ;;  %5166 = vmatprep.subr.bf16.mxu0 %v12198_v33  ;;  %v12244_v33 = vcombine.high %v4363_v41, %v4367_v45  ;;  %v12246_v4 = vcombine.high %v4364_v6, %v4368_v40  ;;  %v4355_v56 = vld [vmem:[%s14278_s7 + $0x150] sm:$0xff]  ;;  %v12264_v31 = vcombine.low %v4363_v41, %v4367_v45  ;;  %v4348_v41 = vld [vmem:[%s14278_s7 + $0x118] sm:$0xff] }
 0x263   :  { %v4352_v45 = vld [vmem:[%s14278_s7 + $0x138] sm:$0xff] }
 0x264   :  { %14673 = vst [vmem:[#allocation78_spill] sm:$0xff] %v12244_v33  ;;  %14674 = vst [vmem:[#allocation79_spill] sm:$0xff] %v12246_v4 }
 0x265   :  { %5126 = vmatpush2.bf16.msra.mxu1 %v12214_v29  ;;  %5167 = vmatpush2.bf16.msra.mxu0 %v12216_v39  ;;  %v4359_v39 = vld [vmem:[%s14278_s7 + $0x170] sm:$0xff]  ;;  %14676 = vst [vmem:[#allocation80_spill] sm:$0xff] %v12264_v31  ;;  %v12272_v29 = vcombine.high %v4356_v61, %v4360_v51 }
 0x266   :  { %5177 = vmatprep.subr.bf16.mxu1 %v12220_v28  ;;  %5218 = vmatprep.subr.bf16.mxu0 %v12222_v37  ;;  %v12266_v37 = vcombine.low %v4364_v6, %v4368_v40  ;;  %v12270_v28 = vcombine.high %v4355_v56, %v4359_v39  ;;  %v12290_v6 = vcombine.low %v4355_v56, %v4359_v39  ;;  %v4340_v56 = vld [vmem:[%s14278_s7 + $0xd8] sm:$0xff] }
 0x267   :  { %14679 = vst [vmem:[#allocation83_spill] sm:$0xff] %v12272_v29  ;;  %v12292_v40 = vcombine.low %v4356_v61, %v4360_v51  ;;  %v4344_v39 = vld [vmem:[%s14278_s7 + $0xf8] sm:$0xff]  ;;  %v12316_v51 = vcombine.low %v4348_v41, %v4352_v45 }
 0x268   :  { %5128 = vmatmul.mubr.bf16.vlgmr.msra.gmra.mxu1 %v14675_v53  ;;  %5169 = vmatmul.mubr.bf16.vlgmr.msra.gmra.mxu0 %v14675_v53  ;;  %14677 = vst [vmem:[#allocation81_spill] sm:$0xff] %v12266_v37  ;;  %14678 = vst [vmem:[#allocation82_spill] sm:$0xff] %v12270_v28 }
 0x269   :  { %5178 = vmatpush1.bf16.msra.mxu1 %v12238_v3  ;;  %5219 = vmatpush1.bf16.msra.mxu0 %v12240_v57  ;;  %v4351_v57 = vld [vmem:[%s14278_s7 + $0x130] sm:$0xff]  ;;  %14680 = vst [vmem:[#allocation84_spill] sm:$0xff] %v12290_v6  ;;  %14681 = vst [vmem:[#allocation85_spill] sm:$0xff] %v12292_v40 }
 0x26a   :  { %5179 = vmatprep.subr.bf16.mxu1 %v12244_v33  ;;  %5220 = vmatprep.subr.bf16.mxu0 %v12246_v4  ;;  %v12296_v4 = vcombine.high %v4347_v18, %v4351_v57  ;;  %v12298_v33 = vcombine.high %v4348_v41, %v4352_v45  ;;  %v4339_v3 = vld [vmem:[%s14278_s7 + $0xd0] sm:$0xff]  ;;  %v12314_v61 = vcombine.low %v4347_v18, %v4351_v57  ;;  %v4332_v18 = vld [vmem:[%s14278_s7 + $0x98] sm:$0xff] }
 0x26b   :  { %5209 = vmatprep.mubr.bf16.mxu1 %v14675_v53  ;;  %5250 = vmatprep.mubr.bf16.mxu0 %v14675_v53  ;;  %14685 = vst [vmem:[#allocation89_spill] sm:$0xff] %v12316_v51  ;;  %v4336_v57 = vld [vmem:[%s14278_s7 + $0xb8] sm:$0xff]  ;;  %v12340_v45 = vcombine.low %v4340_v56, %v4344_v39 }
 0x26c   :  { %14682 = vst [vmem:[#allocation86_spill] sm:$0xff] %v12296_v4  ;;  %14683 = vst [vmem:[#allocation87_spill] sm:$0xff] %v12298_v33 }
 0x26d   :  { %5180 = vmatpush1.bf16.msra.mxu1 %v12264_v31  ;;  %5221 = vmatpush1.bf16.msra.mxu0 %v12266_v37  ;;  %v4343_v37 = vld [vmem:[%s14278_s7 + $0xf0] sm:$0xff]  ;;  %14684 = vst [vmem:[#allocation88_spill] sm:$0xff] %v12314_v61  ;;  %14689 = vst [vmem:[#allocation93_spill] sm:$0xff] %v12340_v45 }
 0x26e   :  { %5181 = vmatprep.subr.bf16.mxu1 %v12270_v28  ;;  %5222 = vmatprep.subr.bf16.mxu0 %v12272_v29  ;;  %v12320_v29 = vcombine.high %v4339_v3, %v4343_v37  ;;  %v12322_v28 = vcombine.high %v4340_v56, %v4344_v39  ;;  %v4331_v31 = vld [vmem:[%s14278_s7 + $0x90] sm:$0xff]  ;;  %v12338_v41 = vcombine.low %v4339_v3, %v4343_v37  ;;  %v4324_v37 = vld [vmem:[%s14278_s7 + $0x58] sm:$0xff] }
 0x26f   :  { %v4328_v3 = vld [vmem:[%s14278_s7 + $0x78] sm:$0xff]  ;;  %v12364_v39 = vcombine.low %v4332_v18, %v4336_v57 }
 0x270   :  { %14686 = vst [vmem:[#allocation90_spill] sm:$0xff] %v12320_v29  ;;  %14687 = vst [vmem:[#allocation91_spill] sm:$0xff] %v12322_v28 }
 0x271   :  { %5182 = vmatpush1.bf16.msra.mxu1 %v12290_v6  ;;  %5223 = vmatpush1.bf16.msra.mxu0 %v12292_v40  ;;  %v4335_v40 = vld [vmem:[%s14278_s7 + $0xb0] sm:$0xff]  ;;  %14688 = vst [vmem:[#allocation92_spill] sm:$0xff] %v12338_v41  ;;  %14693 = vst [vmem:[#allocation97_spill] sm:$0xff] %v12364_v39 }
 0x272   :  { %5183 = vmatprep.subr.bf16.mxu1 %v12296_v4  ;;  %5224 = vmatprep.subr.bf16.mxu0 %v12298_v33  ;;  %v12344_v33 = vcombine.high %v4331_v31, %v4335_v40  ;;  %v12346_v4 = vcombine.high %v4332_v18, %v4336_v57  ;;  %v4323_v6 = vld [vmem:[%s14278_s7 + $0x50] sm:$0xff]  ;;  %v12362_v56 = vcombine.low %v4331_v31, %v4335_v40  ;;  %v4316_v31 = vld [vmem:[%s14278_s7 + $0x18] sm:$0xff] }
 0x273   :  { %v4320_v40 = vld [vmem:[%s14278_s7 + $0x38] sm:$0xff]  ;;  %v12388_v57 = vcombine.low %v4324_v37, %v4328_v3 }
 0x274   :  { %14690 = vst [vmem:[#allocation94_spill] sm:$0xff] %v12344_v33  ;;  %14691 = vst [vmem:[#allocation95_spill] sm:$0xff] %v12346_v4 }
 0x275   :  { %5184 = vmatpush1.bf16.msra.mxu1 %v12314_v61  ;;  %5225 = vmatpush1.bf16.msra.mxu0 %v12316_v51  ;;  %v4327_v51 = vld [vmem:[%s14278_s7 + $0x70] sm:$0xff]  ;;  %14692 = vst [vmem:[#allocation96_spill] sm:$0xff] %v12362_v56  ;;  %14697 = vst [vmem:[#allocation101_spill] sm:$0xff] %v12388_v57 }
 0x276   :  { %5185 = vmatprep.subr.bf16.mxu1 %v12320_v29  ;;  %5226 = vmatprep.subr.bf16.mxu0 %v12322_v28  ;;  %v12368_v28 = vcombine.high %v4323_v6, %v4327_v51  ;;  %v12370_v29 = vcombine.high %v4324_v37, %v4328_v3  ;;  %v4315_v61 = vld [vmem:[%s14278_s7 + $0x10] sm:$0xff]  ;;  %v12386_v18 = vcombine.low %v4323_v6, %v4327_v51  ;;  %v4436_v6 = vld [vmem:[%s14278_s7 + $0x3d8] sm:$0xff] }
 0x277   :  { %v4440_v51 = vld [vmem:[%s14278_s7 + $0x3f8] sm:$0xff]  ;;  %v12412_v3 = vcombine.low %v4316_v31, %v4320_v40 }
 0x278   :  { %14694 = vst [vmem:[#allocation98_spill] sm:$0xff] %v12368_v28  ;;  %14695 = vst [vmem:[#allocation99_spill] sm:$0xff] %v12370_v29 }
 0x279   :  { %5186 = vmatpush1.bf16.msra.mxu1 %v12338_v41  ;;  %5227 = vmatpush1.bf16.msra.mxu0 %v12340_v45  ;;  %v4319_v45 = vld [vmem:[%s14278_s7 + $0x30] sm:$0xff]  ;;  %14696 = vst [vmem:[#allocation100_spill] sm:$0xff] %v12386_v18  ;;  %14701 = vst [vmem:[#allocation105_spill] sm:$0xff] %v12412_v3 }
 0x27a   :  { %5187 = vmatprep.subr.bf16.mxu1 %v12344_v33  ;;  %5228 = vmatprep.subr.bf16.mxu0 %v12346_v4  ;;  %v12392_v4 = vcombine.high %v4315_v61, %v4319_v45  ;;  %v12394_v33 = vcombine.high %v4316_v31, %v4320_v40  ;;  %v4435_v41 = vld [vmem:[%s14278_s7 + $0x3d0] sm:$0xff]  ;;  %v12410_v37 = vcombine.low %v4315_v61, %v4319_v45  ;;  %v4428_v61 = vld [vmem:[%s14278_s7 + $0x398] sm:$0xff] }
 0x27b   :  { %v4432_v45 = vld [vmem:[%s14278_s7 + $0x3b8] sm:$0xff]  ;;  %v12436_v40 = vcombine.low %v4436_v6, %v4440_v51 }
 0x27c   :  { %14698 = vst [vmem:[#allocation102_spill] sm:$0xff] %v12392_v4  ;;  %14699 = vst [vmem:[#allocation103_spill] sm:$0xff] %v12394_v33 }
 0x27d   :  { %5188 = vmatpush1.bf16.msra.mxu1 %v12362_v56  ;;  %5229 = vmatpush1.bf16.msra.mxu0 %v12364_v39  ;;  %v4439_v39 = vld [vmem:[%s14278_s7 + $0x3f0] sm:$0xff]  ;;  %14700 = vst [vmem:[#allocation104_spill] sm:$0xff] %v12410_v37  ;;  %14705 = vst [vmem:[#allocation109_spill] sm:$0xff] %v12436_v40 }
 0x27e   :  { %5189 = vmatprep.subr.bf16.mxu1 %v12368_v28  ;;  %5230 = vmatprep.subr.bf16.mxu0 %v12370_v29  ;;  %v12416_v29 = vcombine.high %v4435_v41, %v4439_v39  ;;  %v12418_v28 = vcombine.high %v4436_v6, %v4440_v51  ;;  %v4427_v56 = vld [vmem:[%s14278_s7 + $0x390] sm:$0xff]  ;;  %v12434_v31 = vcombine.low %v4435_v41, %v4439_v39  ;;  %v4420_v41 = vld [vmem:[%s14278_s7 + $0x358] sm:$0xff] }
 0x27f   :  { %v4424_v39 = vld [vmem:[%s14278_s7 + $0x378] sm:$0xff]  ;;  %v12460_v51 = vcombine.low %v4428_v61, %v4432_v45 }
 0x280   :  { %14702 = vst [vmem:[#allocation106_spill] sm:$0xff] %v12416_v29  ;;  %14703 = vst [vmem:[#allocation107_spill] sm:$0xff] %v12418_v28 }
 0x281   :  { %5190 = vmatpush1.bf16.msra.mxu1 %v12386_v18  ;;  %5231 = vmatpush1.bf16.msra.mxu0 %v12388_v57  ;;  %v4431_v57 = vld [vmem:[%s14278_s7 + $0x3b0] sm:$0xff]  ;;  %14704 = vst [vmem:[#allocation108_spill] sm:$0xff] %v12434_v31  ;;  %14709 = vst [vmem:[#allocation113_spill] sm:$0xff] %v12460_v51 }
 0x282   :  { %5191 = vmatprep.subr.bf16.mxu1 %v12392_v4  ;;  %5232 = vmatprep.subr.bf16.mxu0 %v12394_v33  ;;  %v12440_v33 = vcombine.high %v4427_v56, %v4431_v57  ;;  %v12442_v4 = vcombine.high %v4428_v61, %v4432_v45  ;;  %v4419_v18 = vld [vmem:[%s14278_s7 + $0x350] sm:$0xff]  ;;  %v12458_v6 = vcombine.low %v4427_v56, %v4431_v57  ;;  %v4412_v56 = vld [vmem:[%s14278_s7 + $0x318] sm:$0xff] }
 0x283   :  { %v4416_v57 = vld [vmem:[%s14278_s7 + $0x338] sm:$0xff]  ;;  %v12484_v45 = vcombine.low %v4420_v41, %v4424_v39 }
 0x284   :  { %14706 = vst [vmem:[#allocation110_spill] sm:$0xff] %v12440_v33  ;;  %14707 = vst [vmem:[#allocation111_spill] sm:$0xff] %v12442_v4 }
 0x285   :  { %5192 = vmatpush1.bf16.msra.mxu1 %v12410_v37  ;;  %5233 = vmatpush1.bf16.msra.mxu0 %v12412_v3  ;;  %v4423_v3 = vld [vmem:[%s14278_s7 + $0x370] sm:$0xff]  ;;  %14708 = vst [vmem:[#allocation112_spill] sm:$0xff] %v12458_v6  ;;  %14713 = vst [vmem:[#allocation117_spill] sm:$0xff] %v12484_v45 }
 0x286   :  { %5193 = vmatprep.subr.bf16.mxu1 %v12416_v29  ;;  %5234 = vmatprep.subr.bf16.mxu0 %v12418_v28  ;;  %v12464_v28 = vcombine.high %v4419_v18, %v4423_v3  ;;  %v12466_v29 = vcombine.high %v4420_v41, %v4424_v39  ;;  %v4411_v37 = vld [vmem:[%s14278_s7 + $0x310] sm:$0xff]  ;;  %v12482_v61 = vcombine.low %v4419_v18, %v4423_v3  ;;  %v4404_v18 = vld [vmem:[%s14278_s7 + $0x2d8] sm:$0xff] }
 0x287   :  { %v4408_v3 = vld [vmem:[%s14278_s7 + $0x2f8] sm:$0xff]  ;;  %v12508_v39 = vcombine.low %v4412_v56, %v4416_v57 }
 0x288   :  { %14710 = vst [vmem:[#allocation114_spill] sm:$0xff] %v12464_v28  ;;  %14711 = vst [vmem:[#allocation115_spill] sm:$0xff] %v12466_v29 }
 0x289   :  { %5194 = vmatpush2.bf16.msra.mxu1 %v12434_v31  ;;  %5235 = vmatpush2.bf16.msra.mxu0 %v12436_v40  ;;  %v4415_v40 = vld [vmem:[%s14278_s7 + $0x330] sm:$0xff]  ;;  %14712 = vst [vmem:[#allocation116_spill] sm:$0xff] %v12482_v61  ;;  %14717 = vst [vmem:[#allocation121_spill] sm:$0xff] %v12508_v39 }
 0x28a   :  { %5195 = vmatprep.subr.bf16.mxu1 %v12440_v33  ;;  %5236 = vmatprep.subr.bf16.mxu0 %v12442_v4  ;;  %v12488_v4 = vcombine.high %v4411_v37, %v4415_v40  ;;  %v12490_v33 = vcombine.high %v4412_v56, %v4416_v57  ;;  %v4403_v31 = vld [vmem:[%s14278_s7 + $0x2d0] sm:$0xff]  ;;  %v12506_v41 = vcombine.low %v4411_v37, %v4415_v40  ;;  %v4396_v37 = vld [vmem:[%s14278_s7 + $0x298] sm:$0xff] }
 0x28b   :  { %v4400_v40 = vld [vmem:[%s14278_s7 + $0x2b8] sm:$0xff]  ;;  %v12532_v57 = vcombine.low %v4404_v18, %v4408_v3 }
 0x28c   :  { %14714 = vst [vmem:[#allocation118_spill] sm:$0xff] %v12488_v4  ;;  %14715 = vst [vmem:[#allocation119_spill] sm:$0xff] %v12490_v33 }
 0x28d   :  { %5196 = vmatpush2.bf16.msra.mxu1 %v12458_v6  ;;  %5237 = vmatpush2.bf16.msra.mxu0 %v12460_v51  ;;  %v4407_v51 = vld [vmem:[%s14278_s7 + $0x2f0] sm:$0xff]  ;;  %14716 = vst [vmem:[#allocation120_spill] sm:$0xff] %v12506_v41  ;;  %14721 = vst [vmem:[#allocation125_spill] sm:$0xff] %v12532_v57 }
 0x28e   :  { %5197 = vmatprep.subr.bf16.mxu1 %v12464_v28  ;;  %5238 = vmatprep.subr.bf16.mxu0 %v12466_v29  ;;  %v12512_v29 = vcombine.high %v4403_v31, %v4407_v51  ;;  %v12514_v28 = vcombine.high %v4404_v18, %v4408_v3  ;;  %v4395_v6 = vld [vmem:[%s14278_s7 + $0x290] sm:$0xff]  ;;  %v12530_v56 = vcombine.low %v4403_v31, %v4407_v51  ;;  %v4388_v31 = vld [vmem:[%s14278_s7 + $0x258] sm:$0xff] }
 0x28f   :  { %v4392_v51 = vld [vmem:[%s14278_s7 + $0x278] sm:$0xff]  ;;  %v12556_v3 = vcombine.low %v4396_v37, %v4400_v40 }
 0x290   :  { %14718 = vst [vmem:[#allocation122_spill] sm:$0xff] %v12512_v29  ;;  %14719 = vst [vmem:[#allocation123_spill] sm:$0xff] %v12514_v28 }
 0x291   :  { %5198 = vmatpush2.bf16.msra.mxu1 %v12482_v61  ;;  %5239 = vmatpush2.bf16.msra.mxu0 %v12484_v45  ;;  %v4399_v45 = vld [vmem:[%s14278_s7 + $0x2b0] sm:$0xff]  ;;  %14720 = vst [vmem:[#allocation124_spill] sm:$0xff] %v12530_v56  ;;  %14725 = vst [vmem:[#allocation129_spill] sm:$0xff] %v12556_v3 }
 0x292   :  { %5199 = vmatprep.subr.bf16.mxu1 %v12488_v4  ;;  %5240 = vmatprep.subr.bf16.mxu0 %v12490_v33  ;;  %v12536_v33 = vcombine.high %v4395_v6, %v4399_v45  ;;  %v12538_v4 = vcombine.high %v4396_v37, %v4400_v40  ;;  %v4387_v61 = vld [vmem:[%s14278_s7 + $0x250] sm:$0xff]  ;;  %v12554_v18 = vcombine.low %v4395_v6, %v4399_v45  ;;  %v4380_v6 = vld [vmem:[%s14278_s7 + $0x218] sm:$0xff] }
 0x293   :  { %v4384_v45 = vld [vmem:[%s14278_s7 + $0x238] sm:$0xff]  ;;  %v12580_v40 = vcombine.low %v4388_v31, %v4392_v51 }
 0x294   :  { %14722 = vst [vmem:[#allocation126_spill] sm:$0xff] %v12536_v33  ;;  %14723 = vst [vmem:[#allocation127_spill] sm:$0xff] %v12538_v4 }
 0x295   :  { %5200 = vmatpush2.bf16.msra.mxu1 %v12506_v41  ;;  %5241 = vmatpush2.bf16.msra.mxu0 %v12508_v39  ;;  %v4391_v39 = vld [vmem:[%s14278_s7 + $0x270] sm:$0xff]  ;;  %14724 = vst [vmem:[#allocation128_spill] sm:$0xff] %v12554_v18  ;;  %14729 = vst [vmem:[#allocation133_spill] sm:$0xff] %v12580_v40 }
 0x296   :  { %5201 = vmatprep.subr.bf16.mxu1 %v12512_v29  ;;  %5242 = vmatprep.subr.bf16.mxu0 %v12514_v28  ;;  %v12560_v28 = vcombine.high %v4387_v61, %v4391_v39  ;;  %v12562_v29 = vcombine.high %v4388_v31, %v4392_v51  ;;  %v4379_v41 = vld [vmem:[%s14278_s7 + $0x210] sm:$0xff]  ;;  %v12578_v37 = vcombine.low %v4387_v61, %v4391_v39 }
 0x298   :  { %14726 = vst [vmem:[#allocation130_spill] sm:$0xff] %v12560_v28  ;;  %14727 = vst [vmem:[#allocation131_spill] sm:$0xff] %v12562_v29 }
 0x299   :  { %5202 = vmatpush2.bf16.msra.mxu1 %v12530_v56  ;;  %5243 = vmatpush2.bf16.msra.mxu0 %v12532_v57  ;;  %v4383_v57 = vld [vmem:[%s14278_s7 + $0x230] sm:$0xff]  ;;  %14728 = vst [vmem:[#allocation132_spill] sm:$0xff] %v12578_v37 }
 0x29a   :  { %5203 = vmatprep.subr.bf16.mxu1 %v12536_v33  ;;  %5244 = vmatprep.subr.bf16.mxu0 %v12538_v4  ;;  %v12584_v4 = vcombine.high %v4379_v41, %v4383_v57  ;;  %v12586_v33 = vcombine.high %v4380_v6, %v4384_v45  ;;  %v12590_v56 = vcombine.low %v4379_v41, %v4383_v57  ;;  %v12638_v41 = vld [vmem:[%s14279_s8] sm:$0xff] }
 0x29c   :  { %14730 = vst [vmem:[#allocation134_spill] sm:$0xff] %v12584_v4  ;;  %14731 = vst [vmem:[#allocation135_spill] sm:$0xff] %v12586_v33 }
 0x29d   :  { %5204 = vmatpush2.bf16.msra.mxu1 %v12554_v18  ;;  %5245 = vmatpush2.bf16.msra.mxu0 %v12556_v3  ;;  %14732 = vst [vmem:[#allocation136_spill] sm:$0xff] %v12590_v56  ;;  %v12592_v18 = vcombine.low %v4380_v6, %v4384_v45 }
 0x29e   :  { %5205 = vmatprep.subr.bf16.mxu1 %v12560_v28  ;;  %5246 = vmatprep.subr.bf16.mxu0 %v12562_v29 }
 0x29f   :  { %14733 = vst [vmem:[#allocation137_spill] sm:$0xff] %v12592_v18 }
 0x2a1   :  { %5206 = vmatpush2.bf16.msra.mxu1 %v12578_v37  ;;  %5247 = vmatpush2.bf16.msra.mxu0 %v12580_v40 }
 0x2a2   :  { %5207 = vmatprep.subr.bf16.mxu1 %v12584_v4  ;;  %5248 = vmatprep.subr.bf16.mxu0 %v12586_v33 }
 0x2a5   :  { %5208 = vmatpush2.bf16.msra.mxu1 %v12590_v56  ;;  %5249 = vmatpush2.bf16.msra.mxu0 %v12592_v18 }
 0x2a6   :  { %5328 = vmatprep.subr.bf16.mxu1 %v11798_v35  ;;  %5369 = vmatprep.subr.bf16.mxu0 %v11800_v1 }
 0x2a8   :  { %5210 = vmatmul.mubr.bf16.vlgmr.msra.gmra.mxu1 %v14675_v53  ;;  %5251 = vmatmul.mubr.bf16.vlgmr.msra.gmra.mxu0 %v14675_v53  ;;  %v14734_v53 = vld [vmem:[#allocation13_spill] sm:$0xff] }
 0x2a9   :  { %5329 = vmatpush1.bf16.msra.mxu1 %v11832_v15  ;;  %5370 = vmatpush1.bf16.msra.mxu0 %v11834_v36  ;;  %v3754_v61 = vsub.s32 2, %v14734_v53  ;;  %v3750_v31 = vsub.s32 1, %v14734_v53  ;;  %v3758_v51 = vsub.s32 3, %v14734_v53 }
 0x2aa   :  { %5330 = vmatprep.subr.bf16.mxu1 %v11836_v44  ;;  %5371 = vmatprep.subr.bf16.mxu0 %v11838_v5 }
 0x2ad   :  { %5331 = vmatpush1.bf16.msra.mxu1 %v11858_v48  ;;  %5372 = vmatpush1.bf16.msra.mxu0 %v11860_v49 }
 0x2ae   :  { %5332 = vmatprep.subr.bf16.mxu1 %v11864_v0  ;;  %5373 = vmatprep.subr.bf16.mxu0 %v11866_v60 }
 0x2b1   :  { %5333 = vmatpush1.bf16.msra.mxu1 %v11884_v7  ;;  %5374 = vmatpush1.bf16.msra.mxu0 %v11886_v12 }
 0x2b2   :  { %5334 = vmatprep.subr.bf16.mxu1 %v11890_v55  ;;  %5375 = vmatprep.subr.bf16.mxu0 %v11892_v21 }
 0x2b5   :  { %5335 = vmatpush1.bf16.msra.mxu1 %v11912_v62  ;;  %5376 = vmatpush1.bf16.msra.mxu0 %v11914_v2 }
 0x2b6   :  { %5336 = vmatprep.subr.bf16.mxu1 %v11918_v25  ;;  %5377 = vmatprep.subr.bf16.mxu0 %v11920_v17 }
 0x2b9   :  { %5337 = vmatpush1.bf16.msra.mxu1 %v11938_v27  ;;  %5378 = vmatpush1.bf16.msra.mxu0 %v11940_v22 }
 0x2ba   :  { %5338 = vmatprep.subr.bf16.mxu1 %v11944_v42  ;;  %5379 = vmatprep.subr.bf16.mxu0 %v11946_v8 }
 0x2bd   :  { %5339 = vmatpush1.bf16.msra.mxu1 %v11966_v20  ;;  %5380 = vmatpush1.bf16.msra.mxu0 %v11968_v19 }
 0x2be   :  { %5340 = vmatprep.subr.bf16.mxu1 %v11972_v46  ;;  %5381 = vmatprep.subr.bf16.mxu0 %v11974_v47 }
 0x2c1   :  { %5341 = vmatpush1.bf16.msra.mxu1 %v11992_v63  ;;  %5382 = vmatpush1.bf16.msra.mxu0 %v11994_v50 }
 0x2c2   :  { %5342 = vmatprep.subr.bf16.mxu1 %v11998_v59  ;;  %5383 = vmatprep.subr.bf16.mxu0 %v12000_v16 }
 0x2c5   :  { %5343 = vmatpush1.bf16.msra.mxu1 %v12020_v26  ;;  %5384 = vmatpush1.bf16.msra.mxu0 %v12022_v32  ;;  %v12662_v32 = vrot.slane %v12638_v41, %v3750_v31  ;;  %v12665_v26 = vrot.slane %v12638_v41, %v3758_v51 }
 0x2c6   :  { %5344 = vmatprep.subr.bf16.mxu1 %v12026_v54  ;;  %5385 = vmatprep.subr.bf16.mxu0 %v12028_v10  ;;  %v12656_v10 = vrot.slane %v12638_v41, %v11480_v43  ;;  %v12659_v54 = vrot.slane %v12638_v41, %v3754_v61 }
 0x2c8   :  { %v12640_v39 = vpop.f32.mrf.mxu1  ;;  %v12642_v57 = vpop.f32.mrf.mxu0 }
 0x2c9   :  { %5345 = vmatpush2.bf16.msra.mxu1 %v12046_v24  ;;  %5386 = vmatpush2.bf16.msra.mxu0 %v12048_v14 }
 0x2ca   :  { %v12648_v6 = vpop.f32.mrf.mxu1  ;;  %v12650_v45 = vpop.f32.mrf.mxu0  ;;  %5346 = vmatprep.subr.bf16.mxu1 %v12052_v52  ;;  %5387 = vmatprep.subr.bf16.mxu0 %v12054_v38 }
 0x2cc   :  { %v3995_v24 = vpop.f32.mrf.mxu1  ;;  %v4068_v14 = vpop.f32.mrf.mxu0 }
 0x2cd   :  { %v12668_v16 = vadd.f32 %v3995_v24, %v12656_v10  ;;  %v12671_v38 = vadd.f32 %v4068_v14, %v12659_v54  ;;  %5347 = vmatpush2.bf16.msra.mxu1 %v12070_v34  ;;  %5388 = vmatpush2.bf16.msra.mxu0 %v12072_v11 }
 0x2ce   :  { %v3997_v43 = vpop.f32.mrf.mxu1  ;;  %v4070_v61 = vpop.f32.mrf.mxu0  ;;  %5348 = vmatprep.subr.bf16.mxu1 %v12076_v30  ;;  %5389 = vmatprep.subr.bf16.mxu0 %v12078_v13 }
 0x2cf   :  { %14735 = vst [vmem:[#allocation13_spill] sm:$0xff] %v12668_v16  ;;  %14736 = vst [vmem:[#allocation138_spill] sm:$0xff] %v12671_v38  ;;  %v12678_v31 = vadd.f32 %v3997_v43, %v12662_v32  ;;  %v12681_v51 = vadd.f32 %v4070_v61, %v12665_v26  ;;  %v14741_v43 = vld [vmem:[#allocation55_spill] sm:$0xff] }
 0x2d0   :  { %v4001_v24 = vpop.f32.mrf.mxu1  ;;  %v4074_v16 = vpop.f32.mrf.mxu0 }
 0x2d1   :  { %14737 = vst [vmem:[#allocation139_spill] sm:$0xff] %v12678_v31  ;;  %14738 = vst [vmem:[#allocation140_spill] sm:$0xff] %v12681_v51  ;;  %v12684_v14 = vadd.f32 %v4001_v24, %v12656_v10  ;;  %v12687_v38 = vadd.f32 %v4074_v16, %v12659_v54  ;;  %5349 = vmatpush2.bf16.msra.mxu1 %v12094_v9  ;;  %5390 = vmatpush2.bf16.msra.mxu0 %v12096_v58  ;;  %v14746_v31 = vld [vmem:[#allocation56_spill] sm:$0xff]  ;;  %v14747_v58 = vld [vmem:[#allocation57_spill] sm:$0xff] }
 0x2d2   :  { %v4003_v30 = vpop.f32.mrf.mxu1  ;;  %v4076_v13 = vpop.f32.mrf.mxu0  ;;  %5350 = vmatprep.subr.bf16.mxu1 %v12100_v23  ;;  %5391 = vmatprep.subr.bf16.mxu0 %v14741_v43  ;;  %v14748_v9 = vld [vmem:[#allocation58_spill] sm:$0xff] }
 0x2d3   :  { %14739 = vst [vmem:[#allocation141_spill] sm:$0xff] %v12684_v14  ;;  %14740 = vst [vmem:[#allocation142_spill] sm:$0xff] %v12687_v38  ;;  %v12694_v61 = vadd.f32 %v4003_v30, %v12662_v32  ;;  %v12697_v51 = vadd.f32 %v4076_v13, %v12665_v26  ;;  %v14749_v30 = vld [vmem:[#allocation59_spill] sm:$0xff] }
 0x2d4   :  { %v4005_v24 = vpop.f32.mrf.mxu1  ;;  %v4078_v14 = vpop.f32.mrf.mxu0 }
 0x2d5   :  { %14742 = vst [vmem:[#allocation143_spill] sm:$0xff] %v12694_v61  ;;  %14743 = vst [vmem:[#allocation144_spill] sm:$0xff] %v12697_v51  ;;  %v12700_v16 = vadd.f32 %v4005_v24, %v12656_v10  ;;  %v12703_v38 = vadd.f32 %v4078_v14, %v12659_v54  ;;  %5351 = vmatpush2.bf16.msra.mxu1 %v14746_v31  ;;  %5392 = vmatpush2.bf16.msra.mxu0 %v14747_v58  ;;  %v14754_v61 = vld [vmem:[#allocation60_spill] sm:$0xff]  ;;  %v14755_v58 = vld [vmem:[#allocation61_spill] sm:$0xff] }
 0x2d6   :  { %v4007_v23 = vpop.f32.mrf.mxu1  ;;  %v4080_v43 = vpop.f32.mrf.mxu0  ;;  %5352 = vmatprep.subr.bf16.mxu1 %v14748_v9  ;;  %5393 = vmatprep.subr.bf16.mxu0 %v14749_v30  ;;  %v14756_v31 = vld [vmem:[#allocation62_spill] sm:$0xff] }
 0x2d7   :  { %14744 = vst [vmem:[#allocation145_spill] sm:$0xff] %v12700_v16  ;;  %14745 = vst [vmem:[#allocation146_spill] sm:$0xff] %v12703_v38  ;;  %v12710_v13 = vadd.f32 %v4007_v23, %v12662_v32  ;;  %v12713_v51 = vadd.f32 %v4080_v43, %v12665_v26  ;;  %v14757_v23 = vld [vmem:[#allocation63_spill] sm:$0xff] }
 0x2d8   :  { %v4011_v24 = vpop.f32.mrf.mxu1  ;;  %v4084_v16 = vpop.f32.mrf.mxu0 }
 0x2d9   :  { %14750 = vst [vmem:[#allocation147_spill] sm:$0xff] %v12710_v13  ;;  %14751 = vst [vmem:[#allocation148_spill] sm:$0xff] %v12713_v51  ;;  %v12716_v14 = vadd.f32 %v4011_v24, %v12656_v10  ;;  %v12719_v38 = vadd.f32 %v4084_v16, %v12659_v54  ;;  %5353 = vmatpush2.bf16.msra.mxu1 %v14754_v61  ;;  %5394 = vmatpush2.bf16.msra.mxu0 %v14755_v58  ;;  %v14762_v13 = vld [vmem:[#allocation64_spill] sm:$0xff]  ;;  %v14763_v58 = vld [vmem:[#allocation65_spill] sm:$0xff] }
 0x2da   :  { %v4013_v9 = vpop.f32.mrf.mxu1  ;;  %v4086_v30 = vpop.f32.mrf.mxu0  ;;  %5354 = vmatprep.subr.bf16.mxu1 %v14756_v31  ;;  %5395 = vmatprep.subr.bf16.mxu0 %v14757_v23  ;;  %v14764_v61 = vld [vmem:[#allocation66_spill] sm:$0xff] }
 0x2db   :  { %14752 = vst [vmem:[#allocation149_spill] sm:$0xff] %v12716_v14  ;;  %14753 = vst [vmem:[#allocation150_spill] sm:$0xff] %v12719_v38  ;;  %v12726_v43 = vadd.f32 %v4013_v9, %v12662_v32  ;;  %v12729_v51 = vadd.f32 %v4086_v30, %v12665_v26  ;;  %v14765_v9 = vld [vmem:[#allocation67_spill] sm:$0xff] }
 0x2dc   :  { %v4015_v24 = vpop.f32.mrf.mxu1  ;;  %v4088_v14 = vpop.f32.mrf.mxu0 }
 0x2dd   :  { %14758 = vst [vmem:[#allocation151_spill] sm:$0xff] %v12726_v43  ;;  %14759 = vst [vmem:[#allocation152_spill] sm:$0xff] %v12729_v51  ;;  %v12732_v16 = vadd.f32 %v4015_v24, %v12656_v10  ;;  %v12735_v38 = vadd.f32 %v4088_v14, %v12659_v54  ;;  %5355 = vmatpush2.bf16.msra.mxu1 %v14762_v13  ;;  %5396 = vmatpush2.bf16.msra.mxu0 %v14763_v58  ;;  %v14770_v43 = vld [vmem:[#allocation68_spill] sm:$0xff]  ;;  %v14771_v58 = vld [vmem:[#allocation69_spill] sm:$0xff] }
 0x2de   :  { %v4017_v31 = vpop.f32.mrf.mxu1  ;;  %v4090_v23 = vpop.f32.mrf.mxu0  ;;  %5356 = vmatprep.subr.bf16.mxu1 %v14764_v61  ;;  %5397 = vmatprep.subr.bf16.mxu0 %v14765_v9  ;;  %v14772_v13 = vld [vmem:[#allocation70_spill] sm:$0xff] }
 0x2df   :  { %14760 = vst [vmem:[#allocation153_spill] sm:$0xff] %v12732_v16  ;;  %14761 = vst [vmem:[#allocation154_spill] sm:$0xff] %v12735_v38  ;;  %v12742_v30 = vadd.f32 %v4017_v31, %v12662_v32  ;;  %v12745_v51 = vadd.f32 %v4090_v23, %v12665_v26  ;;  %v14773_v31 = vld [vmem:[#allocation71_spill] sm:$0xff] }
 0x2e0   :  { %v4021_v24 = vpop.f32.mrf.mxu1  ;;  %v4094_v16 = vpop.f32.mrf.mxu0 }
 0x2e1   :  { %14766 = vst [vmem:[#allocation155_spill] sm:$0xff] %v12742_v30  ;;  %14767 = vst [vmem:[#allocation156_spill] sm:$0xff] %v12745_v51  ;;  %v12748_v14 = vadd.f32 %v4021_v24, %v12656_v10  ;;  %v12751_v38 = vadd.f32 %v4094_v16, %v12659_v54  ;;  %5357 = vmatpush2.bf16.msra.mxu1 %v14770_v43  ;;  %5398 = vmatpush2.bf16.msra.mxu0 %v14771_v58  ;;  %v14778_v30 = vld [vmem:[#allocation72_spill] sm:$0xff]  ;;  %v14779_v58 = vld [vmem:[#allocation73_spill] sm:$0xff] }
 0x2e2   :  { %v4023_v61 = vpop.f32.mrf.mxu1  ;;  %v4096_v9 = vpop.f32.mrf.mxu0  ;;  %5358 = vmatprep.subr.bf16.mxu1 %v14772_v13  ;;  %5399 = vmatprep.subr.bf16.mxu0 %v14773_v31  ;;  %v14780_v43 = vld [vmem:[#allocation74_spill] sm:$0xff] }
 0x2e3   :  { %14768 = vst [vmem:[#allocation157_spill] sm:$0xff] %v12748_v14  ;;  %14769 = vst [vmem:[#allocation158_spill] sm:$0xff] %v12751_v38  ;;  %v12758_v23 = vadd.f32 %v4023_v61, %v12662_v32  ;;  %v12761_v51 = vadd.f32 %v4096_v9, %v12665_v26  ;;  %v14781_v61 = vld [vmem:[#allocation75_spill] sm:$0xff] }
 0x2e4   :  { %v4025_v24 = vpop.f32.mrf.mxu1  ;;  %v4098_v14 = vpop.f32.mrf.mxu0 }
 0x2e5   :  { %14774 = vst [vmem:[#allocation159_spill] sm:$0xff] %v12758_v23  ;;  %14775 = vst [vmem:[#allocation160_spill] sm:$0xff] %v12761_v51  ;;  %v12764_v16 = vadd.f32 %v4025_v24, %v12656_v10  ;;  %v12767_v38 = vadd.f32 %v4098_v14, %v12659_v54  ;;  %5359 = vmatpush2.bf16.msra.mxu1 %v14778_v30  ;;  %5400 = vmatpush2.bf16.msra.mxu0 %v14779_v58  ;;  %v3762_v24 = vsub.s32 4, %v14734_v53 }
 0x2e6   :  { %v4027_v13 = vpop.f32.mrf.mxu1  ;;  %v4100_v31 = vpop.f32.mrf.mxu0  ;;  %5410 = vmatprep.subr.bf16.mxu1 %v14780_v43  ;;  %5451 = vmatprep.subr.bf16.mxu0 %v14781_v61  ;;  %v3770_v14 = vsub.s32 6, %v14734_v53  ;;  %v3766_v23 = vsub.s32 5, %v14734_v53  ;;  %v3774_v43 = vsub.s32 7, %v14734_v53 }
 0x2e7   :  { %14776 = vst [vmem:[#allocation161_spill] sm:$0xff] %v12764_v16  ;;  %14777 = vst [vmem:[#allocation162_spill] sm:$0xff] %v12767_v38  ;;  %v12774_v9 = vadd.f32 %v4027_v13, %v12662_v32  ;;  %v12777_v51 = vadd.f32 %v4100_v31, %v12665_v26  ;;  %v12792_v13 = vrot.slane %v12638_v41, %v3762_v24 }
 0x2e8   :  { %v12781_v38 = vpop.f32.mrf.mxu1  ;;  %v12783_v16 = vpop.f32.mrf.mxu0  ;;  %v12795_v31 = vrot.slane %v12638_v41, %v3770_v14  ;;  %v12798_v30 = vrot.slane %v12638_v41, %v3766_v23  ;;  %v12801_v11 = vrot.slane %v12638_v41, %v3774_v43 }
 0x2e9   :  { %14782 = vst [vmem:[#allocation163_spill] sm:$0xff] %v12774_v9  ;;  %14783 = vst [vmem:[#allocation164_spill] sm:$0xff] %v12777_v51 }
 0x2ea   :  { %v12787_v58 = vpop.f32.mrf.mxu1  ;;  %v12789_v61 = vpop.f32.mrf.mxu0 }
 0x2ec   :  { %v4141_v51 = vpop.f32.mrf.mxu1  ;;  %v4214_v9 = vpop.f32.mrf.mxu0 }
 0x2ed   :  { %v12804_v53 = vadd.f32 %v4141_v51, %v12792_v13  ;;  %v12807_v34 = vadd.f32 %v4214_v9, %v12795_v31 }
 0x2ee   :  { %v4143_v52 = vpop.f32.mrf.mxu1  ;;  %v4216_v24 = vpop.f32.mrf.mxu0 }
 0x2ef   :  { %14784 = vst [vmem:[#allocation165_spill] sm:$0xff] %v12804_v53  ;;  %14785 = vst [vmem:[#allocation166_spill] sm:$0xff] %v12807_v34  ;;  %v12810_v59 = vadd.f32 %v4143_v52, %v12798_v30  ;;  %v12813_v14 = vadd.f32 %v4216_v24, %v12801_v11 }
 0x2f0   :  { %v4147_v50 = vpop.f32.mrf.mxu1  ;;  %v4220_v23 = vpop.f32.mrf.mxu0 }
 0x2f1   :  { %14786 = vst [vmem:[#allocation167_spill] sm:$0xff] %v12810_v59  ;;  %14787 = vst [vmem:[#allocation168_spill] sm:$0xff] %v12813_v14  ;;  %v12816_v63 = vadd.f32 %v4147_v50, %v12792_v13  ;;  %v12819_v41 = vadd.f32 %v4220_v23, %v12795_v31 }
 0x2f2   :  { %v4149_v51 = vpop.f32.mrf.mxu1  ;;  %v4222_v43 = vpop.f32.mrf.mxu0 }
 0x2f3   :  { %14788 = vst [vmem:[#allocation169_spill] sm:$0xff] %v12816_v63  ;;  %14789 = vst [vmem:[#allocation170_spill] sm:$0xff] %v12819_v41  ;;  %v12822_v9 = vadd.f32 %v4149_v51, %v12798_v30  ;;  %v12825_v34 = vadd.f32 %v4222_v43, %v12801_v11 }
 0x2f4   :  { %v4151_v52 = vpop.f32.mrf.mxu1  ;;  %v4224_v59 = vpop.f32.mrf.mxu0 }
 0x2f5   :  { %14790 = vst [vmem:[#allocation171_spill] sm:$0xff] %v12822_v9  ;;  %14791 = vst [vmem:[#allocation172_spill] sm:$0xff] %v12825_v34  ;;  %v12828_v24 = vadd.f32 %v4151_v52, %v12792_v13  ;;  %v12831_v14 = vadd.f32 %v4224_v59, %v12795_v31 }
 0x2f6   :  { %v4153_v50 = vpop.f32.mrf.mxu1  ;;  %v4226_v63 = vpop.f32.mrf.mxu0 }
 0x2f7   :  { %14792 = vst [vmem:[#allocation173_spill] sm:$0xff] %v12828_v24  ;;  %14793 = vst [vmem:[#allocation174_spill] sm:$0xff] %v12831_v14  ;;  %v12834_v23 = vadd.f32 %v4153_v50, %v12798_v30  ;;  %v12837_v41 = vadd.f32 %v4226_v63, %v12801_v11 }
 0x2f8   :  { %v4157_v51 = vpop.f32.mrf.mxu1  ;;  %v4230_v9 = vpop.f32.mrf.mxu0 }
 0x2f9   :  { %14794 = vst [vmem:[#allocation175_spill] sm:$0xff] %v12834_v23  ;;  %14795 = vst [vmem:[#allocation176_spill] sm:$0xff] %v12837_v41  ;;  %v12840_v43 = vadd.f32 %v4157_v51, %v12792_v13  ;;  %v12843_v34 = vadd.f32 %v4230_v9, %v12795_v31 }
 0x2fa   :  { %v4159_v52 = vpop.f32.mrf.mxu1  ;;  %v4232_v24 = vpop.f32.mrf.mxu0 }
 0x2fb   :  { %14796 = vst [vmem:[#allocation177_spill] sm:$0xff] %v12840_v43  ;;  %14797 = vst [vmem:[#allocation178_spill] sm:$0xff] %v12843_v34  ;;  %v12846_v59 = vadd.f32 %v4159_v52, %v12798_v30  ;;  %v12849_v14 = vadd.f32 %v4232_v24, %v12801_v11 }
 0x2fc   :  { %v4161_v50 = vpop.f32.mrf.mxu1  ;;  %v4234_v23 = vpop.f32.mrf.mxu0 }
 0x2fd   :  { %14798 = vst [vmem:[#allocation179_spill] sm:$0xff] %v12846_v59  ;;  %14799 = vst [vmem:[#allocation180_spill] sm:$0xff] %v12849_v14  ;;  %v12852_v63 = vadd.f32 %v4161_v50, %v12792_v13  ;;  %v12855_v41 = vadd.f32 %v4234_v23, %v12795_v31 }
 0x2fe   :  { %v4163_v51 = vpop.f32.mrf.mxu1  ;;  %v4236_v43 = vpop.f32.mrf.mxu0 }
 0x2ff   :  { %14800 = vst [vmem:[#allocation181_spill] sm:$0xff] %v12852_v63  ;;  %14801 = vst [vmem:[#allocation182_spill] sm:$0xff] %v12855_v41  ;;  %v12858_v9 = vadd.f32 %v4163_v51, %v12798_v30  ;;  %v12861_v34 = vadd.f32 %v4236_v43, %v12801_v11 }
 0x300   :  { %v4167_v52 = vpop.f32.mrf.mxu1  ;;  %v4240_v59 = vpop.f32.mrf.mxu0 }
 0x301   :  { %14802 = vst [vmem:[#allocation183_spill] sm:$0xff] %v12858_v9  ;;  %14803 = vst [vmem:[#allocation184_spill] sm:$0xff] %v12861_v34  ;;  %v12864_v24 = vadd.f32 %v4167_v52, %v12792_v13  ;;  %v12867_v14 = vadd.f32 %v4240_v59, %v12795_v31 }
 0x302   :  { %v4169_v50 = vpop.f32.mrf.mxu1  ;;  %v4242_v63 = vpop.f32.mrf.mxu0 }
 0x303   :  { %14804 = vst [vmem:[#allocation185_spill] sm:$0xff] %v12864_v24  ;;  %14805 = vst [vmem:[#allocation186_spill] sm:$0xff] %v12867_v14  ;;  %v12870_v23 = vadd.f32 %v4169_v50, %v12798_v30  ;;  %v12873_v41 = vadd.f32 %v4242_v63, %v12801_v11 }
 0x304   :  { %v4171_v51 = vpop.f32.mrf.mxu1  ;;  %v4244_v9 = vpop.f32.mrf.mxu0 }
 0x305   :  { %14806 = vst [vmem:[#allocation187_spill] sm:$0xff] %v12870_v23  ;;  %14807 = vst [vmem:[#allocation188_spill] sm:$0xff] %v12873_v41  ;;  %v12876_v43 = vadd.f32 %v4171_v51, %v12792_v13  ;;  %v12879_v34 = vadd.f32 %v4244_v9, %v12795_v31  ;;  %v3992_v9 = vadd.f32 %v12640_v39, %v12656_v10 }
 0x306   :  { %v4173_v52 = vpop.f32.mrf.mxu1  ;;  %v4246_v24 = vpop.f32.mrf.mxu0 }
 0x307   :  { %14808 = vst [vmem:[#allocation189_spill] sm:$0xff] %v12876_v43  ;;  %14809 = vst [vmem:[#allocation190_spill] sm:$0xff] %v12879_v34  ;;  %v12882_v59 = vadd.f32 %v4173_v52, %v12798_v30  ;;  %v12885_v14 = vadd.f32 %v4246_v24, %v12801_v11  ;;  %v4065_v34 = vadd.f32 %v12642_v57, %v12659_v54 }
 0x308   :  { %v3994_v52 = vadd.f32 %v12648_v6, %v12662_v32 }
 0x309   :  { %14810 = vst [vmem:[#allocation191_spill] sm:$0xff] %v12882_v59  ;;  %14811 = vst [vmem:[#allocation192_spill] sm:$0xff] %v12885_v14  ;;  %v4067_v14 = vadd.f32 %v12650_v45, %v12665_v26  ;;  %v4138_v26 = vadd.f32 %v12781_v38, %v12792_v13  ;;  %v4211_v45 = vadd.f32 %v12783_v16, %v12795_v31 }
 0x328   :  { %v5129_v50 = vpop.f32.mrf.mxu1  ;;  %v5170_v23 = vpop.f32.mrf.mxu0 }
 0x329   :  { %v5259_v59 = vadd.f32 %v5129_v50, %v3992_v9  ;;  %v5261_v24 = vadd.f32 %v5170_v23, %v4065_v34 }
 0x32a   :  { %v5131_v63 = vpop.f32.mrf.mxu1  ;;  %v5172_v41 = vpop.f32.mrf.mxu0 }
 0x32b   :  { %v5260_v43 = vadd.f32 %v5131_v63, %v3994_v52  ;;  %v8590_v19 = vmul.f32 -1.442695, %v5259_v59 }
 0x32c   :  { %v5133_v53 = vpop.f32.mrf.mxu1  ;;  %v5174_v47 = vpop.f32.mrf.mxu0 }
 0x32d   :  { %v5262_v53 = vadd.f32 %v5172_v41, %v4067_v14  ;;  %v8592_v47 = vmul.f32 -1.442695, %v5261_v24  ;;  %9538 = vpow2.f32 %v8590_v19  ;;  %v4140_v19 = vadd.f32 %v12787_v58, %v12798_v30 }
 0x32e   :  { %v5134_v46 = vpop.f32.mrf.mxu1  ;;  %v5175_v51 = vpop.f32.mrf.mxu0 }
 0x32f   :  { %v8591_v46 = vmul.f32 -1.442695, %v5260_v43  ;;  %v8593_v51 = vmul.f32 -1.442695, %v5262_v53  ;;  %9540 = vpow2.f32 %v8592_v47  ;;  %v4213_v43 = vadd.f32 %v12789_v61, %v12801_v11 }
 0x331   :  { %9542 = vpow2.f32 %v8591_v46 }
 0x332   :  { %9544 = vpow2.f32 %v8593_v51 }
 0x33a   :  { %v9539_v10 = vpop.eup %9538 }
 0x33b   :  { %v5273_v57 = vadd.f32 1.0, %v9539_v10 }
 0x33c   :  { %v9541_v54 = vpop.eup %9540 }
 0x33d   :  { %v5285_v6 = vadd.f32 1.0, %v9541_v54  ;;  %9546 = vrcp.f32 %v5273_v57 }
 0x33e   :  { %v9543_v39 = vpop.eup %9542 }
 0x33f   :  { %v9545_v32 = vpop.eup %9544  ;;  %v5274_v34 = vadd.f32 1.0, %v9543_v39  ;;  %9548 = vrcp.f32 %v5285_v6 }
 0x340   :  { %v5286_v14 = vadd.f32 1.0, %v9545_v32 }
 0x341   :  { %9550 = vrcp.f32 %v5274_v34 }
 0x34a   :  { %v9547_v11 = vpop.eup %9546 }
 0x34c   :  { %v9549_v61 = vpop.eup %9548 }
 0x34d   :  { %v5305_v51 = vmul.f32 0.0, %v9549_v61  ;;  %v14821_v61 = vld [vmem:[#allocation85_spill] sm:$0xff] }
 0x34e   :  { %v9551_v53 = vpop.eup %9550 }
 0x368   :  { %v5211_v41 = vpop.f32.mrf.mxu1  ;;  %v5252_v23 = vpop.f32.mrf.mxu0 }
 0x369   :  { %v5263_v59 = vadd.f32 %v5211_v41, %v4138_v26  ;;  %v5265_v50 = vadd.f32 %v5252_v23, %v4211_v45 }
 0x36a   :  { %v5213_v63 = vpop.f32.mrf.mxu1  ;;  %v5254_v9 = vpop.f32.mrf.mxu0 }
 0x36b   :  { %9552 = vtanh.f32 %v5263_v59  ;;  %v8594_v38 = vmul.f32 -1.442695, %v5265_v50  ;;  %v5264_v13 = vadd.f32 %v5213_v63, %v4140_v19  ;;  %v5266_v16 = vadd.f32 %v5254_v9, %v4213_v43 }
 0x36c   :  { %9554 = vrcp.f32 %v5286_v14  ;;  %v5215_v31 = vpop.f32.mrf.mxu1  ;;  %v5256_v58 = vpop.f32.mrf.mxu0 }
 0x36d   :  { %9556 = vpow2.f32 %v8594_v38  ;;  %v8595_v30 = vmul.f32 -1.442695, %v5266_v16  ;;  %v14812_v38 = vld [vmem:[#allocation76_spill] sm:$0xff]  ;;  %v14814_v16 = vld [vmem:[#allocation78_spill] sm:$0xff]  ;;  %v14815_v31 = vld [vmem:[#allocation79_spill] sm:$0xff] }
 0x36e   :  { %9558 = vtanh.f32 %v5264_v13  ;;  %v5216_v52 = vpop.f32.mrf.mxu1  ;;  %v5257_v24 = vpop.f32.mrf.mxu0  ;;  %v14813_v13 = vld [vmem:[#allocation77_spill] sm:$0xff]  ;;  %v14816_v58 = vld [vmem:[#allocation80_spill] sm:$0xff] }
 0x36f   :  { %9560 = vpow2.f32 %v8595_v30  ;;  %v14817_v30 = vld [vmem:[#allocation81_spill] sm:$0xff]  ;;  %v14818_v52 = vld [vmem:[#allocation82_spill] sm:$0xff]  ;;  %v14819_v24 = vld [vmem:[#allocation83_spill] sm:$0xff] }
 0x378   :  { %v9553_v47 = vpop.eup %9552 }
 0x379   :  { %v9555_v46 = vpop.eup %9554  ;;  %v5307_v10 = vmul.f32 %v9553_v47, %v9547_v11  ;;  %v14820_v11 = vld [vmem:[#allocation84_spill] sm:$0xff]  ;;  %v14823_v47 = vld [vmem:[#allocation87_spill] sm:$0xff] }
 0x37a   :  { %v9557_v54 = vpop.eup %9556  ;;  %v5306_v34 = vmul.f32 0.0, %v9555_v46  ;;  %v14824_v46 = vld [vmem:[#allocation88_spill] sm:$0xff] }
 0x37b   :  { %v9559_v39 = vpop.eup %9558  ;;  %v12903_v57 = vadd.f32 %v5307_v10, %v5305_v51  ;;  %v5299_v32 = vadd.f32 1.0, %v9557_v54  ;;  %v14825_v51 = vld [vmem:[#allocation89_spill] sm:$0xff]  ;;  %v14826_v10 = vld [vmem:[#allocation90_spill] sm:$0xff]  ;;  %v14827_v54 = vld [vmem:[#allocation91_spill] sm:$0xff] }
 0x37c   :  { %v9561_v6 = vpop.eup %9560  ;;  %v5308_v26 = vmul.f32 %v9559_v39, %v9551_v53  ;;  %v14822_v53 = vld [vmem:[#allocation86_spill] sm:$0xff]  ;;  %v14828_v39 = vld [vmem:[#allocation92_spill] sm:$0xff] }
 0x37d   :  { %9562 = vtanh.f32 %v12903_v57  ;;  %v5300_v45 = vadd.f32 1.0, %v9561_v6  ;;  %v14830_v6 = vld [vmem:[#allocation94_spill] sm:$0xff] }
 0x37e   :  { %9564 = vrcp.f32 %v5299_v32  ;;  %v12906_v19 = vadd.f32 %v5308_v26, %v5306_v34  ;;  %v14829_v32 = vld [vmem:[#allocation93_spill] sm:$0xff]  ;;  %v14831_v34 = vld [vmem:[#allocation95_spill] sm:$0xff]  ;;  %v14832_v26 = vld [vmem:[#allocation96_spill] sm:$0xff] }
 0x37f   :  { %9566 = vrcp.f32 %v5300_v45  ;;  %v14833_v45 = vld [vmem:[#allocation97_spill] sm:$0xff] }
 0x380   :  { %9568 = vtanh.f32 %v12906_v19 }
 0x38a   :  { %v9563_v14 = vpop.eup %9562 }
 0x38b   :  { %v9565_v41 = vpop.eup %9564 }
 0x38c   :  { %v9567_v23 = vpop.eup %9566  ;;  %v5313_v43 = vmul.f32 %v9565_v41, %v9563_v14  ;;  %v14834_v14 = vld [vmem:[#allocation98_spill] sm:$0xff]  ;;  %v14835_v41 = vld [vmem:[#allocation99_spill] sm:$0xff] }
 0x38d   :  { %v9569_v59 = vpop.eup %9568 }
 0x38e   :  { %v5314_v50 = vmul.f32 %v9569_v59, %v9567_v23  ;;  %5315 = vst [vmem:[#allocation7] sm:$0xff] %v5313_v43  ;;  %v12909_v9 = vpack.c.bf16 %v5313_v43, %v5313_v43  ;;  %v14836_v23 = vld [vmem:[#allocation100_spill] sm:$0xff]  ;;  %v14837_v43 = vld [vmem:[#allocation101_spill] sm:$0xff]  ;;  %v14838_v59 = vld [vmem:[#allocation102_spill] sm:$0xff] }
 0x390   :  { %5316 = vst [vmem:[#allocation7 + $0x8] sm:$0xff] %v5314_v50  ;;  %v5327_v63 = vpack.c.bf16 %v5314_v50, %v5314_v50  ;;  %v14839_v50 = vld [vmem:[#allocation103_spill] sm:$0xff] }
 0x392   :  { %5360 = vmatprep.mubr.bf16.mxu1 %v5327_v63  ;;  %5401 = vmatprep.mubr.bf16.mxu0 %v5327_v63 }
 0x393   :  { %5361 = vmatmul.mubr.bf16.vlgmr.msra.gmra.mxu1 %v12909_v9  ;;  %5402 = vmatmul.mubr.bf16.vlgmr.msra.gmra.mxu0 %v12909_v9 }
 0x394   :  { %5411 = vmatpush1.bf16.msra.mxu1 %v14812_v38  ;;  %5452 = vmatpush1.bf16.msra.mxu0 %v14813_v13 }
 0x395   :  { %5442 = vmatprep.mubr.bf16.mxu1 %v5327_v63  ;;  %5483 = vmatprep.mubr.bf16.mxu0 %v5327_v63  ;;  %v14840_v63 = vld [vmem:[#allocation104_spill] sm:$0xff] }
 0x396   :  { %5412 = vmatprep.subr.bf16.mxu1 %v14814_v16  ;;  %5453 = vmatprep.subr.bf16.mxu0 %v14815_v31 }
 0x398   :  { %5413 = vmatpush1.bf16.msra.mxu1 %v14816_v58  ;;  %5454 = vmatpush1.bf16.msra.mxu0 %v14817_v30 }
 0x399   :  { %5414 = vmatprep.subr.bf16.mxu1 %v14818_v52  ;;  %5455 = vmatprep.subr.bf16.mxu0 %v14819_v24 }
 0x39c   :  { %5415 = vmatpush1.bf16.msra.mxu1 %v14820_v11  ;;  %5456 = vmatpush1.bf16.msra.mxu0 %v14821_v61 }
 0x39d   :  { %5416 = vmatprep.subr.bf16.mxu1 %v14822_v53  ;;  %5457 = vmatprep.subr.bf16.mxu0 %v14823_v47 }
 0x3a0   :  { %5417 = vmatpush1.bf16.msra.mxu1 %v14824_v46  ;;  %5458 = vmatpush1.bf16.msra.mxu0 %v14825_v51 }
 0x3a1   :  { %5418 = vmatprep.subr.bf16.mxu1 %v14826_v10  ;;  %5459 = vmatprep.subr.bf16.mxu0 %v14827_v54 }
 0x3a4   :  { %5419 = vmatpush1.bf16.msra.mxu1 %v14828_v39  ;;  %5460 = vmatpush1.bf16.msra.mxu0 %v14829_v32 }
 0x3a5   :  { %5420 = vmatprep.subr.bf16.mxu1 %v14830_v6  ;;  %5461 = vmatprep.subr.bf16.mxu0 %v14831_v34  ;;  %v14841_v6 = vld [vmem:[#allocation105_spill] sm:$0xff]  ;;  %v14842_v34 = vld [vmem:[#allocation106_spill] sm:$0xff] }
 0x3a8   :  { %5421 = vmatpush1.bf16.msra.mxu1 %v14832_v26  ;;  %5462 = vmatpush1.bf16.msra.mxu0 %v14833_v45  ;;  %v14843_v26 = vld [vmem:[#allocation107_spill] sm:$0xff]  ;;  %v14844_v45 = vld [vmem:[#allocation108_spill] sm:$0xff] }
 0x3a9   :  { %5422 = vmatprep.subr.bf16.mxu1 %v14834_v14  ;;  %5463 = vmatprep.subr.bf16.mxu0 %v14835_v41  ;;  %v14845_v14 = vld [vmem:[#allocation109_spill] sm:$0xff]  ;;  %v14846_v41 = vld [vmem:[#allocation110_spill] sm:$0xff] }
 0x3ac   :  { %5423 = vmatpush1.bf16.msra.mxu1 %v14836_v23  ;;  %5464 = vmatpush1.bf16.msra.mxu0 %v14837_v43  ;;  %v14847_v23 = vld [vmem:[#allocation111_spill] sm:$0xff]  ;;  %v14848_v43 = vld [vmem:[#allocation112_spill] sm:$0xff] }
 0x3ad   :  { %5424 = vmatprep.subr.bf16.mxu1 %v14838_v59  ;;  %5465 = vmatprep.subr.bf16.mxu0 %v14839_v50  ;;  %v14849_v59 = vld [vmem:[#allocation113_spill] sm:$0xff]  ;;  %v14850_v50 = vld [vmem:[#allocation114_spill] sm:$0xff] }
 0x3b0   :  { %5425 = vmatpush1.bf16.msra.mxu1 %v14840_v63  ;;  %5466 = vmatpush1.bf16.msra.mxu0 %v14841_v6  ;;  %v14851_v63 = vld [vmem:[#allocation115_spill] sm:$0xff]  ;;  %v14852_v6 = vld [vmem:[#allocation116_spill] sm:$0xff] }
 0x3b1   :  { %5426 = vmatprep.subr.bf16.mxu1 %v14842_v34  ;;  %5467 = vmatprep.subr.bf16.mxu0 %v14843_v26  ;;  %v14853_v34 = vld [vmem:[#allocation117_spill] sm:$0xff]  ;;  %v14854_v26 = vld [vmem:[#allocation118_spill] sm:$0xff] }
 0x3b4   :  { %5427 = vmatpush2.bf16.msra.mxu1 %v14844_v45  ;;  %5468 = vmatpush2.bf16.msra.mxu0 %v14845_v14  ;;  %v14855_v45 = vld [vmem:[#allocation119_spill] sm:$0xff]  ;;  %v14856_v14 = vld [vmem:[#allocation120_spill] sm:$0xff] }
 0x3b5   :  { %5428 = vmatprep.subr.bf16.mxu1 %v14846_v41  ;;  %5469 = vmatprep.subr.bf16.mxu0 %v14847_v23  ;;  %v14857_v41 = vld [vmem:[#allocation121_spill] sm:$0xff]  ;;  %v14858_v23 = vld [vmem:[#allocation122_spill] sm:$0xff] }
 0x3b8   :  { %5429 = vmatpush2.bf16.msra.mxu1 %v14848_v43  ;;  %5470 = vmatpush2.bf16.msra.mxu0 %v14849_v59  ;;  %v14859_v43 = vld [vmem:[#allocation123_spill] sm:$0xff]  ;;  %v14860_v59 = vld [vmem:[#allocation124_spill] sm:$0xff] }
 0x3b9   :  { %5430 = vmatprep.subr.bf16.mxu1 %v14850_v50  ;;  %5471 = vmatprep.subr.bf16.mxu0 %v14851_v63  ;;  %v14861_v50 = vld [vmem:[#allocation125_spill] sm:$0xff]  ;;  %v14862_v63 = vld [vmem:[#allocation126_spill] sm:$0xff] }
 0x3bc   :  { %5431 = vmatpush2.bf16.msra.mxu1 %v14852_v6  ;;  %5472 = vmatpush2.bf16.msra.mxu0 %v14853_v34  ;;  %v14863_v6 = vld [vmem:[#allocation127_spill] sm:$0xff]  ;;  %v14864_v34 = vld [vmem:[#allocation128_spill] sm:$0xff] }
 0x3bd   :  { %5432 = vmatprep.subr.bf16.mxu1 %v14854_v26  ;;  %5473 = vmatprep.subr.bf16.mxu0 %v14855_v45 }
 0x3c0   :  { %5433 = vmatpush2.bf16.msra.mxu1 %v14856_v14  ;;  %5474 = vmatpush2.bf16.msra.mxu0 %v14857_v41 }
 0x3c1   :  { %5434 = vmatprep.subr.bf16.mxu1 %v14858_v23  ;;  %5475 = vmatprep.subr.bf16.mxu0 %v14859_v43 }
 0x3c4   :  { %5435 = vmatpush2.bf16.msra.mxu1 %v14860_v59  ;;  %5476 = vmatpush2.bf16.msra.mxu0 %v14861_v50 }
 0x3c5   :  { %5436 = vmatprep.subr.bf16.mxu1 %v14862_v63  ;;  %5477 = vmatprep.subr.bf16.mxu0 %v14863_v6 }
 0x3c8   :  { %5437 = vmatpush2.bf16.msra.mxu1 %v14864_v34  ;;  %5478 = vmatpush2.bf16.msra.mxu0 %v12556_v3 }
 0x3c9   :  { %5438 = vmatprep.subr.bf16.mxu1 %v12560_v28  ;;  %5479 = vmatprep.subr.bf16.mxu0 %v12562_v29 }
 0x3cc   :  { %5439 = vmatpush2.bf16.msra.mxu1 %v12578_v37  ;;  %5480 = vmatpush2.bf16.msra.mxu0 %v12580_v40 }
 0x3cd   :  { %5440 = vmatprep.subr.bf16.mxu1 %v12584_v4  ;;  %5481 = vmatprep.subr.bf16.mxu0 %v12586_v33 }
 0x3d0   :  { %5441 = vmatpush2.bf16.msra.mxu1 %v12590_v56  ;;  %5482 = vmatpush2.bf16.msra.mxu0 %v12592_v18 }
 0x3d1   :  { %5562 = vmatprep.subr.bf16.mxu1 %v11798_v35  ;;  %5603 = vmatprep.subr.bf16.mxu0 %v11800_v1 }
 0x3d3   :  { %5443 = vmatmul.mubr.bf16.vlgmr.msra.gmra.mxu1 %v12909_v9  ;;  %5484 = vmatmul.mubr.bf16.vlgmr.msra.gmra.mxu0 %v12909_v9  ;;  %v14865_v9 = vld [vmem:[#allocation33_spill] sm:$0xff] }
 0x3d4   :  { %5563 = vmatpush1.bf16.msra.mxu1 %v11832_v15  ;;  %5604 = vmatpush1.bf16.msra.mxu0 %v11834_v36 }
 0x3d5   :  { %5564 = vmatprep.subr.bf16.mxu1 %v11836_v44  ;;  %5605 = vmatprep.subr.bf16.mxu0 %v11838_v5 }
 0x3d8   :  { %5565 = vmatpush1.bf16.msra.mxu1 %v11858_v48  ;;  %5606 = vmatpush1.bf16.msra.mxu0 %v11860_v49  ;;  %v14910_v49 = vld [vmem:[#allocation139_spill] sm:$0xff] }
 0x3d9   :  { %5566 = vmatprep.subr.bf16.mxu1 %v11864_v0  ;;  %5607 = vmatprep.subr.bf16.mxu0 %v11866_v60  ;;  %v14908_v60 = vld [vmem:[#allocation13_spill] sm:$0xff]  ;;  %v14909_v0 = vld [vmem:[#allocation138_spill] sm:$0xff] }
 0x3dc   :  { %5567 = vmatpush1.bf16.msra.mxu1 %v11884_v7  ;;  %5608 = vmatpush1.bf16.msra.mxu0 %v11886_v12 }
 0x3dd   :  { %5568 = vmatprep.subr.bf16.mxu1 %v11890_v55  ;;  %5609 = vmatprep.subr.bf16.mxu0 %v11892_v21  ;;  %v14866_v21 = vld [vmem:[#allocation34_spill] sm:$0xff] }
 0x3e0   :  { %5569 = vmatpush1.bf16.msra.mxu1 %v11912_v62  ;;  %5610 = vmatpush1.bf16.msra.mxu0 %v11914_v2  ;;  %v14867_v62 = vld [vmem:[#allocation35_spill] sm:$0xff]  ;;  %v14868_v2 = vld [vmem:[#allocation36_spill] sm:$0xff] }
 0x3e1   :  { %5570 = vmatprep.subr.bf16.mxu1 %v11918_v25  ;;  %5611 = vmatprep.subr.bf16.mxu0 %v11920_v17  ;;  %v14869_v25 = vld [vmem:[#allocation37_spill] sm:$0xff]  ;;  %v14870_v17 = vld [vmem:[#allocation38_spill] sm:$0xff] }
 0x3e4   :  { %5571 = vmatpush1.bf16.msra.mxu1 %v11938_v27  ;;  %5612 = vmatpush1.bf16.msra.mxu0 %v11940_v22  ;;  %v14871_v27 = vld [vmem:[#allocation39_spill] sm:$0xff]  ;;  %v14872_v22 = vld [vmem:[#allocation40_spill] sm:$0xff] }
 0x3e5   :  { %5572 = vmatprep.subr.bf16.mxu1 %v11944_v42  ;;  %5613 = vmatprep.subr.bf16.mxu0 %v11946_v8  ;;  %v14873_v42 = vld [vmem:[#allocation41_spill] sm:$0xff]  ;;  %v14874_v8 = vld [vmem:[#allocation42_spill] sm:$0xff] }
 0x3e8   :  { %5573 = vmatpush1.bf16.msra.mxu1 %v11966_v20  ;;  %5614 = vmatpush1.bf16.msra.mxu0 %v14865_v9  ;;  %v14875_v20 = vld [vmem:[#allocation43_spill] sm:$0xff]  ;;  %v14876_v9 = vld [vmem:[#allocation44_spill] sm:$0xff] }
 0x3e9   :  { %5574 = vmatprep.subr.bf16.mxu1 %v14866_v21  ;;  %5615 = vmatprep.subr.bf16.mxu0 %v14867_v62  ;;  %v14877_v21 = vld [vmem:[#allocation45_spill] sm:$0xff]  ;;  %v14878_v62 = vld [vmem:[#allocation46_spill] sm:$0xff] }
 0x3ec   :  { %5575 = vmatpush1.bf16.msra.mxu1 %v14868_v2  ;;  %5616 = vmatpush1.bf16.msra.mxu0 %v14869_v25  ;;  %v14879_v2 = vld [vmem:[#allocation47_spill] sm:$0xff]  ;;  %v14880_v25 = vld [vmem:[#allocation48_spill] sm:$0xff] }
 0x3ed   :  { %5576 = vmatprep.subr.bf16.mxu1 %v14870_v17  ;;  %5617 = vmatprep.subr.bf16.mxu0 %v14871_v27  ;;  %v14881_v17 = vld [vmem:[#allocation49_spill] sm:$0xff]  ;;  %v14882_v27 = vld [vmem:[#allocation50_spill] sm:$0xff] }
 0x3f0   :  { %5577 = vmatpush1.bf16.msra.mxu1 %v14872_v22  ;;  %5618 = vmatpush1.bf16.msra.mxu0 %v14873_v42  ;;  %v14883_v22 = vld [vmem:[#allocation51_spill] sm:$0xff]  ;;  %v14884_v42 = vld [vmem:[#allocation52_spill] sm:$0xff] }
 0x3f1   :  { %5578 = vmatprep.subr.bf16.mxu1 %v14874_v8  ;;  %5619 = vmatprep.subr.bf16.mxu0 %v14875_v20  ;;  %v14885_v8 = vld [vmem:[#allocation53_spill] sm:$0xff]  ;;  %v14886_v20 = vld [vmem:[#allocation54_spill] sm:$0xff] }
 0x3f4   :  { %5579 = vmatpush2.bf16.msra.mxu1 %v14876_v9  ;;  %5620 = vmatpush2.bf16.msra.mxu0 %v14877_v21  ;;  %v14887_v9 = vld [vmem:[#allocation55_spill] sm:$0xff]  ;;  %v14888_v21 = vld [vmem:[#allocation56_spill] sm:$0xff] }
 0x3f5   :  { %5580 = vmatprep.subr.bf16.mxu1 %v14878_v62  ;;  %5621 = vmatprep.subr.bf16.mxu0 %v14879_v2  ;;  %v14889_v62 = vld [vmem:[#allocation57_spill] sm:$0xff]  ;;  %v14890_v2 = vld [vmem:[#allocation58_spill] sm:$0xff] }
 0x3f8   :  { %5581 = vmatpush2.bf16.msra.mxu1 %v14880_v25  ;;  %5622 = vmatpush2.bf16.msra.mxu0 %v14881_v17  ;;  %v14891_v25 = vld [vmem:[#allocation59_spill] sm:$0xff]  ;;  %v14892_v17 = vld [vmem:[#allocation60_spill] sm:$0xff] }
 0x3f9   :  { %5582 = vmatprep.subr.bf16.mxu1 %v14882_v27  ;;  %5623 = vmatprep.subr.bf16.mxu0 %v14883_v22  ;;  %v14893_v27 = vld [vmem:[#allocation61_spill] sm:$0xff]  ;;  %v14894_v22 = vld [vmem:[#allocation62_spill] sm:$0xff] }
 0x3fc   :  { %5583 = vmatpush2.bf16.msra.mxu1 %v14884_v42  ;;  %5624 = vmatpush2.bf16.msra.mxu0 %v14885_v8  ;;  %v14895_v42 = vld [vmem:[#allocation63_spill] sm:$0xff]  ;;  %v14896_v8 = vld [vmem:[#allocation64_spill] sm:$0xff] }
 0x3fd   :  { %5584 = vmatprep.subr.bf16.mxu1 %v14886_v20  ;;  %5625 = vmatprep.subr.bf16.mxu0 %v14887_v9  ;;  %v14897_v20 = vld [vmem:[#allocation65_spill] sm:$0xff]  ;;  %v14898_v9 = vld [vmem:[#allocation66_spill] sm:$0xff] }
 0x400   :  { %5585 = vmatpush2.bf16.msra.mxu1 %v14888_v21  ;;  %5626 = vmatpush2.bf16.msra.mxu0 %v14889_v62  ;;  %v14899_v21 = vld [vmem:[#allocation67_spill] sm:$0xff]  ;;  %v14900_v62 = vld [vmem:[#allocation68_spill] sm:$0xff] }
 0x401   :  { %5586 = vmatprep.subr.bf16.mxu1 %v14890_v2  ;;  %5627 = vmatprep.subr.bf16.mxu0 %v14891_v25  ;;  %v14901_v2 = vld [vmem:[#allocation69_spill] sm:$0xff]  ;;  %v14902_v25 = vld [vmem:[#allocation70_spill] sm:$0xff] }
 0x404   :  { %5587 = vmatpush2.bf16.msra.mxu1 %v14892_v17  ;;  %5628 = vmatpush2.bf16.msra.mxu0 %v14893_v27  ;;  %v14903_v17 = vld [vmem:[#allocation71_spill] sm:$0xff]  ;;  %v14904_v27 = vld [vmem:[#allocation72_spill] sm:$0xff] }
 0x405   :  { %5588 = vmatprep.subr.bf16.mxu1 %v14894_v22  ;;  %5629 = vmatprep.subr.bf16.mxu0 %v14895_v42  ;;  %v14905_v22 = vld [vmem:[#allocation73_spill] sm:$0xff]  ;;  %v14906_v42 = vld [vmem:[#allocation74_spill] sm:$0xff] }
 0x408   :  { %5589 = vmatpush2.bf16.msra.mxu1 %v14896_v8  ;;  %5630 = vmatpush2.bf16.msra.mxu0 %v14897_v20  ;;  %v14907_v8 = vld [vmem:[#allocation75_spill] sm:$0xff] }
 0x409   :  { %5590 = vmatprep.subr.bf16.mxu1 %v14898_v9  ;;  %5631 = vmatprep.subr.bf16.mxu0 %v14899_v21 }
 0x40c   :  { %5591 = vmatpush2.bf16.msra.mxu1 %v14900_v62  ;;  %5632 = vmatpush2.bf16.msra.mxu0 %v14901_v2 }
 0x40d   :  { %5592 = vmatprep.subr.bf16.mxu1 %v14902_v25  ;;  %5633 = vmatprep.subr.bf16.mxu0 %v14903_v17 }
 0x410   :  { %5593 = vmatpush2.bf16.msra.mxu1 %v14904_v27  ;;  %5634 = vmatpush2.bf16.msra.mxu0 %v14905_v22  ;;  %v14911_v22 = vld [vmem:[#allocation140_spill] sm:$0xff] }
 0x411   :  { %5644 = vmatprep.subr.bf16.mxu1 %v14906_v42  ;;  %5685 = vmatprep.subr.bf16.mxu0 %v14907_v8 }
 0x453   :  { %v5362_v20 = vpop.f32.mrf.mxu1  ;;  %v5403_v9 = vpop.f32.mrf.mxu0 }
 0x454   :  { %v5492_v25 = vadd.f32 %v5362_v20, %v14908_v60  ;;  %v5494_v17 = vadd.f32 %v5403_v9, %v14909_v0 }
 0x455   :  { %v5364_v55 = vpop.f32.mrf.mxu1  ;;  %v5405_v21 = vpop.f32.mrf.mxu0 }
 0x456   :  { %v5493_v27 = vadd.f32 %v5364_v55, %v14910_v49  ;;  %v8596_v48 = vmul.f32 -1.442695, %v5492_v25  ;;  %v5495_v5 = vadd.f32 %v5405_v21, %v14911_v22  ;;  %v8598_v42 = vmul.f32 -1.442695, %v5494_v17  ;;  %v14912_v21 = vld [vmem:[#allocation165_spill] sm:$0xff]  ;;  %v14913_v17 = vld [vmem:[#allocation166_spill] sm:$0xff] }
 0x457   :  { %v5366_v12 = vpop.f32.mrf.mxu1  ;;  %v5407_v62 = vpop.f32.mrf.mxu0  ;;  %v14914_v22 = vld [vmem:[#allocation167_spill] sm:$0xff] }
 0x458   :  { %v8597_v44 = vmul.f32 -1.442695, %v5493_v27  ;;  %9570 = vpow2.f32 %v8596_v48  ;;  %v8599_v8 = vmul.f32 -1.442695, %v5495_v5 }
 0x459   :  { %v5367_v7 = vpop.f32.mrf.mxu1  ;;  %v5408_v2 = vpop.f32.mrf.mxu0  ;;  %9572 = vpow2.f32 %v8598_v42 }
 0x45a   :  { %9574 = vpow2.f32 %v8597_v44 }
 0x45b   :  { %9576 = vpow2.f32 %v8599_v8  ;;  %v14915_v8 = vld [vmem:[#allocation168_spill] sm:$0xff] }
 0x465   :  { %v9571_v12 = vpop.eup %9570 }
 0x466   :  { %v9573_v62 = vpop.eup %9572  ;;  %v5506_v2 = vadd.f32 1.0, %v9571_v12 }
 0x467   :  { %v9575_v7 = vpop.eup %9574  ;;  %v5518_v60 = vadd.f32 1.0, %v9573_v62 }
 0x468   :  { %v9577_v36 = vpop.eup %9576  ;;  %v5507_v20 = vadd.f32 1.0, %v9575_v7  ;;  %9578 = vrcp.f32 %v5506_v2 }
 0x469   :  { %v5519_v0 = vadd.f32 1.0, %v9577_v36  ;;  %9580 = vrcp.f32 %v5518_v60 }
 0x46a   :  { %9582 = vrcp.f32 %v5507_v20 }
 0x475   :  { %v9579_v60 = vpop.eup %9578 }
 0x493   :  { %v5444_v49 = vpop.f32.mrf.mxu1  ;;  %v5485_v55 = vpop.f32.mrf.mxu0 }
 0x494   :  { %v5496_v25 = vadd.f32 %v5444_v49, %v14912_v21  ;;  %v5498_v48 = vadd.f32 %v5485_v55, %v14913_v17  ;;  %v9581_v49 = vpop.eup %9580 }
 0x495   :  { %v5446_v5 = vpop.f32.mrf.mxu1  ;;  %v5487_v44 = vpop.f32.mrf.mxu0 }
 0x496   :  { %9584 = vtanh.f32 %v5496_v25  ;;  %v8600_v27 = vmul.f32 -1.442695, %v5498_v48  ;;  %v5497_v42 = vadd.f32 %v5446_v5, %v14914_v22  ;;  %v5499_v9 = vadd.f32 %v5487_v44, %v14915_v8  ;;  %v9583_v20 = vpop.eup %9582 }
 0x497   :  { %9586 = vrcp.f32 %v5519_v0  ;;  %v5448_v12 = vpop.f32.mrf.mxu1  ;;  %v5489_v62 = vpop.f32.mrf.mxu0  ;;  %v5538_v25 = vmul.f32 %v9581_v49, %v12903_v57  ;;  %v14916_v49 = vld [vmem:[#allocation94_spill] sm:$0xff] }
 0x498   :  { %9588 = vpow2.f32 %v8600_v27  ;;  %v8601_v36 = vmul.f32 -1.442695, %v5499_v9 }
 0x499   :  { %9590 = vtanh.f32 %v5497_v42  ;;  %v5449_v7 = vpop.f32.mrf.mxu1  ;;  %v5490_v2 = vpop.f32.mrf.mxu0 }
 0x49a   :  { %9592 = vpow2.f32 %v8601_v36 }
 0x4a3   :  { %v9585_v55 = vpop.eup %9584 }
 0x4a4   :  { %v9587_v21 = vpop.eup %9586  ;;  %v5540_v17 = vmul.f32 %v9585_v55, %v9579_v60  ;;  %v14918_v55 = vld [vmem:[#allocation96_spill] sm:$0xff] }
 0x4a5   :  { %v9589_v48 = vpop.eup %9588  ;;  %v5539_v27 = vmul.f32 %v9587_v21, %v12906_v19  ;;  %v14919_v21 = vld [vmem:[#allocation97_spill] sm:$0xff] }
 0x4a6   :  { %v9591_v5 = vpop.eup %9590  ;;  %v13052_v44 = vadd.f32 %v5540_v17, %v5538_v25  ;;  %v5532_v0 = vadd.f32 1.0, %v9589_v48  ;;  %v14920_v25 = vld [vmem:[#allocation98_spill] sm:$0xff]  ;;  %v14921_v17 = vld [vmem:[#allocation99_spill] sm:$0xff]  ;;  %v14922_v48 = vld [vmem:[#allocation100_spill] sm:$0xff] }
 0x4a7   :  { %v9593_v22 = vpop.eup %9592  ;;  %v5541_v42 = vmul.f32 %v9591_v5, %v9583_v20  ;;  %v14917_v20 = vld [vmem:[#allocation95_spill] sm:$0xff]  ;;  %v14923_v5 = vld [vmem:[#allocation101_spill] sm:$0xff] }
 0x4a8   :  { %9594 = vtanh.f32 %v13052_v44  ;;  %v5533_v8 = vadd.f32 1.0, %v9593_v22  ;;  %v14925_v22 = vld [vmem:[#allocation103_spill] sm:$0xff] }
 0x4a9   :  { %9596 = vrcp.f32 %v5532_v0  ;;  %v13056_v9 = vadd.f32 %v5541_v42, %v5539_v27  ;;  %v14924_v0 = vld [vmem:[#allocation102_spill] sm:$0xff]  ;;  %v14926_v27 = vld [vmem:[#allocation104_spill] sm:$0xff]  ;;  %v14927_v42 = vld [vmem:[#allocation105_spill] sm:$0xff] }
 0x4aa   :  { %9598 = vrcp.f32 %v5533_v8  ;;  %v14928_v8 = vld [vmem:[#allocation106_spill] sm:$0xff] }
 0x4ab   :  { %9600 = vtanh.f32 %v13056_v9 }
 0x4b5   :  { %v9595_v57 = vpop.eup %9594 }
 0x4b6   :  { %v9597_v12 = vpop.eup %9596 }
 0x4b7   :  { %v9599_v62 = vpop.eup %9598  ;;  %v5546_v36 = vmul.f32 %v9597_v12, %v9595_v57  ;;  %v14929_v57 = vld [vmem:[#allocation107_spill] sm:$0xff]  ;;  %v14930_v12 = vld [vmem:[#allocation108_spill] sm:$0xff] }
 0x4b8   :  { %v9601_v7 = vpop.eup %9600 }
 0x4b9   :  { %v5547_v2 = vmul.f32 %v9601_v7, %v9599_v62  ;;  %5549 = vst [vmem:[#allocation7 + $0x10] sm:$0xff] %v5546_v36  ;;  %v13059_v19 = vpack.c.bf16 %v5546_v36, %v5546_v36  ;;  %v14931_v62 = vld [vmem:[#allocation109_spill] sm:$0xff]  ;;  %v14932_v36 = vld [vmem:[#allocation110_spill] sm:$0xff]  ;;  %v14933_v7 = vld [vmem:[#allocation111_spill] sm:$0xff] }
 0x4bb   :  { %5550 = vst [vmem:[#allocation7 + $0x18] sm:$0xff] %v5547_v2  ;;  %v5561_v60 = vpack.c.bf16 %v5547_v2, %v5547_v2  ;;  %v14934_v2 = vld [vmem:[#allocation112_spill] sm:$0xff] }
 0x4bd   :  { %5594 = vmatprep.mubr.bf16.mxu1 %v5561_v60  ;;  %5635 = vmatprep.mubr.bf16.mxu0 %v5561_v60 }
 0x4be   :  { %5595 = vmatmul.mubr.bf16.vlgmr.msra.gmra.mxu1 %v13059_v19  ;;  %5636 = vmatmul.mubr.bf16.vlgmr.msra.gmra.mxu0 %v13059_v19 }
 0x4bf   :  { %5645 = vmatpush1.bf16.msra.mxu1 %v14812_v38  ;;  %5686 = vmatpush1.bf16.msra.mxu0 %v14813_v13 }
 0x4c0   :  { %5676 = vmatprep.mubr.bf16.mxu1 %v5561_v60  ;;  %5717 = vmatprep.mubr.bf16.mxu0 %v5561_v60  ;;  %v14935_v60 = vld [vmem:[#allocation113_spill] sm:$0xff] }
 0x4c1   :  { %5646 = vmatprep.subr.bf16.mxu1 %v14814_v16  ;;  %5687 = vmatprep.subr.bf16.mxu0 %v14815_v31 }
 0x4c3   :  { %5647 = vmatpush1.bf16.msra.mxu1 %v14816_v58  ;;  %5688 = vmatpush1.bf16.msra.mxu0 %v14817_v30 }
 0x4c4   :  { %5648 = vmatprep.subr.bf16.mxu1 %v14818_v52  ;;  %5689 = vmatprep.subr.bf16.mxu0 %v14819_v24 }
 0x4c7   :  { %5649 = vmatpush1.bf16.msra.mxu1 %v14820_v11  ;;  %5690 = vmatpush1.bf16.msra.mxu0 %v14821_v61 }
 0x4c8   :  { %5650 = vmatprep.subr.bf16.mxu1 %v14822_v53  ;;  %5691 = vmatprep.subr.bf16.mxu0 %v14823_v47 }
 0x4cb   :  { %5651 = vmatpush1.bf16.msra.mxu1 %v14824_v46  ;;  %5692 = vmatpush1.bf16.msra.mxu0 %v14825_v51 }
 0x4cc   :  { %5652 = vmatprep.subr.bf16.mxu1 %v14826_v10  ;;  %5693 = vmatprep.subr.bf16.mxu0 %v14827_v54 }
 0x4cf   :  { %5653 = vmatpush1.bf16.msra.mxu1 %v14828_v39  ;;  %5694 = vmatpush1.bf16.msra.mxu0 %v14829_v32 }
 0x4d0   :  { %5654 = vmatprep.subr.bf16.mxu1 %v14916_v49  ;;  %5695 = vmatprep.subr.bf16.mxu0 %v14917_v20 }
 0x4d3   :  { %5655 = vmatpush1.bf16.msra.mxu1 %v14918_v55  ;;  %5696 = vmatpush1.bf16.msra.mxu0 %v14919_v21 }
 0x4d4   :  { %5656 = vmatprep.subr.bf16.mxu1 %v14920_v25  ;;  %5697 = vmatprep.subr.bf16.mxu0 %v14921_v17 }
 0x4d7   :  { %5657 = vmatpush1.bf16.msra.mxu1 %v14922_v48  ;;  %5698 = vmatpush1.bf16.msra.mxu0 %v14923_v5 }
 0x4d8   :  { %5658 = vmatprep.subr.bf16.mxu1 %v14924_v0  ;;  %5699 = vmatprep.subr.bf16.mxu0 %v14925_v22  ;;  %v14936_v22 = vld [vmem:[#allocation114_spill] sm:$0xff] }
 0x4db   :  { %5659 = vmatpush1.bf16.msra.mxu1 %v14926_v27  ;;  %5700 = vmatpush1.bf16.msra.mxu0 %v14927_v42  ;;  %v14937_v27 = vld [vmem:[#allocation115_spill] sm:$0xff]  ;;  %v14938_v42 = vld [vmem:[#allocation116_spill] sm:$0xff] }
 0x4dc   :  { %5660 = vmatprep.subr.bf16.mxu1 %v14928_v8  ;;  %5701 = vmatprep.subr.bf16.mxu0 %v14929_v57  ;;  %v14939_v8 = vld [vmem:[#allocation117_spill] sm:$0xff] }
 0x4df   :  { %5661 = vmatpush2.bf16.msra.mxu1 %v14930_v12  ;;  %5702 = vmatpush2.bf16.msra.mxu0 %v14931_v62 }
 0x4e0   :  { %5662 = vmatprep.subr.bf16.mxu1 %v14932_v36  ;;  %5703 = vmatprep.subr.bf16.mxu0 %v14933_v7 }
 0x4e3   :  { %5663 = vmatpush2.bf16.msra.mxu1 %v14934_v2  ;;  %5704 = vmatpush2.bf16.msra.mxu0 %v14935_v60 }
 0x4e4   :  { %5664 = vmatprep.subr.bf16.mxu1 %v14936_v22  ;;  %5705 = vmatprep.subr.bf16.mxu0 %v14937_v27 }
 0x4e7   :  { %5665 = vmatpush2.bf16.msra.mxu1 %v14938_v42  ;;  %5706 = vmatpush2.bf16.msra.mxu0 %v14939_v8 }
 0x4e8   :  { %5666 = vmatprep.subr.bf16.mxu1 %v14854_v26  ;;  %5707 = vmatprep.subr.bf16.mxu0 %v14855_v45 }
 0x4eb   :  { %5667 = vmatpush2.bf16.msra.mxu1 %v14856_v14  ;;  %5708 = vmatpush2.bf16.msra.mxu0 %v14857_v41 }
 0x4ec   :  { %5668 = vmatprep.subr.bf16.mxu1 %v14858_v23  ;;  %5709 = vmatprep.subr.bf16.mxu0 %v14859_v43 }
 0x4ef   :  { %5669 = vmatpush2.bf16.msra.mxu1 %v14860_v59  ;;  %5710 = vmatpush2.bf16.msra.mxu0 %v14861_v50  ;;  %v15005_v50 = vld [vmem:[#allocation143_spill] sm:$0xff] }
 0x4f0   :  { %5670 = vmatprep.subr.bf16.mxu1 %v14862_v63  ;;  %5711 = vmatprep.subr.bf16.mxu0 %v14863_v6  ;;  %v15003_v6 = vld [vmem:[#allocation141_spill] sm:$0xff]  ;;  %v15004_v63 = vld [vmem:[#allocation142_spill] sm:$0xff] }
 0x4f3   :  { %5671 = vmatpush2.bf16.msra.mxu1 %v14864_v34  ;;  %5712 = vmatpush2.bf16.msra.mxu0 %v12556_v3 }
 0x4f4   :  { %5672 = vmatprep.subr.bf16.mxu1 %v12560_v28  ;;  %5713 = vmatprep.subr.bf16.mxu0 %v12562_v29  ;;  %v14948_v29 = vld [vmem:[#allocation25_spill] sm:$0xff] }
 0x4f7   :  { %5673 = vmatpush2.bf16.msra.mxu1 %v12578_v37  ;;  %5714 = vmatpush2.bf16.msra.mxu0 %v12580_v40  ;;  %v14940_v37 = vld [vmem:[#allocation21_spill] sm:$0xff]  ;;  %v14941_v40 = vld [vmem:[#allocation12_spill] sm:$0xff] }
 0x4f8   :  { %5674 = vmatprep.subr.bf16.mxu1 %v12584_v4  ;;  %5715 = vmatprep.subr.bf16.mxu0 %v12586_v33  ;;  %v14942_v4 = vld [vmem:[#allocation16_spill] sm:$0xff]  ;;  %v14943_v33 = vld [vmem:[#allocation18_spill] sm:$0xff] }
 0x4fb   :  { %5675 = vmatpush2.bf16.msra.mxu1 %v12590_v56  ;;  %5716 = vmatpush2.bf16.msra.mxu0 %v12592_v18  ;;  %v14944_v56 = vld [vmem:[#allocation20_spill] sm:$0xff]  ;;  %v14945_v18 = vld [vmem:[#allocation22_spill] sm:$0xff] }
 0x4fc   :  { %5796 = vmatprep.subr.bf16.mxu1 %v11798_v35  ;;  %5837 = vmatprep.subr.bf16.mxu0 %v11800_v1  ;;  %v14946_v35 = vld [vmem:[#allocation23_spill] sm:$0xff]  ;;  %v14947_v1 = vld [vmem:[#allocation24_spill] sm:$0xff] }
 0x4fe   :  { %5677 = vmatmul.mubr.bf16.vlgmr.msra.gmra.mxu1 %v13059_v19  ;;  %5718 = vmatmul.mubr.bf16.vlgmr.msra.gmra.mxu0 %v13059_v19  ;;  %v14949_v19 = vld [vmem:[#allocation8_spill] sm:$0xff] }
 0x4ff   :  { %5797 = vmatpush1.bf16.msra.mxu1 %v11832_v15  ;;  %5838 = vmatpush1.bf16.msra.mxu0 %v14940_v37  ;;  %v14950_v15 = vld [vmem:[#allocation9_spill] sm:$0xff]  ;;  %v14951_v37 = vld [vmem:[#allocation10_spill] sm:$0xff] }
 0x500   :  { %5798 = vmatprep.subr.bf16.mxu1 %v14941_v40  ;;  %5839 = vmatprep.subr.bf16.mxu0 %v14942_v4  ;;  %v14952_v40 = vld [vmem:[#allocation11_spill] sm:$0xff]  ;;  %v14953_v4 = vld [vmem:[#allocation26_spill] sm:$0xff] }
 0x503   :  { %5799 = vmatpush1.bf16.msra.mxu1 %v14943_v33  ;;  %5840 = vmatpush1.bf16.msra.mxu0 %v14944_v56  ;;  %v14954_v33 = vld [vmem:[#allocation27_spill] sm:$0xff]  ;;  %v14955_v56 = vld [vmem:[#allocation28_spill] sm:$0xff] }
 0x504   :  { %5800 = vmatprep.subr.bf16.mxu1 %v14945_v18  ;;  %5841 = vmatprep.subr.bf16.mxu0 %v14946_v35  ;;  %v14956_v18 = vld [vmem:[#allocation29_spill] sm:$0xff]  ;;  %v14957_v35 = vld [vmem:[#allocation30_spill] sm:$0xff] }
 0x507   :  { %5801 = vmatpush1.bf16.msra.mxu1 %v14947_v1  ;;  %5842 = vmatpush1.bf16.msra.mxu0 %v14948_v29  ;;  %v14958_v1 = vld [vmem:[#allocation31_spill] sm:$0xff]  ;;  %v14959_v29 = vld [vmem:[#allocation32_spill] sm:$0xff] }
 0x508   :  { %5802 = vmatprep.subr.bf16.mxu1 %v14949_v19  ;;  %5843 = vmatprep.subr.bf16.mxu0 %v14950_v15  ;;  %v14960_v19 = vld [vmem:[#allocation33_spill] sm:$0xff]  ;;  %v14961_v15 = vld [vmem:[#allocation34_spill] sm:$0xff] }
 0x50b   :  { %5803 = vmatpush1.bf16.msra.mxu1 %v14951_v37  ;;  %5844 = vmatpush1.bf16.msra.mxu0 %v14952_v40  ;;  %v14962_v37 = vld [vmem:[#allocation35_spill] sm:$0xff]  ;;  %v14963_v40 = vld [vmem:[#allocation36_spill] sm:$0xff] }
 0x50c   :  { %5804 = vmatprep.subr.bf16.mxu1 %v14953_v4  ;;  %5845 = vmatprep.subr.bf16.mxu0 %v14954_v33  ;;  %v14964_v4 = vld [vmem:[#allocation37_spill] sm:$0xff]  ;;  %v14965_v33 = vld [vmem:[#allocation38_spill] sm:$0xff] }
 0x50f   :  { %5805 = vmatpush1.bf16.msra.mxu1 %v14955_v56  ;;  %5846 = vmatpush1.bf16.msra.mxu0 %v14956_v18  ;;  %v14966_v56 = vld [vmem:[#allocation39_spill] sm:$0xff]  ;;  %v14967_v18 = vld [vmem:[#allocation40_spill] sm:$0xff] }
 0x510   :  { %5806 = vmatprep.subr.bf16.mxu1 %v14957_v35  ;;  %5847 = vmatprep.subr.bf16.mxu0 %v14958_v1  ;;  %v14968_v35 = vld [vmem:[#allocation41_spill] sm:$0xff]  ;;  %v14969_v1 = vld [vmem:[#allocation42_spill] sm:$0xff] }
 0x513   :  { %5807 = vmatpush1.bf16.msra.mxu1 %v14959_v29  ;;  %5848 = vmatpush1.bf16.msra.mxu0 %v14960_v19  ;;  %v14970_v29 = vld [vmem:[#allocation43_spill] sm:$0xff]  ;;  %v14971_v19 = vld [vmem:[#allocation44_spill] sm:$0xff] }
 0x514   :  { %5808 = vmatprep.subr.bf16.mxu1 %v14961_v15  ;;  %5849 = vmatprep.subr.bf16.mxu0 %v14962_v37  ;;  %v14972_v15 = vld [vmem:[#allocation45_spill] sm:$0xff]  ;;  %v14973_v37 = vld [vmem:[#allocation46_spill] sm:$0xff] }
 0x517   :  { %5809 = vmatpush1.bf16.msra.mxu1 %v14963_v40  ;;  %5850 = vmatpush1.bf16.msra.mxu0 %v14964_v4  ;;  %v14974_v40 = vld [vmem:[#allocation47_spill] sm:$0xff]  ;;  %v14975_v4 = vld [vmem:[#allocation48_spill] sm:$0xff] }
 0x518   :  { %5810 = vmatprep.subr.bf16.mxu1 %v14965_v33  ;;  %5851 = vmatprep.subr.bf16.mxu0 %v14966_v56  ;;  %v14976_v33 = vld [vmem:[#allocation49_spill] sm:$0xff]  ;;  %v14977_v56 = vld [vmem:[#allocation50_spill] sm:$0xff] }
 0x51b   :  { %5811 = vmatpush1.bf16.msra.mxu1 %v14967_v18  ;;  %5852 = vmatpush1.bf16.msra.mxu0 %v14968_v35  ;;  %v14978_v18 = vld [vmem:[#allocation51_spill] sm:$0xff]  ;;  %v14979_v35 = vld [vmem:[#allocation52_spill] sm:$0xff] }
 0x51c   :  { %5812 = vmatprep.subr.bf16.mxu1 %v14969_v1  ;;  %5853 = vmatprep.subr.bf16.mxu0 %v14970_v29  ;;  %v14980_v1 = vld [vmem:[#allocation53_spill] sm:$0xff]  ;;  %v14981_v29 = vld [vmem:[#allocation54_spill] sm:$0xff] }
 0x51f   :  { %5813 = vmatpush2.bf16.msra.mxu1 %v14971_v19  ;;  %5854 = vmatpush2.bf16.msra.mxu0 %v14972_v15  ;;  %v14982_v19 = vld [vmem:[#allocation55_spill] sm:$0xff]  ;;  %v14983_v15 = vld [vmem:[#allocation56_spill] sm:$0xff] }
 0x520   :  { %5814 = vmatprep.subr.bf16.mxu1 %v14973_v37  ;;  %5855 = vmatprep.subr.bf16.mxu0 %v14974_v40  ;;  %v14984_v37 = vld [vmem:[#allocation57_spill] sm:$0xff]  ;;  %v14985_v40 = vld [vmem:[#allocation58_spill] sm:$0xff] }
 0x523   :  { %5815 = vmatpush2.bf16.msra.mxu1 %v14975_v4  ;;  %5856 = vmatpush2.bf16.msra.mxu0 %v14976_v33  ;;  %v14986_v4 = vld [vmem:[#allocation59_spill] sm:$0xff]  ;;  %v14987_v33 = vld [vmem:[#allocation60_spill] sm:$0xff] }
 0x524   :  { %5816 = vmatprep.subr.bf16.mxu1 %v14977_v56  ;;  %5857 = vmatprep.subr.bf16.mxu0 %v14978_v18  ;;  %v14988_v56 = vld [vmem:[#allocation61_spill] sm:$0xff]  ;;  %v14989_v18 = vld [vmem:[#allocation62_spill] sm:$0xff] }
 0x527   :  { %5817 = vmatpush2.bf16.msra.mxu1 %v14979_v35  ;;  %5858 = vmatpush2.bf16.msra.mxu0 %v14980_v1  ;;  %v14990_v35 = vld [vmem:[#allocation63_spill] sm:$0xff]  ;;  %v14991_v1 = vld [vmem:[#allocation64_spill] sm:$0xff] }
 0x528   :  { %5818 = vmatprep.subr.bf16.mxu1 %v14981_v29  ;;  %5859 = vmatprep.subr.bf16.mxu0 %v14982_v19  ;;  %v14992_v29 = vld [vmem:[#allocation65_spill] sm:$0xff]  ;;  %v14993_v19 = vld [vmem:[#allocation66_spill] sm:$0xff] }
 0x52b   :  { %5819 = vmatpush2.bf16.msra.mxu1 %v14983_v15  ;;  %5860 = vmatpush2.bf16.msra.mxu0 %v14984_v37  ;;  %v14994_v15 = vld [vmem:[#allocation67_spill] sm:$0xff]  ;;  %v14995_v37 = vld [vmem:[#allocation68_spill] sm:$0xff] }
 0x52c   :  { %5820 = vmatprep.subr.bf16.mxu1 %v14985_v40  ;;  %5861 = vmatprep.subr.bf16.mxu0 %v14986_v4  ;;  %v14996_v40 = vld [vmem:[#allocation69_spill] sm:$0xff]  ;;  %v14997_v4 = vld [vmem:[#allocation70_spill] sm:$0xff] }
 0x52f   :  { %5821 = vmatpush2.bf16.msra.mxu1 %v14987_v33  ;;  %5862 = vmatpush2.bf16.msra.mxu0 %v14988_v56  ;;  %v14998_v33 = vld [vmem:[#allocation71_spill] sm:$0xff]  ;;  %v14999_v56 = vld [vmem:[#allocation72_spill] sm:$0xff] }
 0x530   :  { %5822 = vmatprep.subr.bf16.mxu1 %v14989_v18  ;;  %5863 = vmatprep.subr.bf16.mxu0 %v14990_v35  ;;  %v15000_v18 = vld [vmem:[#allocation73_spill] sm:$0xff]  ;;  %v15001_v35 = vld [vmem:[#allocation74_spill] sm:$0xff] }
 0x533   :  { %5823 = vmatpush2.bf16.msra.mxu1 %v14991_v1  ;;  %5864 = vmatpush2.bf16.msra.mxu0 %v14992_v29  ;;  %v15002_v1 = vld [vmem:[#allocation75_spill] sm:$0xff] }
 0x534   :  { %5824 = vmatprep.subr.bf16.mxu1 %v14993_v19  ;;  %5865 = vmatprep.subr.bf16.mxu0 %v14994_v15 }
 0x537   :  { %5825 = vmatpush2.bf16.msra.mxu1 %v14995_v37  ;;  %5866 = vmatpush2.bf16.msra.mxu0 %v14996_v40 }
 0x538   :  { %5826 = vmatprep.subr.bf16.mxu1 %v14997_v4  ;;  %5867 = vmatprep.subr.bf16.mxu0 %v14998_v33 }
 0x53b   :  { %5827 = vmatpush2.bf16.msra.mxu1 %v14999_v56  ;;  %5868 = vmatpush2.bf16.msra.mxu0 %v15000_v18  ;;  %v15006_v18 = vld [vmem:[#allocation144_spill] sm:$0xff] }
 0x53c   :  { %5878 = vmatprep.subr.bf16.mxu1 %v15001_v35  ;;  %5919 = vmatprep.subr.bf16.mxu0 %v15002_v1 }
 0x57e   :  { %v5596_v29 = vpop.f32.mrf.mxu1  ;;  %v5637_v19 = vpop.f32.mrf.mxu0 }
 0x57f   :  { %v5726_v4 = vadd.f32 %v5596_v29, %v15003_v6  ;;  %v5728_v33 = vadd.f32 %v5637_v19, %v15004_v63 }
 0x580   :  { %v5598_v28 = vpop.f32.mrf.mxu1  ;;  %v5639_v15 = vpop.f32.mrf.mxu0 }
 0x581   :  { %v5727_v56 = vadd.f32 %v5598_v28, %v15005_v50  ;;  %v8602_v59 = vmul.f32 -1.442695, %v5726_v4  ;;  %v5729_v43 = vadd.f32 %v5639_v15, %v15006_v18  ;;  %v8604_v35 = vmul.f32 -1.442695, %v5728_v33  ;;  %v15007_v15 = vld [vmem:[#allocation169_spill] sm:$0xff]  ;;  %v15010_v50 = vld [vmem:[#allocation172_spill] sm:$0xff] }
 0x582   :  { %v5600_v3 = vpop.f32.mrf.mxu1  ;;  %v5641_v37 = vpop.f32.mrf.mxu0 }
 0x583   :  { %v8603_v23 = vmul.f32 -1.442695, %v5727_v56  ;;  %9602 = vpow2.f32 %v8602_v59  ;;  %v8605_v1 = vmul.f32 -1.442695, %v5729_v43  ;;  %v15008_v56 = vld [vmem:[#allocation170_spill] sm:$0xff]  ;;  %v15009_v43 = vld [vmem:[#allocation171_spill] sm:$0xff] }
 0x584   :  { %v5601_v34 = vpop.f32.mrf.mxu1  ;;  %v5642_v40 = vpop.f32.mrf.mxu0  ;;  %9604 = vpow2.f32 %v8604_v35 }
 0x585   :  { %9606 = vpow2.f32 %v8603_v23 }
 0x586   :  { %9608 = vpow2.f32 %v8605_v1 }
 0x590   :  { %v9603_v3 = vpop.eup %9602 }
 0x591   :  { %v9605_v37 = vpop.eup %9604  ;;  %v5740_v40 = vadd.f32 1.0, %v9603_v3 }
 0x592   :  { %v9607_v34 = vpop.eup %9606  ;;  %v5752_v29 = vadd.f32 1.0, %v9605_v37 }
 0x593   :  { %v9609_v41 = vpop.eup %9608  ;;  %v5741_v6 = vadd.f32 1.0, %v9607_v34  ;;  %9610 = vrcp.f32 %v5740_v40 }
 0x594   :  { %v5753_v63 = vadd.f32 1.0, %v9609_v41  ;;  %9612 = vrcp.f32 %v5752_v29 }
 0x595   :  { %9614 = vrcp.f32 %v5741_v6 }
 0x5a0   :  { %v9611_v29 = vpop.eup %9610 }
 0x5be   :  { %v5678_v28 = vpop.f32.mrf.mxu1  ;;  %v5719_v4 = vpop.f32.mrf.mxu0 }
 0x5bf   :  { %v5730_v33 = vadd.f32 %v5678_v28, %v15007_v15  ;;  %v5732_v18 = vadd.f32 %v5719_v4, %v15008_v56  ;;  %v9613_v28 = vpop.eup %9612 }
 0x5c0   :  { %v5680_v35 = vpop.f32.mrf.mxu1  ;;  %v5721_v23 = vpop.f32.mrf.mxu0 }
 0x5c1   :  { %9616 = vtanh.f32 %v5730_v33  ;;  %v8606_v1 = vmul.f32 -1.442695, %v5732_v18  ;;  %v5731_v59 = vadd.f32 %v5680_v35, %v15009_v43  ;;  %v5733_v19 = vadd.f32 %v5721_v23, %v15010_v50  ;;  %v9615_v6 = vpop.eup %9614 }
 0x5c2   :  { %9618 = vrcp.f32 %v5753_v63  ;;  %v5682_v3 = vpop.f32.mrf.mxu1  ;;  %v5723_v37 = vpop.f32.mrf.mxu0  ;;  %v5772_v33 = vmul.f32 %v9613_v28, %v13052_v44  ;;  %v15011_v28 = vld [vmem:[#allocation103_spill] sm:$0xff] }
 0x5c3   :  { %9620 = vpow2.f32 %v8606_v1  ;;  %v8607_v41 = vmul.f32 -1.442695, %v5733_v19 }
 0x5c4   :  { %9622 = vtanh.f32 %v5731_v59  ;;  %v5683_v34 = vpop.f32.mrf.mxu1  ;;  %v5724_v40 = vpop.f32.mrf.mxu0 }
 0x5c5   :  { %9624 = vpow2.f32 %v8607_v41 }
 0x5ce   :  { %v9617_v4 = vpop.eup %9616 }
 0x5cf   :  { %v9619_v15 = vpop.eup %9618  ;;  %v5774_v56 = vmul.f32 %v9617_v4, %v9611_v29  ;;  %v15013_v4 = vld [vmem:[#allocation105_spill] sm:$0xff] }
 0x5d0   :  { %v9621_v18 = vpop.eup %9620  ;;  %v5773_v1 = vmul.f32 %v9619_v15, %v13056_v9  ;;  %v15014_v15 = vld [vmem:[#allocation106_spill] sm:$0xff] }
 0x5d1   :  { %v9623_v35 = vpop.eup %9622  ;;  %v13202_v23 = vadd.f32 %v5774_v56, %v5772_v33  ;;  %v5766_v63 = vadd.f32 1.0, %v9621_v18  ;;  %v15015_v33 = vld [vmem:[#allocation121_spill] sm:$0xff]  ;;  %v15016_v56 = vld [vmem:[#allocation122_spill] sm:$0xff]  ;;  %v15017_v18 = vld [vmem:[#allocation123_spill] sm:$0xff] }
 0x5d2   :  { %v9625_v43 = vpop.eup %9624  ;;  %v5775_v59 = vmul.f32 %v9623_v35, %v9615_v6  ;;  %v15012_v6 = vld [vmem:[#allocation104_spill] sm:$0xff] }
 0x5d3   :  { %9626 = vtanh.f32 %v13202_v23  ;;  %v5767_v50 = vadd.f32 1.0, %v9625_v43  ;;  %v15018_v35 = vld [vmem:[#allocation124_spill] sm:$0xff]  ;;  %v15020_v43 = vld [vmem:[#allocation126_spill] sm:$0xff] }
 0x5d4   :  { %9628 = vrcp.f32 %v5766_v63  ;;  %v13206_v19 = vadd.f32 %v5775_v59, %v5773_v1  ;;  %v15019_v63 = vld [vmem:[#allocation125_spill] sm:$0xff]  ;;  %v15021_v1 = vld [vmem:[#allocation127_spill] sm:$0xff]  ;;  %v15022_v59 = vld [vmem:[#allocation128_spill] sm:$0xff] }
 0x5d5   :  { %9630 = vrcp.f32 %v5767_v50  ;;  %v15023_v50 = vld [vmem:[#allocation129_spill] sm:$0xff] }
 0x5d6   :  { %9632 = vtanh.f32 %v13206_v19 }
 0x5e0   :  { %v9627_v44 = vpop.eup %9626 }
 0x5e1   :  { %v9629_v3 = vpop.eup %9628 }
 0x5e2   :  { %v9631_v37 = vpop.eup %9630  ;;  %v5780_v41 = vmul.f32 %v9629_v3, %v9627_v44  ;;  %v15024_v44 = vld [vmem:[#allocation130_spill] sm:$0xff]  ;;  %v15025_v3 = vld [vmem:[#allocation131_spill] sm:$0xff] }
 0x5e3   :  { %v9633_v34 = vpop.eup %9632 }
 0x5e4   :  { %v5781_v40 = vmul.f32 %v9633_v34, %v9631_v37  ;;  %5783 = vst [vmem:[#allocation7 + $0x20] sm:$0xff] %v5780_v41  ;;  %v13209_v9 = vpack.c.bf16 %v5780_v41, %v5780_v41  ;;  %v15026_v37 = vld [vmem:[#allocation132_spill] sm:$0xff]  ;;  %v15027_v41 = vld [vmem:[#allocation133_spill] sm:$0xff]  ;;  %v15028_v34 = vld [vmem:[#allocation134_spill] sm:$0xff] }
 0x5e6   :  { %5784 = vst [vmem:[#allocation7 + $0x28] sm:$0xff] %v5781_v40  ;;  %v5795_v29 = vpack.c.bf16 %v5781_v40, %v5781_v40  ;;  %v15029_v40 = vld [vmem:[#allocation135_spill] sm:$0xff] }
 0x5e8   :  { %5828 = vmatprep.mubr.bf16.mxu1 %v5795_v29  ;;  %5869 = vmatprep.mubr.bf16.mxu0 %v5795_v29 }
 0x5e9   :  { %5829 = vmatmul.mubr.bf16.vlgmr.msra.gmra.mxu1 %v13209_v9  ;;  %5870 = vmatmul.mubr.bf16.vlgmr.msra.gmra.mxu0 %v13209_v9 }
 0x5ea   :  { %5879 = vmatpush1.bf16.msra.mxu1 %v14812_v38  ;;  %5920 = vmatpush1.bf16.msra.mxu0 %v14813_v13 }
 0x5eb   :  { %5910 = vmatprep.mubr.bf16.mxu1 %v5795_v29  ;;  %5951 = vmatprep.mubr.bf16.mxu0 %v5795_v29  ;;  %v15030_v29 = vld [vmem:[#allocation136_spill] sm:$0xff] }
 0x5ec   :  { %5880 = vmatprep.subr.bf16.mxu1 %v14814_v16  ;;  %5921 = vmatprep.subr.bf16.mxu0 %v14815_v31 }
 0x5ee   :  { %5881 = vmatpush1.bf16.msra.mxu1 %v14816_v58  ;;  %5922 = vmatpush1.bf16.msra.mxu0 %v14817_v30 }
 0x5ef   :  { %5882 = vmatprep.subr.bf16.mxu1 %v14818_v52  ;;  %5923 = vmatprep.subr.bf16.mxu0 %v14819_v24 }
 0x5f2   :  { %5883 = vmatpush1.bf16.msra.mxu1 %v14820_v11  ;;  %5924 = vmatpush1.bf16.msra.mxu0 %v14821_v61 }
 0x5f3   :  { %5884 = vmatprep.subr.bf16.mxu1 %v14822_v53  ;;  %5925 = vmatprep.subr.bf16.mxu0 %v14823_v47 }
 0x5f6   :  { %5885 = vmatpush1.bf16.msra.mxu1 %v14824_v46  ;;  %5926 = vmatpush1.bf16.msra.mxu0 %v14825_v51 }
 0x5f7   :  { %5886 = vmatprep.subr.bf16.mxu1 %v14826_v10  ;;  %5927 = vmatprep.subr.bf16.mxu0 %v14827_v54 }
 0x5fa   :  { %5887 = vmatpush1.bf16.msra.mxu1 %v14828_v39  ;;  %5928 = vmatpush1.bf16.msra.mxu0 %v14829_v32 }
 0x5fb   :  { %5888 = vmatprep.subr.bf16.mxu1 %v14916_v49  ;;  %5929 = vmatprep.subr.bf16.mxu0 %v14917_v20 }
 0x5fe   :  { %5889 = vmatpush1.bf16.msra.mxu1 %v14918_v55  ;;  %5930 = vmatpush1.bf16.msra.mxu0 %v14919_v21 }
 0x5ff   :  { %5890 = vmatprep.subr.bf16.mxu1 %v14920_v25  ;;  %5931 = vmatprep.subr.bf16.mxu0 %v14921_v17 }
 0x602   :  { %5891 = vmatpush1.bf16.msra.mxu1 %v14922_v48  ;;  %5932 = vmatpush1.bf16.msra.mxu0 %v14923_v5 }
 0x603   :  { %5892 = vmatprep.subr.bf16.mxu1 %v14924_v0  ;;  %5933 = vmatprep.subr.bf16.mxu0 %v15011_v28 }
 0x606   :  { %5893 = vmatpush1.bf16.msra.mxu1 %v15012_v6  ;;  %5934 = vmatpush1.bf16.msra.mxu0 %v15013_v4 }
 0x607   :  { %5894 = vmatprep.subr.bf16.mxu1 %v15014_v15  ;;  %5935 = vmatprep.subr.bf16.mxu0 %v14929_v57 }
 0x60a   :  { %5895 = vmatpush2.bf16.msra.mxu1 %v14930_v12  ;;  %5936 = vmatpush2.bf16.msra.mxu0 %v14931_v62 }
 0x60b   :  { %5896 = vmatprep.subr.bf16.mxu1 %v14932_v36  ;;  %5937 = vmatprep.subr.bf16.mxu0 %v14933_v7 }
 0x60e   :  { %5897 = vmatpush2.bf16.msra.mxu1 %v14934_v2  ;;  %5938 = vmatpush2.bf16.msra.mxu0 %v14935_v60 }
 0x60f   :  { %5898 = vmatprep.subr.bf16.mxu1 %v14936_v22  ;;  %5939 = vmatprep.subr.bf16.mxu0 %v14937_v27 }
 0x612   :  { %5899 = vmatpush2.bf16.msra.mxu1 %v14938_v42  ;;  %5940 = vmatpush2.bf16.msra.mxu0 %v14939_v8 }
 0x613   :  { %5900 = vmatprep.subr.bf16.mxu1 %v14854_v26  ;;  %5941 = vmatprep.subr.bf16.mxu0 %v14855_v45 }
 0x616   :  { %5901 = vmatpush2.bf16.msra.mxu1 %v14856_v14  ;;  %5942 = vmatpush2.bf16.msra.mxu0 %v15015_v33  ;;  %v15100_v33 = vld [vmem:[#allocation147_spill] sm:$0xff] }
 0x617   :  { %5902 = vmatprep.subr.bf16.mxu1 %v15016_v56  ;;  %5943 = vmatprep.subr.bf16.mxu0 %v15017_v18  ;;  %v15098_v18 = vld [vmem:[#allocation145_spill] sm:$0xff]  ;;  %v15099_v56 = vld [vmem:[#allocation146_spill] sm:$0xff] }
 0x61a   :  { %5903 = vmatpush2.bf16.msra.mxu1 %v15018_v35  ;;  %5944 = vmatpush2.bf16.msra.mxu0 %v15019_v63 }
 0x61b   :  { %5904 = vmatprep.subr.bf16.mxu1 %v15020_v43  ;;  %5945 = vmatprep.subr.bf16.mxu0 %v15021_v1  ;;  %v15031_v43 = vld [vmem:[#allocation137_spill] sm:$0xff]  ;;  %v15032_v1 = vld [vmem:[#allocation14_spill] sm:$0xff] }
 0x61e   :  { %5905 = vmatpush2.bf16.msra.mxu1 %v15022_v59  ;;  %5946 = vmatpush2.bf16.msra.mxu0 %v15023_v50  ;;  %v15033_v59 = vld [vmem:[#allocation17_spill] sm:$0xff] }
 0x61f   :  { %5906 = vmatprep.subr.bf16.mxu1 %v15024_v44  ;;  %5947 = vmatprep.subr.bf16.mxu0 %v15025_v3  ;;  %v15034_v3 = vld [vmem:[#allocation19_spill] sm:$0xff]  ;;  %v15043_v44 = vld [vmem:[#allocation25_spill] sm:$0xff] }
 0x622   :  { %5907 = vmatpush2.bf16.msra.mxu1 %v15026_v37  ;;  %5948 = vmatpush2.bf16.msra.mxu0 %v15027_v41  ;;  %v15035_v37 = vld [vmem:[#allocation21_spill] sm:$0xff]  ;;  %v15036_v41 = vld [vmem:[#allocation12_spill] sm:$0xff] }
 0x623   :  { %5908 = vmatprep.subr.bf16.mxu1 %v15028_v34  ;;  %5949 = vmatprep.subr.bf16.mxu0 %v15029_v40  ;;  %v15037_v34 = vld [vmem:[#allocation16_spill] sm:$0xff]  ;;  %v15038_v40 = vld [vmem:[#allocation18_spill] sm:$0xff] }
 0x626   :  { %5909 = vmatpush2.bf16.msra.mxu1 %v15030_v29  ;;  %5950 = vmatpush2.bf16.msra.mxu0 %v15031_v43  ;;  %v15039_v29 = vld [vmem:[#allocation20_spill] sm:$0xff]  ;;  %v15040_v43 = vld [vmem:[#allocation22_spill] sm:$0xff] }
 0x627   :  { %6030 = vmatprep.subr.bf16.mxu1 %v15032_v1  ;;  %6071 = vmatprep.subr.bf16.mxu0 %v15033_v59  ;;  %v15041_v1 = vld [vmem:[#allocation23_spill] sm:$0xff]  ;;  %v15042_v59 = vld [vmem:[#allocation24_spill] sm:$0xff] }
 0x629   :  { %5911 = vmatmul.mubr.bf16.vlgmr.msra.gmra.mxu1 %v13209_v9  ;;  %5952 = vmatmul.mubr.bf16.vlgmr.msra.gmra.mxu0 %v13209_v9  ;;  %v15044_v9 = vld [vmem:[#allocation8_spill] sm:$0xff] }
 0x62a   :  { %6031 = vmatpush1.bf16.msra.mxu1 %v15034_v3  ;;  %6072 = vmatpush1.bf16.msra.mxu0 %v15035_v37  ;;  %v15045_v3 = vld [vmem:[#allocation9_spill] sm:$0xff]  ;;  %v15046_v37 = vld [vmem:[#allocation10_spill] sm:$0xff] }
 0x62b   :  { %6032 = vmatprep.subr.bf16.mxu1 %v15036_v41  ;;  %6073 = vmatprep.subr.bf16.mxu0 %v15037_v34  ;;  %v15047_v41 = vld [vmem:[#allocation11_spill] sm:$0xff]  ;;  %v15048_v34 = vld [vmem:[#allocation26_spill] sm:$0xff] }
 0x62e   :  { %6033 = vmatpush1.bf16.msra.mxu1 %v15038_v40  ;;  %6074 = vmatpush1.bf16.msra.mxu0 %v15039_v29  ;;  %v15049_v40 = vld [vmem:[#allocation27_spill] sm:$0xff]  ;;  %v15050_v29 = vld [vmem:[#allocation28_spill] sm:$0xff] }
 0x62f   :  { %6034 = vmatprep.subr.bf16.mxu1 %v15040_v43  ;;  %6075 = vmatprep.subr.bf16.mxu0 %v15041_v1  ;;  %v15051_v43 = vld [vmem:[#allocation29_spill] sm:$0xff]  ;;  %v15052_v1 = vld [vmem:[#allocation30_spill] sm:$0xff] }
 0x632   :  { %6035 = vmatpush1.bf16.msra.mxu1 %v15042_v59  ;;  %6076 = vmatpush1.bf16.msra.mxu0 %v15043_v44  ;;  %v15053_v59 = vld [vmem:[#allocation31_spill] sm:$0xff]  ;;  %v15054_v44 = vld [vmem:[#allocation32_spill] sm:$0xff] }
 0x633   :  { %6036 = vmatprep.subr.bf16.mxu1 %v15044_v9  ;;  %6077 = vmatprep.subr.bf16.mxu0 %v15045_v3  ;;  %v15055_v9 = vld [vmem:[#allocation33_spill] sm:$0xff]  ;;  %v15056_v3 = vld [vmem:[#allocation34_spill] sm:$0xff] }
 0x636   :  { %6037 = vmatpush1.bf16.msra.mxu1 %v15046_v37  ;;  %6078 = vmatpush1.bf16.msra.mxu0 %v15047_v41  ;;  %v15057_v37 = vld [vmem:[#allocation35_spill] sm:$0xff]  ;;  %v15058_v41 = vld [vmem:[#allocation36_spill] sm:$0xff] }
 0x637   :  { %6038 = vmatprep.subr.bf16.mxu1 %v15048_v34  ;;  %6079 = vmatprep.subr.bf16.mxu0 %v15049_v40  ;;  %v15059_v34 = vld [vmem:[#allocation37_spill] sm:$0xff]  ;;  %v15060_v40 = vld [vmem:[#allocation38_spill] sm:$0xff] }
 0x63a   :  { %6039 = vmatpush1.bf16.msra.mxu1 %v15050_v29  ;;  %6080 = vmatpush1.bf16.msra.mxu0 %v15051_v43  ;;  %v15061_v29 = vld [vmem:[#allocation39_spill] sm:$0xff]  ;;  %v15062_v43 = vld [vmem:[#allocation40_spill] sm:$0xff] }
 0x63b   :  { %6040 = vmatprep.subr.bf16.mxu1 %v15052_v1  ;;  %6081 = vmatprep.subr.bf16.mxu0 %v15053_v59  ;;  %v15063_v1 = vld [vmem:[#allocation41_spill] sm:$0xff]  ;;  %v15064_v59 = vld [vmem:[#allocation42_spill] sm:$0xff] }
 0x63e   :  { %6041 = vmatpush1.bf16.msra.mxu1 %v15054_v44  ;;  %6082 = vmatpush1.bf16.msra.mxu0 %v15055_v9  ;;  %v15065_v44 = vld [vmem:[#allocation43_spill] sm:$0xff]  ;;  %v15066_v9 = vld [vmem:[#allocation44_spill] sm:$0xff] }
 0x63f   :  { %6042 = vmatprep.subr.bf16.mxu1 %v15056_v3  ;;  %6083 = vmatprep.subr.bf16.mxu0 %v15057_v37  ;;  %v15067_v3 = vld [vmem:[#allocation45_spill] sm:$0xff]  ;;  %v15068_v37 = vld [vmem:[#allocation46_spill] sm:$0xff] }
 0x642   :  { %6043 = vmatpush1.bf16.msra.mxu1 %v15058_v41  ;;  %6084 = vmatpush1.bf16.msra.mxu0 %v15059_v34  ;;  %v15069_v41 = vld [vmem:[#allocation47_spill] sm:$0xff]  ;;  %v15070_v34 = vld [vmem:[#allocation48_spill] sm:$0xff] }
 0x643   :  { %6044 = vmatprep.subr.bf16.mxu1 %v15060_v40  ;;  %6085 = vmatprep.subr.bf16.mxu0 %v15061_v29  ;;  %v15071_v40 = vld [vmem:[#allocation49_spill] sm:$0xff]  ;;  %v15072_v29 = vld [vmem:[#allocation50_spill] sm:$0xff] }
 0x646   :  { %6045 = vmatpush1.bf16.msra.mxu1 %v15062_v43  ;;  %6086 = vmatpush1.bf16.msra.mxu0 %v15063_v1  ;;  %v15073_v43 = vld [vmem:[#allocation51_spill] sm:$0xff]  ;;  %v15074_v1 = vld [vmem:[#allocation52_spill] sm:$0xff] }
 0x647   :  { %6046 = vmatprep.subr.bf16.mxu1 %v15064_v59  ;;  %6087 = vmatprep.subr.bf16.mxu0 %v15065_v44  ;;  %v15075_v59 = vld [vmem:[#allocation53_spill] sm:$0xff]  ;;  %v15076_v44 = vld [vmem:[#allocation54_spill] sm:$0xff] }
 0x64a   :  { %6047 = vmatpush2.bf16.msra.mxu1 %v15066_v9  ;;  %6088 = vmatpush2.bf16.msra.mxu0 %v15067_v3  ;;  %v15077_v9 = vld [vmem:[#allocation55_spill] sm:$0xff]  ;;  %v15078_v3 = vld [vmem:[#allocation56_spill] sm:$0xff] }
 0x64b   :  { %6048 = vmatprep.subr.bf16.mxu1 %v15068_v37  ;;  %6089 = vmatprep.subr.bf16.mxu0 %v15069_v41  ;;  %v15079_v37 = vld [vmem:[#allocation57_spill] sm:$0xff]  ;;  %v15080_v41 = vld [vmem:[#allocation58_spill] sm:$0xff] }
 0x64e   :  { %6049 = vmatpush2.bf16.msra.mxu1 %v15070_v34  ;;  %6090 = vmatpush2.bf16.msra.mxu0 %v15071_v40  ;;  %v15081_v34 = vld [vmem:[#allocation59_spill] sm:$0xff]  ;;  %v15082_v40 = vld [vmem:[#allocation60_spill] sm:$0xff] }
 0x64f   :  { %6050 = vmatprep.subr.bf16.mxu1 %v15072_v29  ;;  %6091 = vmatprep.subr.bf16.mxu0 %v15073_v43  ;;  %v15083_v29 = vld [vmem:[#allocation61_spill] sm:$0xff]  ;;  %v15084_v43 = vld [vmem:[#allocation62_spill] sm:$0xff] }
 0x652   :  { %6051 = vmatpush2.bf16.msra.mxu1 %v15074_v1  ;;  %6092 = vmatpush2.bf16.msra.mxu0 %v15075_v59  ;;  %v15085_v1 = vld [vmem:[#allocation63_spill] sm:$0xff]  ;;  %v15086_v59 = vld [vmem:[#allocation64_spill] sm:$0xff] }
 0x653   :  { %6052 = vmatprep.subr.bf16.mxu1 %v15076_v44  ;;  %6093 = vmatprep.subr.bf16.mxu0 %v15077_v9  ;;  %v15087_v44 = vld [vmem:[#allocation65_spill] sm:$0xff]  ;;  %v15088_v9 = vld [vmem:[#allocation66_spill] sm:$0xff] }
 0x656   :  { %6053 = vmatpush2.bf16.msra.mxu1 %v15078_v3  ;;  %6094 = vmatpush2.bf16.msra.mxu0 %v15079_v37  ;;  %v15089_v3 = vld [vmem:[#allocation67_spill] sm:$0xff]  ;;  %v15090_v37 = vld [vmem:[#allocation68_spill] sm:$0xff] }
 0x657   :  { %6054 = vmatprep.subr.bf16.mxu1 %v15080_v41  ;;  %6095 = vmatprep.subr.bf16.mxu0 %v15081_v34  ;;  %v15091_v41 = vld [vmem:[#allocation69_spill] sm:$0xff]  ;;  %v15092_v34 = vld [vmem:[#allocation70_spill] sm:$0xff] }
 0x65a   :  { %6055 = vmatpush2.bf16.msra.mxu1 %v15082_v40  ;;  %6096 = vmatpush2.bf16.msra.mxu0 %v15083_v29  ;;  %v15093_v40 = vld [vmem:[#allocation71_spill] sm:$0xff]  ;;  %v15094_v29 = vld [vmem:[#allocation72_spill] sm:$0xff] }
 0x65b   :  { %6056 = vmatprep.subr.bf16.mxu1 %v15084_v43  ;;  %6097 = vmatprep.subr.bf16.mxu0 %v15085_v1  ;;  %v15095_v43 = vld [vmem:[#allocation73_spill] sm:$0xff]  ;;  %v15096_v1 = vld [vmem:[#allocation74_spill] sm:$0xff] }
 0x65e   :  { %6057 = vmatpush2.bf16.msra.mxu1 %v15086_v59  ;;  %6098 = vmatpush2.bf16.msra.mxu0 %v15087_v44  ;;  %v15097_v59 = vld [vmem:[#allocation75_spill] sm:$0xff] }
 0x65f   :  { %6058 = vmatprep.subr.bf16.mxu1 %v15088_v9  ;;  %6099 = vmatprep.subr.bf16.mxu0 %v15089_v3 }
 0x662   :  { %6059 = vmatpush2.bf16.msra.mxu1 %v15090_v37  ;;  %6100 = vmatpush2.bf16.msra.mxu0 %v15091_v41 }
 0x663   :  { %6060 = vmatprep.subr.bf16.mxu1 %v15092_v34  ;;  %6101 = vmatprep.subr.bf16.mxu0 %v15093_v40 }
 0x666   :  { %6061 = vmatpush2.bf16.msra.mxu1 %v15094_v29  ;;  %6102 = vmatpush2.bf16.msra.mxu0 %v15095_v43  ;;  %v15101_v43 = vld [vmem:[#allocation148_spill] sm:$0xff] }
 0x667   :  { %6112 = vmatprep.subr.bf16.mxu1 %v15096_v1  ;;  %6153 = vmatprep.subr.bf16.mxu0 %v15097_v59 }
 0x6a9   :  { %v5830_v44 = vpop.f32.mrf.mxu1  ;;  %v5871_v9 = vpop.f32.mrf.mxu0 }
 0x6aa   :  { %v5960_v34 = vadd.f32 %v5830_v44, %v15098_v18  ;;  %v5962_v40 = vadd.f32 %v5871_v9, %v15099_v56 }
 0x6ab   :  { %v5832_v50 = vpop.f32.mrf.mxu1  ;;  %v5873_v3 = vpop.f32.mrf.mxu0 }
 0x6ac   :  { %v5961_v29 = vadd.f32 %v5832_v50, %v15100_v33  ;;  %v8608_v14 = vmul.f32 -1.442695, %v5960_v34  ;;  %v5963_v45 = vadd.f32 %v5873_v3, %v15101_v43  ;;  %v8610_v1 = vmul.f32 -1.442695, %v5962_v40  ;;  %v15102_v43 = vld [vmem:[#allocation173_spill] sm:$0xff]  ;;  %v15103_v34 = vld [vmem:[#allocation174_spill] sm:$0xff] }
 0x6ad   :  { %v5834_v63 = vpop.f32.mrf.mxu1  ;;  %v5875_v37 = vpop.f32.mrf.mxu0 }
 0x6ae   :  { %v8609_v26 = vmul.f32 -1.442695, %v5961_v29  ;;  %9634 = vpow2.f32 %v8608_v14  ;;  %v8611_v59 = vmul.f32 -1.442695, %v5963_v45  ;;  %v15105_v29 = vld [vmem:[#allocation176_spill] sm:$0xff] }
 0x6af   :  { %v5835_v35 = vpop.f32.mrf.mxu1  ;;  %v5876_v41 = vpop.f32.mrf.mxu0  ;;  %9636 = vpow2.f32 %v8610_v1 }
 0x6b0   :  { %9638 = vpow2.f32 %v8609_v26 }
 0x6b1   :  { %9640 = vpow2.f32 %v8611_v59  ;;  %v15104_v59 = vld [vmem:[#allocation175_spill] sm:$0xff] }
 0x6bb   :  { %v9635_v63 = vpop.eup %9634 }
 0x6bc   :  { %v9637_v37 = vpop.eup %9636  ;;  %v5974_v41 = vadd.f32 1.0, %v9635_v63 }
 0x6bd   :  { %v9639_v35 = vpop.eup %9638  ;;  %v5986_v18 = vadd.f32 1.0, %v9637_v37 }
 0x6be   :  { %v9641_v8 = vpop.eup %9640  ;;  %v5975_v44 = vadd.f32 1.0, %v9639_v35  ;;  %9642 = vrcp.f32 %v5974_v41 }
 0x6bf   :  { %v5987_v56 = vadd.f32 1.0, %v9641_v8  ;;  %9644 = vrcp.f32 %v5986_v18 }
 0x6c0   :  { %9646 = vrcp.f32 %v5975_v44 }
 0x6cb   :  { %v9643_v18 = vpop.eup %9642 }
 0x6e9   :  { %v5912_v33 = vpop.f32.mrf.mxu1  ;;  %v5953_v50 = vpop.f32.mrf.mxu0 }
 0x6ea   :  { %v5964_v3 = vadd.f32 %v5912_v33, %v15102_v43  ;;  %v5966_v14 = vadd.f32 %v5953_v50, %v15103_v34  ;;  %v9645_v33 = vpop.eup %9644 }
 0x6eb   :  { %v5914_v45 = vpop.f32.mrf.mxu1  ;;  %v5955_v26 = vpop.f32.mrf.mxu0 }
 0x6ec   :  { %9648 = vtanh.f32 %v5964_v3  ;;  %v8612_v1 = vmul.f32 -1.442695, %v5966_v14  ;;  %v5965_v40 = vadd.f32 %v5914_v45, %v15104_v59  ;;  %v5967_v9 = vadd.f32 %v5955_v26, %v15105_v29  ;;  %v9647_v44 = vpop.eup %9646 }
 0x6ed   :  { %9650 = vrcp.f32 %v5987_v56  ;;  %v5916_v63 = vpop.f32.mrf.mxu1  ;;  %v5957_v37 = vpop.f32.mrf.mxu0  ;;  %v6006_v3 = vmul.f32 %v9645_v33, %v13202_v23  ;;  %v15106_v33 = vld [vmem:[#allocation117_spill] sm:$0xff] }
 0x6ee   :  { %9652 = vpow2.f32 %v8612_v1  ;;  %v8613_v8 = vmul.f32 -1.442695, %v5967_v9 }
 0x6ef   :  { %9654 = vtanh.f32 %v5965_v40  ;;  %v5917_v35 = vpop.f32.mrf.mxu1  ;;  %v5958_v41 = vpop.f32.mrf.mxu0 }
 0x6f0   :  { %9656 = vpow2.f32 %v8613_v8 }
 0x6f9   :  { %v9649_v50 = vpop.eup %9648 }
 0x6fa   :  { %v9651_v43 = vpop.eup %9650  ;;  %v6008_v34 = vmul.f32 %v9649_v50, %v9643_v18  ;;  %v15108_v50 = vld [vmem:[#allocation119_spill] sm:$0xff] }
 0x6fb   :  { %v9653_v14 = vpop.eup %9652  ;;  %v6007_v1 = vmul.f32 %v9651_v43, %v13206_v19  ;;  %v15109_v43 = vld [vmem:[#allocation120_spill] sm:$0xff] }
 0x6fc   :  { %v9655_v45 = vpop.eup %9654  ;;  %v13352_v26 = vadd.f32 %v6008_v34, %v6006_v3  ;;  %v6000_v56 = vadd.f32 1.0, %v9653_v14  ;;  %v15110_v3 = vld [vmem:[#allocation121_spill] sm:$0xff]  ;;  %v15111_v34 = vld [vmem:[#allocation122_spill] sm:$0xff]  ;;  %v15112_v14 = vld [vmem:[#allocation123_spill] sm:$0xff] }
 0x6fd   :  { %v9657_v59 = vpop.eup %9656  ;;  %v6009_v40 = vmul.f32 %v9655_v45, %v9647_v44  ;;  %v15107_v44 = vld [vmem:[#allocation118_spill] sm:$0xff]  ;;  %v15113_v45 = vld [vmem:[#allocation124_spill] sm:$0xff] }
 0x6fe   :  { %9658 = vtanh.f32 %v13352_v26  ;;  %v6001_v29 = vadd.f32 1.0, %v9657_v59  ;;  %v15115_v59 = vld [vmem:[#allocation126_spill] sm:$0xff] }
 0x6ff   :  { %9660 = vrcp.f32 %v6000_v56  ;;  %v13356_v9 = vadd.f32 %v6009_v40, %v6007_v1  ;;  %v15114_v56 = vld [vmem:[#allocation125_spill] sm:$0xff]  ;;  %v15116_v1 = vld [vmem:[#allocation127_spill] sm:$0xff]  ;;  %v15117_v40 = vld [vmem:[#allocation128_spill] sm:$0xff] }
 0x700   :  { %9662 = vrcp.f32 %v6001_v29  ;;  %v15118_v29 = vld [vmem:[#allocation129_spill] sm:$0xff] }
 0x701   :  { %9664 = vtanh.f32 %v13356_v9 }
 0x70b   :  { %v9659_v23 = vpop.eup %9658 }
 0x70c   :  { %v9661_v63 = vpop.eup %9660 }
 0x70d   :  { %v9663_v37 = vpop.eup %9662  ;;  %v6014_v8 = vmul.f32 %v9661_v63, %v9659_v23  ;;  %v15119_v23 = vld [vmem:[#allocation130_spill] sm:$0xff]  ;;  %v15120_v63 = vld [vmem:[#allocation131_spill] sm:$0xff] }
 0x70e   :  { %v9665_v35 = vpop.eup %9664 }
 0x70f   :  { %v6015_v41 = vmul.f32 %v9665_v35, %v9663_v37  ;;  %6017 = vst [vmem:[#allocation7 + $0x30] sm:$0xff] %v6014_v8  ;;  %v13359_v19 = vpack.c.bf16 %v6014_v8, %v6014_v8  ;;  %v15121_v37 = vld [vmem:[#allocation132_spill] sm:$0xff]  ;;  %v15122_v8 = vld [vmem:[#allocation133_spill] sm:$0xff]  ;;  %v15123_v35 = vld [vmem:[#allocation134_spill] sm:$0xff] }
 0x711   :  { %6018 = vst [vmem:[#allocation7 + $0x38] sm:$0xff] %v6015_v41  ;;  %v6029_v18 = vpack.c.bf16 %v6015_v41, %v6015_v41  ;;  %v15124_v41 = vld [vmem:[#allocation135_spill] sm:$0xff] }
 0x713   :  { %6062 = vmatprep.mubr.bf16.mxu1 %v6029_v18  ;;  %6103 = vmatprep.mubr.bf16.mxu0 %v6029_v18 }
 0x714   :  { %6063 = vmatmul.mubr.bf16.vlgmr.msra.gmra.mxu1 %v13359_v19  ;;  %6104 = vmatmul.mubr.bf16.vlgmr.msra.gmra.mxu0 %v13359_v19 }
 0x715   :  { %6113 = vmatpush1.bf16.msra.mxu1 %v14812_v38  ;;  %6154 = vmatpush1.bf16.msra.mxu0 %v14813_v13 }
 0x716   :  { %6144 = vmatprep.mubr.bf16.mxu1 %v6029_v18  ;;  %6185 = vmatprep.mubr.bf16.mxu0 %v6029_v18  ;;  %v15125_v18 = vld [vmem:[#allocation136_spill] sm:$0xff] }
 0x717   :  { %6114 = vmatprep.subr.bf16.mxu1 %v14814_v16  ;;  %6155 = vmatprep.subr.bf16.mxu0 %v14815_v31 }
 0x719   :  { %6115 = vmatpush1.bf16.msra.mxu1 %v14816_v58  ;;  %6156 = vmatpush1.bf16.msra.mxu0 %v14817_v30 }
 0x71a   :  { %6116 = vmatprep.subr.bf16.mxu1 %v14818_v52  ;;  %6157 = vmatprep.subr.bf16.mxu0 %v14819_v24 }
 0x71d   :  { %6117 = vmatpush1.bf16.msra.mxu1 %v14820_v11  ;;  %6158 = vmatpush1.bf16.msra.mxu0 %v14821_v61 }
 0x71e   :  { %6118 = vmatprep.subr.bf16.mxu1 %v14822_v53  ;;  %6159 = vmatprep.subr.bf16.mxu0 %v14823_v47 }
 0x721   :  { %6119 = vmatpush1.bf16.msra.mxu1 %v14824_v46  ;;  %6160 = vmatpush1.bf16.msra.mxu0 %v14825_v51 }
 0x722   :  { %6120 = vmatprep.subr.bf16.mxu1 %v14826_v10  ;;  %6161 = vmatprep.subr.bf16.mxu0 %v14827_v54 }
 0x725   :  { %6121 = vmatpush1.bf16.msra.mxu1 %v14828_v39  ;;  %6162 = vmatpush1.bf16.msra.mxu0 %v14829_v32 }
 0x726   :  { %6122 = vmatprep.subr.bf16.mxu1 %v14916_v49  ;;  %6163 = vmatprep.subr.bf16.mxu0 %v14917_v20 }
 0x729   :  { %6123 = vmatpush1.bf16.msra.mxu1 %v14918_v55  ;;  %6164 = vmatpush1.bf16.msra.mxu0 %v14919_v21 }
 0x72a   :  { %6124 = vmatprep.subr.bf16.mxu1 %v14920_v25  ;;  %6165 = vmatprep.subr.bf16.mxu0 %v14921_v17 }
 0x72d   :  { %6125 = vmatpush1.bf16.msra.mxu1 %v14922_v48  ;;  %6166 = vmatpush1.bf16.msra.mxu0 %v14923_v5 }
 0x72e   :  { %6126 = vmatprep.subr.bf16.mxu1 %v14924_v0  ;;  %6167 = vmatprep.subr.bf16.mxu0 %v15011_v28 }
 0x731   :  { %6127 = vmatpush1.bf16.msra.mxu1 %v15012_v6  ;;  %6168 = vmatpush1.bf16.msra.mxu0 %v15013_v4 }
 0x732   :  { %6128 = vmatprep.subr.bf16.mxu1 %v15014_v15  ;;  %6169 = vmatprep.subr.bf16.mxu0 %v14929_v57 }
 0x735   :  { %6129 = vmatpush2.bf16.msra.mxu1 %v14930_v12  ;;  %6170 = vmatpush2.bf16.msra.mxu0 %v14931_v62 }
 0x736   :  { %6130 = vmatprep.subr.bf16.mxu1 %v14932_v36  ;;  %6171 = vmatprep.subr.bf16.mxu0 %v14933_v7 }
 0x739   :  { %6131 = vmatpush2.bf16.msra.mxu1 %v14934_v2  ;;  %6172 = vmatpush2.bf16.msra.mxu0 %v14935_v60 }
 0x73a   :  { %6132 = vmatprep.subr.bf16.mxu1 %v14936_v22  ;;  %6173 = vmatprep.subr.bf16.mxu0 %v14937_v27 }
 0x73d   :  { %6133 = vmatpush2.bf16.msra.mxu1 %v14938_v42  ;;  %6174 = vmatpush2.bf16.msra.mxu0 %v15106_v33 }
 0x73e   :  { %6134 = vmatprep.subr.bf16.mxu1 %v15107_v44  ;;  %6175 = vmatprep.subr.bf16.mxu0 %v15108_v50 }
 0x741   :  { %6135 = vmatpush2.bf16.msra.mxu1 %v15109_v43  ;;  %6176 = vmatpush2.bf16.msra.mxu0 %v15110_v3  ;;  %v15195_v3 = vld [vmem:[#allocation151_spill] sm:$0xff] }
 0x742   :  { %6136 = vmatprep.subr.bf16.mxu1 %v15111_v34  ;;  %6177 = vmatprep.subr.bf16.mxu0 %v15112_v14  ;;  %v15193_v14 = vld [vmem:[#allocation149_spill] sm:$0xff]  ;;  %v15194_v34 = vld [vmem:[#allocation150_spill] sm:$0xff] }
 0x745   :  { %6137 = vmatpush2.bf16.msra.mxu1 %v15113_v45  ;;  %6178 = vmatpush2.bf16.msra.mxu0 %v15114_v56 }
 0x746   :  { %6138 = vmatprep.subr.bf16.mxu1 %v15115_v59  ;;  %6179 = vmatprep.subr.bf16.mxu0 %v15116_v1  ;;  %v15126_v59 = vld [vmem:[#allocation137_spill] sm:$0xff]  ;;  %v15127_v1 = vld [vmem:[#allocation14_spill] sm:$0xff] }
 0x749   :  { %6139 = vmatpush2.bf16.msra.mxu1 %v15117_v40  ;;  %6180 = vmatpush2.bf16.msra.mxu0 %v15118_v29  ;;  %v15128_v40 = vld [vmem:[#allocation17_spill] sm:$0xff] }
 0x74a   :  { %6140 = vmatprep.subr.bf16.mxu1 %v15119_v23  ;;  %6181 = vmatprep.subr.bf16.mxu0 %v15120_v63  ;;  %v15129_v63 = vld [vmem:[#allocation19_spill] sm:$0xff]  ;;  %v15138_v23 = vld [vmem:[#allocation25_spill] sm:$0xff] }
 0x74d   :  { %6141 = vmatpush2.bf16.msra.mxu1 %v15121_v37  ;;  %6182 = vmatpush2.bf16.msra.mxu0 %v15122_v8  ;;  %v15130_v37 = vld [vmem:[#allocation21_spill] sm:$0xff]  ;;  %v15131_v8 = vld [vmem:[#allocation12_spill] sm:$0xff] }
 0x74e   :  { %6142 = vmatprep.subr.bf16.mxu1 %v15123_v35  ;;  %6183 = vmatprep.subr.bf16.mxu0 %v15124_v41  ;;  %v15132_v35 = vld [vmem:[#allocation16_spill] sm:$0xff]  ;;  %v15133_v41 = vld [vmem:[#allocation18_spill] sm:$0xff] }
 0x751   :  { %6143 = vmatpush2.bf16.msra.mxu1 %v15125_v18  ;;  %6184 = vmatpush2.bf16.msra.mxu0 %v15126_v59  ;;  %v15134_v18 = vld [vmem:[#allocation20_spill] sm:$0xff]  ;;  %v15135_v59 = vld [vmem:[#allocation22_spill] sm:$0xff] }
 0x752   :  { %6264 = vmatprep.subr.bf16.mxu1 %v15127_v1  ;;  %6305 = vmatprep.subr.bf16.mxu0 %v15128_v40  ;;  %v15136_v1 = vld [vmem:[#allocation23_spill] sm:$0xff]  ;;  %v15137_v40 = vld [vmem:[#allocation24_spill] sm:$0xff] }
 0x754   :  { %6145 = vmatmul.mubr.bf16.vlgmr.msra.gmra.mxu1 %v13359_v19  ;;  %6186 = vmatmul.mubr.bf16.vlgmr.msra.gmra.mxu0 %v13359_v19  ;;  %v15139_v19 = vld [vmem:[#allocation8_spill] sm:$0xff] }
 0x755   :  { %6265 = vmatpush1.bf16.msra.mxu1 %v15129_v63  ;;  %6306 = vmatpush1.bf16.msra.mxu0 %v15130_v37  ;;  %v15140_v63 = vld [vmem:[#allocation9_spill] sm:$0xff]  ;;  %v15141_v37 = vld [vmem:[#allocation10_spill] sm:$0xff] }
 0x756   :  { %6266 = vmatprep.subr.bf16.mxu1 %v15131_v8  ;;  %6307 = vmatprep.subr.bf16.mxu0 %v15132_v35  ;;  %v15142_v8 = vld [vmem:[#allocation11_spill] sm:$0xff]  ;;  %v15143_v35 = vld [vmem:[#allocation26_spill] sm:$0xff] }
 0x759   :  { %6267 = vmatpush1.bf16.msra.mxu1 %v15133_v41  ;;  %6308 = vmatpush1.bf16.msra.mxu0 %v15134_v18  ;;  %v15144_v41 = vld [vmem:[#allocation27_spill] sm:$0xff]  ;;  %v15145_v18 = vld [vmem:[#allocation28_spill] sm:$0xff] }
 0x75a   :  { %6268 = vmatprep.subr.bf16.mxu1 %v15135_v59  ;;  %6309 = vmatprep.subr.bf16.mxu0 %v15136_v1  ;;  %v15146_v59 = vld [vmem:[#allocation29_spill] sm:$0xff]  ;;  %v15147_v1 = vld [vmem:[#allocation30_spill] sm:$0xff] }
 0x75d   :  { %6269 = vmatpush1.bf16.msra.mxu1 %v15137_v40  ;;  %6310 = vmatpush1.bf16.msra.mxu0 %v15138_v23  ;;  %v15148_v40 = vld [vmem:[#allocation31_spill] sm:$0xff]  ;;  %v15149_v23 = vld [vmem:[#allocation32_spill] sm:$0xff] }
 0x75e   :  { %6270 = vmatprep.subr.bf16.mxu1 %v15139_v19  ;;  %6311 = vmatprep.subr.bf16.mxu0 %v15140_v63  ;;  %v15150_v19 = vld [vmem:[#allocation33_spill] sm:$0xff]  ;;  %v15151_v63 = vld [vmem:[#allocation34_spill] sm:$0xff] }
 0x761   :  { %6271 = vmatpush1.bf16.msra.mxu1 %v15141_v37  ;;  %6312 = vmatpush1.bf16.msra.mxu0 %v15142_v8  ;;  %v15152_v37 = vld [vmem:[#allocation35_spill] sm:$0xff]  ;;  %v15153_v8 = vld [vmem:[#allocation36_spill] sm:$0xff] }
 0x762   :  { %6272 = vmatprep.subr.bf16.mxu1 %v15143_v35  ;;  %6313 = vmatprep.subr.bf16.mxu0 %v15144_v41  ;;  %v15154_v35 = vld [vmem:[#allocation37_spill] sm:$0xff]  ;;  %v15155_v41 = vld [vmem:[#allocation38_spill] sm:$0xff] }
 0x765   :  { %6273 = vmatpush1.bf16.msra.mxu1 %v15145_v18  ;;  %6314 = vmatpush1.bf16.msra.mxu0 %v15146_v59  ;;  %v15156_v18 = vld [vmem:[#allocation39_spill] sm:$0xff]  ;;  %v15157_v59 = vld [vmem:[#allocation40_spill] sm:$0xff] }
 0x766   :  { %6274 = vmatprep.subr.bf16.mxu1 %v15147_v1  ;;  %6315 = vmatprep.subr.bf16.mxu0 %v15148_v40  ;;  %v15158_v1 = vld [vmem:[#allocation41_spill] sm:$0xff]  ;;  %v15159_v40 = vld [vmem:[#allocation42_spill] sm:$0xff] }
 0x769   :  { %6275 = vmatpush1.bf16.msra.mxu1 %v15149_v23  ;;  %6316 = vmatpush1.bf16.msra.mxu0 %v15150_v19  ;;  %v15160_v23 = vld [vmem:[#allocation43_spill] sm:$0xff]  ;;  %v15161_v19 = vld [vmem:[#allocation44_spill] sm:$0xff] }
 0x76a   :  { %6276 = vmatprep.subr.bf16.mxu1 %v15151_v63  ;;  %6317 = vmatprep.subr.bf16.mxu0 %v15152_v37  ;;  %v15162_v63 = vld [vmem:[#allocation45_spill] sm:$0xff]  ;;  %v15163_v37 = vld [vmem:[#allocation46_spill] sm:$0xff] }
 0x76d   :  { %6277 = vmatpush1.bf16.msra.mxu1 %v15153_v8  ;;  %6318 = vmatpush1.bf16.msra.mxu0 %v15154_v35  ;;  %v15164_v8 = vld [vmem:[#allocation47_spill] sm:$0xff]  ;;  %v15165_v35 = vld [vmem:[#allocation48_spill] sm:$0xff] }
 0x76e   :  { %6278 = vmatprep.subr.bf16.mxu1 %v15155_v41  ;;  %6319 = vmatprep.subr.bf16.mxu0 %v15156_v18  ;;  %v15166_v41 = vld [vmem:[#allocation49_spill] sm:$0xff]  ;;  %v15167_v18 = vld [vmem:[#allocation50_spill] sm:$0xff] }
 0x771   :  { %6279 = vmatpush1.bf16.msra.mxu1 %v15157_v59  ;;  %6320 = vmatpush1.bf16.msra.mxu0 %v15158_v1  ;;  %v15168_v59 = vld [vmem:[#allocation51_spill] sm:$0xff]  ;;  %v15169_v1 = vld [vmem:[#allocation52_spill] sm:$0xff] }
 0x772   :  { %6280 = vmatprep.subr.bf16.mxu1 %v15159_v40  ;;  %6321 = vmatprep.subr.bf16.mxu0 %v15160_v23  ;;  %v15170_v40 = vld [vmem:[#allocation53_spill] sm:$0xff]  ;;  %v15171_v23 = vld [vmem:[#allocation54_spill] sm:$0xff] }
 0x775   :  { %6281 = vmatpush2.bf16.msra.mxu1 %v15161_v19  ;;  %6322 = vmatpush2.bf16.msra.mxu0 %v15162_v63  ;;  %v15172_v19 = vld [vmem:[#allocation55_spill] sm:$0xff]  ;;  %v15173_v63 = vld [vmem:[#allocation56_spill] sm:$0xff] }
 0x776   :  { %6282 = vmatprep.subr.bf16.mxu1 %v15163_v37  ;;  %6323 = vmatprep.subr.bf16.mxu0 %v15164_v8  ;;  %v15174_v37 = vld [vmem:[#allocation57_spill] sm:$0xff]  ;;  %v15175_v8 = vld [vmem:[#allocation58_spill] sm:$0xff] }
 0x779   :  { %6283 = vmatpush2.bf16.msra.mxu1 %v15165_v35  ;;  %6324 = vmatpush2.bf16.msra.mxu0 %v15166_v41  ;;  %v15176_v35 = vld [vmem:[#allocation59_spill] sm:$0xff]  ;;  %v15177_v41 = vld [vmem:[#allocation60_spill] sm:$0xff] }
 0x77a   :  { %6284 = vmatprep.subr.bf16.mxu1 %v15167_v18  ;;  %6325 = vmatprep.subr.bf16.mxu0 %v15168_v59  ;;  %v15178_v18 = vld [vmem:[#allocation61_spill] sm:$0xff]  ;;  %v15179_v59 = vld [vmem:[#allocation62_spill] sm:$0xff] }
 0x77d   :  { %6285 = vmatpush2.bf16.msra.mxu1 %v15169_v1  ;;  %6326 = vmatpush2.bf16.msra.mxu0 %v15170_v40  ;;  %v15180_v1 = vld [vmem:[#allocation63_spill] sm:$0xff]  ;;  %v15181_v40 = vld [vmem:[#allocation64_spill] sm:$0xff] }
 0x77e   :  { %6286 = vmatprep.subr.bf16.mxu1 %v15171_v23  ;;  %6327 = vmatprep.subr.bf16.mxu0 %v15172_v19  ;;  %v15182_v23 = vld [vmem:[#allocation65_spill] sm:$0xff]  ;;  %v15183_v19 = vld [vmem:[#allocation66_spill] sm:$0xff] }
 0x781   :  { %6287 = vmatpush2.bf16.msra.mxu1 %v15173_v63  ;;  %6328 = vmatpush2.bf16.msra.mxu0 %v15174_v37  ;;  %v15184_v63 = vld [vmem:[#allocation67_spill] sm:$0xff]  ;;  %v15185_v37 = vld [vmem:[#allocation68_spill] sm:$0xff] }
 0x782   :  { %6288 = vmatprep.subr.bf16.mxu1 %v15175_v8  ;;  %6329 = vmatprep.subr.bf16.mxu0 %v15176_v35  ;;  %v15186_v8 = vld [vmem:[#allocation69_spill] sm:$0xff]  ;;  %v15187_v35 = vld [vmem:[#allocation70_spill] sm:$0xff] }
 0x785   :  { %6289 = vmatpush2.bf16.msra.mxu1 %v15177_v41  ;;  %6330 = vmatpush2.bf16.msra.mxu0 %v15178_v18  ;;  %v15188_v41 = vld [vmem:[#allocation71_spill] sm:$0xff]  ;;  %v15189_v18 = vld [vmem:[#allocation72_spill] sm:$0xff] }
 0x786   :  { %6290 = vmatprep.subr.bf16.mxu1 %v15179_v59  ;;  %6331 = vmatprep.subr.bf16.mxu0 %v15180_v1  ;;  %v15190_v59 = vld [vmem:[#allocation73_spill] sm:$0xff]  ;;  %v15191_v1 = vld [vmem:[#allocation74_spill] sm:$0xff] }
 0x789   :  { %6291 = vmatpush2.bf16.msra.mxu1 %v15181_v40  ;;  %6332 = vmatpush2.bf16.msra.mxu0 %v15182_v23  ;;  %v15192_v40 = vld [vmem:[#allocation75_spill] sm:$0xff] }
 0x78a   :  { %6292 = vmatprep.subr.bf16.mxu1 %v15183_v19  ;;  %6333 = vmatprep.subr.bf16.mxu0 %v15184_v63 }
 0x78d   :  { %6293 = vmatpush2.bf16.msra.mxu1 %v15185_v37  ;;  %6334 = vmatpush2.bf16.msra.mxu0 %v15186_v8 }
 0x78e   :  { %6294 = vmatprep.subr.bf16.mxu1 %v15187_v35  ;;  %6335 = vmatprep.subr.bf16.mxu0 %v15188_v41 }
 0x791   :  { %6295 = vmatpush2.bf16.msra.mxu1 %v15189_v18  ;;  %6336 = vmatpush2.bf16.msra.mxu0 %v15190_v59  ;;  %v15196_v59 = vld [vmem:[#allocation152_spill] sm:$0xff] }
 0x792   :  { %6346 = vmatprep.subr.bf16.mxu1 %v15191_v1  ;;  %6387 = vmatprep.subr.bf16.mxu0 %v15192_v40 }
 0x7d4   :  { %v6064_v23 = vpop.f32.mrf.mxu1  ;;  %v6105_v19 = vpop.f32.mrf.mxu0 }
 0x7d5   :  { %v6194_v35 = vadd.f32 %v6064_v23, %v15193_v14  ;;  %v6196_v41 = vadd.f32 %v6105_v19, %v15194_v34 }
 0x7d6   :  { %v6066_v29 = vpop.f32.mrf.mxu1  ;;  %v6107_v63 = vpop.f32.mrf.mxu0 }
 0x7d7   :  { %v6195_v18 = vadd.f32 %v6066_v29, %v15195_v3  ;;  %v8614_v43 = vmul.f32 -1.442695, %v6194_v35  ;;  %v6197_v50 = vadd.f32 %v6107_v63, %v15196_v59  ;;  %v8616_v1 = vmul.f32 -1.442695, %v6196_v41  ;;  %v15197_v59 = vld [vmem:[#allocation177_spill] sm:$0xff]  ;;  %v15198_v35 = vld [vmem:[#allocation178_spill] sm:$0xff] }
 0x7d8   :  { %v6068_v56 = vpop.f32.mrf.mxu1  ;;  %v6109_v37 = vpop.f32.mrf.mxu0 }
 0x7d9   :  { %v8615_v44 = vmul.f32 -1.442695, %v6195_v18  ;;  %9666 = vpow2.f32 %v8614_v43  ;;  %v8617_v40 = vmul.f32 -1.442695, %v6197_v50  ;;  %v15200_v18 = vld [vmem:[#allocation180_spill] sm:$0xff] }
 0x7da   :  { %v6069_v45 = vpop.f32.mrf.mxu1  ;;  %v6110_v8 = vpop.f32.mrf.mxu0  ;;  %9668 = vpow2.f32 %v8616_v1 }
 0x7db   :  { %9670 = vpow2.f32 %v8615_v44 }
 0x7dc   :  { %9672 = vpow2.f32 %v8617_v40  ;;  %v15199_v40 = vld [vmem:[#allocation179_spill] sm:$0xff] }
 0x7e6   :  { %v9667_v56 = vpop.eup %9666 }
 0x7e7   :  { %v9669_v37 = vpop.eup %9668  ;;  %v6208_v8 = vadd.f32 1.0, %v9667_v56 }
 0x7e8   :  { %v9671_v45 = vpop.eup %9670  ;;  %v6220_v14 = vadd.f32 1.0, %v9669_v37 }
 0x7e9   :  { %v9673_v33 = vpop.eup %9672  ;;  %v6209_v23 = vadd.f32 1.0, %v9671_v45  ;;  %9674 = vrcp.f32 %v6208_v8 }
 0x7ea   :  { %v6221_v34 = vadd.f32 1.0, %v9673_v33  ;;  %9676 = vrcp.f32 %v6220_v14 }
 0x7eb   :  { %9678 = vrcp.f32 %v6209_v23 }
 0x7f6   :  { %v9675_v14 = vpop.eup %9674 }
 0x814   :  { %v6146_v3 = vpop.f32.mrf.mxu1  ;;  %v6187_v29 = vpop.f32.mrf.mxu0 }
 0x815   :  { %v6198_v63 = vadd.f32 %v6146_v3, %v15197_v59  ;;  %v6200_v43 = vadd.f32 %v6187_v29, %v15198_v35  ;;  %v9677_v3 = vpop.eup %9676 }
 0x816   :  { %v6148_v50 = vpop.f32.mrf.mxu1  ;;  %v6189_v44 = vpop.f32.mrf.mxu0 }
 0x817   :  { %9680 = vtanh.f32 %v6198_v63  ;;  %v8618_v1 = vmul.f32 -1.442695, %v6200_v43  ;;  %v6199_v41 = vadd.f32 %v6148_v50, %v15199_v40  ;;  %v6201_v19 = vadd.f32 %v6189_v44, %v15200_v18  ;;  %v9679_v23 = vpop.eup %9678 }
 0x818   :  { %9682 = vrcp.f32 %v6221_v34  ;;  %v6150_v56 = vpop.f32.mrf.mxu1  ;;  %v6191_v37 = vpop.f32.mrf.mxu0  ;;  %v6240_v63 = vmul.f32 %v9677_v3, %v13352_v26  ;;  %v15201_v3 = vld [vmem:[#allocation117_spill] sm:$0xff] }
 0x819   :  { %9684 = vpow2.f32 %v8618_v1  ;;  %v8619_v33 = vmul.f32 -1.442695, %v6201_v19 }
 0x81a   :  { %9686 = vtanh.f32 %v6199_v41  ;;  %v6151_v45 = vpop.f32.mrf.mxu1  ;;  %v6192_v8 = vpop.f32.mrf.mxu0 }
 0x81b   :  { %9688 = vpow2.f32 %v8619_v33 }
 0x824   :  { %v9681_v29 = vpop.eup %9680 }
 0x825   :  { %v9683_v59 = vpop.eup %9682  ;;  %v6242_v35 = vmul.f32 %v9681_v29, %v9675_v14  ;;  %v15203_v29 = vld [vmem:[#allocation119_spill] sm:$0xff] }
 0x826   :  { %v9685_v43 = vpop.eup %9684  ;;  %v6241_v1 = vmul.f32 %v9683_v59, %v13356_v9  ;;  %v15204_v59 = vld [vmem:[#allocation120_spill] sm:$0xff] }
 0x827   :  { %v9687_v50 = vpop.eup %9686  ;;  %v13502_v44 = vadd.f32 %v6242_v35, %v6240_v63  ;;  %v6234_v34 = vadd.f32 1.0, %v9685_v43  ;;  %v15205_v63 = vld [vmem:[#allocation121_spill] sm:$0xff]  ;;  %v15206_v35 = vld [vmem:[#allocation122_spill] sm:$0xff]  ;;  %v15207_v43 = vld [vmem:[#allocation123_spill] sm:$0xff] }
 0x828   :  { %v9689_v40 = vpop.eup %9688  ;;  %v6243_v41 = vmul.f32 %v9687_v50, %v9679_v23  ;;  %v15202_v23 = vld [vmem:[#allocation118_spill] sm:$0xff]  ;;  %v15208_v50 = vld [vmem:[#allocation124_spill] sm:$0xff] }
 0x829   :  { %9690 = vtanh.f32 %v13502_v44  ;;  %v6235_v18 = vadd.f32 1.0, %v9689_v40  ;;  %v15210_v40 = vld [vmem:[#allocation126_spill] sm:$0xff] }
 0x82a   :  { %9692 = vrcp.f32 %v6234_v34  ;;  %v13506_v19 = vadd.f32 %v6243_v41, %v6241_v1  ;;  %v15209_v34 = vld [vmem:[#allocation125_spill] sm:$0xff]  ;;  %v15211_v1 = vld [vmem:[#allocation127_spill] sm:$0xff]  ;;  %v15212_v41 = vld [vmem:[#allocation128_spill] sm:$0xff] }
 0x82b   :  { %9694 = vrcp.f32 %v6235_v18  ;;  %v15213_v18 = vld [vmem:[#allocation129_spill] sm:$0xff] }
 0x82c   :  { %9696 = vtanh.f32 %v13506_v19 }
 0x836   :  { %v9691_v26 = vpop.eup %9690 }
 0x837   :  { %v9693_v56 = vpop.eup %9692 }
 0x838   :  { %v9695_v37 = vpop.eup %9694  ;;  %v6248_v33 = vmul.f32 %v9693_v56, %v9691_v26  ;;  %v15214_v26 = vld [vmem:[#allocation130_spill] sm:$0xff]  ;;  %v15215_v56 = vld [vmem:[#allocation131_spill] sm:$0xff] }
 0x839   :  { %v9697_v45 = vpop.eup %9696 }
 0x83a   :  { %v6249_v8 = vmul.f32 %v9697_v45, %v9695_v37  ;;  %6251 = vst [vmem:[#allocation7 + $0x40] sm:$0xff] %v6248_v33  ;;  %v13509_v9 = vpack.c.bf16 %v6248_v33, %v6248_v33  ;;  %v15216_v37 = vld [vmem:[#allocation132_spill] sm:$0xff]  ;;  %v15217_v33 = vld [vmem:[#allocation133_spill] sm:$0xff]  ;;  %v15218_v45 = vld [vmem:[#allocation134_spill] sm:$0xff] }
 0x83c   :  { %6252 = vst [vmem:[#allocation7 + $0x48] sm:$0xff] %v6249_v8  ;;  %v6263_v14 = vpack.c.bf16 %v6249_v8, %v6249_v8  ;;  %v15219_v8 = vld [vmem:[#allocation135_spill] sm:$0xff] }
 0x83e   :  { %6296 = vmatprep.mubr.bf16.mxu1 %v6263_v14  ;;  %6337 = vmatprep.mubr.bf16.mxu0 %v6263_v14 }
 0x83f   :  { %6297 = vmatmul.mubr.bf16.vlgmr.msra.gmra.mxu1 %v13509_v9  ;;  %6338 = vmatmul.mubr.bf16.vlgmr.msra.gmra.mxu0 %v13509_v9 }
 0x840   :  { %6347 = vmatpush1.bf16.msra.mxu1 %v14812_v38  ;;  %6388 = vmatpush1.bf16.msra.mxu0 %v14813_v13 }
 0x841   :  { %6378 = vmatprep.mubr.bf16.mxu1 %v6263_v14  ;;  %6419 = vmatprep.mubr.bf16.mxu0 %v6263_v14  ;;  %v15220_v14 = vld [vmem:[#allocation136_spill] sm:$0xff] }
 0x842   :  { %6348 = vmatprep.subr.bf16.mxu1 %v14814_v16  ;;  %6389 = vmatprep.subr.bf16.mxu0 %v14815_v31 }
 0x844   :  { %6349 = vmatpush1.bf16.msra.mxu1 %v14816_v58  ;;  %6390 = vmatpush1.bf16.msra.mxu0 %v14817_v30 }
 0x845   :  { %6350 = vmatprep.subr.bf16.mxu1 %v14818_v52  ;;  %6391 = vmatprep.subr.bf16.mxu0 %v14819_v24 }
 0x848   :  { %6351 = vmatpush1.bf16.msra.mxu1 %v14820_v11  ;;  %6392 = vmatpush1.bf16.msra.mxu0 %v14821_v61 }
 0x849   :  { %6352 = vmatprep.subr.bf16.mxu1 %v14822_v53  ;;  %6393 = vmatprep.subr.bf16.mxu0 %v14823_v47 }
 0x84c   :  { %6353 = vmatpush1.bf16.msra.mxu1 %v14824_v46  ;;  %6394 = vmatpush1.bf16.msra.mxu0 %v14825_v51 }
 0x84d   :  { %6354 = vmatprep.subr.bf16.mxu1 %v14826_v10  ;;  %6395 = vmatprep.subr.bf16.mxu0 %v14827_v54 }
 0x850   :  { %6355 = vmatpush1.bf16.msra.mxu1 %v14828_v39  ;;  %6396 = vmatpush1.bf16.msra.mxu0 %v14829_v32 }
 0x851   :  { %6356 = vmatprep.subr.bf16.mxu1 %v14916_v49  ;;  %6397 = vmatprep.subr.bf16.mxu0 %v14917_v20 }
 0x854   :  { %6357 = vmatpush1.bf16.msra.mxu1 %v14918_v55  ;;  %6398 = vmatpush1.bf16.msra.mxu0 %v14919_v21 }
 0x855   :  { %6358 = vmatprep.subr.bf16.mxu1 %v14920_v25  ;;  %6399 = vmatprep.subr.bf16.mxu0 %v14921_v17 }
 0x858   :  { %6359 = vmatpush1.bf16.msra.mxu1 %v14922_v48  ;;  %6400 = vmatpush1.bf16.msra.mxu0 %v14923_v5 }
 0x859   :  { %6360 = vmatprep.subr.bf16.mxu1 %v14924_v0  ;;  %6401 = vmatprep.subr.bf16.mxu0 %v15011_v28 }
 0x85c   :  { %6361 = vmatpush1.bf16.msra.mxu1 %v15012_v6  ;;  %6402 = vmatpush1.bf16.msra.mxu0 %v15013_v4 }
 0x85d   :  { %6362 = vmatprep.subr.bf16.mxu1 %v15014_v15  ;;  %6403 = vmatprep.subr.bf16.mxu0 %v14929_v57 }
 0x860   :  { %6363 = vmatpush2.bf16.msra.mxu1 %v14930_v12  ;;  %6404 = vmatpush2.bf16.msra.mxu0 %v14931_v62 }
 0x861   :  { %6364 = vmatprep.subr.bf16.mxu1 %v14932_v36  ;;  %6405 = vmatprep.subr.bf16.mxu0 %v14933_v7 }
 0x864   :  { %6365 = vmatpush2.bf16.msra.mxu1 %v14934_v2  ;;  %6406 = vmatpush2.bf16.msra.mxu0 %v14935_v60 }
 0x865   :  { %6366 = vmatprep.subr.bf16.mxu1 %v14936_v22  ;;  %6407 = vmatprep.subr.bf16.mxu0 %v14937_v27 }
 0x868   :  { %6367 = vmatpush2.bf16.msra.mxu1 %v14938_v42  ;;  %6408 = vmatpush2.bf16.msra.mxu0 %v15201_v3 }
 0x869   :  { %6368 = vmatprep.subr.bf16.mxu1 %v15202_v23  ;;  %6409 = vmatprep.subr.bf16.mxu0 %v15203_v29 }
 0x86c   :  { %6369 = vmatpush2.bf16.msra.mxu1 %v15204_v59  ;;  %6410 = vmatpush2.bf16.msra.mxu0 %v15205_v63  ;;  %v15290_v63 = vld [vmem:[#allocation155_spill] sm:$0xff] }
 0x86d   :  { %6370 = vmatprep.subr.bf16.mxu1 %v15206_v35  ;;  %6411 = vmatprep.subr.bf16.mxu0 %v15207_v43  ;;  %v15288_v43 = vld [vmem:[#allocation153_spill] sm:$0xff]  ;;  %v15289_v35 = vld [vmem:[#allocation154_spill] sm:$0xff] }
 0x870   :  { %6371 = vmatpush2.bf16.msra.mxu1 %v15208_v50  ;;  %6412 = vmatpush2.bf16.msra.mxu0 %v15209_v34 }
 0x871   :  { %6372 = vmatprep.subr.bf16.mxu1 %v15210_v40  ;;  %6413 = vmatprep.subr.bf16.mxu0 %v15211_v1  ;;  %v15221_v40 = vld [vmem:[#allocation137_spill] sm:$0xff]  ;;  %v15222_v1 = vld [vmem:[#allocation14_spill] sm:$0xff] }
 0x874   :  { %6373 = vmatpush2.bf16.msra.mxu1 %v15212_v41  ;;  %6414 = vmatpush2.bf16.msra.mxu0 %v15213_v18  ;;  %v15223_v41 = vld [vmem:[#allocation17_spill] sm:$0xff] }
 0x875   :  { %6374 = vmatprep.subr.bf16.mxu1 %v15214_v26  ;;  %6415 = vmatprep.subr.bf16.mxu0 %v15215_v56  ;;  %v15224_v56 = vld [vmem:[#allocation19_spill] sm:$0xff]  ;;  %v15233_v26 = vld [vmem:[#allocation25_spill] sm:$0xff] }
 0x878   :  { %6375 = vmatpush2.bf16.msra.mxu1 %v15216_v37  ;;  %6416 = vmatpush2.bf16.msra.mxu0 %v15217_v33  ;;  %v15225_v37 = vld [vmem:[#allocation21_spill] sm:$0xff]  ;;  %v15226_v33 = vld [vmem:[#allocation12_spill] sm:$0xff] }
 0x879   :  { %6376 = vmatprep.subr.bf16.mxu1 %v15218_v45  ;;  %6417 = vmatprep.subr.bf16.mxu0 %v15219_v8  ;;  %v15227_v45 = vld [vmem:[#allocation16_spill] sm:$0xff]  ;;  %v15228_v8 = vld [vmem:[#allocation18_spill] sm:$0xff] }
 0x87c   :  { %6377 = vmatpush2.bf16.msra.mxu1 %v15220_v14  ;;  %6418 = vmatpush2.bf16.msra.mxu0 %v15221_v40  ;;  %v15229_v14 = vld [vmem:[#allocation20_spill] sm:$0xff]  ;;  %v15230_v40 = vld [vmem:[#allocation22_spill] sm:$0xff] }
 0x87d   :  { %6498 = vmatprep.subr.bf16.mxu1 %v15222_v1  ;;  %6539 = vmatprep.subr.bf16.mxu0 %v15223_v41  ;;  %v15231_v1 = vld [vmem:[#allocation23_spill] sm:$0xff]  ;;  %v15232_v41 = vld [vmem:[#allocation24_spill] sm:$0xff] }
 0x87f   :  { %6379 = vmatmul.mubr.bf16.vlgmr.msra.gmra.mxu1 %v13509_v9  ;;  %6420 = vmatmul.mubr.bf16.vlgmr.msra.gmra.mxu0 %v13509_v9  ;;  %v15234_v9 = vld [vmem:[#allocation8_spill] sm:$0xff] }
 0x880   :  { %6499 = vmatpush1.bf16.msra.mxu1 %v15224_v56  ;;  %6540 = vmatpush1.bf16.msra.mxu0 %v15225_v37  ;;  %v15235_v56 = vld [vmem:[#allocation9_spill] sm:$0xff]  ;;  %v15236_v37 = vld [vmem:[#allocation10_spill] sm:$0xff] }
 0x881   :  { %6500 = vmatprep.subr.bf16.mxu1 %v15226_v33  ;;  %6541 = vmatprep.subr.bf16.mxu0 %v15227_v45  ;;  %v15237_v33 = vld [vmem:[#allocation11_spill] sm:$0xff]  ;;  %v15238_v45 = vld [vmem:[#allocation26_spill] sm:$0xff] }
 0x884   :  { %6501 = vmatpush1.bf16.msra.mxu1 %v15228_v8  ;;  %6542 = vmatpush1.bf16.msra.mxu0 %v15229_v14  ;;  %v15239_v8 = vld [vmem:[#allocation27_spill] sm:$0xff]  ;;  %v15240_v14 = vld [vmem:[#allocation28_spill] sm:$0xff] }
 0x885   :  { %6502 = vmatprep.subr.bf16.mxu1 %v15230_v40  ;;  %6543 = vmatprep.subr.bf16.mxu0 %v15231_v1  ;;  %v15241_v40 = vld [vmem:[#allocation29_spill] sm:$0xff]  ;;  %v15242_v1 = vld [vmem:[#allocation30_spill] sm:$0xff] }
 0x888   :  { %6503 = vmatpush1.bf16.msra.mxu1 %v15232_v41  ;;  %6544 = vmatpush1.bf16.msra.mxu0 %v15233_v26  ;;  %v15243_v41 = vld [vmem:[#allocation31_spill] sm:$0xff]  ;;  %v15244_v26 = vld [vmem:[#allocation32_spill] sm:$0xff] }
 0x889   :  { %6504 = vmatprep.subr.bf16.mxu1 %v15234_v9  ;;  %6545 = vmatprep.subr.bf16.mxu0 %v15235_v56  ;;  %v15245_v9 = vld [vmem:[#allocation33_spill] sm:$0xff]  ;;  %v15246_v56 = vld [vmem:[#allocation34_spill] sm:$0xff] }
 0x88c   :  { %6505 = vmatpush1.bf16.msra.mxu1 %v15236_v37  ;;  %6546 = vmatpush1.bf16.msra.mxu0 %v15237_v33  ;;  %v15247_v37 = vld [vmem:[#allocation35_spill] sm:$0xff]  ;;  %v15248_v33 = vld [vmem:[#allocation36_spill] sm:$0xff] }
 0x88d   :  { %6506 = vmatprep.subr.bf16.mxu1 %v15238_v45  ;;  %6547 = vmatprep.subr.bf16.mxu0 %v15239_v8  ;;  %v15249_v45 = vld [vmem:[#allocation37_spill] sm:$0xff]  ;;  %v15250_v8 = vld [vmem:[#allocation38_spill] sm:$0xff] }
 0x890   :  { %6507 = vmatpush1.bf16.msra.mxu1 %v15240_v14  ;;  %6548 = vmatpush1.bf16.msra.mxu0 %v15241_v40  ;;  %v15251_v14 = vld [vmem:[#allocation39_spill] sm:$0xff]  ;;  %v15252_v40 = vld [vmem:[#allocation40_spill] sm:$0xff] }
 0x891   :  { %6508 = vmatprep.subr.bf16.mxu1 %v15242_v1  ;;  %6549 = vmatprep.subr.bf16.mxu0 %v15243_v41  ;;  %v15253_v1 = vld [vmem:[#allocation41_spill] sm:$0xff]  ;;  %v15254_v41 = vld [vmem:[#allocation42_spill] sm:$0xff] }
 0x894   :  { %6509 = vmatpush1.bf16.msra.mxu1 %v15244_v26  ;;  %6550 = vmatpush1.bf16.msra.mxu0 %v15245_v9  ;;  %v15255_v26 = vld [vmem:[#allocation43_spill] sm:$0xff]  ;;  %v15256_v9 = vld [vmem:[#allocation44_spill] sm:$0xff] }
 0x895   :  { %6510 = vmatprep.subr.bf16.mxu1 %v15246_v56  ;;  %6551 = vmatprep.subr.bf16.mxu0 %v15247_v37  ;;  %v15257_v56 = vld [vmem:[#allocation45_spill] sm:$0xff]  ;;  %v15258_v37 = vld [vmem:[#allocation46_spill] sm:$0xff] }
 0x898   :  { %6511 = vmatpush1.bf16.msra.mxu1 %v15248_v33  ;;  %6552 = vmatpush1.bf16.msra.mxu0 %v15249_v45  ;;  %v15259_v33 = vld [vmem:[#allocation47_spill] sm:$0xff]  ;;  %v15260_v45 = vld [vmem:[#allocation48_spill] sm:$0xff] }
 0x899   :  { %6512 = vmatprep.subr.bf16.mxu1 %v15250_v8  ;;  %6553 = vmatprep.subr.bf16.mxu0 %v15251_v14  ;;  %v15261_v8 = vld [vmem:[#allocation49_spill] sm:$0xff]  ;;  %v15262_v14 = vld [vmem:[#allocation50_spill] sm:$0xff] }
 0x89c   :  { %6513 = vmatpush1.bf16.msra.mxu1 %v15252_v40  ;;  %6554 = vmatpush1.bf16.msra.mxu0 %v15253_v1  ;;  %v15263_v40 = vld [vmem:[#allocation51_spill] sm:$0xff]  ;;  %v15264_v1 = vld [vmem:[#allocation52_spill] sm:$0xff] }
 0x89d   :  { %6514 = vmatprep.subr.bf16.mxu1 %v15254_v41  ;;  %6555 = vmatprep.subr.bf16.mxu0 %v15255_v26  ;;  %v15265_v41 = vld [vmem:[#allocation53_spill] sm:$0xff]  ;;  %v15266_v26 = vld [vmem:[#allocation54_spill] sm:$0xff] }
 0x8a0   :  { %6515 = vmatpush2.bf16.msra.mxu1 %v15256_v9  ;;  %6556 = vmatpush2.bf16.msra.mxu0 %v15257_v56  ;;  %v15267_v9 = vld [vmem:[#allocation55_spill] sm:$0xff]  ;;  %v15268_v56 = vld [vmem:[#allocation56_spill] sm:$0xff] }
 0x8a1   :  { %6516 = vmatprep.subr.bf16.mxu1 %v15258_v37  ;;  %6557 = vmatprep.subr.bf16.mxu0 %v15259_v33  ;;  %v15269_v37 = vld [vmem:[#allocation57_spill] sm:$0xff]  ;;  %v15270_v33 = vld [vmem:[#allocation58_spill] sm:$0xff] }
 0x8a4   :  { %6517 = vmatpush2.bf16.msra.mxu1 %v15260_v45  ;;  %6558 = vmatpush2.bf16.msra.mxu0 %v15261_v8  ;;  %v15271_v45 = vld [vmem:[#allocation59_spill] sm:$0xff]  ;;  %v15272_v8 = vld [vmem:[#allocation60_spill] sm:$0xff] }
 0x8a5   :  { %6518 = vmatprep.subr.bf16.mxu1 %v15262_v14  ;;  %6559 = vmatprep.subr.bf16.mxu0 %v15263_v40  ;;  %v15273_v14 = vld [vmem:[#allocation61_spill] sm:$0xff]  ;;  %v15274_v40 = vld [vmem:[#allocation62_spill] sm:$0xff] }
 0x8a8   :  { %6519 = vmatpush2.bf16.msra.mxu1 %v15264_v1  ;;  %6560 = vmatpush2.bf16.msra.mxu0 %v15265_v41  ;;  %v15275_v1 = vld [vmem:[#allocation63_spill] sm:$0xff]  ;;  %v15276_v41 = vld [vmem:[#allocation64_spill] sm:$0xff] }
 0x8a9   :  { %6520 = vmatprep.subr.bf16.mxu1 %v15266_v26  ;;  %6561 = vmatprep.subr.bf16.mxu0 %v15267_v9  ;;  %v15277_v26 = vld [vmem:[#allocation65_spill] sm:$0xff]  ;;  %v15278_v9 = vld [vmem:[#allocation66_spill] sm:$0xff] }
 0x8ac   :  { %6521 = vmatpush2.bf16.msra.mxu1 %v15268_v56  ;;  %6562 = vmatpush2.bf16.msra.mxu0 %v15269_v37  ;;  %v15279_v56 = vld [vmem:[#allocation67_spill] sm:$0xff]  ;;  %v15280_v37 = vld [vmem:[#allocation68_spill] sm:$0xff] }
 0x8ad   :  { %6522 = vmatprep.subr.bf16.mxu1 %v15270_v33  ;;  %6563 = vmatprep.subr.bf16.mxu0 %v15271_v45  ;;  %v15281_v33 = vld [vmem:[#allocation69_spill] sm:$0xff]  ;;  %v15282_v45 = vld [vmem:[#allocation70_spill] sm:$0xff] }
 0x8b0   :  { %6523 = vmatpush2.bf16.msra.mxu1 %v15272_v8  ;;  %6564 = vmatpush2.bf16.msra.mxu0 %v15273_v14  ;;  %v15283_v8 = vld [vmem:[#allocation71_spill] sm:$0xff]  ;;  %v15284_v14 = vld [vmem:[#allocation72_spill] sm:$0xff] }
 0x8b1   :  { %6524 = vmatprep.subr.bf16.mxu1 %v15274_v40  ;;  %6565 = vmatprep.subr.bf16.mxu0 %v15275_v1  ;;  %v15285_v40 = vld [vmem:[#allocation73_spill] sm:$0xff]  ;;  %v15286_v1 = vld [vmem:[#allocation74_spill] sm:$0xff] }
 0x8b4   :  { %6525 = vmatpush2.bf16.msra.mxu1 %v15276_v41  ;;  %6566 = vmatpush2.bf16.msra.mxu0 %v15277_v26  ;;  %v15287_v41 = vld [vmem:[#allocation75_spill] sm:$0xff] }
 0x8b5   :  { %6526 = vmatprep.subr.bf16.mxu1 %v15278_v9  ;;  %6567 = vmatprep.subr.bf16.mxu0 %v15279_v56 }
 0x8b8   :  { %6527 = vmatpush2.bf16.msra.mxu1 %v15280_v37  ;;  %6568 = vmatpush2.bf16.msra.mxu0 %v15281_v33 }
 0x8b9   :  { %6528 = vmatprep.subr.bf16.mxu1 %v15282_v45  ;;  %6569 = vmatprep.subr.bf16.mxu0 %v15283_v8 }
 0x8bc   :  { %6529 = vmatpush2.bf16.msra.mxu1 %v15284_v14  ;;  %6570 = vmatpush2.bf16.msra.mxu0 %v15285_v40  ;;  %v15291_v40 = vld [vmem:[#allocation156_spill] sm:$0xff] }
 0x8bd   :  { %6580 = vmatprep.subr.bf16.mxu1 %v15286_v1  ;;  %6621 = vmatprep.subr.bf16.mxu0 %v15287_v41 }
 0x8ff   :  { %v6298_v26 = vpop.f32.mrf.mxu1  ;;  %v6339_v9 = vpop.f32.mrf.mxu0 }
 0x900   :  { %v6428_v45 = vadd.f32 %v6298_v26, %v15288_v43  ;;  %v6430_v8 = vadd.f32 %v6339_v9, %v15289_v35 }
 0x901   :  { %v6300_v18 = vpop.f32.mrf.mxu1  ;;  %v6341_v56 = vpop.f32.mrf.mxu0 }
 0x902   :  { %v6429_v14 = vadd.f32 %v6300_v18, %v15290_v63  ;;  %v8620_v59 = vmul.f32 -1.442695, %v6428_v45  ;;  %v6431_v29 = vadd.f32 %v6341_v56, %v15291_v40  ;;  %v8622_v1 = vmul.f32 -1.442695, %v6430_v8  ;;  %v15292_v40 = vld [vmem:[#allocation181_spill] sm:$0xff]  ;;  %v15293_v45 = vld [vmem:[#allocation182_spill] sm:$0xff] }
 0x903   :  { %v6302_v34 = vpop.f32.mrf.mxu1  ;;  %v6343_v37 = vpop.f32.mrf.mxu0 }
 0x904   :  { %v8621_v23 = vmul.f32 -1.442695, %v6429_v14  ;;  %9698 = vpow2.f32 %v8620_v59  ;;  %v8623_v41 = vmul.f32 -1.442695, %v6431_v29  ;;  %v15295_v14 = vld [vmem:[#allocation184_spill] sm:$0xff] }
 0x905   :  { %v6303_v50 = vpop.f32.mrf.mxu1  ;;  %v6344_v33 = vpop.f32.mrf.mxu0  ;;  %9700 = vpow2.f32 %v8622_v1 }
 0x906   :  { %9702 = vpow2.f32 %v8621_v23 }
 0x907   :  { %9704 = vpow2.f32 %v8623_v41  ;;  %v15294_v41 = vld [vmem:[#allocation183_spill] sm:$0xff] }
 0x911   :  { %v9699_v34 = vpop.eup %9698 }
 0x912   :  { %v9701_v37 = vpop.eup %9700  ;;  %v6442_v33 = vadd.f32 1.0, %v9699_v34 }
 0x913   :  { %v9703_v50 = vpop.eup %9702  ;;  %v6454_v43 = vadd.f32 1.0, %v9701_v37 }
 0x914   :  { %v9705_v3 = vpop.eup %9704  ;;  %v6443_v26 = vadd.f32 1.0, %v9703_v50  ;;  %9706 = vrcp.f32 %v6442_v33 }
 0x915   :  { %v6455_v35 = vadd.f32 1.0, %v9705_v3  ;;  %9708 = vrcp.f32 %v6454_v43 }
 0x916   :  { %9710 = vrcp.f32 %v6443_v26 }
 0x921   :  { %v9707_v43 = vpop.eup %9706 }
 0x93f   :  { %v6380_v63 = vpop.f32.mrf.mxu1  ;;  %v6421_v18 = vpop.f32.mrf.mxu0 }
 0x940   :  { %v6432_v56 = vadd.f32 %v6380_v63, %v15292_v40  ;;  %v6434_v59 = vadd.f32 %v6421_v18, %v15293_v45  ;;  %v9709_v63 = vpop.eup %9708 }
 0x941   :  { %v6382_v29 = vpop.f32.mrf.mxu1  ;;  %v6423_v23 = vpop.f32.mrf.mxu0 }
 0x942   :  { %9712 = vtanh.f32 %v6432_v56  ;;  %v8624_v1 = vmul.f32 -1.442695, %v6434_v59  ;;  %v6433_v8 = vadd.f32 %v6382_v29, %v15294_v41  ;;  %v6435_v9 = vadd.f32 %v6423_v23, %v15295_v14  ;;  %v9711_v26 = vpop.eup %9710 }
 0x943   :  { %9714 = vrcp.f32 %v6455_v35  ;;  %v6384_v34 = vpop.f32.mrf.mxu1  ;;  %v6425_v37 = vpop.f32.mrf.mxu0  ;;  %v6474_v56 = vmul.f32 %v9709_v63, %v13502_v44  ;;  %v15296_v63 = vld [vmem:[#allocation117_spill] sm:$0xff] }
 0x944   :  { %9716 = vpow2.f32 %v8624_v1  ;;  %v8625_v3 = vmul.f32 -1.442695, %v6435_v9 }
 0x945   :  { %9718 = vtanh.f32 %v6433_v8  ;;  %v6385_v50 = vpop.f32.mrf.mxu1  ;;  %v6426_v33 = vpop.f32.mrf.mxu0 }
 0x946   :  { %9720 = vpow2.f32 %v8625_v3 }
 0x94f   :  { %v9713_v18 = vpop.eup %9712 }
 0x950   :  { %v9715_v40 = vpop.eup %9714  ;;  %v6476_v45 = vmul.f32 %v9713_v18, %v9707_v43  ;;  %v15298_v18 = vld [vmem:[#allocation119_spill] sm:$0xff] }
 0x951   :  { %v9717_v59 = vpop.eup %9716  ;;  %v6475_v1 = vmul.f32 %v9715_v40, %v13506_v19  ;;  %v15299_v40 = vld [vmem:[#allocation120_spill] sm:$0xff] }
 0x952   :  { %v9719_v29 = vpop.eup %9718  ;;  %v13652_v23 = vadd.f32 %v6476_v45, %v6474_v56  ;;  %v6468_v35 = vadd.f32 1.0, %v9717_v59  ;;  %v15300_v56 = vld [vmem:[#allocation121_spill] sm:$0xff]  ;;  %v15301_v45 = vld [vmem:[#allocation122_spill] sm:$0xff]  ;;  %v15302_v59 = vld [vmem:[#allocation123_spill] sm:$0xff] }
 0x953   :  { %v9721_v41 = vpop.eup %9720  ;;  %v6477_v8 = vmul.f32 %v9719_v29, %v9711_v26  ;;  %v15297_v26 = vld [vmem:[#allocation118_spill] sm:$0xff]  ;;  %v15303_v29 = vld [vmem:[#allocation124_spill] sm:$0xff] }
 0x954   :  { %9722 = vtanh.f32 %v13652_v23  ;;  %v6469_v14 = vadd.f32 1.0, %v9721_v41  ;;  %v15305_v41 = vld [vmem:[#allocation126_spill] sm:$0xff] }
 0x955   :  { %9724 = vrcp.f32 %v6468_v35  ;;  %v13656_v9 = vadd.f32 %v6477_v8, %v6475_v1  ;;  %v15304_v35 = vld [vmem:[#allocation125_spill] sm:$0xff]  ;;  %v15306_v1 = vld [vmem:[#allocation127_spill] sm:$0xff]  ;;  %v15307_v8 = vld [vmem:[#allocation128_spill] sm:$0xff] }
 0x956   :  { %9726 = vrcp.f32 %v6469_v14  ;;  %v15308_v14 = vld [vmem:[#allocation129_spill] sm:$0xff] }
 0x957   :  { %9728 = vtanh.f32 %v13656_v9 }
 0x961   :  { %v9723_v44 = vpop.eup %9722 }
 0x962   :  { %v9725_v34 = vpop.eup %9724 }
 0x963   :  { %v9727_v37 = vpop.eup %9726  ;;  %v6482_v3 = vmul.f32 %v9725_v34, %v9723_v44  ;;  %v15309_v44 = vld [vmem:[#allocation130_spill] sm:$0xff]  ;;  %v15310_v34 = vld [vmem:[#allocation131_spill] sm:$0xff] }
 0x964   :  { %v9729_v50 = vpop.eup %9728 }
 0x965   :  { %v6483_v33 = vmul.f32 %v9729_v50, %v9727_v37  ;;  %6485 = vst [vmem:[#allocation7 + $0x50] sm:$0xff] %v6482_v3  ;;  %v13659_v19 = vpack.c.bf16 %v6482_v3, %v6482_v3  ;;  %v15311_v37 = vld [vmem:[#allocation132_spill] sm:$0xff]  ;;  %v15312_v3 = vld [vmem:[#allocation133_spill] sm:$0xff]  ;;  %v15313_v50 = vld [vmem:[#allocation134_spill] sm:$0xff] }
 0x967   :  { %6486 = vst [vmem:[#allocation7 + $0x58] sm:$0xff] %v6483_v33  ;;  %v6497_v43 = vpack.c.bf16 %v6483_v33, %v6483_v33  ;;  %v15314_v33 = vld [vmem:[#allocation135_spill] sm:$0xff] }
 0x969   :  { %6530 = vmatprep.mubr.bf16.mxu1 %v6497_v43  ;;  %6571 = vmatprep.mubr.bf16.mxu0 %v6497_v43 }
 0x96a   :  { %6531 = vmatmul.mubr.bf16.vlgmr.msra.gmra.mxu1 %v13659_v19  ;;  %6572 = vmatmul.mubr.bf16.vlgmr.msra.gmra.mxu0 %v13659_v19 }
 0x96b   :  { %6581 = vmatpush1.bf16.msra.mxu1 %v14812_v38  ;;  %6622 = vmatpush1.bf16.msra.mxu0 %v14813_v13 }
 0x96c   :  { %6612 = vmatprep.mubr.bf16.mxu1 %v6497_v43  ;;  %6653 = vmatprep.mubr.bf16.mxu0 %v6497_v43  ;;  %v15315_v43 = vld [vmem:[#allocation136_spill] sm:$0xff] }
 0x96d   :  { %6582 = vmatprep.subr.bf16.mxu1 %v14814_v16  ;;  %6623 = vmatprep.subr.bf16.mxu0 %v14815_v31 }
 0x96f   :  { %6583 = vmatpush1.bf16.msra.mxu1 %v14816_v58  ;;  %6624 = vmatpush1.bf16.msra.mxu0 %v14817_v30 }
 0x970   :  { %6584 = vmatprep.subr.bf16.mxu1 %v14818_v52  ;;  %6625 = vmatprep.subr.bf16.mxu0 %v14819_v24 }
 0x973   :  { %6585 = vmatpush1.bf16.msra.mxu1 %v14820_v11  ;;  %6626 = vmatpush1.bf16.msra.mxu0 %v14821_v61 }
 0x974   :  { %6586 = vmatprep.subr.bf16.mxu1 %v14822_v53  ;;  %6627 = vmatprep.subr.bf16.mxu0 %v14823_v47 }
 0x977   :  { %6587 = vmatpush1.bf16.msra.mxu1 %v14824_v46  ;;  %6628 = vmatpush1.bf16.msra.mxu0 %v14825_v51 }
 0x978   :  { %6588 = vmatprep.subr.bf16.mxu1 %v14826_v10  ;;  %6629 = vmatprep.subr.bf16.mxu0 %v14827_v54 }
 0x97b   :  { %6589 = vmatpush1.bf16.msra.mxu1 %v14828_v39  ;;  %6630 = vmatpush1.bf16.msra.mxu0 %v14829_v32 }
 0x97c   :  { %6590 = vmatprep.subr.bf16.mxu1 %v14916_v49  ;;  %6631 = vmatprep.subr.bf16.mxu0 %v14917_v20 }
 0x97f   :  { %6591 = vmatpush1.bf16.msra.mxu1 %v14918_v55  ;;  %6632 = vmatpush1.bf16.msra.mxu0 %v14919_v21 }
 0x980   :  { %6592 = vmatprep.subr.bf16.mxu1 %v14920_v25  ;;  %6633 = vmatprep.subr.bf16.mxu0 %v14921_v17 }
 0x983   :  { %6593 = vmatpush1.bf16.msra.mxu1 %v14922_v48  ;;  %6634 = vmatpush1.bf16.msra.mxu0 %v14923_v5 }
 0x984   :  { %6594 = vmatprep.subr.bf16.mxu1 %v14924_v0  ;;  %6635 = vmatprep.subr.bf16.mxu0 %v15011_v28 }
 0x987   :  { %6595 = vmatpush1.bf16.msra.mxu1 %v15012_v6  ;;  %6636 = vmatpush1.bf16.msra.mxu0 %v15013_v4 }
 0x988   :  { %6596 = vmatprep.subr.bf16.mxu1 %v15014_v15  ;;  %6637 = vmatprep.subr.bf16.mxu0 %v14929_v57 }
 0x98b   :  { %6597 = vmatpush2.bf16.msra.mxu1 %v14930_v12  ;;  %6638 = vmatpush2.bf16.msra.mxu0 %v14931_v62 }
 0x98c   :  { %6598 = vmatprep.subr.bf16.mxu1 %v14932_v36  ;;  %6639 = vmatprep.subr.bf16.mxu0 %v14933_v7 }
 0x98f   :  { %6599 = vmatpush2.bf16.msra.mxu1 %v14934_v2  ;;  %6640 = vmatpush2.bf16.msra.mxu0 %v14935_v60 }
 0x990   :  { %6600 = vmatprep.subr.bf16.mxu1 %v14936_v22  ;;  %6641 = vmatprep.subr.bf16.mxu0 %v14937_v27 }
 0x993   :  { %6601 = vmatpush2.bf16.msra.mxu1 %v14938_v42  ;;  %6642 = vmatpush2.bf16.msra.mxu0 %v15296_v63 }
 0x994   :  { %6602 = vmatprep.subr.bf16.mxu1 %v15297_v26  ;;  %6643 = vmatprep.subr.bf16.mxu0 %v15298_v18 }
 0x997   :  { %6603 = vmatpush2.bf16.msra.mxu1 %v15299_v40  ;;  %6644 = vmatpush2.bf16.msra.mxu0 %v15300_v56  ;;  %v15385_v56 = vld [vmem:[#allocation159_spill] sm:$0xff] }
 0x998   :  { %6604 = vmatprep.subr.bf16.mxu1 %v15301_v45  ;;  %6645 = vmatprep.subr.bf16.mxu0 %v15302_v59  ;;  %v15383_v59 = vld [vmem:[#allocation157_spill] sm:$0xff]  ;;  %v15384_v45 = vld [vmem:[#allocation158_spill] sm:$0xff] }
 0x99b   :  { %6605 = vmatpush2.bf16.msra.mxu1 %v15303_v29  ;;  %6646 = vmatpush2.bf16.msra.mxu0 %v15304_v35 }
 0x99c   :  { %6606 = vmatprep.subr.bf16.mxu1 %v15305_v41  ;;  %6647 = vmatprep.subr.bf16.mxu0 %v15306_v1  ;;  %v15316_v41 = vld [vmem:[#allocation137_spill] sm:$0xff]  ;;  %v15317_v1 = vld [vmem:[#allocation14_spill] sm:$0xff] }
 0x99f   :  { %6607 = vmatpush2.bf16.msra.mxu1 %v15307_v8  ;;  %6648 = vmatpush2.bf16.msra.mxu0 %v15308_v14  ;;  %v15318_v8 = vld [vmem:[#allocation17_spill] sm:$0xff] }
 0x9a0   :  { %6608 = vmatprep.subr.bf16.mxu1 %v15309_v44  ;;  %6649 = vmatprep.subr.bf16.mxu0 %v15310_v34  ;;  %v15319_v34 = vld [vmem:[#allocation19_spill] sm:$0xff]  ;;  %v15328_v44 = vld [vmem:[#allocation25_spill] sm:$0xff] }
 0x9a3   :  { %6609 = vmatpush2.bf16.msra.mxu1 %v15311_v37  ;;  %6650 = vmatpush2.bf16.msra.mxu0 %v15312_v3  ;;  %v15320_v37 = vld [vmem:[#allocation21_spill] sm:$0xff]  ;;  %v15321_v3 = vld [vmem:[#allocation12_spill] sm:$0xff] }
 0x9a4   :  { %6610 = vmatprep.subr.bf16.mxu1 %v15313_v50  ;;  %6651 = vmatprep.subr.bf16.mxu0 %v15314_v33  ;;  %v15322_v50 = vld [vmem:[#allocation16_spill] sm:$0xff]  ;;  %v15323_v33 = vld [vmem:[#allocation18_spill] sm:$0xff] }
 0x9a7   :  { %6611 = vmatpush2.bf16.msra.mxu1 %v15315_v43  ;;  %6652 = vmatpush2.bf16.msra.mxu0 %v15316_v41  ;;  %v15324_v43 = vld [vmem:[#allocation20_spill] sm:$0xff]  ;;  %v15325_v41 = vld [vmem:[#allocation22_spill] sm:$0xff] }
 0x9a8   :  { %6732 = vmatprep.subr.bf16.mxu1 %v15317_v1  ;;  %6773 = vmatprep.subr.bf16.mxu0 %v15318_v8  ;;  %v15326_v1 = vld [vmem:[#allocation23_spill] sm:$0xff]  ;;  %v15327_v8 = vld [vmem:[#allocation24_spill] sm:$0xff] }
 0x9aa   :  { %6613 = vmatmul.mubr.bf16.vlgmr.msra.gmra.mxu1 %v13659_v19  ;;  %6654 = vmatmul.mubr.bf16.vlgmr.msra.gmra.mxu0 %v13659_v19  ;;  %v15329_v19 = vld [vmem:[#allocation8_spill] sm:$0xff] }
 0x9ab   :  { %6733 = vmatpush1.bf16.msra.mxu1 %v15319_v34  ;;  %6774 = vmatpush1.bf16.msra.mxu0 %v15320_v37  ;;  %v15330_v34 = vld [vmem:[#allocation9_spill] sm:$0xff]  ;;  %v15331_v37 = vld [vmem:[#allocation10_spill] sm:$0xff] }
 0x9ac   :  { %6734 = vmatprep.subr.bf16.mxu1 %v15321_v3  ;;  %6775 = vmatprep.subr.bf16.mxu0 %v15322_v50  ;;  %v15332_v3 = vld [vmem:[#allocation11_spill] sm:$0xff]  ;;  %v15333_v50 = vld [vmem:[#allocation26_spill] sm:$0xff] }
 0x9af   :  { %6735 = vmatpush1.bf16.msra.mxu1 %v15323_v33  ;;  %6776 = vmatpush1.bf16.msra.mxu0 %v15324_v43  ;;  %v15334_v33 = vld [vmem:[#allocation27_spill] sm:$0xff]  ;;  %v15335_v43 = vld [vmem:[#allocation28_spill] sm:$0xff] }
 0x9b0   :  { %6736 = vmatprep.subr.bf16.mxu1 %v15325_v41  ;;  %6777 = vmatprep.subr.bf16.mxu0 %v15326_v1  ;;  %v15336_v41 = vld [vmem:[#allocation29_spill] sm:$0xff]  ;;  %v15337_v1 = vld [vmem:[#allocation30_spill] sm:$0xff] }
 0x9b3   :  { %6737 = vmatpush1.bf16.msra.mxu1 %v15327_v8  ;;  %6778 = vmatpush1.bf16.msra.mxu0 %v15328_v44  ;;  %v15338_v8 = vld [vmem:[#allocation31_spill] sm:$0xff]  ;;  %v15339_v44 = vld [vmem:[#allocation32_spill] sm:$0xff] }
 0x9b4   :  { %6738 = vmatprep.subr.bf16.mxu1 %v15329_v19  ;;  %6779 = vmatprep.subr.bf16.mxu0 %v15330_v34  ;;  %v15340_v19 = vld [vmem:[#allocation33_spill] sm:$0xff]  ;;  %v15341_v34 = vld [vmem:[#allocation34_spill] sm:$0xff] }
 0x9b7   :  { %6739 = vmatpush1.bf16.msra.mxu1 %v15331_v37  ;;  %6780 = vmatpush1.bf16.msra.mxu0 %v15332_v3  ;;  %v15342_v37 = vld [vmem:[#allocation35_spill] sm:$0xff]  ;;  %v15343_v3 = vld [vmem:[#allocation36_spill] sm:$0xff] }
 0x9b8   :  { %6740 = vmatprep.subr.bf16.mxu1 %v15333_v50  ;;  %6781 = vmatprep.subr.bf16.mxu0 %v15334_v33  ;;  %v15344_v50 = vld [vmem:[#allocation37_spill] sm:$0xff]  ;;  %v15345_v33 = vld [vmem:[#allocation38_spill] sm:$0xff] }
 0x9bb   :  { %6741 = vmatpush1.bf16.msra.mxu1 %v15335_v43  ;;  %6782 = vmatpush1.bf16.msra.mxu0 %v15336_v41  ;;  %v15346_v43 = vld [vmem:[#allocation39_spill] sm:$0xff]  ;;  %v15347_v41 = vld [vmem:[#allocation40_spill] sm:$0xff] }
 0x9bc   :  { %6742 = vmatprep.subr.bf16.mxu1 %v15337_v1  ;;  %6783 = vmatprep.subr.bf16.mxu0 %v15338_v8  ;;  %v15348_v1 = vld [vmem:[#allocation41_spill] sm:$0xff]  ;;  %v15349_v8 = vld [vmem:[#allocation42_spill] sm:$0xff] }
 0x9bf   :  { %6743 = vmatpush1.bf16.msra.mxu1 %v15339_v44  ;;  %6784 = vmatpush1.bf16.msra.mxu0 %v15340_v19  ;;  %v15350_v44 = vld [vmem:[#allocation43_spill] sm:$0xff]  ;;  %v15351_v19 = vld [vmem:[#allocation44_spill] sm:$0xff] }
 0x9c0   :  { %6744 = vmatprep.subr.bf16.mxu1 %v15341_v34  ;;  %6785 = vmatprep.subr.bf16.mxu0 %v15342_v37  ;;  %v15352_v34 = vld [vmem:[#allocation45_spill] sm:$0xff]  ;;  %v15353_v37 = vld [vmem:[#allocation46_spill] sm:$0xff] }
 0x9c3   :  { %6745 = vmatpush1.bf16.msra.mxu1 %v15343_v3  ;;  %6786 = vmatpush1.bf16.msra.mxu0 %v15344_v50  ;;  %v15354_v3 = vld [vmem:[#allocation47_spill] sm:$0xff]  ;;  %v15355_v50 = vld [vmem:[#allocation48_spill] sm:$0xff] }
 0x9c4   :  { %6746 = vmatprep.subr.bf16.mxu1 %v15345_v33  ;;  %6787 = vmatprep.subr.bf16.mxu0 %v15346_v43  ;;  %v15356_v33 = vld [vmem:[#allocation49_spill] sm:$0xff]  ;;  %v15357_v43 = vld [vmem:[#allocation50_spill] sm:$0xff] }
 0x9c7   :  { %6747 = vmatpush1.bf16.msra.mxu1 %v15347_v41  ;;  %6788 = vmatpush1.bf16.msra.mxu0 %v15348_v1  ;;  %v15358_v41 = vld [vmem:[#allocation51_spill] sm:$0xff]  ;;  %v15359_v1 = vld [vmem:[#allocation52_spill] sm:$0xff] }
 0x9c8   :  { %6748 = vmatprep.subr.bf16.mxu1 %v15349_v8  ;;  %6789 = vmatprep.subr.bf16.mxu0 %v15350_v44  ;;  %v15360_v8 = vld [vmem:[#allocation53_spill] sm:$0xff]  ;;  %v15361_v44 = vld [vmem:[#allocation54_spill] sm:$0xff] }
 0x9cb   :  { %6749 = vmatpush2.bf16.msra.mxu1 %v15351_v19  ;;  %6790 = vmatpush2.bf16.msra.mxu0 %v15352_v34  ;;  %v15362_v19 = vld [vmem:[#allocation55_spill] sm:$0xff]  ;;  %v15363_v34 = vld [vmem:[#allocation56_spill] sm:$0xff] }
 0x9cc   :  { %6750 = vmatprep.subr.bf16.mxu1 %v15353_v37  ;;  %6791 = vmatprep.subr.bf16.mxu0 %v15354_v3  ;;  %v15364_v37 = vld [vmem:[#allocation57_spill] sm:$0xff]  ;;  %v15365_v3 = vld [vmem:[#allocation58_spill] sm:$0xff] }
 0x9cf   :  { %6751 = vmatpush2.bf16.msra.mxu1 %v15355_v50  ;;  %6792 = vmatpush2.bf16.msra.mxu0 %v15356_v33  ;;  %v15366_v50 = vld [vmem:[#allocation59_spill] sm:$0xff]  ;;  %v15367_v33 = vld [vmem:[#allocation60_spill] sm:$0xff] }
 0x9d0   :  { %6752 = vmatprep.subr.bf16.mxu1 %v15357_v43  ;;  %6793 = vmatprep.subr.bf16.mxu0 %v15358_v41  ;;  %v15368_v43 = vld [vmem:[#allocation61_spill] sm:$0xff]  ;;  %v15369_v41 = vld [vmem:[#allocation62_spill] sm:$0xff] }
 0x9d3   :  { %6753 = vmatpush2.bf16.msra.mxu1 %v15359_v1  ;;  %6794 = vmatpush2.bf16.msra.mxu0 %v15360_v8  ;;  %v15370_v1 = vld [vmem:[#allocation63_spill] sm:$0xff]  ;;  %v15371_v8 = vld [vmem:[#allocation64_spill] sm:$0xff] }
 0x9d4   :  { %6754 = vmatprep.subr.bf16.mxu1 %v15361_v44  ;;  %6795 = vmatprep.subr.bf16.mxu0 %v15362_v19  ;;  %v15372_v44 = vld [vmem:[#allocation65_spill] sm:$0xff]  ;;  %v15373_v19 = vld [vmem:[#allocation66_spill] sm:$0xff] }
 0x9d7   :  { %6755 = vmatpush2.bf16.msra.mxu1 %v15363_v34  ;;  %6796 = vmatpush2.bf16.msra.mxu0 %v15364_v37  ;;  %v15374_v34 = vld [vmem:[#allocation67_spill] sm:$0xff]  ;;  %v15375_v37 = vld [vmem:[#allocation68_spill] sm:$0xff] }
 0x9d8   :  { %6756 = vmatprep.subr.bf16.mxu1 %v15365_v3  ;;  %6797 = vmatprep.subr.bf16.mxu0 %v15366_v50  ;;  %v15376_v3 = vld [vmem:[#allocation69_spill] sm:$0xff]  ;;  %v15377_v50 = vld [vmem:[#allocation70_spill] sm:$0xff] }
 0x9db   :  { %6757 = vmatpush2.bf16.msra.mxu1 %v15367_v33  ;;  %6798 = vmatpush2.bf16.msra.mxu0 %v15368_v43  ;;  %v15378_v33 = vld [vmem:[#allocation71_spill] sm:$0xff]  ;;  %v15379_v43 = vld [vmem:[#allocation72_spill] sm:$0xff] }
 0x9dc   :  { %6758 = vmatprep.subr.bf16.mxu1 %v15369_v41  ;;  %6799 = vmatprep.subr.bf16.mxu0 %v15370_v1  ;;  %v15380_v41 = vld [vmem:[#allocation73_spill] sm:$0xff]  ;;  %v15381_v1 = vld [vmem:[#allocation74_spill] sm:$0xff] }
 0x9df   :  { %6759 = vmatpush2.bf16.msra.mxu1 %v15371_v8  ;;  %6800 = vmatpush2.bf16.msra.mxu0 %v15372_v44  ;;  %v15382_v8 = vld [vmem:[#allocation75_spill] sm:$0xff] }
 0x9e0   :  { %6760 = vmatprep.subr.bf16.mxu1 %v15373_v19  ;;  %6801 = vmatprep.subr.bf16.mxu0 %v15374_v34 }
 0x9e3   :  { %6761 = vmatpush2.bf16.msra.mxu1 %v15375_v37  ;;  %6802 = vmatpush2.bf16.msra.mxu0 %v15376_v3 }
 0x9e4   :  { %6762 = vmatprep.subr.bf16.mxu1 %v15377_v50  ;;  %6803 = vmatprep.subr.bf16.mxu0 %v15378_v33 }
 0x9e7   :  { %6763 = vmatpush2.bf16.msra.mxu1 %v15379_v43  ;;  %6804 = vmatpush2.bf16.msra.mxu0 %v15380_v41  ;;  %v15386_v41 = vld [vmem:[#allocation160_spill] sm:$0xff] }
 0x9e8   :  { %6814 = vmatprep.subr.bf16.mxu1 %v15381_v1  ;;  %6855 = vmatprep.subr.bf16.mxu0 %v15382_v8 }
 0xa2a   :  { %v6532_v44 = vpop.f32.mrf.mxu1  ;;  %v6573_v19 = vpop.f32.mrf.mxu0 }
 0xa2b   :  { %v6662_v50 = vadd.f32 %v6532_v44, %v15383_v59  ;;  %v6664_v33 = vadd.f32 %v6573_v19, %v15384_v45  ;;  %v15387_v19 = vld [vmem:[#allocation185_spill] sm:$0xff] }
 0xa2c   :  { %v6534_v14 = vpop.f32.mrf.mxu1  ;;  %v6575_v34 = vpop.f32.mrf.mxu0 }
 0xa2d   :  { %v6663_v43 = vadd.f32 %v6534_v14, %v15385_v56  ;;  %v8626_v40 = vmul.f32 -1.442695, %v6662_v50  ;;  %v6665_v18 = vadd.f32 %v6575_v34, %v15386_v41  ;;  %v8628_v1 = vmul.f32 -1.442695, %v6664_v33  ;;  %v15388_v50 = vld [vmem:[#allocation186_spill] sm:$0xff] }
 0xa2e   :  { %v6536_v35 = vpop.f32.mrf.mxu1  ;;  %v6577_v37 = vpop.f32.mrf.mxu0 }
 0xa2f   :  { %v8627_v26 = vmul.f32 -1.442695, %v6663_v43  ;;  %9730 = vpow2.f32 %v8626_v40  ;;  %v8629_v8 = vmul.f32 -1.442695, %v6665_v18  ;;  %v15389_v43 = vld [vmem:[#allocation187_spill] sm:$0xff] }
 0xa30   :  { %v6537_v29 = vpop.f32.mrf.mxu1  ;;  %v6578_v3 = vpop.f32.mrf.mxu0  ;;  %9732 = vpow2.f32 %v8628_v1  ;;  %v15390_v1 = vld [vmem:[#allocation188_spill] sm:$0xff] }
 0xa31   :  { %9734 = vpow2.f32 %v8627_v26 }
 0xa32   :  { %9736 = vpow2.f32 %v8629_v8 }
 0xa3c   :  { %v9731_v35 = vpop.eup %9730 }
 0xa3d   :  { %v9733_v37 = vpop.eup %9732  ;;  %v6676_v3 = vadd.f32 1.0, %v9731_v35 }
 0xa3e   :  { %v9735_v29 = vpop.eup %9734  ;;  %v6688_v59 = vadd.f32 1.0, %v9733_v37 }
 0xa3f   :  { %v9737_v63 = vpop.eup %9736  ;;  %v6677_v44 = vadd.f32 1.0, %v9735_v29  ;;  %9738 = vrcp.f32 %v6676_v3 }
 0xa40   :  { %v6689_v45 = vadd.f32 1.0, %v9737_v63  ;;  %9740 = vrcp.f32 %v6688_v59 }
 0xa41   :  { %9742 = vrcp.f32 %v6677_v44 }
 0xa4c   :  { %v9739_v59 = vpop.eup %9738 }
 0xa6a   :  { %v6614_v56 = vpop.f32.mrf.mxu1  ;;  %v6655_v14 = vpop.f32.mrf.mxu0 }
 0xa6b   :  { %v6666_v34 = vadd.f32 %v6614_v56, %v15387_v19  ;;  %v6668_v40 = vadd.f32 %v6655_v14, %v15388_v50  ;;  %v9741_v56 = vpop.eup %9740 }
 0xa6c   :  { %v6616_v18 = vpop.f32.mrf.mxu1  ;;  %v6657_v26 = vpop.f32.mrf.mxu0 }
 0xa6d   :  { %9744 = vtanh.f32 %v6666_v34  ;;  %v8630_v33 = vmul.f32 -1.442695, %v6668_v40  ;;  %v6667_v41 = vadd.f32 %v6616_v18, %v15389_v43  ;;  %v6669_v8 = vadd.f32 %v6657_v26, %v15390_v1  ;;  %v9743_v44 = vpop.eup %9742 }
 0xa6e   :  { %9746 = vrcp.f32 %v6689_v45  ;;  %v6618_v35 = vpop.f32.mrf.mxu1  ;;  %v6659_v37 = vpop.f32.mrf.mxu0  ;;  %v6708_v34 = vmul.f32 %v9741_v56, %v13652_v23 }
 0xa6f   :  { %9748 = vpow2.f32 %v8630_v33  ;;  %v8631_v63 = vmul.f32 -1.442695, %v6669_v8 }
 0xa70   :  { %9750 = vtanh.f32 %v6667_v41  ;;  %v6619_v29 = vpop.f32.mrf.mxu1  ;;  %v6660_v3 = vpop.f32.mrf.mxu0 }
 0xa71   :  { %9752 = vpow2.f32 %v8631_v63 }
 0xa7a   :  { %v9745_v14 = vpop.eup %9744 }
 0xa7b   :  { %v9747_v19 = vpop.eup %9746  ;;  %v6710_v50 = vmul.f32 %v9745_v14, %v9739_v59 }
 0xa7c   :  { %v9749_v40 = vpop.eup %9748  ;;  %v6709_v33 = vmul.f32 %v9747_v19, %v13656_v9 }
 0xa7d   :  { %v9751_v18 = vpop.eup %9750  ;;  %v13802_v26 = vadd.f32 %v6710_v50, %v6708_v34  ;;  %v6702_v45 = vadd.f32 1.0, %v9749_v40  ;;  %v15412_v34 = vld [vmem:[#allocation161_spill] sm:$0xff]  ;;  %v15413_v40 = vld [vmem:[#allocation162_spill] sm:$0xff] }
 0xa7e   :  { %v9753_v43 = vpop.eup %9752  ;;  %v6711_v41 = vmul.f32 %v9751_v18, %v9743_v44 }
 0xa7f   :  { %9754 = vtanh.f32 %v13802_v26  ;;  %v6703_v1 = vadd.f32 1.0, %v9753_v43 }
 0xa80   :  { %9756 = vrcp.f32 %v6702_v45  ;;  %v13806_v8 = vadd.f32 %v6711_v41, %v6709_v33  ;;  %v15414_v45 = vld [vmem:[#allocation163_spill] sm:$0xff]  ;;  %v15415_v41 = vld [vmem:[#allocation164_spill] sm:$0xff] }
 0xa81   :  { %9758 = vrcp.f32 %v6703_v1 }
 0xa82   :  { %9760 = vtanh.f32 %v13806_v8 }
 0xa8c   :  { %v9755_v23 = vpop.eup %9754 }
 0xa8d   :  { %v9757_v35 = vpop.eup %9756 }
 0xa8e   :  { %v9759_v37 = vpop.eup %9758  ;;  %v6716_v63 = vmul.f32 %v9757_v35, %v9755_v23 }
 0xa8f   :  { %v9761_v29 = vpop.eup %9760 }
 0xa90   :  { %v6717_v3 = vmul.f32 %v9761_v29, %v9759_v37  ;;  %6719 = vst [vmem:[#allocation7 + $0x60] sm:$0xff] %v6716_v63  ;;  %v13809_v9 = vpack.c.bf16 %v6716_v63, %v6716_v63 }
 0xa92   :  { %6720 = vst [vmem:[#allocation7 + $0x68] sm:$0xff] %v6717_v3  ;;  %v6731_v59 = vpack.c.bf16 %v6717_v3, %v6717_v3 }
 0xa94   :  { %6764 = vmatprep.mubr.bf16.mxu1 %v6731_v59  ;;  %6805 = vmatprep.mubr.bf16.mxu0 %v6731_v59 }
 0xa95   :  { %6765 = vmatmul.mubr.bf16.vlgmr.msra.gmra.mxu1 %v13809_v9  ;;  %6806 = vmatmul.mubr.bf16.vlgmr.msra.gmra.mxu0 %v13809_v9 }
 0xa96   :  { %6815 = vmatpush1.bf16.msra.mxu1 %v14812_v38  ;;  %6856 = vmatpush1.bf16.msra.mxu0 %v14813_v13  ;;  %v15391_v38 = vld [vmem:[#allocation117_spill] sm:$0xff]  ;;  %v15392_v13 = vld [vmem:[#allocation118_spill] sm:$0xff] }
 0xa97   :  { %6846 = vmatprep.mubr.bf16.mxu1 %v6731_v59  ;;  %6887 = vmatprep.mubr.bf16.mxu0 %v6731_v59 }
 0xa98   :  { %6816 = vmatprep.subr.bf16.mxu1 %v14814_v16  ;;  %6857 = vmatprep.subr.bf16.mxu0 %v14815_v31  ;;  %v15393_v16 = vld [vmem:[#allocation119_spill] sm:$0xff]  ;;  %v15394_v31 = vld [vmem:[#allocation120_spill] sm:$0xff] }
 0xa9a   :  { %6817 = vmatpush1.bf16.msra.mxu1 %v14816_v58  ;;  %6858 = vmatpush1.bf16.msra.mxu0 %v14817_v30  ;;  %v15395_v58 = vld [vmem:[#allocation121_spill] sm:$0xff]  ;;  %v15396_v30 = vld [vmem:[#allocation122_spill] sm:$0xff] }
 0xa9b   :  { %6818 = vmatprep.subr.bf16.mxu1 %v14818_v52  ;;  %6859 = vmatprep.subr.bf16.mxu0 %v14819_v24  ;;  %v15397_v52 = vld [vmem:[#allocation123_spill] sm:$0xff]  ;;  %v15398_v24 = vld [vmem:[#allocation124_spill] sm:$0xff] }
 0xa9e   :  { %6819 = vmatpush1.bf16.msra.mxu1 %v14820_v11  ;;  %6860 = vmatpush1.bf16.msra.mxu0 %v14821_v61  ;;  %v15399_v11 = vld [vmem:[#allocation125_spill] sm:$0xff]  ;;  %v15400_v61 = vld [vmem:[#allocation126_spill] sm:$0xff] }
 0xa9f   :  { %6820 = vmatprep.subr.bf16.mxu1 %v14822_v53  ;;  %6861 = vmatprep.subr.bf16.mxu0 %v14823_v47  ;;  %v15401_v53 = vld [vmem:[#allocation127_spill] sm:$0xff]  ;;  %v15402_v47 = vld [vmem:[#allocation128_spill] sm:$0xff] }
 0xaa2   :  { %6821 = vmatpush1.bf16.msra.mxu1 %v14824_v46  ;;  %6862 = vmatpush1.bf16.msra.mxu0 %v14825_v51  ;;  %v15403_v46 = vld [vmem:[#allocation129_spill] sm:$0xff]  ;;  %v15404_v51 = vld [vmem:[#allocation130_spill] sm:$0xff] }
 0xaa3   :  { %6822 = vmatprep.subr.bf16.mxu1 %v14826_v10  ;;  %6863 = vmatprep.subr.bf16.mxu0 %v14827_v54  ;;  %v15405_v10 = vld [vmem:[#allocation131_spill] sm:$0xff]  ;;  %v15406_v54 = vld [vmem:[#allocation132_spill] sm:$0xff] }
 0xaa6   :  { %6823 = vmatpush1.bf16.msra.mxu1 %v14828_v39  ;;  %6864 = vmatpush1.bf16.msra.mxu0 %v14829_v32  ;;  %v15407_v39 = vld [vmem:[#allocation133_spill] sm:$0xff]  ;;  %v15408_v32 = vld [vmem:[#allocation134_spill] sm:$0xff] }
 0xaa7   :  { %6824 = vmatprep.subr.bf16.mxu1 %v14916_v49  ;;  %6865 = vmatprep.subr.bf16.mxu0 %v14917_v20  ;;  %v15409_v49 = vld [vmem:[#allocation135_spill] sm:$0xff]  ;;  %v15410_v20 = vld [vmem:[#allocation136_spill] sm:$0xff] }
 0xaaa   :  { %6825 = vmatpush1.bf16.msra.mxu1 %v14918_v55  ;;  %6866 = vmatpush1.bf16.msra.mxu0 %v14919_v21  ;;  %v15411_v55 = vld [vmem:[#allocation137_spill] sm:$0xff]  ;;  %v9518_v21 = vld [vmem:[%s14280_s9 + $0x78] sm:$0xff]  }
 0xaab   :  { %6826 = vmatprep.subr.bf16.mxu1 %v14920_v25  ;;  %6867 = vmatprep.subr.bf16.mxu0 %v14921_v17  ;;  %v9519_v25 = vld [vmem:[%s14280_s9 + $0x38] sm:$0xff]   ;;  %v9520_v17 = vld [vmem:[%s14280_s9 + $0x70] sm:$0xff]  }
 0xaae   :  { %6827 = vmatpush1.bf16.msra.mxu1 %v14922_v48  ;;  %6868 = vmatpush1.bf16.msra.mxu0 %v14923_v5  ;;  %v9521_v48 = vld [vmem:[%s14280_s9 + $0x30] sm:$0xff]   ;;  %v9522_v5 = vld [vmem:[%s14280_s9 + $0x68] sm:$0xff]  }
 0xaaf   :  { %6828 = vmatprep.subr.bf16.mxu1 %v14924_v0  ;;  %6869 = vmatprep.subr.bf16.mxu0 %v15011_v28  ;;  %v9523_v0 = vld [vmem:[%s14280_s9 + $0x28] sm:$0xff]  }
 0xab2   :  { %6829 = vmatpush1.bf16.msra.mxu1 %v15012_v6  ;;  %6870 = vmatpush1.bf16.msra.mxu0 %v15013_v4 }
 0xab3   :  { %6830 = vmatprep.subr.bf16.mxu1 %v15014_v15  ;;  %6871 = vmatprep.subr.bf16.mxu0 %v14929_v57  ;;  %v9527_v57 = vld [vmem:[%s14280_s9 + $0x18] sm:$0xff]  }
 0xab6   :  { %6831 = vmatpush2.bf16.msra.mxu1 %v14930_v12  ;;  %6872 = vmatpush2.bf16.msra.mxu0 %v14931_v62  ;;  %v9528_v12 = vld [vmem:[%s14280_s9 + $0x50] sm:$0xff]  }
 0xab7   :  { %6832 = vmatprep.subr.bf16.mxu1 %v14932_v36  ;;  %6873 = vmatprep.subr.bf16.mxu0 %v14933_v7  ;;  %v9529_v62 = vld [vmem:[%s14280_s9 + $0x10] sm:$0xff]   ;;  %v9530_v36 = vld [vmem:[%s14280_s9 + $0x48] sm:$0xff]  }
 0xab8   :  { %v9531_v7 = vld [vmem:[%s14280_s9 + $0x8] sm:$0xff]  }
 0xaba   :  { %6833 = vmatpush2.bf16.msra.mxu1 %v14934_v2  ;;  %6874 = vmatpush2.bf16.msra.mxu0 %v14935_v60  ;;  %v9532_v2 = vld [vmem:[%s14280_s9 + $0x40] sm:$0xff]  }
 0xabb   :  { %6834 = vmatprep.subr.bf16.mxu1 %v14936_v22  ;;  %6875 = vmatprep.subr.bf16.mxu0 %v14937_v27  ;;  %v9524_v22 = vld [vmem:[%s14280_s9 + $0x60] sm:$0xff]  }
 0xabc   :  { %v9525_v27 = vld [vmem:[%s14280_s9 + $0x20] sm:$0xff]  }
 0xabd   :  { %v9533_v60 = vld [vmem:[%s14280_s9] sm:$0xff]  }
 0xabe   :  { %6835 = vmatpush2.bf16.msra.mxu1 %v14938_v42  ;;  %6876 = vmatpush2.bf16.msra.mxu0 %v15391_v38  ;;  %v9526_v42 = vld [vmem:[%s14280_s9 + $0x58] sm:$0xff]  }
 0xabf   :  { %6836 = vmatprep.subr.bf16.mxu1 %v15392_v13  ;;  %6877 = vmatprep.subr.bf16.mxu0 %v15393_v16 }
 0xac2   :  { %6837 = vmatpush2.bf16.msra.mxu1 %v15394_v31  ;;  %6878 = vmatpush2.bf16.msra.mxu0 %v15395_v58 }
 0xac3   :  { %6838 = vmatprep.subr.bf16.mxu1 %v15396_v30  ;;  %6879 = vmatprep.subr.bf16.mxu0 %v15397_v52  ;;  %v15416_v30 = vld [vmem:[#allocation189_spill] sm:$0xff] }
 0xac6   :  { %6839 = vmatpush2.bf16.msra.mxu1 %v15398_v24  ;;  %6880 = vmatpush2.bf16.msra.mxu0 %v15399_v11  ;;  %v15417_v24 = vld [vmem:[#allocation190_spill] sm:$0xff] }
 0xac7   :  { %6840 = vmatprep.subr.bf16.mxu1 %v15400_v61  ;;  %6881 = vmatprep.subr.bf16.mxu0 %v15401_v53 }
 0xaca   :  { %6841 = vmatpush2.bf16.msra.mxu1 %v15402_v47  ;;  %6882 = vmatpush2.bf16.msra.mxu0 %v15403_v46  ;;  %v15418_v46 = vld [vmem:[#allocation191_spill] sm:$0xff] }
 0xacb   :  { %6842 = vmatprep.subr.bf16.mxu1 %v15404_v51  ;;  %6883 = vmatprep.subr.bf16.mxu0 %v15405_v10  ;;  %v15419_v10 = vld [vmem:[#allocation192_spill] sm:$0xff] }
 0xace   :  { %6843 = vmatpush2.bf16.msra.mxu1 %v15406_v54  ;;  %6884 = vmatpush2.bf16.msra.mxu0 %v15407_v39 }
 0xacf   :  { %6844 = vmatprep.subr.bf16.mxu1 %v15408_v32  ;;  %6885 = vmatprep.subr.bf16.mxu0 %v15409_v49 }
 0xad2   :  { %6845 = vmatpush2.bf16.msra.mxu1 %v15410_v20  ;;  %6886 = vmatpush2.bf16.msra.mxu0 %v15411_v55 }
 0xad3   :  { %9196 = vmatprep.subr.bf16.mxu1 %v9518_v21 }
 0xad5   :  { %6847 = vmatmul.mubr.bf16.vlgmr.msra.gmra.mxu1 %v13809_v9  ;;  %6888 = vmatmul.mubr.bf16.vlgmr.msra.gmra.mxu0 %v13809_v9 }
 0xad6   :  { %9197 = vmatpush3.bf16.msra.mxu1 %v9519_v25 }
 0xad7   :  { %9198 = vmatprep.subr.bf16.mxu1 %v9520_v17 }
 0xada   :  { %9199 = vmatpush3.bf16.msra.mxu1 %v9521_v48 }
 0xadb   :  { %9200 = vmatprep.subr.bf16.mxu1 %v9522_v5 }
 0xade   :  { %9201 = vmatpush3.bf16.msra.mxu1 %v9523_v0 }
 0xadf   :  { %9202 = vmatprep.subr.bf16.mxu1 %v9524_v22 }
 0xae2   :  { %9203 = vmatpush3.bf16.msra.mxu1 %v9525_v27 }
 0xae3   :  { %9204 = vmatprep.subr.bf16.mxu1 %v9526_v42 }
 0xae6   :  { %9205 = vmatpush3.bf16.msra.mxu1 %v9527_v57 }
 0xae7   :  { %9206 = vmatprep.subr.bf16.mxu1 %v9528_v12 }
 0xaea   :  { %9207 = vmatpush3.bf16.msra.mxu1 %v9529_v62 }
 0xaeb   :  { %9208 = vmatprep.subr.bf16.mxu1 %v9530_v36 }
 0xaee   :  { %9209 = vmatpush3.bf16.msra.mxu1 %v9531_v7 }
 0xaef   :  { %9210 = vmatprep.subr.bf16.mxu1 %v9532_v2 }
 0xaf2   :  { %9211 = vmatpush3.bf16.msra.mxu1 %v9533_v60 }
 0xb55   :  { %v6766_v28 = vpop.f32.mrf.mxu1  ;;  %v6807_v6 = vpop.f32.mrf.mxu0 }
 0xb56   :  { %v6896_v50 = vadd.f32 %v6766_v28, %v15412_v34  ;;  %v6898_v18 = vadd.f32 %v6807_v6, %v15413_v40  ;;  %v6961_v28 = vld [vmem:[#allocation7 + $0x10] ss:$8 sm:$0x3]  ;;  %v7055_v6 = vld [vmem:[#allocation7 + $0x11] ss:$8 sm:$0x3] }
 0xb57   :  { %v6768_v4 = vpop.f32.mrf.mxu1  ;;  %v6809_v15 = vpop.f32.mrf.mxu0  ;;  %v7154_v34 = vld [vmem:[#allocation7 + $0x32] ss:$8 sm:$0x3]  ;;  %v7057_v40 = vld [vmem:[#allocation7 + $0x21] ss:$8 sm:$0x3] }
 0xb58   :  { %v6897_v43 = vadd.f32 %v6768_v4, %v15414_v45  ;;  %v8632_v33 = vmul.f32 -1.442695, %v6896_v50  ;;  %v6899_v1 = vadd.f32 %v6809_v15, %v15415_v41  ;;  %v8634_v23 = vmul.f32 -1.442695, %v6898_v18 }
 0xb59   :  { %v6770_v56 = vpop.f32.mrf.mxu1  ;;  %v6811_v44 = vpop.f32.mrf.mxu0  ;;  %v6959_v4 = vld [vmem:[#allocation7] ss:$8 sm:$0x3]  ;;  %v6965_v15 = vld [vmem:[#allocation7 + $0x30] ss:$8 sm:$0x3] }
 0xb5a   :  { %v8633_v35 = vmul.f32 -1.442695, %v6897_v43  ;;  %9762 = vpow2.f32 %v8632_v33  ;;  %v8635_v37 = vmul.f32 -1.442695, %v6899_v1  ;;  %v6982_v43 = vcombine.low %v6959_v4, %v6961_v28 }
 0xb5b   :  { %v6771_v14 = vpop.f32.mrf.mxu1  ;;  %v6812_v19 = vpop.f32.mrf.mxu0  ;;  %9764 = vpow2.f32 %v8634_v23  ;;  %v7059_v56 = vld [vmem:[#allocation7 + $0x31] ss:$8 sm:$0x3]  ;;  %v7150_v44 = vld [vmem:[#allocation7 + $0x12] ss:$8 sm:$0x3] }
 0xb5c   :  { %9766 = vpow2.f32 %v8633_v35  ;;  %v7245_v14 = vld [vmem:[#allocation7 + $0x13] ss:$8 sm:$0x3]  ;;  %v6963_v19 = vld [vmem:[#allocation7 + $0x20] ss:$8 sm:$0x3]  ;;  %v7077_v1 = vcombine.low %v7057_v40, %v7059_v56 }
 0xb5d   :  { %9768 = vpow2.f32 %v8635_v37  ;;  %v7340_v50 = vld [vmem:[#allocation7 + $0x14] ss:$8 sm:$0x3]  ;;  %v7243_v18 = vld [vmem:[#allocation7 + $0x3] ss:$8 sm:$0x3]  ;;  %v6983_v33 = vcombine.low %v6963_v19, %v6965_v15 }
 0xb5e   :  { %v7249_v45 = vld [vmem:[#allocation7 + $0x33] ss:$8 sm:$0x3]  ;;  %v7152_v23 = vld [vmem:[#allocation7 + $0x22] ss:$8 sm:$0x3] }
 0xb5f   :  { %v7338_v35 = vld [vmem:[#allocation7 + $0x4] ss:$8 sm:$0x3]  ;;  %v7435_v37 = vld [vmem:[#allocation7 + $0x15] ss:$8 sm:$0x3] }
 0xb67   :  { %v9763_v63 = vpop.eup %9762 }
 0xb68   :  { %v9765_v29 = vpop.eup %9764  ;;  %v6910_v59 = vadd.f32 1.0, %v9763_v63  ;;  %v7172_v63 = vcombine.low %v7152_v23, %v7154_v34 }
 0xb69   :  { %v9767_v3 = vpop.eup %9766  ;;  %v6922_v38 = vadd.f32 1.0, %v9765_v29  ;;  %v7247_v29 = vld [vmem:[#allocation7 + $0x23] ss:$8 sm:$0x3] }
 0xb6a   :  { %v9769_v9 = vpop.eup %9768  ;;  %v6911_v13 = vadd.f32 1.0, %v9767_v3  ;;  %9770 = vrcp.f32 %v6910_v59  ;;  %v7530_v3 = vld [vmem:[#allocation7 + $0x16] ss:$8 sm:$0x3] }
 0xb6b   :  { %v6923_v16 = vadd.f32 1.0, %v9769_v9  ;;  %9772 = vrcp.f32 %v6922_v38  ;;  %v7266_v9 = vcombine.low %v7243_v18, %v7245_v14  ;;  %v7267_v38 = vcombine.low %v7247_v29, %v7249_v45  ;;  %v6969_v45 = vld [vmem:[#allocation7 + $0x50] ss:$8 sm:$0x3] }
 0xb6c   :  { %9774 = vrcp.f32 %v6911_v13  ;;  %v7344_v13 = vld [vmem:[#allocation7 + $0x34] ss:$8 sm:$0x3]  ;;  %v7158_v29 = vld [vmem:[#allocation7 + $0x52] ss:$8 sm:$0x3] }
 0xb77   :  { %v9771_v21 = vpop.eup %9770 }
 0xb78   :  { %v9773_v25 = vpop.eup %9772 }
 0xb79   :  { %v9775_v17 = vpop.eup %9774  ;;  %v6942_v0 = vmul.f32 %v9773_v25, %v13802_v26  ;;  %v7053_v26 = vld [vmem:[#allocation7 + $0x1] ss:$8 sm:$0x3] }
 0xb7a   :  { %v7076_v41 = vcombine.low %v7053_v26, %v7055_v6 }
 0xb95   :  { %v6848_v31 = vpop.f32.mrf.mxu1  ;;  %v6889_v58 = vpop.f32.mrf.mxu0 }
 0xb96   :  { %v6900_v52 = vadd.f32 %v6848_v31, %v15416_v30  ;;  %v6902_v11 = vadd.f32 %v6889_v58, %v15417_v24  ;;  %v7439_v31 = vld [vmem:[#allocation7 + $0x35] ss:$8 sm:$0x3]  ;;  %v7625_v58 = vld [vmem:[#allocation7 + $0x17] ss:$8 sm:$0x3] }
 0xb97   :  { %v6850_v61 = vpop.f32.mrf.mxu1  ;;  %v6891_v53 = vpop.f32.mrf.mxu0  ;;  %v7342_v30 = vld [vmem:[#allocation7 + $0x24] ss:$8 sm:$0x3]  ;;  %v7437_v24 = vld [vmem:[#allocation7 + $0x25] ss:$8 sm:$0x3] }
 0xb98   :  { %9776 = vtanh.f32 %v6900_v52  ;;  %v8636_v47 = vmul.f32 -1.442695, %v6902_v11  ;;  %v6901_v51 = vadd.f32 %v6850_v61, %v15418_v46  ;;  %v6903_v54 = vadd.f32 %v6891_v53, %v15419_v10  ;;  %v15420_v11 = vld [vmem:[#allocation15_spill] sm:$0xff] }
 0xb99   :  { %9778 = vrcp.f32 %v6923_v16  ;;  %v6852_v39 = vpop.f32.mrf.mxu1  ;;  %v6893_v32 = vpop.f32.mrf.mxu0  ;;  %v7433_v16 = vld [vmem:[#allocation7 + $0x5] ss:$8 sm:$0x3]  ;;  %v7361_v52 = vcombine.low %v7338_v35, %v7340_v50  ;;  %v6992_v61 = vrot.slane %v6982_v43, %v15420_v11  ;;  %v6999_v53 = vrot.slane %v6983_v33, %v15420_v11  ;;  %v7629_v10 = vld [vmem:[#allocation7 + $0x37] ss:$8 sm:$0x3] }
 0xb9a   :  { %9780 = vpow2.f32 %v8636_v47  ;;  %v8637_v49 = vmul.f32 -1.442695, %v6903_v54  ;;  %v7086_v47 = vrot.slane %v7076_v41, %v15420_v11  ;;  %v7093_v46 = vrot.slane %v7077_v1, %v15420_v11  ;;  %v7063_v33 = vld [vmem:[#allocation7 + $0x51] ss:$8 sm:$0x3] }
 0xb9b   :  { %9782 = vtanh.f32 %v6901_v51  ;;  %v6853_v20 = vpop.f32.mrf.mxu1  ;;  %v6894_v55 = vpop.f32.mrf.mxu0  ;;  %v7534_v51 = vld [vmem:[#allocation7 + $0x36] ss:$8 sm:$0x3]  ;;  %v7188_v54 = vrot.slane %v7172_v63, %v15420_v11  ;;  %v7362_v39 = vcombine.low %v7342_v30, %v7344_v13  ;;  %v7456_v32 = vcombine.low %v7433_v16, %v7435_v37  ;;  %v6967_v35 = vld [vmem:[#allocation7 + $0x40] ss:$8 sm:$0x3] }
 0xb9c   :  { %9784 = vpow2.f32 %v8637_v49  ;;  %v7457_v49 = vcombine.low %v7437_v24, %v7439_v31  ;;  %v7528_v20 = vld [vmem:[#allocation7 + $0x6] ss:$8 sm:$0x3]  ;;  %v7623_v55 = vld [vmem:[#allocation7 + $0x7] ss:$8 sm:$0x3]  ;;  %v13942_v25 = vrot.slane %v7266_v9, %v15420_v11 }
 0xb9d   :  { %v7378_v15 = vrot.slane %v7362_v39, %v15420_v11  ;;  %v7466_v19 = vrot.slane %v7456_v32, %v15420_v11  ;;  %v7061_v37 = vld [vmem:[#allocation7 + $0x41] ss:$8 sm:$0x3]  ;;  %v7156_v63 = vld [vmem:[#allocation7 + $0x42] ss:$8 sm:$0x3] }
 0xb9e   :  { %v7473_v26 = vrot.slane %v7457_v49, %v15420_v11  ;;  %v7251_v16 = vld [vmem:[#allocation7 + $0x43] ss:$8 sm:$0x3]  ;;  %v7348_v30 = vld [vmem:[#allocation7 + $0x54] ss:$8 sm:$0x3]  ;;  %v7078_v39 = vcombine.low %v7061_v37, %v7063_v33  ;;  %v7173_v32 = vcombine.low %v7156_v63, %v7158_v29 }
 0xb9f   :  { %v7635_v37 = vld [vmem:[#allocation7 + $0x67] ss:$8 sm:$0x3] }
 0xba0   :  { %v7489_v13 = vcombine.high %v7466_v19, %v7473_v26  ;;  %v7488_v24 = vcombine.low %v7466_v19, %v7473_v26 }
 0xba5   :  { %v9777_v48 = vpop.eup %9776 }
 0xba6   :  { %v9779_v5 = vpop.eup %9778  ;;  %v6944_v22 = vmul.f32 %v9777_v48, %v9771_v21  ;;  %v7532_v48 = vld [vmem:[#allocation7 + $0x26] ss:$8 sm:$0x3] }
 0xba7   :  { %v9781_v27 = vpop.eup %9780  ;;  %v6943_v36 = vmul.f32 %v9779_v5, %v13806_v8  ;;  %v7148_v8 = vld [vmem:[#allocation7 + $0x2] ss:$8 sm:$0x3]  ;;  %v7551_v5 = vcombine.low %v7528_v20, %v7530_v3  ;;  %v7346_v20 = vld [vmem:[#allocation7 + $0x44] ss:$8 sm:$0x3] }
 0xba8   :  { %v9783_v42 = vpop.eup %9782  ;;  %v6946_v57 = vadd.f32 %v6944_v22, %v6942_v0  ;;  %v6936_v12 = vadd.f32 1.0, %v9781_v27  ;;  %v7171_v59 = vcombine.low %v7148_v8, %v7150_v44  ;;  %v7627_v0 = vld [vmem:[#allocation7 + $0x27] ss:$8 sm:$0x3]  ;;  %v13948_v27 = vrot.slane %v7361_v52, %v15420_v11 }
 0xba9   :  { %v9785_v62 = vpop.eup %9784  ;;  %v6945_v7 = vmul.f32 %v9783_v42, %v9775_v17  ;;  %v13945_v17 = vrot.slane %v7267_v38, %v15420_v11  ;;  %v7552_v42 = vcombine.low %v7532_v48, %v7534_v51  ;;  %v7561_v34 = vrot.slane %v7551_v5, %v15420_v11  ;;  %v7536_v5 = vld [vmem:[#allocation7 + $0x46] ss:$8 sm:$0x3] }
 0xbaa   :  { %9786 = vtanh.f32 %v6946_v57  ;;  %v6937_v2 = vadd.f32 1.0, %v9785_v62  ;;  %v7181_v21 = vrot.slane %v7171_v59, %v15420_v11  ;;  %v7646_v57 = vcombine.low %v7623_v55, %v7625_v58  ;;  %v7253_v59 = vld [vmem:[#allocation7 + $0x53] ss:$8 sm:$0x3] }
 0xbab   :  { %9788 = vrcp.f32 %v6936_v12  ;;  %v6947_v60 = vadd.f32 %v6945_v7, %v6943_v36  ;;  %v7647_v12 = vcombine.low %v7627_v0, %v7629_v10  ;;  %v7014_v36 = vcombine.low %v6992_v61, %v6999_v53  ;;  %v7441_v55 = vld [vmem:[#allocation7 + $0x45] ss:$8 sm:$0x3]  ;;  %v13993_v0 = vld [vmem:[#allocation7 + $0x57] ss:$8 sm:$0x3] }
 0xbac   :  { %9790 = vrcp.f32 %v6937_v2  ;;  %v7015_v7 = vcombine.high %v6992_v61, %v6999_v53  ;;  %v7108_v2 = vcombine.low %v7086_v47, %v7093_v46  ;;  %v7204_v4 = vcombine.high %v7181_v21, %v7188_v54  ;;  %v7443_v61 = vld [vmem:[#allocation7 + $0x55] ss:$8 sm:$0x3]  ;;  %v7538_v53 = vld [vmem:[#allocation7 + $0x56] ss:$8 sm:$0x3] }
 0xbad   :  { %9792 = vtanh.f32 %v6947_v60  ;;  %v7109_v60 = vcombine.high %v7086_v47, %v7093_v46  ;;  %v7299_v44 = vcombine.high %v13942_v25, %v13945_v17  ;;  %v7203_v14 = vcombine.low %v7181_v21, %v7188_v54 }
 0xbae   :  { %v7568_v40 = vrot.slane %v7552_v42, %v15420_v11  ;;  %v7656_v8 = vrot.slane %v7646_v57, %v15420_v11  ;;  %v7663_v18 = vrot.slane %v7647_v12, %v15420_v11  ;;  %v13960_v43 = vrot.slane %v7015_v7, %v15420_v11  ;;  %v7160_v7 = vld [vmem:[#allocation7 + $0x62] ss:$8 sm:$0x3] }
 0xbaf   :  { %v13963_v41 = vrot.slane %v7109_v60, %v15420_v11  ;;  %v13966_v1 = vrot.slane %v7014_v36, %v15420_v11  ;;  %v13969_v23 = vrot.slane %v7108_v2, %v15420_v11  ;;  %v13972_v3 = vrot.slane %v7204_v4, %v15420_v11  ;;  %v14001_v36 = vld [vmem:[#allocation7 + $0x47] ss:$8 sm:$0x3]  ;;  %v7255_v2 = vld [vmem:[#allocation7 + $0x63] ss:$8 sm:$0x3] }
 0xbb0   :  { %v7298_v9 = vcombine.low %v13942_v25, %v13945_v17  ;;  %v7394_v38 = vcombine.high %v13948_v27, %v7378_v15  ;;  %v13978_v31 = vrot.slane %v7299_v44, %v15420_v11  ;;  %v13981_v58 = vrot.slane %v7203_v14, %v15420_v11 }
 0xbb1   :  { %v7393_v52 = vcombine.low %v13948_v27, %v7378_v15  ;;  %v7584_v47 = vcombine.high %v7561_v34, %v7568_v40  ;;  %v7679_v46 = vcombine.high %v7656_v8, %v7663_v18  ;;  %v7583_v51 = vcombine.low %v7561_v34, %v7568_v40  ;;  %v7065_v27 = vld [vmem:[#allocation7 + $0x61] ss:$8 sm:$0x3]  ;;  %v7350_v34 = vld [vmem:[#allocation7 + $0x64] ss:$8 sm:$0x3] }
 0xbb2   :  { %v7678_v10 = vcombine.low %v7656_v8, %v7663_v18  ;;  %v6984_v54 = vcombine.low %v6967_v35, %v6969_v45  ;;  %v7268_v49 = vcombine.low %v7251_v16, %v7253_v59  ;;  %v13985_v21 = vrot.slane %v7298_v9, %v15420_v11  ;;  %v7540_v35 = vld [vmem:[#allocation7 + $0x66] ss:$8 sm:$0x3] }
 0xbb3   :  { %v7363_v25 = vcombine.low %v7346_v20, %v7348_v30  ;;  %v13988_v17 = vrot.slane %v7394_v38, %v15420_v11  ;;  %v13991_v48 = vrot.slane %v7489_v13, %v15420_v11  ;;  %v7458_v42 = vcombine.low %v7441_v55, %v7443_v61 }
 0xbb4   :  { %v13996_v57 = vrot.slane %v7393_v52, %v15420_v11  ;;  %v13999_v12 = vrot.slane %v7488_v24, %v15420_v11  ;;  %v14004_v60 = vrot.slane %v7584_v47, %v15420_v11  ;;  %v14013_v4 = vrot.slane %v7678_v10, %v15420_v11 }
 0xbb5   :  { %v7006_v26 = vrot.slane %v6984_v54, %v15420_v11  ;;  %v7100_v44 = vrot.slane %v7078_v39, %v15420_v11  ;;  %v7195_v14 = vrot.slane %v7173_v32, %v15420_v11  ;;  %v7290_v19 = vrot.slane %v7268_v49, %v15420_v11 }
 0xbb6   :  { %v14020_v33 = vrot.slane %v7363_v25, %v15420_v11  ;;  %v7648_v63 = vcombine.low %v14001_v36, %v13993_v0  ;;  %v14025_v13 = vrot.slane %v7458_v42, %v15420_v11 }
 0xbb7   :  { %v9787_v22 = vpop.eup %9786 }
 0xbb8   :  { %v9789_v62 = vpop.eup %9788 }
 0xbb9   :  { %v9791_v28 = vpop.eup %9790  ;;  %v6950_v6 = vmul.f32 %v9789_v62, %v9787_v22  ;;  %v6971_v22 = vld [vmem:[#allocation7 + $0x60] ss:$8 sm:$0x3]  ;;  %v7553_v62 = vcombine.low %v7536_v5, %v7538_v53 }
 0xbba   :  { %v9793_v56 = vpop.eup %9792 }
 0xbbb   :  { %6953 = vst [vmem:[#allocation7 + $0x70] sm:$0xff] %v6950_v6  ;;  %v6951_v50 = vmul.f32 %v9793_v56, %v9791_v28  ;;  %v14007_v28 = vrot.slane %v7679_v46, %v15420_v11  ;;  %v14010_v6 = vrot.slane %v7583_v51, %v15420_v11  ;;  %v14028_v16 = vrot.slane %v7553_v62, %v15420_v11 }
 0xbbd   :  { %6954 = vst [vmem:[#allocation7 + $0x78] sm:$0xff] %v6951_v50  ;;  %v7445_v50 = vld [vmem:[#allocation7 + $0x65] ss:$8 sm:$0x3] }
 0xbc4   :  { %v6973_v15 = vld [vmem:[#allocation7 + $0x70] ss:$8 sm:$0x3]  ;;  %v7067_v56 = vld [vmem:[#allocation7 + $0x71] ss:$8 sm:$0x3] }
 0xbc5   :  { %v6985_v40 = vcombine.low %v6971_v22, %v6973_v15  ;;  %v7079_v8 = vcombine.low %v7065_v27, %v7067_v56  ;;  %v7162_v18 = vld [vmem:[#allocation7 + $0x72] ss:$8 sm:$0x3]  ;;  %v7257_v45 = vld [vmem:[#allocation7 + $0x73] ss:$8 sm:$0x3] }
 0xbc6   :  { %v7174_v29 = vcombine.low %v7160_v7, %v7162_v18  ;;  %v7269_v59 = vcombine.low %v7255_v2, %v7257_v45  ;;  %v7352_v9 = vld [vmem:[#allocation7 + $0x74] ss:$8 sm:$0x3]  ;;  %v7447_v38 = vld [vmem:[#allocation7 + $0x75] ss:$8 sm:$0x3] }
 0xbc7   :  { %v7013_v30 = vrot.slane %v6985_v40, %v15420_v11  ;;  %v7107_v52 = vrot.slane %v7079_v8, %v15420_v11  ;;  %v7364_v24 = vcombine.low %v7350_v34, %v7352_v9  ;;  %v7459_v61 = vcombine.low %v7445_v50, %v7447_v38  ;;  %v7542_v53 = vld [vmem:[#allocation7 + $0x76] ss:$8 sm:$0x3]  ;;  %v7637_v47 = vld [vmem:[#allocation7 + $0x77] ss:$8 sm:$0x3] }
 0xbc8   :  { %v7202_v46 = vrot.slane %v7174_v29, %v15420_v11  ;;  %v7297_v51 = vrot.slane %v7269_v59, %v15420_v11  ;;  %v7554_v10 = vcombine.low %v7540_v35, %v7542_v53  ;;  %v7649_v54 = vcombine.low %v7635_v37, %v7637_v47 }
 0xbc9   :  { %v7016_v39 = vcombine.low %v7006_v26, %v7013_v30  ;;  %v7017_v32 = vcombine.high %v7006_v26, %v7013_v30  ;;  %v7110_v49 = vcombine.low %v7100_v44, %v7107_v52  ;;  %v7111_v20 = vcombine.high %v7100_v44, %v7107_v52 }
 0xbca   :  { %v7206_v55 = vcombine.high %v7195_v14, %v7202_v46  ;;  %v7301_v25 = vcombine.high %v7290_v19, %v7297_v51  ;;  %v7205_v5 = vcombine.low %v7195_v14, %v7202_v46  ;;  %v7300_v0 = vcombine.low %v7290_v19, %v7297_v51 }
 0xbcb   :  { %v7045_v22 = vrot.slane %v7017_v32, %v15420_v11  ;;  %v7139_v27 = vrot.slane %v7111_v20, %v15420_v11  ;;  %v7038_v42 = vrot.slane %v7016_v39, %v15420_v11  ;;  %v7132_v62 = vrot.slane %v7110_v49, %v15420_v11 }
 0xbcc   :  { %v7234_v36 = vrot.slane %v7206_v55, %v15420_v11  ;;  %v7329_v7 = vrot.slane %v7301_v25, %v15420_v11  ;;  %v7227_v2 = vrot.slane %v7205_v5, %v15420_v11  ;;  %v7322_v15 = vrot.slane %v7300_v0, %v15420_v11  ;;  %v8652_v55 = vld [vmem:[%s14283_s10] ss:$0 sm:$0xff] }
 0xbcd   :  { %v7047_v26 = vcombine.low %v13960_v43, %v7045_v22  ;;  %v7141_v56 = vcombine.low %v13963_v41, %v7139_v27  ;;  %v7046_v44 = vcombine.low %v13966_v1, %v7038_v42  ;;  %v7140_v14 = vcombine.low %v13969_v23, %v7132_v62 }
 0xbce   :  { %v7236_v19 = vcombine.low %v13972_v3, %v7234_v36  ;;  %v7331_v34 = vcombine.low %v13978_v31, %v7329_v7  ;;  %v7235_v50 = vcombine.low %v13981_v58, %v7227_v2  ;;  %v7330_v40 = vcombine.low %v13985_v21, %v7322_v15 }
 0xbcf   :  { %7051 = vst [vmem:[%s14281_s13 + $0x8] sm:$0xff] %v7047_v26  ;;  %8639 = vst [vmem:[%s14281_s13 + $0x18] sm:$0xff] %v7141_v56  ;;  %v7734_v43 = vpack.c.bf16 %v7141_v56, %v7047_v26  ;;  %v7733_v41 = vpack.c.bf16 %v7140_v14, %v7046_v44  ;;  %v7392_v1 = vrot.slane %v7364_v24, %v15420_v11 }
 0xbd0   :  { %7050 = vst [vmem:[%s14281_s13] sm:$0xff] %v7046_v44  ;;  %8638 = vst [vmem:[%s14281_s13 + $0x10] sm:$0xff] %v7140_v14  ;;  %v7487_v23 = vrot.slane %v7459_v61, %v15420_v11  ;;  %v7736_v3 = vpack.c.bf16 %v7331_v34, %v7236_v19  ;;  %v7582_v31 = vrot.slane %v7554_v10, %v15420_v11 }
 0xbd1   :  { %8641 = vst [vmem:[%s14281_s13 + $0x28] sm:$0xff] %v7236_v19  ;;  %8643 = vst [vmem:[%s14281_s13 + $0x38] sm:$0xff] %v7331_v34  ;;  %v7670_v58 = vrot.slane %v7648_v63, %v15420_v11  ;;  %v7677_v21 = vrot.slane %v7649_v54, %v15420_v11  ;;  %7908 = vmatprep.mubr.bf16.mxu1 %v7734_v43  ;;  %v7396_v8 = vcombine.high %v14020_v33, %v7392_v1 }
 0xbd2   :  { %8640 = vst [vmem:[%s14281_s13 + $0x20] sm:$0xff] %v7235_v50  ;;  %8642 = vst [vmem:[%s14281_s13 + $0x30] sm:$0xff] %v7330_v40  ;;  %v7491_v18 = vcombine.high %v14025_v13, %v7487_v23  ;;  %v7395_v45 = vcombine.low %v14020_v33, %v7392_v1  ;;  %v7490_v35 = vcombine.low %v14025_v13, %v7487_v23  ;;  %7909 = vmatmul.mubr.bf16.vlgmr.msra.gmra.mxu1 %v7733_v41 }
 0xbd3   :  { %v7586_v37 = vcombine.high %v14028_v16, %v7582_v31  ;;  %v7681_v29 = vcombine.high %v7670_v58, %v7677_v21  ;;  %v7585_v59 = vcombine.low %v14028_v16, %v7582_v31  ;;  %v7680_v9 = vcombine.low %v7670_v58, %v7677_v21  ;;  %7916 = vmatprep.mubr.bf16.mxu1 %v7736_v3 }
 0xbd4   :  { %v7424_v63 = vrot.slane %v7396_v8, %v15420_v11  ;;  %v7519_v38 = vrot.slane %v7491_v18, %v15420_v11  ;;  %v7417_v30 = vrot.slane %v7395_v45, %v15420_v11  ;;  %v7512_v52 = vrot.slane %v7490_v35, %v15420_v11 }
 0xbd5   :  { %v7614_v33 = vrot.slane %v7586_v37, %v15420_v11  ;;  %v7709_v13 = vrot.slane %v7681_v29, %v15420_v11  ;;  %v7607_v24 = vrot.slane %v7585_v59, %v15420_v11  ;;  %v7702_v61 = vrot.slane %v7680_v9, %v15420_v11 }
 0xbd6   :  { %v7426_v16 = vcombine.low %v13988_v17, %v7424_v63  ;;  %v7521_v53 = vcombine.low %v13991_v48, %v7519_v38  ;;  %v7425_v47 = vcombine.low %v13996_v57, %v7417_v30  ;;  %v7520_v46 = vcombine.low %v13999_v12, %v7512_v52 }
 0xbd7   :  { %v7616_v51 = vcombine.low %v14004_v60, %v7614_v33  ;;  %v7711_v10 = vcombine.low %v14007_v28, %v7709_v13  ;;  %v7615_v54 = vcombine.low %v14010_v6, %v7607_v24  ;;  %v7710_v39 = vcombine.low %v14013_v4, %v7702_v61  ;;  %v9534_v60 = vld [vmem:[%s14282_s11 + $0x18] sm:$0xff]   ;;  %v9535_v28 = vld [vmem:[%s14282_s11 + $0x10] sm:$0xff]   ;;  %v9536_v6 = vld [vmem:[%s14282_s11 + $0x8] sm:$0xff]  }
 0xbd8   :  { %8645 = vst [vmem:[%s14281_s13 + $0x48] sm:$0xff] %v7426_v16  ;;  %8647 = vst [vmem:[%s14281_s13 + $0x58] sm:$0xff] %v7521_v53  ;;  %v7735_v11 = vpack.c.bf16 %v7330_v40, %v7235_v50  ;;  %v7738_v17 = vpack.c.bf16 %v7521_v53, %v7426_v16  ;;  %v7737_v48 = vpack.c.bf16 %v7520_v46, %v7425_v47  ;;  %9278 = vmatprep.subr.bf16.mxu0 %v9534_v60  ;;  %v9537_v4 = vld [vmem:[%s14282_s11] sm:$0xff]   ;;  %v15421_v24 = vlaneseq }
 0xbd9   :  { %8644 = vst [vmem:[%s14281_s13 + $0x40] sm:$0xff] %v7425_v47  ;;  %8646 = vst [vmem:[%s14281_s13 + $0x50] sm:$0xff] %v7520_v46  ;;  %v7740_v57 = vpack.c.bf16 %v7711_v10, %v7616_v51  ;;  %v7739_v12 = vpack.c.bf16 %v7710_v39, %v7615_v54  ;;  %9279 = vmatpush3.bf16.msra.mxu0 %v9534_v60  ;;  %v8669_v16 = vld [vmem:[%s14284_s12] ss:$0 sm:$0xff] }
 0xbda   :  { %8649 = vst [vmem:[%s14281_s13 + $0x68] sm:$0xff] %v7616_v51  ;;  %8651 = vst [vmem:[%s14281_s13 + $0x78] sm:$0xff] %v7711_v10  ;;  %7917 = vmatmul.mubr.bf16.gmra.mxu1 %v7735_v11  ;;  %9280 = vmatprep.subr.bf16.mxu0 %v9535_v28  ;;  %v14145_v61 = vand.u32 127, %v15421_v24 }
 0xbdb   :  { %8648 = vst [vmem:[%s14281_s13 + $0x60] sm:$0xff] %v7615_v54  ;;  %8650 = vst [vmem:[%s14281_s13 + $0x70] sm:$0xff] %v7710_v39  ;;  %7924 = vmatprep.mubr.bf16.mxu1 %v7738_v17 }
 0xbdc   :  { %vm8071_vm5 = vcmp.lt.s32.totalorder %v14145_v61, 2 }
 0xbdd   :  { %9281 = vmatpush3.bf16.msra.mxu0 %v9535_v28 }
 0xbde   :  { %9282 = vmatprep.subr.bf16.mxu0 %v9536_v6 }
 0xbe1   :  { %9283 = vmatpush3.bf16.msra.mxu0 %v9536_v6 }
 0xbe2   :  { %7925 = vmatmul.mubr.bf16.gmra.mxu1 %v7737_v48  ;;  %9284 = vmatprep.subr.bf16.mxu0 %v9537_v4 }
 0xbe3   :  { %7932 = vmatprep.mubr.bf16.mxu1 %v7740_v57 }
 0xbe5   :  { %9285 = vmatpush3.bf16.msra.mxu0 %v9537_v4 }
 0xbea   :  { %7933 = vmatmul.mubr.bf16.gmra.mxu1 %v7739_v12 }
 0xc92   :  { %v9212_v32 = vpop.f32.mrf.mxu1 }
 0xc94   :  { %v9213_v49 = vpop.f32.mrf.mxu1 }
 0xc95   :  { %v9214_v20 = vadd.f32 %v9213_v49, %v9212_v32 }
 0xc96   :  { %v9215_v25 = vpop.f32.mrf.mxu1 }
 0xc97   :  { %v7911_v0 = vadd.f32 %v9214_v20, %v8652_v55 }
 0xc98   :  { %v9216_v5 = vpop.f32.mrf.mxu1 }
 0xc99   :  { %v9217_v22 = vadd.f32 %v9216_v5, %v9215_v25  ;;  %v7941_v36 = vmax.f32 %v7911_v0, 0.0 }
 0xc9a   :  { %v9218_v27 = vpop.f32.mrf.mxu1 }
 0xc9b   :  { %v7914_v42 = vadd.f32 %v9217_v22, %v8652_v55 }
 0xc9c   :  { %v9219_v62 = vpop.f32.mrf.mxu1 }
 0xc9d   :  { %v7942_v7 = vmax.f32 %v7914_v42, 0.0  ;;  %v9220_v2 = vadd.f32 %v9219_v62, %v9218_v27 }
 0xc9e   :  { %v9221_v15 = vpop.f32.mrf.mxu1 }
 0xc9f   :  { %v7949_v26 = vpack.c.bf16 %v7942_v7, %v7941_v36  ;;  %v7919_v44 = vadd.f32 %v9220_v2, %v8652_v55 }
 0xca0   :  { %v9222_v56 = vpop.f32.mrf.mxu1 }
 0xca1   :  { %v9223_v14 = vadd.f32 %v9222_v56, %v9221_v15  ;;  %9286 = vmatprep.mubr.msk.bf16.mxu0 %vm304_vm3, %v7949_v26  ;;  %v7943_v40 = vmax.f32 %v7919_v44, 0.0 }
 0xca2   :  { %v9224_v19 = vpop.f32.mrf.mxu1 }
 0xca3   :  { %v7922_v34 = vadd.f32 %v9223_v14, %v8652_v55 }
 0xca4   :  { %v9225_v50 = vpop.f32.mrf.mxu1 }
 0xca5   :  { %v7944_v43 = vmax.f32 %v7922_v34, 0.0  ;;  %v9226_v41 = vadd.f32 %v9225_v50, %v9224_v19 }
 0xca6   :  { %v9227_v1 = vpop.f32.mrf.mxu1 }
 0xca7   :  { %v7950_v23 = vpack.c.bf16 %v7944_v43, %v7943_v40  ;;  %v7927_v31 = vadd.f32 %v9226_v41, %v8652_v55 }
 0xca8   :  { %v9228_v3 = vpop.f32.mrf.mxu1 }
 0xca9   :  { %v9229_v58 = vadd.f32 %v9228_v3, %v9227_v1  ;;  %9287 = vmatmul.mubr.msk.bf16.vlgmr.msra.gmra.mxu0 %vm304_vm3, %v7950_v23  ;;  %v7945_v45 = vmax.f32 %v7927_v31, 0.0 }
 0xcaa   :  { %v9230_v21 = vpop.f32.mrf.mxu1 }
 0xcab   :  { %v7930_v8 = vadd.f32 %v9229_v58, %v8652_v55 }
 0xcac   :  { %v9231_v18 = vpop.f32.mrf.mxu1 }
 0xcad   :  { %v7946_v35 = vmax.f32 %v7930_v8, 0.0  ;;  %v9232_v37 = vadd.f32 %v9231_v18, %v9230_v21 }
 0xcae   :  { %v9233_v29 = vpop.f32.mrf.mxu1 }
 0xcaf   :  { %v7951_v59 = vpack.c.bf16 %v7946_v35, %v7945_v45  ;;  %v7935_v63 = vadd.f32 %v9232_v37, %v8652_v55 }
 0xcb0   :  { %v9234_v9 = vpop.f32.mrf.mxu1 }
 0xcb1   :  { %v9235_v38 = vadd.f32 %v9234_v9, %v9233_v29  ;;  %9290 = vmatprep.mubr.msk.bf16.mxu0 %vm304_vm3, %v7951_v59  ;;  %v7947_v52 = vmax.f32 %v7935_v63, 0.0 }
 0xcb3   :  { %v7938_v30 = vadd.f32 %v9235_v38, %v8652_v55 }
 0xcb5   :  { %v7948_v33 = vmax.f32 %v7938_v30, 0.0 }
 0xcb7   :  { %v7952_v13 = vpack.c.bf16 %v7948_v33, %v7947_v52 }
 0xcb9   :  { %9291 = vmatmul.mubr.msk.bf16.gmra.mxu0 %vm304_vm3, %v7952_v13 }
 0xd69   :  { %v9288_v53 = vpop.f32.mrf.mxu0 }
 0xd6a   :  { %v14151_v47 = vadd.f32 %v9288_v53, %v8669_v16 }
 0xd6b   :  { %v8038_v46 = vpop.f32.mrf.mxu0 }
 0xd6c   :  { %v14153_v51 = vadd.f32 %v8669_v16, %v8038_v46  ;;  %v8074_v10 = vsel %vm8071_vm5, %v14151_v47, -1e+30 }
 0xd6d   :  { %8084 = vmax.xlane.f32.xlu1 %v8074_v10  ;;  %v9289_v54 = vpop.f32.mrf.mxu0 }
 0xd6e   :  { %v14158_v39 = vadd.f32 %v9289_v54, %v8669_v16  ;;  %v8072_v11 = vsel %vm8071_vm5, %v14153_v51, -1e+30 }
 0xd6f   :  { %v8041_v17 = vpop.f32.mrf.mxu0  ;;  %8080 = vmax.xlane.f32.xlu0 %v8072_v11 }
 0xd70   :  { %v14163_v48 = vadd.f32 %v8669_v16, %v8041_v17  ;;  %v8075_v57 = vsel %vm8071_vm5, %v14158_v39, -1e+30 }
 0xd71   :  { %8086 = vmax.xlane.f32.xlu1 %v8075_v57 }
 0xd72   :  { %v8073_v12 = vsel %vm8071_vm5, %v14163_v48, -1e+30 }
 0xd73   :  { %8082 = vmax.xlane.f32.xlu0 %v8073_v12 }
 0xd79   :  { %v9292_v60 = vpop.f32.mrf.mxu0 }
 0xd7a   :  { %v14173_v32 = vadd.f32 %v9292_v60, %v8669_v16 }
 0xd7b   :  { %v8054_v28 = vpop.f32.mrf.mxu0 }
 0xd7c   :  { %v14171_v6 = vadd.f32 %v8669_v16, %v8054_v28  ;;  %v8078_v0 = vsel %vm8071_vm5, %v14173_v32, -1e+30 }
 0xd7d   :  { %v9293_v4 = vpop.f32.mrf.mxu0 }
 0xd7e   :  { %v8076_v49 = vsel %vm8071_vm5, %v14171_v6, -1e+30  ;;  %v14180_v25 = vadd.f32 %v9293_v4, %v8669_v16 }
 0xd7f   :  { %v8057_v20 = vpop.f32.mrf.mxu0  ;;  %8088 = vmax.xlane.f32.xlu0 %v8076_v49 }
 0xd80   :  { %v14178_v55 = vadd.f32 %v8669_v16, %v8057_v20  ;;  %v8079_v22 = vsel %vm8071_vm5, %v14180_v25, -1e+30 }
 0xd82   :  { %v8077_v5 = vsel %vm8071_vm5, %v14178_v55, -1e+30 }
 0xd83   :  { %8090 = vmax.xlane.f32.xlu1 %v8077_v5  ;;  %8092 = vmax.xlane.f32.xlu0 %v8078_v0 }
 0xd87   :  { %8094 = vmax.xlane.f32.xlu1 %v8079_v22 }
 0xdf6   :  { %v14191_v27 = vpop.xlane.xlu1 %8084 }
 0xdf7   :  { %v8098_v42 = vsub.f32 %v8074_v10, %v14191_v27 }
 0xdf8   :  { %v14194_v62 = vpop.xlane.xlu0 %8080 }
 0xdf9   :  { %v8108_v36 = vmul.f32 1.442695, %v8098_v42  ;;  %v8096_v7 = vsub.f32 %v8072_v11, %v14194_v62 }
 0xdfa   :  { %v14197_v2 = vpop.xlane.xlu1 %8086 }
 0xdfb   :  { %9794 = vpow2.f32 %v8108_v36  ;;  %v8104_v15 = vmul.f32 1.442695, %v8096_v7  ;;  %v8099_v26 = vsub.f32 %v8075_v57, %v14197_v2 }
 0xdfc   :  { %v14200_v56 = vpop.xlane.xlu0 %8082 }
 0xdfd   :  { %9796 = vpow2.f32 %v8104_v15  ;;  %v8110_v44 = vmul.f32 1.442695, %v8099_v26  ;;  %v8097_v14 = vsub.f32 %v8073_v12, %v14200_v56 }
 0xdff   :  { %9798 = vpow2.f32 %v8110_v44  ;;  %v8106_v19 = vmul.f32 1.442695, %v8097_v14 }
 0xe01   :  { %9800 = vpow2.f32 %v8106_v19 }
 0xe08   :  { %v9795_v34 = vpop.eup %9794  ;;  %v14203_v50 = vpop.xlane.xlu0 %8088 }
 0xe09   :  { %v8100_v40 = vsub.f32 %v8076_v49, %v14203_v50  ;;  %v8122_v43 = vsel %vm8071_vm5, %v9795_v34, 0.0 }
 0xe0a   :  { %v9797_v41 = vpop.eup %9796  ;;  %8132 = vadd.xlane.f32.xlu0 %v8122_v43 }
 0xe0b   :  { %v8112_v1 = vmul.f32 1.442695, %v8100_v40  ;;  %v8120_v58 = vsel %vm8071_vm5, %v9797_v41, 0.0 }
 0xe0c   :  { %v9799_v23 = vpop.eup %9798  ;;  %v14208_v3 = vpop.xlane.xlu1 %8090 }
 0xe0d   :  { %v14210_v31 = vpop.xlane.xlu0 %8092  ;;  %9802 = vpow2.f32 %v8112_v1  ;;  %v8101_v21 = vsub.f32 %v8077_v5, %v14208_v3  ;;  %v8123_v18 = vsel %vm8071_vm5, %v9799_v23, 0.0 }
 0xe0e   :  { %v8102_v8 = vsub.f32 %v8078_v0, %v14210_v31  ;;  %v9801_v45 = vpop.eup %9800  ;;  %8134 = vadd.xlane.f32.xlu1 %v8123_v18  ;;  %8128 = vadd.xlane.f32.xlu0 %v8120_v58 }
 0xe0f   :  { %v8114_v35 = vmul.f32 1.442695, %v8101_v21  ;;  %v8121_v9 = vsel %vm8071_vm5, %v9801_v45, 0.0 }
 0xe10   :  { %v8116_v37 = vmul.f32 1.442695, %v8102_v8  ;;  %v14218_v29 = vpop.xlane.xlu1 %8094 }
 0xe11   :  { %9804 = vpow2.f32 %v8114_v35  ;;  %v8103_v59 = vsub.f32 %v8079_v22, %v14218_v29 }
 0xe12   :  { %9806 = vpow2.f32 %v8116_v37  ;;  %8130 = vadd.xlane.f32.xlu1 %v8121_v9 }
 0xe13   :  { %v8118_v63 = vmul.f32 1.442695, %v8103_v59 }
 0xe15   :  { %9808 = vpow2.f32 %v8118_v63 }
 0xe1a   :  { %v9803_v38 = vpop.eup %9802 }
 0xe1b   :  { %v8124_v30 = vsel %vm8071_vm5, %v9803_v38, 0.0 }
 0xe1c   :  { %8136 = vadd.xlane.f32.xlu0 %v8124_v30 }
 0xe1e   :  { %v9805_v52 = vpop.eup %9804 }
 0xe1f   :  { %v9807_v33 = vpop.eup %9806  ;;  %v8125_v13 = vsel %vm8071_vm5, %v9805_v52, 0.0 }
 0xe20   :  { %8138 = vadd.xlane.f32.xlu1 %v8125_v13  ;;  %v8126_v24 = vsel %vm8071_vm5, %v9807_v33, 0.0 }
 0xe21   :  { %8140 = vadd.xlane.f32.xlu0 %v8126_v24 }
 0xe22   :  { %v9809_v16 = vpop.eup %9808 }
 0xe23   :  { %v8127_v53 = vsel %vm8071_vm5, %v9809_v16, 0.0 }
 0xe24   :  { %8142 = vadd.xlane.f32.xlu1 %v8127_v53 }
 0xe93   :  { %v8133_v46 = vpop.xlane.xlu0 %8132 }
 0xe94   :  { %9810 = vlog2.f32 %v8133_v46 }
 0xe97   :  { %v8135_v10 = vpop.xlane.xlu1 %8134  ;;  %v8129_v54 = vpop.xlane.xlu0 %8128 }
 0xe98   :  { %9812 = vlog2.f32 %v8135_v10 }
 0xe99   :  { %9814 = vlog2.f32 %v8129_v54 }
 0xe9b   :  { %v8131_v11 = vpop.xlane.xlu1 %8130 }
 0xe9c   :  { %9816 = vlog2.f32 %v8131_v11 }
 0xea1   :  { %v9811_v17 = vpop.eup %9810 }
 0xea2   :  { %v8149_v57 = vmul.f32 0.6931472, %v9811_v17 }
 0xea4   :  { %v8162_v12 = vadd.f32 %v8149_v57, %v14191_v27 }
 0xea5   :  { %v9813_v60 = vpop.eup %9812  ;;  %v8137_v28 = vpop.xlane.xlu0 %8136 }
 0xea6   :  { %v9815_v4 = vpop.eup %9814  ;;  %v8170_v49 = vsub.f32 %v14151_v47, %v8162_v12  ;;  %v8151_v61 = vmul.f32 0.6931472, %v9813_v60  ;;  %9818 = vlog2.f32 %v8137_v28 }
 0xea7   :  { %v8145_v20 = vmul.f32 0.6931472, %v9815_v4 }
 0xea8   :  { %8178 = vst [vmem:[%s14285_s14 + $0x10] sm:$0xff] %v8170_v49  ;;  %v8163_v5 = vadd.f32 %v8151_v61, %v14197_v2 }
 0xea9   :  { %v9817_v0 = vpop.eup %9816  ;;  %v8160_v22 = vadd.f32 %v8145_v20, %v14194_v62  ;;  %v8139_v42 = vpop.xlane.xlu1 %8138 }
 0xeaa   :  { %v8171_v27 = vsub.f32 %v14158_v39, %v8163_v5  ;;  %v8147_v36 = vmul.f32 0.6931472, %v9817_v0  ;;  %9820 = vlog2.f32 %v8139_v42  ;;  %v8141_v7 = vpop.xlane.xlu0 %8140 }
 0xeab   :  { %v8168_v47 = vsub.f32 %v14153_v51, %v8160_v22  ;;  %9822 = vlog2.f32 %v8141_v7 }
 0xeac   :  { %8179 = vst [vmem:[%s14285_s14 + $0x18] sm:$0xff] %v8171_v27  ;;  %v8161_v15 = vadd.f32 %v8147_v36, %v14200_v56 }
 0xead   :  { %8176 = vst [vmem:[%s14285_s14] sm:$0xff] %v8168_v47  ;;  %v8143_v62 = vpop.xlane.xlu1 %8142 }
 0xeae   :  { %v8169_v2 = vsub.f32 %v14163_v48, %v8161_v15  ;;  %9824 = vlog2.f32 %v8143_v62 }
 0xeb0   :  { %8177 = vst [vmem:[%s14285_s14 + $0x8] sm:$0xff] %v8169_v2 }
 0xeb3   :  { %v9819_v51 = vpop.eup %9818 }
 0xeb4   :  { %v8153_v39 = vmul.f32 0.6931472, %v9819_v51 }
 0xeb6   :  { %v8164_v26 = vadd.f32 %v8153_v39, %v14203_v50 }
 0xeb7   :  { %v9821_v44 = vpop.eup %9820 }
 0xeb8   :  { %v9823_v14 = vpop.eup %9822  ;;  %v8172_v56 = vsub.f32 %v14171_v6, %v8164_v26  ;;  %v8155_v19 = vmul.f32 0.6931472, %v9821_v44 }
 0xeb9   :  { %v8157_v34 = vmul.f32 0.6931472, %v9823_v14 }
 0xeba   :  { %8180 = vst [vmem:[%s14285_s14 + $0x20] sm:$0xff] %v8172_v56  ;;  %v8165_v48 = vadd.f32 %v8155_v19, %v14208_v3 }
 0xebb   :  { %v9825_v40 = vpop.eup %9824  ;;  %v8166_v43 = vadd.f32 %v8157_v34, %v14210_v31 }
 0xebc   :  { %v8173_v41 = vsub.f32 %v14178_v55, %v8165_v48  ;;  %v8159_v1 = vmul.f32 0.6931472, %v9825_v40 }
 0xebd   :  { %v8174_v50 = vsub.f32 %v14173_v32, %v8166_v43 }
 0xebe   :  { %8181 = vst [vmem:[%s14285_s14 + $0x28] sm:$0xff] %v8173_v41  ;;  %v8167_v6 = vadd.f32 %v8159_v1, %v14218_v29 }
 0xebf   :  { %8182 = vst [vmem:[%s14285_s14 + $0x30] sm:$0xff] %v8174_v50 }
 0xec0   :  { %v8175_v23 = vsub.f32 %v14180_v25, %v8167_v6 }
 0xec2   :  { %8183 = vst [vmem:[%s14285_s14 + $0x38] sm:$0xff] %v8175_v23 }

</bundles_post_ra>
